<compile_context>
chip_gen: v7x
topology: tpu7x:2x2x1
jax: 0.10.0
libtpu: 0.0.40
codegen_flags: <defaults>
</compile_context>

<pallas_src>
import jax
import jax.numpy as jnp
from jax.experimental import pallas as pl
from jax.experimental.pallas import tpu as pltpu

BN_EPS = 1e-5
PADC = 8   # column offset of the activation inside the padded VMEM scratch
           # (8-aligned interior stores; columns PADC-1 and PADC+W are the zero halo)


# ----------------------------------------------------------------------------
# In-kernel helpers
# ----------------------------------------------------------------------------
def _conv3x3(pad_ref, H, W, w_ref, b_ref, s_ref, t_ref):
    """3x3 stride-1 conv + bias + ReLU + folded BN, reading a padded VMEM scratch.

    pad_ref : (H+2, PADC+W+1, Cin) f32; activation lives at [1:H+1, PADC:PADC+W, :],
              everything else is zero (provides the padding=1 halo).
    w_ref   : (9, Cin, Cout) bf16, tap-major (dy*3+dx).
    Returns (H*W, Cout) f32.
    """
    Cin = pad_ref.shape[-1]
    Cout = w_ref.shape[-1]
    acc = jnp.zeros((H * W, Cout), jnp.float32)
    for dy in range(3):
        for dx in range(3):
            c0 = PADC - 1 + dx
            patch = pad_ref[dy:dy + H, c0:c0 + W, :].reshape(H * W, Cin)
            acc = acc + jnp.dot(patch.astype(jnp.bfloat16), w_ref[dy * 3 + dx],
                                preferred_element_type=jnp.float32)
    y = jnp.maximum(acc + b_ref[...], 0.0)       # conv bias + ReLU
    return y * s_ref[...] + t_ref[...]           # BatchNorm (eval, folded)


def _store_act(pad_ref, y, H, W):
    """Write a (H*W, C) activation into the padded-scratch interior (aligned store)."""
    C = pad_ref.shape[-1]
    pad_ref[1:1 + H, PADC:PADC + W, :] = y.reshape(H, W, C).astype(pad_ref.dtype)


# ----------------------------------------------------------------------------
# Stage kernels (one pallas_call per spatial resolution, grid over batch)
# ----------------------------------------------------------------------------
def _make_stage_a_kernel(H, W):
    # conv1 (1->64) + conv12 (64->64) + conv2 (64->128, stride-2 computed at stride 1)
    def kernel(cols_ref, w1_ref, b1_ref, s1_ref, t1_ref,
               w12_ref, b12_ref, s12_ref, t12_ref,
               w2_ref, b2_ref, s2_ref, t2_ref,
               o_ref, pad_ref):
        pad_ref[...] = jnp.zeros_like(pad_ref)   # zero halo / unused cols every step
        # conv1 (Cin=1): single im2col matmul (H*W, 9) x (9, 64)
        p = cols_ref[0].reshape(H * W, 9).astype(jnp.bfloat16)
        y = jnp.maximum(jnp.dot(p, w1_ref[...], preferred_element_type=jnp.float32)
                        + b1_ref[...], 0.0)
        y = y * s1_ref[...] + t1_ref[...]
        _store_act(pad_ref, y, H, W)
        # conv12 (64 -> 64), activation stays in VMEM
        y = _conv3x3(pad_ref, H, W, w12_ref, b12_ref, s12_ref, t12_ref)
        _store_act(pad_ref, y, H, W)
        # conv2 (64 -> 128): full-res; wrapper takes the even-index subsample (stride 2)
        y = _conv3x3(pad_ref, H, W, w2_ref, b2_ref, s2_ref, t2_ref)
        o_ref[...] = y.reshape(1, H, W, w2_ref.shape[-1]).astype(o_ref.dtype)
    return kernel


def _make_stage_b_kernel(H, W):
    # conv22 (128->128) + conv23 (128->128) + conv3 (128->256, stride-2 at stride 1)
    def kernel(x_ref, w22_ref, b22_ref, s22_ref, t22_ref,
               w23_ref, b23_ref, s23_ref, t23_ref,
               w3_ref, b3_ref, s3_ref, t3_ref,
               o_ref, pad_ref):
        pad_ref[...] = jnp.zeros_like(pad_ref)
        pad_ref[1:1 + H, PADC:PADC + W, :] = x_ref[0].astype(pad_ref.dtype)
        y = _conv3x3(pad_ref, H, W, w22_ref, b22_ref, s22_ref, t22_ref)
        _store_act(pad_ref, y, H, W)
        y = _conv3x3(pad_ref, H, W, w23_ref, b23_ref, s23_ref, t23_ref)
        _store_act(pad_ref, y, H, W)
        y = _conv3x3(pad_ref, H, W, w3_ref, b3_ref, s3_ref, t3_ref)
        o_ref[...] = y.reshape(1, H, W, w3_ref.shape[-1]).astype(o_ref.dtype)
    return kernel


def _make_stage_c_kernel(H, W):
    # conv31 (256->256) + conv32 (256->256) + avg-pool + (bnfc1.fc1) relu + (bnfc2.fc2) relu
    def kernel(x_ref, w31_ref, b31_ref, s31_ref, t31_ref,
               w32_ref, b32_ref, s32_ref, t32_ref,
               wf1_ref, bf1_ref, wf2_ref, bf2_ref,
               o_ref, pad_ref):
        pad_ref[...] = jnp.zeros_like(pad_ref)
        pad_ref[1:1 + H, PADC:PADC + W, :] = x_ref[0].astype(pad_ref.dtype)
        y = _conv3x3(pad_ref, H, W, w31_ref, b31_ref, s31_ref, t31_ref)
        _store_act(pad_ref, y, H, W)
        y = _conv3x3(pad_ref, H, W, w32_ref, b32_ref, s32_ref, t32_ref)   # (H*W, 256)
        # AdaptiveAvgPool2d((1,1)) + flatten
        pooled = jnp.mean(y, axis=0, keepdims=True)                        # (1, 256)
        # bnfc1 folded into fc1, bnfc2 folded into fc2 (exact, done at init)
        h = jnp.maximum(jnp.dot(pooled.astype(jnp.bfloat16), wf1_ref[...],
                                preferred_element_type=jnp.float32) + bf1_ref[...], 0.0)
        out = jnp.maximum(jnp.dot(h.astype(jnp.bfloat16), wf2_ref[...],
                                  preferred_element_type=jnp.float32) + bf2_ref[...], 0.0)
        o_ref[...] = out.reshape(1, 1, 10).astype(o_ref.dtype)
    return kernel


# ----------------------------------------------------------------------------
# pallas_call wrappers
# ----------------------------------------------------------------------------
def _const_specs(arrs):
    # Full-array blocks, same block for every grid step (weights / bias / BN params).
    return [pl.BlockSpec(a.shape, lambda b, _n=a.ndim: (0,) * _n) for a in arrs]


def _compiler_params():
    return pltpu.CompilerParams(dimension_semantics=("parallel",))


def stage_a(cols, params):
    B, H, W, _ = cols.shape
    w1, b1, s1, t1 = params["conv1"]
    w12, b12, s12, t12 = params["conv12"]
    w2, b2, s2, t2 = params["conv2"]
    consts = [w1, b1, s1, t1, w12, b12, s12, t12, w2, b2, s2, t2]
    return pl.pallas_call(
        _make_stage_a_kernel(H, W),
        out_shape=jax.ShapeDtypeStruct((B, H, W, 128), jnp.float32),
        grid=(B,),
        in_specs=[pl.BlockSpec((1, H, W, 9), lambda b: (b, 0, 0, 0))] + _const_specs(consts),
        out_specs=pl.BlockSpec((1, H, W, 128), lambda b: (b, 0, 0, 0)),
        scratch_shapes=[pltpu.VMEM((H + 2, PADC + W + 1, 64), jnp.float32)],
        compiler_params=_compiler_params(),
    )(cols, *consts)


def stage_b(x, params):
    B, H, W, _ = x.shape
    w22, b22, s22, t22 = params["conv22"]
    w23, b23, s23, t23 = params["conv23"]
    w3, b3, s3, t3 = params["conv3"]
    consts = [w22, b22, s22, t22, w23, b23, s23, t23, w3, b3, s3, t3]
    return pl.pallas_call(
        _make_stage_b_kernel(H, W),
        out_shape=jax.ShapeDtypeStruct((B, H, W, 256), jnp.float32),
        grid=(B,),
        in_specs=[pl.BlockSpec((1, H, W, 128), lambda b: (b, 0, 0, 0))] + _const_specs(consts),
        out_specs=pl.BlockSpec((1, H, W, 256), lambda b: (b, 0, 0, 0)),
        scratch_shapes=[pltpu.VMEM((H + 2, PADC + W + 1, 128), jnp.float32)],
        compiler_params=_compiler_params(),
    )(x, *consts)


def stage_c(x, params):
    B, H, W, _ = x.shape
    w31, b31, s31, t31 = params["conv31"]
    w32, b32, s32, t32 = params["conv32"]
    wf1, bf1 = params["fc1"]
    wf2, bf2 = params["fc2"]
    consts = [w31, b31, s31, t31, w32, b32, s32, t32, wf1, bf1, wf2, bf2]
    return pl.pallas_call(
        _make_stage_c_kernel(H, W),
        out_shape=jax.ShapeDtypeStruct((B, 1, 10), jnp.float32),
        grid=(B,),
        in_specs=[pl.BlockSpec((1, H, W, 256), lambda b: (b, 0, 0, 0))] + _const_specs(consts),
        out_specs=pl.BlockSpec((1, 1, 10), lambda b: (b, 0, 0)),
        scratch_shapes=[pltpu.VMEM((H + 2, PADC + W + 1, 256), jnp.float32)],
        compiler_params=_compiler_params(),
    )(x, *consts)


# ----------------------------------------------------------------------------
# Deterministic synthetic parameters (PyTorch shapes, converted for the kernels)
# ----------------------------------------------------------------------------
_CONV_CFG = [
    ("conv1", 1, 64),
    ("conv12", 64, 64),
    ("conv2", 64, 128),
    ("conv22", 128, 128),
    ("conv23", 128, 128),
    ("conv3", 128, 256),
    ("conv31", 256, 256),
    ("conv32", 256, 256),
]


def _fold_bn(key, c):
    k1, k2, k3, k4 = jax.random.split(key, 4)
    gamma = 1.0 + 0.1 * jax.random.normal(k1, (c,), jnp.float32)
    beta = 0.05 * jax.random.normal(k2, (c,), jnp.float32)
    rmean = 0.05 * jax.random.normal(k3, (c,), jnp.float32)
    rvar = 1.0 + 0.1 * jax.random.uniform(k4, (c,), jnp.float32)
    scale = gamma / jnp.sqrt(rvar + BN_EPS)
    shift = beta - rmean * scale
    return scale, shift                      # (c,)


def init_params(key):
    params = {}
    for name, cin, cout in _CONV_CFG:
        key, kw, kb, kbn = jax.random.split(key, 4)
        w = 0.05 * jax.random.normal(kw, (cout, cin, 3, 3), jnp.float32)   # torch OIHW
        b = 0.02 * jax.random.normal(kb, (cout,), jnp.float32)
        scale, shift = _fold_bn(kbn, cout)
        wt = jnp.transpose(w, (2, 3, 1, 0))                                # (3,3,cin,cout)
        if name == "conv1":
            w9 = wt.reshape(9, cout)                                       # cin==1 -> (9, 64)
        else:
            w9 = wt.reshape(9, cin, cout)
        params[name] = (w9.astype(jnp.bfloat16),
                        b.reshape(1, cout),
                        scale.reshape(1, cout),
                        shift.reshape(1, cout))

    # head: fold bnfc1 into fc1 and bnfc2 into fc2 (exact: BN precedes each matmul)
    key, kbn1, kw1, kb1, kbn2, kw2, kb2 = jax.random.split(key, 7)
    s1, t1 = _fold_bn(kbn1, 256)
    w1 = 0.05 * jax.random.normal(kw1, (128, 256), jnp.float32)            # torch (out, in)
    fb1 = 0.02 * jax.random.normal(kb1, (128,), jnp.float32)
    W1 = jnp.transpose(w1)                                                 # (256, 128)
    params["fc1"] = ((s1[:, None] * W1).astype(jnp.bfloat16),
                     (t1 @ W1 + fb1).reshape(1, 128).astype(jnp.float32))

    s2, t2 = _fold_bn(kbn2, 128)
    w2 = 0.05 * jax.random.normal(kw2, (10, 128), jnp.float32)
    fb2 = 0.02 * jax.random.normal(kb2, (10,), jnp.float32)
    W2 = jnp.transpose(w2)                                                 # (128, 10)
    params["fc2"] = ((s2[:, None] * W2).astype(jnp.bfloat16),
                     (t2 @ W2 + fb2).reshape(1, 10).astype(jnp.float32))
    return params


# ----------------------------------------------------------------------------
# Forward pass (NCHW in, (B, 10) out) — mirrors CNN.forward
# ----------------------------------------------------------------------------
def _im2col_1ch(x):
    """x: (B, H, W, 1) -> (B, H, W, 9) 3x3 zero-padded im2col, tap-major (dy*3+dx)."""
    B, H, W, _ = x.shape
    xp = jnp.pad(x, ((0, 0), (1, 1), (1, 1), (0, 0)))
    return jnp.concatenate([xp[:, dy:dy + H, dx:dx + W, :]
                            for dy in range(3) for dx in range(3)], axis=-1)


def forward(x_nchw, params):
    x = jnp.transpose(x_nchw, (0, 2, 3, 1)).astype(jnp.float32)   # NCHW -> NHWC
    cols = _im2col_1ch(x)                                         # conv1 im2col (Cin=1)
    a = stage_a(cols, params)        # conv1+conv12+conv2(full-res)    : (B, H,   W,   128)
    a = a[:, ::2, ::2, :]            # conv2 stride-2 (even subsample)
    b = stage_b(a, params)           # conv22+conv23+conv3(full-res)   : (B, H/2, W/2, 256)
    b = b[:, ::2, ::2, :]            # conv3 stride-2
    c = stage_c(b, params)           # conv31+conv32+pool+fc head      : (B, 1, 10)
    return c[:, 0, :]


if __name__ == "__main__":
    root = jax.random.PRNGKey(0)
    k_params, k_x = jax.random.split(root)
    params = init_params(k_params)

    # small MNIST-like input: batch=2, 1 channel, 16x16 (NCHW, like PyTorch)
    x = jax.random.normal(k_x, (2, 1, 16, 16), jnp.float32)

    out = jax.jit(forward)(x, params)
    out = jax.block_until_ready(out)

    assert out.shape == (2, 10), out.shape
    assert bool(jnp.all(jnp.isfinite(out)))
    print("KERNEL_OK")
</pallas_src>

<mosaic_0001>
module attributes {stable_mosaic.version = 11 : i64} {
  func.func @kernel(%arg0: i32, %arg1: memref<1x16x16x9xf32, #tpu.memory_space<vmem>>, %arg2: memref<9x64xbf16, #tpu.memory_space<vmem>>, %arg3: memref<1x64xf32, #tpu.memory_space<vmem>>, %arg4: memref<1x64xf32, #tpu.memory_space<vmem>>, %arg5: memref<1x64xf32, #tpu.memory_space<vmem>>, %arg6: memref<9x64x64xbf16, #tpu.memory_space<vmem>>, %arg7: memref<1x64xf32, #tpu.memory_space<vmem>>, %arg8: memref<1x64xf32, #tpu.memory_space<vmem>>, %arg9: memref<1x64xf32, #tpu.memory_space<vmem>>, %arg10: memref<9x64x128xbf16, #tpu.memory_space<vmem>>, %arg11: memref<1x128xf32, #tpu.memory_space<vmem>>, %arg12: memref<1x128xf32, #tpu.memory_space<vmem>>, %arg13: memref<1x128xf32, #tpu.memory_space<vmem>>, %arg14: memref<1x16x16x128xf32, #tpu.memory_space<vmem>>, %arg15: memref<18x25x64xf32, #tpu.memory_space<vmem>>) attributes {dimension_semantics = [#tpu.dimension_semantics<parallel>], iteration_bounds = array<i64: 2>, scalar_prefetch = 0 : i64, scratch_operands = 1 : i64, tpu.core_type = #tpu.core_type<tc>, window_params = [{transform_indices = @transform_0, window_bounds = array<i64: 1, 16, 16, 9>}, {pipeline_mode = #tpu.pipeline_mode<synchronous>, transform_indices = @transform_1, window_bounds = array<i64: 9, 64>}, {pipeline_mode = #tpu.pipeline_mode<synchronous>, transform_indices = @transform_2, window_bounds = array<i64: 1, 64>}, {pipeline_mode = #tpu.pipeline_mode<synchronous>, transform_indices = @transform_3, window_bounds = array<i64: 1, 64>}, {pipeline_mode = #tpu.pipeline_mode<synchronous>, transform_indices = @transform_4, window_bounds = array<i64: 1, 64>}, {pipeline_mode = #tpu.pipeline_mode<synchronous>, transform_indices = @transform_5, window_bounds = array<i64: 9, 64, 64>}, {pipeline_mode = #tpu.pipeline_mode<synchronous>, transform_indices = @transform_6, window_bounds = array<i64: 1, 64>}, {pipeline_mode = #tpu.pipeline_mode<synchronous>, transform_indices = @transform_7, window_bounds = array<i64: 1, 64>}, {pipeline_mode = #tpu.pipeline_mode<synchronous>, transform_indices = @transform_8, window_bounds = array<i64: 1, 64>}, {pipeline_mode = #tpu.pipeline_mode<synchronous>, transform_indices = @transform_9, window_bounds = array<i64: 9, 64, 128>}, {pipeline_mode = #tpu.pipeline_mode<synchronous>, transform_indices = @transform_10, window_bounds = array<i64: 1, 128>}, {pipeline_mode = #tpu.pipeline_mode<synchronous>, transform_indices = @transform_11, window_bounds = array<i64: 1, 128>}, {pipeline_mode = #tpu.pipeline_mode<synchronous>, transform_indices = @transform_12, window_bounds = array<i64: 1, 128>}, {transform_indices = @transform_13, window_bounds = array<i64: 1, 16, 16, 128>}]} {
    %cst = arith.constant 0.000000e+00 : f32
    %0 = vector.broadcast %cst : f32 to vector<18x25x64xf32>
    %c0 = arith.constant 0 : index
    %c0_0 = arith.constant 0 : index
    %c0_1 = arith.constant 0 : index
    %1 = vector.load %arg15[%c0, %c0_0, %c0_1] : memref<18x25x64xf32, #tpu.memory_space<vmem>>, vector<18x25x64xf32>
    tpu.vector_store %arg15[%c0, %c0_0, %c0_1], %0 {strides = array<i32>} : memref<18x25x64xf32, #tpu.memory_space<vmem>>, vector<18x25x64xf32>,
    %c0_2 = arith.constant 0 : index
    %c0_3 = arith.constant 0 : index
    %c0_4 = arith.constant 0 : index
    %c0_5 = arith.constant 0 : index
    %2 = vector.load %arg1[%c0_2, %c0_3, %c0_4, %c0_5] : memref<1x16x16x9xf32, #tpu.memory_space<vmem>>, vector<1x16x16x9xf32>
    %3 = vector.shape_cast %2 : vector<1x16x16x9xf32> to vector<16x16x9xf32>
    %4 = vector.shape_cast %3 : vector<16x16x9xf32> to vector<256x9xf32>
    %5 = arith.truncf %4 : vector<256x9xf32> to vector<256x9xbf16>
    %c0_6 = arith.constant 0 : index
    %c0_7 = arith.constant 0 : index
    %6 = vector.load %arg2[%c0_6, %c0_7] : memref<9x64xbf16, #tpu.memory_space<vmem>>, vector<9x64xbf16>
    %cst_8 = arith.constant dense<0.000000e+00> : vector<256x64xf32>
    %7 = tpu.matmul %5, %6, %cst_8 {dimension_numbers = #tpu.dot_dimension_numbers<[1], [0], [0], [1], [0, 0, 1, 1], [], []>} : vector<256x9xbf16>, vector<9x64xbf16>, vector<256x64xf32> -> vector<256x64xf32>
    %c0_9 = arith.constant 0 : index
    %c0_10 = arith.constant 0 : index
    %8 = vector.load %arg3[%c0_9, %c0_10] : memref<1x64xf32, #tpu.memory_space<vmem>>, vector<1x64xf32>
    %9 = vector.broadcast %8 : vector<1x64xf32> to vector<256x64xf32>
    %10 = arith.addf %7, %9 : vector<256x64xf32>
    %cst_11 = arith.constant 0.000000e+00 : f32
    %11 = vector.broadcast %cst_11 : f32 to vector<256x64xf32>
    %12 = arith.maximumf %10, %11 : vector<256x64xf32>
    %c0_12 = arith.constant 0 : index
    %c0_13 = arith.constant 0 : index
    %13 = vector.load %arg4[%c0_12, %c0_13] : memref<1x64xf32, #tpu.memory_space<vmem>>, vector<1x64xf32>
    %14 = vector.broadcast %13 : vector<1x64xf32> to vector<256x64xf32>
    %15 = arith.mulf %12, %14 : vector<256x64xf32>
    %c0_14 = arith.constant 0 : index
    %c0_15 = arith.constant 0 : index
    %16 = vector.load %arg5[%c0_14, %c0_15] : memref<1x64xf32, #tpu.memory_space<vmem>>, vector<1x64xf32>
    %17 = vector.broadcast %16 : vector<1x64xf32> to vector<256x64xf32>
    %18 = arith.addf %15, %17 : vector<256x64xf32>
    %19 = vector.shape_cast %18 : vector<256x64xf32> to vector<16x16x64xf32>
    %c1 = arith.constant 1 : index
    %c8 = arith.constant 8 : index
    %c0_16 = arith.constant 0 : index
    %20 = vector.load %arg15[%c1, %c8, %c0_16] : memref<18x25x64xf32, #tpu.memory_space<vmem>>, vector<16x16x64xf32>
    tpu.vector_store %arg15[%c1, %c8, %c0_16], %19 {strides = array<i32>} : memref<18x25x64xf32, #tpu.memory_space<vmem>>, vector<16x16x64xf32>,
    %cst_17 = arith.constant 0.000000e+00 : f32
    %21 = vector.broadcast %cst_17 : f32 to vector<256x64xf32>
    %c0_18 = arith.constant 0 : index
    %c7 = arith.constant 7 : index
    %c0_19 = arith.constant 0 : index
    %22 = vector.load %arg15[%c0_18, %c7, %c0_19] : memref<18x25x64xf32, #tpu.memory_space<vmem>>, vector<16x16x64xf32>
    %23 = vector.shape_cast %22 : vector<16x16x64xf32> to vector<256x64xf32>
    %24 = arith.truncf %23 : vector<256x64xf32> to vector<256x64xbf16>
    %c0_20 = arith.constant 0 : index
    %c0_21 = arith.constant 0 : index
    %c0_22 = arith.constant 0 : index
    %25 = vector.load %arg6[%c0_20, %c0_21, %c0_22] : memref<9x64x64xbf16, #tpu.memory_space<vmem>>, vector<1x64x64xbf16>
    %26 = vector.shape_cast %25 : vector<1x64x64xbf16> to vector<64x64xbf16>
    %cst_23 = arith.constant dense<0.000000e+00> : vector<256x64xf32>
    %27 = tpu.matmul %24, %26, %cst_23 {dimension_numbers = #tpu.dot_dimension_numbers<[1], [0], [0], [1], [0, 0, 1, 1], [], []>} : vector<256x64xbf16>, vector<64x64xbf16>, vector<256x64xf32> -> vector<256x64xf32>
    %28 = arith.addf %21, %27 : vector<256x64xf32>
    %c0_24 = arith.constant 0 : index
    %c8_25 = arith.constant 8 : index
    %c0_26 = arith.constant 0 : index
    %29 = vector.load %arg15[%c0_24, %c8_25, %c0_26] : memref<18x25x64xf32, #tpu.memory_space<vmem>>, vector<16x16x64xf32>
    %30 = vector.shape_cast %29 : vector<16x16x64xf32> to vector<256x64xf32>
    %31 = arith.truncf %30 : vector<256x64xf32> to vector<256x64xbf16>
    %c1_27 = arith.constant 1 : index
    %c0_28 = arith.constant 0 : index
    %c0_29 = arith.constant 0 : index
    %32 = vector.load %arg6[%c1_27, %c0_28, %c0_29] : memref<9x64x64xbf16, #tpu.memory_space<vmem>>, vector<1x64x64xbf16>
    %33 = vector.shape_cast %32 : vector<1x64x64xbf16> to vector<64x64xbf16>
    %cst_30 = arith.constant dense<0.000000e+00> : vector<256x64xf32>
    %34 = tpu.matmul %31, %33, %cst_30 {dimension_numbers = #tpu.dot_dimension_numbers<[1], [0], [0], [1], [0, 0, 1, 1], [], []>} : vector<256x64xbf16>, vector<64x64xbf16>, vector<256x64xf32> -> vector<256x64xf32>
    %35 = arith.addf %28, %34 : vector<256x64xf32>
    %c0_31 = arith.constant 0 : index
    %c9 = arith.constant 9 : index
    %c0_32 = arith.constant 0 : index
    %36 = vector.load %arg15[%c0_31, %c9, %c0_32] : memref<18x25x64xf32, #tpu.memory_space<vmem>>, vector<16x16x64xf32>
    %37 = vector.shape_cast %36 : vector<16x16x64xf32> to vector<256x64xf32>
    %38 = arith.truncf %37 : vector<256x64xf32> to vector<256x64xbf16>
    %c2 = arith.constant 2 : index
    %c0_33 = arith.constant 0 : index
    %c0_34 = arith.constant 0 : index
    %39 = vector.load %arg6[%c2, %c0_33, %c0_34] : memref<9x64x64xbf16, #tpu.memory_space<vmem>>, vector<1x64x64xbf16>
    %40 = vector.shape_cast %39 : vector<1x64x64xbf16> to vector<64x64xbf16>
    %cst_35 = arith.constant dense<0.000000e+00> : vector<256x64xf32>
    %41 = tpu.matmul %38, %40, %cst_35 {dimension_numbers = #tpu.dot_dimension_numbers<[1], [0], [0], [1], [0, 0, 1, 1], [], []>} : vector<256x64xbf16>, vector<64x64xbf16>, vector<256x64xf32> -> vector<256x64xf32>
    %42 = arith.addf %35, %41 : vector<256x64xf32>
    %c1_36 = arith.constant 1 : index
    %c7_37 = arith.constant 7 : index
    %c0_38 = arith.constant 0 : index
    %43 = vector.load %arg15[%c1_36, %c7_37, %c0_38] : memref<18x25x64xf32, #tpu.memory_space<vmem>>, vector<16x16x64xf32>
    %44 = vector.shape_cast %43 : vector<16x16x64xf32> to vector<256x64xf32>
    %45 = arith.truncf %44 : vector<256x64xf32> to vector<256x64xbf16>
    %c3 = arith.constant 3 : index
    %c0_39 = arith.constant 0 : index
    %c0_40 = arith.constant 0 : index
    %46 = vector.load %arg6[%c3, %c0_39, %c0_40] : memref<9x64x64xbf16, #tpu.memory_space<vmem>>, vector<1x64x64xbf16>
    %47 = vector.shape_cast %46 : vector<1x64x64xbf16> to vector<64x64xbf16>
    %cst_41 = arith.constant dense<0.000000e+00> : vector<256x64xf32>
    %48 = tpu.matmul %45, %47, %cst_41 {dimension_numbers = #tpu.dot_dimension_numbers<[1], [0], [0], [1], [0, 0, 1, 1], [], []>} : vector<256x64xbf16>, vector<64x64xbf16>, vector<256x64xf32> -> vector<256x64xf32>
    %49 = arith.addf %42, %48 : vector<256x64xf32>
    %c1_42 = arith.constant 1 : index
    %c8_43 = arith.constant 8 : index
    %c0_44 = arith.constant 0 : index
    %50 = vector.load %arg15[%c1_42, %c8_43, %c0_44] : memref<18x25x64xf32, #tpu.memory_space<vmem>>, vector<16x16x64xf32>
    %51 = vector.shape_cast %50 : vector<16x16x64xf32> to vector<256x64xf32>
    %52 = arith.truncf %51 : vector<256x64xf32> to vector<256x64xbf16>
    %c4 = arith.constant 4 : index
    %c0_45 = arith.constant 0 : index
    %c0_46 = arith.constant 0 : index
    %53 = vector.load %arg6[%c4, %c0_45, %c0_46] : memref<9x64x64xbf16, #tpu.memory_space<vmem>>, vector<1x64x64xbf16>
    %54 = vector.shape_cast %53 : vector<1x64x64xbf16> to vector<64x64xbf16>
    %cst_47 = arith.constant dense<0.000000e+00> : vector<256x64xf32>
    %55 = tpu.matmul %52, %54, %cst_47 {dimension_numbers = #tpu.dot_dimension_numbers<[1], [0], [0], [1], [0, 0, 1, 1], [], []>} : vector<256x64xbf16>, vector<64x64xbf16>, vector<256x64xf32> -> vector<256x64xf32>
    %56 = arith.addf %49, %55 : vector<256x64xf32>
    %c1_48 = arith.constant 1 : index
    %c9_49 = arith.constant 9 : index
    %c0_50 = arith.constant 0 : index
    %57 = vector.load %arg15[%c1_48, %c9_49, %c0_50] : memref<18x25x64xf32, #tpu.memory_space<vmem>>, vector<16x16x64xf32>
    %58 = vector.shape_cast %57 : vector<16x16x64xf32> to vector<256x64xf32>
    %59 = arith.truncf %58 : vector<256x64xf32> to vector<256x64xbf16>
    %c5 = arith.constant 5 : index
    %c0_51 = arith.constant 0 : index
    %c0_52 = arith.constant 0 : index
    %60 = vector.load %arg6[%c5, %c0_51, %c0_52] : memref<9x64x64xbf16, #tpu.memory_space<vmem>>, vector<1x64x64xbf16>
    %61 = vector.shape_cast %60 : vector<1x64x64xbf16> to vector<64x64xbf16>
    %cst_53 = arith.constant dense<0.000000e+00> : vector<256x64xf32>
    %62 = tpu.matmul %59, %61, %cst_53 {dimension_numbers = #tpu.dot_dimension_numbers<[1], [0], [0], [1], [0, 0, 1, 1], [], []>} : vector<256x64xbf16>, vector<64x64xbf16>, vector<256x64xf32> -> vector<256x64xf32>
    %63 = arith.addf %56, %62 : vector<256x64xf32>
    %c2_54 = arith.constant 2 : index
    %c7_55 = arith.constant 7 : index
    %c0_56 = arith.constant 0 : index
    %64 = vector.load %arg15[%c2_54, %c7_55, %c0_56] : memref<18x25x64xf32, #tpu.memory_space<vmem>>, vector<16x16x64xf32>
    %65 = vector.shape_cast %64 : vector<16x16x64xf32> to vector<256x64xf32>
    %66 = arith.truncf %65 : vector<256x64xf32> to vector<256x64xbf16>
    %c6 = arith.constant 6 : index
    %c0_57 = arith.constant 0 : index
    %c0_58 = arith.constant 0 : index
    %67 = vector.load %arg6[%c6, %c0_57, %c0_58] : memref<9x64x64xbf16, #tpu.memory_space<vmem>>, vector<1x64x64xbf16>
    %68 = vector.shape_cast %67 : vector<1x64x64xbf16> to vector<64x64xbf16>
    %cst_59 = arith.constant dense<0.000000e+00> : vector<256x64xf32>
    %69 = tpu.matmul %66, %68, %cst_59 {dimension_numbers = #tpu.dot_dimension_numbers<[1], [0], [0], [1], [0, 0, 1, 1], [], []>} : vector<256x64xbf16>, vector<64x64xbf16>, vector<256x64xf32> -> vector<256x64xf32>
    %70 = arith.addf %63, %69 : vector<256x64xf32>
    %c2_60 = arith.constant 2 : index
    %c8_61 = arith.constant 8 : index
    %c0_62 = arith.constant 0 : index
    %71 = vector.load %arg15[%c2_60, %c8_61, %c0_62] : memref<18x25x64xf32, #tpu.memory_space<vmem>>, vector<16x16x64xf32>
    %72 = vector.shape_cast %71 : vector<16x16x64xf32> to vector<256x64xf32>
    %73 = arith.truncf %72 : vector<256x64xf32> to vector<256x64xbf16>
    %c7_63 = arith.constant 7 : index
    %c0_64 = arith.constant 0 : index
    %c0_65 = arith.constant 0 : index
    %74 = vector.load %arg6[%c7_63, %c0_64, %c0_65] : memref<9x64x64xbf16, #tpu.memory_space<vmem>>, vector<1x64x64xbf16>
    %75 = vector.shape_cast %74 : vector<1x64x64xbf16> to vector<64x64xbf16>
    %cst_66 = arith.constant dense<0.000000e+00> : vector<256x64xf32>
    %76 = tpu.matmul %73, %75, %cst_66 {dimension_numbers = #tpu.dot_dimension_numbers<[1], [0], [0], [1], [0, 0, 1, 1], [], []>} : vector<256x64xbf16>, vector<64x64xbf16>, vector<256x64xf32> -> vector<256x64xf32>
    %77 = arith.addf %70, %76 : vector<256x64xf32>
    %c2_67 = arith.constant 2 : index
    %c9_68 = arith.constant 9 : index
    %c0_69 = arith.constant 0 : index
    %78 = vector.load %arg15[%c2_67, %c9_68, %c0_69] : memref<18x25x64xf32, #tpu.memory_space<vmem>>, vector<16x16x64xf32>
    %79 = vector.shape_cast %78 : vector<16x16x64xf32> to vector<256x64xf32>
    %80 = arith.truncf %79 : vector<256x64xf32> to vector<256x64xbf16>
    %c8_70 = arith.constant 8 : index
    %c0_71 = arith.constant 0 : index
    %c0_72 = arith.constant 0 : index
    %81 = vector.load %arg6[%c8_70, %c0_71, %c0_72] : memref<9x64x64xbf16, #tpu.memory_space<vmem>>, vector<1x64x64xbf16>
    %82 = vector.shape_cast %81 : vector<1x64x64xbf16> to vector<64x64xbf16>
    %cst_73 = arith.constant dense<0.000000e+00> : vector<256x64xf32>
    %83 = tpu.matmul %80, %82, %cst_73 {dimension_numbers = #tpu.dot_dimension_numbers<[1], [0], [0], [1], [0, 0, 1, 1], [], []>} : vector<256x64xbf16>, vector<64x64xbf16>, vector<256x64xf32> -> vector<256x64xf32>
    %84 = arith.addf %77, %83 : vector<256x64xf32>
    %c0_74 = arith.constant 0 : index
    %c0_75 = arith.constant 0 : index
    %85 = vector.load %arg7[%c0_74, %c0_75] : memref<1x64xf32, #tpu.memory_space<vmem>>, vector<1x64xf32>
    %86 = vector.broadcast %85 : vector<1x64xf32> to vector<256x64xf32>
    %87 = arith.addf %84, %86 : vector<256x64xf32>
    %cst_76 = arith.constant 0.000000e+00 : f32
    %88 = vector.broadcast %cst_76 : f32 to vector<256x64xf32>
    %89 = arith.maximumf %87, %88 : vector<256x64xf32>
    %c0_77 = arith.constant 0 : index
    %c0_78 = arith.constant 0 : index
    %90 = vector.load %arg8[%c0_77, %c0_78] : memref<1x64xf32, #tpu.memory_space<vmem>>, vector<1x64xf32>
    %91 = vector.broadcast %90 : vector<1x64xf32> to vector<256x64xf32>
    %92 = arith.mulf %89, %91 : vector<256x64xf32>
    %c0_79 = arith.constant 0 : index
    %c0_80 = arith.constant 0 : index
    %93 = vector.load %arg9[%c0_79, %c0_80] : memref<1x64xf32, #tpu.memory_space<vmem>>, vector<1x64xf32>
    %94 = vector.broadcast %93 : vector<1x64xf32> to vector<256x64xf32>
    %95 = arith.addf %92, %94 : vector<256x64xf32>
    %96 = vector.shape_cast %95 : vector<256x64xf32> to vector<16x16x64xf32>
    %c1_81 = arith.constant 1 : index
    %c8_82 = arith.constant 8 : index
    %c0_83 = arith.constant 0 : index
    %97 = vector.load %arg15[%c1_81, %c8_82, %c0_83] : memref<18x25x64xf32, #tpu.memory_space<vmem>>, vector<16x16x64xf32>
    tpu.vector_store %arg15[%c1_81, %c8_82, %c0_83], %96 {strides = array<i32>} : memref<18x25x64xf32, #tpu.memory_space<vmem>>, vector<16x16x64xf32>,
    %cst_84 = arith.constant 0.000000e+00 : f32
    %98 = vector.broadcast %cst_84 : f32 to vector<256x128xf32>
    %c0_85 = arith.constant 0 : index
    %c7_86 = arith.constant 7 : index
    %c0_87 = arith.constant 0 : index
    %99 = vector.load %arg15[%c0_85, %c7_86, %c0_87] : memref<18x25x64xf32, #tpu.memory_space<vmem>>, vector<16x16x64xf32>
    %100 = vector.shape_cast %99 : vector<16x16x64xf32> to vector<256x64xf32>
    %101 = arith.truncf %100 : vector<256x64xf32> to vector<256x64xbf16>
    %c0_88 = arith.constant 0 : index
    %c0_89 = arith.constant 0 : index
    %c0_90 = arith.constant 0 : index
    %102 = vector.load %arg10[%c0_88, %c0_89, %c0_90] : memref<9x64x128xbf16, #tpu.memory_space<vmem>>, vector<1x64x128xbf16>
    %103 = vector.shape_cast %102 : vector<1x64x128xbf16> to vector<64x128xbf16>
    %cst_91 = arith.constant dense<0.000000e+00> : vector<256x128xf32>
    %104 = tpu.matmul %101, %103, %cst_91 {dimension_numbers = #tpu.dot_dimension_numbers<[1], [0], [0], [1], [0, 0, 1, 1], [], []>} : vector<256x64xbf16>, vector<64x128xbf16>, vector<256x128xf32> -> vector<256x128xf32>
    %105 = arith.addf %98, %104 : vector<256x128xf32>
    %c0_92 = arith.constant 0 : index
    %c8_93 = arith.constant 8 : index
    %c0_94 = arith.constant 0 : index
    %106 = vector.load %arg15[%c0_92, %c8_93, %c0_94] : memref<18x25x64xf32, #tpu.memory_space<vmem>>, vector<16x16x64xf32>
    %107 = vector.shape_cast %106 : vector<16x16x64xf32> to vector<256x64xf32>
    %108 = arith.truncf %107 : vector<256x64xf32> to vector<256x64xbf16>
    %c1_95 = arith.constant 1 : index
    %c0_96 = arith.constant 0 : index
    %c0_97 = arith.constant 0 : index
    %109 = vector.load %arg10[%c1_95, %c0_96, %c0_97] : memref<9x64x128xbf16, #tpu.memory_space<vmem>>, vector<1x64x128xbf16>
    %110 = vector.shape_cast %109 : vector<1x64x128xbf16> to vector<64x128xbf16>
    %cst_98 = arith.constant dense<0.000000e+00> : vector<256x128xf32>
    %111 = tpu.matmul %108, %110, %cst_98 {dimension_numbers = #tpu.dot_dimension_numbers<[1], [0], [0], [1], [0, 0, 1, 1], [], []>} : vector<256x64xbf16>, vector<64x128xbf16>, vector<256x128xf32> -> vector<256x128xf32>
    %112 = arith.addf %105, %111 : vector<256x128xf32>
    %c0_99 = arith.constant 0 : index
    %c9_100 = arith.constant 9 : index
    %c0_101 = arith.constant 0 : index
    %113 = vector.load %arg15[%c0_99, %c9_100, %c0_101] : memref<18x25x64xf32, #tpu.memory_space<vmem>>, vector<16x16x64xf32>
    %114 = vector.shape_cast %113 : vector<16x16x64xf32> to vector<256x64xf32>
    %115 = arith.truncf %114 : vector<256x64xf32> to vector<256x64xbf16>
    %c2_102 = arith.constant 2 : index
    %c0_103 = arith.constant 0 : index
    %c0_104 = arith.constant 0 : index
    %116 = vector.load %arg10[%c2_102, %c0_103, %c0_104] : memref<9x64x128xbf16, #tpu.memory_space<vmem>>, vector<1x64x128xbf16>
    %117 = vector.shape_cast %116 : vector<1x64x128xbf16> to vector<64x128xbf16>
    %cst_105 = arith.constant dense<0.000000e+00> : vector<256x128xf32>
    %118 = tpu.matmul %115, %117, %cst_105 {dimension_numbers = #tpu.dot_dimension_numbers<[1], [0], [0], [1], [0, 0, 1, 1], [], []>} : vector<256x64xbf16>, vector<64x128xbf16>, vector<256x128xf32> -> vector<256x128xf32>
    %119 = arith.addf %112, %118 : vector<256x128xf32>
    %c1_106 = arith.constant 1 : index
    %c7_107 = arith.constant 7 : index
    %c0_108 = arith.constant 0 : index
    %120 = vector.load %arg15[%c1_106, %c7_107, %c0_108] : memref<18x25x64xf32, #tpu.memory_space<vmem>>, vector<16x16x64xf32>
    %121 = vector.shape_cast %120 : vector<16x16x64xf32> to vector<256x64xf32>
    %122 = arith.truncf %121 : vector<256x64xf32> to vector<256x64xbf16>
    %c3_109 = arith.constant 3 : index
    %c0_110 = arith.constant 0 : index
    %c0_111 = arith.constant 0 : index
    %123 = vector.load %arg10[%c3_109, %c0_110, %c0_111] : memref<9x64x128xbf16, #tpu.memory_space<vmem>>, vector<1x64x128xbf16>
    %124 = vector.shape_cast %123 : vector<1x64x128xbf16> to vector<64x128xbf16>
    %cst_112 = arith.constant dense<0.000000e+00> : vector<256x128xf32>
    %125 = tpu.matmul %122, %124, %cst_112 {dimension_numbers = #tpu.dot_dimension_numbers<[1], [0], [0], [1], [0, 0, 1, 1], [], []>} : vector<256x64xbf16>, vector<64x128xbf16>, vector<256x128xf32> -> vector<256x128xf32>
    %126 = arith.addf %119, %125 : vector<256x128xf32>
    %c1_113 = arith.constant 1 : index
    %c8_114 = arith.constant 8 : index
    %c0_115 = arith.constant 0 : index
    %127 = vector.load %arg15[%c1_113, %c8_114, %c0_115] : memref<18x25x64xf32, #tpu.memory_space<vmem>>, vector<16x16x64xf32>
    %128 = vector.shape_cast %127 : vector<16x16x64xf32> to vector<256x64xf32>
    %129 = arith.truncf %128 : vector<256x64xf32> to vector<256x64xbf16>
    %c4_116 = arith.constant 4 : index
    %c0_117 = arith.constant 0 : index
    %c0_118 = arith.constant 0 : index
    %130 = vector.load %arg10[%c4_116, %c0_117, %c0_118] : memref<9x64x128xbf16, #tpu.memory_space<vmem>>, vector<1x64x128xbf16>
    %131 = vector.shape_cast %130 : vector<1x64x128xbf16> to vector<64x128xbf16>
    %cst_119 = arith.constant dense<0.000000e+00> : vector<256x128xf32>
    %132 = tpu.matmul %129, %131, %cst_119 {dimension_numbers = #tpu.dot_dimension_numbers<[1], [0], [0], [1], [0, 0, 1, 1], [], []>} : vector<256x64xbf16>, vector<64x128xbf16>, vector<256x128xf32> -> vector<256x128xf32>
    %133 = arith.addf %126, %132 : vector<256x128xf32>
    %c1_120 = arith.constant 1 : index
    %c9_121 = arith.constant 9 : index
    %c0_122 = arith.constant 0 : index
    %134 = vector.load %arg15[%c1_120, %c9_121, %c0_122] : memref<18x25x64xf32, #tpu.memory_space<vmem>>, vector<16x16x64xf32>
    %135 = vector.shape_cast %134 : vector<16x16x64xf32> to vector<256x64xf32>
    %136 = arith.truncf %135 : vector<256x64xf32> to vector<256x64xbf16>
    %c5_123 = arith.constant 5 : index
    %c0_124 = arith.constant 0 : index
    %c0_125 = arith.constant 0 : index
    %137 = vector.load %arg10[%c5_123, %c0_124, %c0_125] : memref<9x64x128xbf16, #tpu.memory_space<vmem>>, vector<1x64x128xbf16>
    %138 = vector.shape_cast %137 : vector<1x64x128xbf16> to vector<64x128xbf16>
    %cst_126 = arith.constant dense<0.000000e+00> : vector<256x128xf32>
    %139 = tpu.matmul %136, %138, %cst_126 {dimension_numbers = #tpu.dot_dimension_numbers<[1], [0], [0], [1], [0, 0, 1, 1], [], []>} : vector<256x64xbf16>, vector<64x128xbf16>, vector<256x128xf32> -> vector<256x128xf32>
    %140 = arith.addf %133, %139 : vector<256x128xf32>
    %c2_127 = arith.constant 2 : index
    %c7_128 = arith.constant 7 : index
    %c0_129 = arith.constant 0 : index
    %141 = vector.load %arg15[%c2_127, %c7_128, %c0_129] : memref<18x25x64xf32, #tpu.memory_space<vmem>>, vector<16x16x64xf32>
    %142 = vector.shape_cast %141 : vector<16x16x64xf32> to vector<256x64xf32>
    %143 = arith.truncf %142 : vector<256x64xf32> to vector<256x64xbf16>
    %c6_130 = arith.constant 6 : index
    %c0_131 = arith.constant 0 : index
    %c0_132 = arith.constant 0 : index
    %144 = vector.load %arg10[%c6_130, %c0_131, %c0_132] : memref<9x64x128xbf16, #tpu.memory_space<vmem>>, vector<1x64x128xbf16>
    %145 = vector.shape_cast %144 : vector<1x64x128xbf16> to vector<64x128xbf16>
    %cst_133 = arith.constant dense<0.000000e+00> : vector<256x128xf32>
    %146 = tpu.matmul %143, %145, %cst_133 {dimension_numbers = #tpu.dot_dimension_numbers<[1], [0], [0], [1], [0, 0, 1, 1], [], []>} : vector<256x64xbf16>, vector<64x128xbf16>, vector<256x128xf32> -> vector<256x128xf32>
    %147 = arith.addf %140, %146 : vector<256x128xf32>
    %c2_134 = arith.constant 2 : index
    %c8_135 = arith.constant 8 : index
    %c0_136 = arith.constant 0 : index
    %148 = vector.load %arg15[%c2_134, %c8_135, %c0_136] : memref<18x25x64xf32, #tpu.memory_space<vmem>>, vector<16x16x64xf32>
    %149 = vector.shape_cast %148 : vector<16x16x64xf32> to vector<256x64xf32>
    %150 = arith.truncf %149 : vector<256x64xf32> to vector<256x64xbf16>
    %c7_137 = arith.constant 7 : index
    %c0_138 = arith.constant 0 : index
    %c0_139 = arith.constant 0 : index
    %151 = vector.load %arg10[%c7_137, %c0_138, %c0_139] : memref<9x64x128xbf16, #tpu.memory_space<vmem>>, vector<1x64x128xbf16>
    %152 = vector.shape_cast %151 : vector<1x64x128xbf16> to vector<64x128xbf16>
    %cst_140 = arith.constant dense<0.000000e+00> : vector<256x128xf32>
    %153 = tpu.matmul %150, %152, %cst_140 {dimension_numbers = #tpu.dot_dimension_numbers<[1], [0], [0], [1], [0, 0, 1, 1], [], []>} : vector<256x64xbf16>, vector<64x128xbf16>, vector<256x128xf32> -> vector<256x128xf32>
    %154 = arith.addf %147, %153 : vector<256x128xf32>
    %c2_141 = arith.constant 2 : index
    %c9_142 = arith.constant 9 : index
    %c0_143 = arith.constant 0 : index
    %155 = vector.load %arg15[%c2_141, %c9_142, %c0_143] : memref<18x25x64xf32, #tpu.memory_space<vmem>>, vector<16x16x64xf32>
    %156 = vector.shape_cast %155 : vector<16x16x64xf32> to vector<256x64xf32>
    %157 = arith.truncf %156 : vector<256x64xf32> to vector<256x64xbf16>
    %c8_144 = arith.constant 8 : index
    %c0_145 = arith.constant 0 : index
    %c0_146 = arith.constant 0 : index
    %158 = vector.load %arg10[%c8_144, %c0_145, %c0_146] : memref<9x64x128xbf16, #tpu.memory_space<vmem>>, vector<1x64x128xbf16>
    %159 = vector.shape_cast %158 : vector<1x64x128xbf16> to vector<64x128xbf16>
    %cst_147 = arith.constant dense<0.000000e+00> : vector<256x128xf32>
    %160 = tpu.matmul %157, %159, %cst_147 {dimension_numbers = #tpu.dot_dimension_numbers<[1], [0], [0], [1], [0, 0, 1, 1], [], []>} : vector<256x64xbf16>, vector<64x128xbf16>, vector<256x128xf32> -> vector<256x128xf32>
    %161 = arith.addf %154, %160 : vector<256x128xf32>
    %c0_148 = arith.constant 0 : index
    %c0_149 = arith.constant 0 : index
    %162 = vector.load %arg11[%c0_148, %c0_149] : memref<1x128xf32, #tpu.memory_space<vmem>>, vector<1x128xf32>
    %163 = vector.broadcast %162 : vector<1x128xf32> to vector<256x128xf32>
    %164 = arith.addf %161, %163 : vector<256x128xf32>
    %cst_150 = arith.constant 0.000000e+00 : f32
    %165 = vector.broadcast %cst_150 : f32 to vector<256x128xf32>
    %166 = arith.maximumf %164, %165 : vector<256x128xf32>
    %c0_151 = arith.constant 0 : index
    %c0_152 = arith.constant 0 : index
    %167 = vector.load %arg12[%c0_151, %c0_152] : memref<1x128xf32, #tpu.memory_space<vmem>>, vector<1x128xf32>
    %168 = vector.broadcast %167 : vector<1x128xf32> to vector<256x128xf32>
    %169 = arith.mulf %166, %168 : vector<256x128xf32>
    %c0_153 = arith.constant 0 : index
    %c0_154 = arith.constant 0 : index
    %170 = vector.load %arg13[%c0_153, %c0_154] : memref<1x128xf32, #tpu.memory_space<vmem>>, vector<1x128xf32>
    %171 = vector.broadcast %170 : vector<1x128xf32> to vector<256x128xf32>
    %172 = arith.addf %169, %171 : vector<256x128xf32>
    %173 = vector.shape_cast %172 : vector<256x128xf32> to vector<1x16x16x128xf32>
    %c0_155 = arith.constant 0 : index
    %c0_156 = arith.constant 0 : index
    %c0_157 = arith.constant 0 : index
    %c0_158 = arith.constant 0 : index
    %174 = vector.load %arg14[%c0_155, %c0_156, %c0_157, %c0_158] : memref<1x16x16x128xf32, #tpu.memory_space<vmem>>, vector<1x16x16x128xf32>
    tpu.vector_store %arg14[%c0_155, %c0_156, %c0_157, %c0_158], %173 {strides = array<i32>} : memref<1x16x16x128xf32, #tpu.memory_space<vmem>>, vector<1x16x16x128xf32>,
    return
  }
  func.func @transform_0(%arg0: i32) -> (i32, i32, i32, i32) {
    %c0_i32 = arith.constant 0 : i32
    %c0_i32_0 = arith.constant 0 : i32
    %c0_i32_1 = arith.constant 0 : i32
    %c0_i32_2 = arith.constant 0 : i32
    return %arg0, %c0_i32, %c0_i32_0, %c0_i32_1 : i32, i32, i32, i32
  }
  func.func @transform_1(%arg0: i32) -> (i32, i32) {
    %c0_i32 = arith.constant 0 : i32
    %c0_i32_0 = arith.constant 0 : i32
    %c0_i32_1 = arith.constant 0 : i32
    return %c0_i32, %c0_i32_0 : i32, i32
  }
  func.func @transform_2(%arg0: i32) -> (i32, i32) {
    %c0_i32 = arith.constant 0 : i32
    %c0_i32_0 = arith.constant 0 : i32
    %c0_i32_1 = arith.constant 0 : i32
    return %c0_i32, %c0_i32_0 : i32, i32
  }
  func.func @transform_3(%arg0: i32) -> (i32, i32) {
    %c0_i32 = arith.constant 0 : i32
    %c0_i32_0 = arith.constant 0 : i32
    %c0_i32_1 = arith.constant 0 : i32
    return %c0_i32, %c0_i32_0 : i32, i32
  }
  func.func @transform_4(%arg0: i32) -> (i32, i32) {
    %c0_i32 = arith.constant 0 : i32
    %c0_i32_0 = arith.constant 0 : i32
    %c0_i32_1 = arith.constant 0 : i32
    return %c0_i32, %c0_i32_0 : i32, i32
  }
  func.func @transform_5(%arg0: i32) -> (i32, i32, i32) {
    %c0_i32 = arith.constant 0 : i32
    %c0_i32_0 = arith.constant 0 : i32
    %c0_i32_1 = arith.constant 0 : i32
    %c0_i32_2 = arith.constant 0 : i32
    return %c0_i32, %c0_i32_0, %c0_i32_1 : i32, i32, i32
  }
  func.func @transform_6(%arg0: i32) -> (i32, i32) {
    %c0_i32 = arith.constant 0 : i32
    %c0_i32_0 = arith.constant 0 : i32
    %c0_i32_1 = arith.constant 0 : i32
    return %c0_i32, %c0_i32_0 : i32, i32
  }
  func.func @transform_7(%arg0: i32) -> (i32, i32) {
    %c0_i32 = arith.constant 0 : i32
    %c0_i32_0 = arith.constant 0 : i32
    %c0_i32_1 = arith.constant 0 : i32
    return %c0_i32, %c0_i32_0 : i32, i32
  }
  func.func @transform_8(%arg0: i32) -> (i32, i32) {
    %c0_i32 = arith.constant 0 : i32
    %c0_i32_0 = arith.constant 0 : i32
    %c0_i32_1 = arith.constant 0 : i32
    return %c0_i32, %c0_i32_0 : i32, i32
  }
  func.func @transform_9(%arg0: i32) -> (i32, i32, i32) {
    %c0_i32 = arith.constant 0 : i32
    %c0_i32_0 = arith.constant 0 : i32
    %c0_i32_1 = arith.constant 0 : i32
    %c0_i32_2 = arith.constant 0 : i32
    return %c0_i32, %c0_i32_0, %c0_i32_1 : i32, i32, i32
  }
  func.func @transform_10(%arg0: i32) -> (i32, i32) {
    %c0_i32 = arith.constant 0 : i32
    %c0_i32_0 = arith.constant 0 : i32
    %c0_i32_1 = arith.constant 0 : i32
    return %c0_i32, %c0_i32_0 : i32, i32
  }
  func.func @transform_11(%arg0: i32) -> (i32, i32) {
    %c0_i32 = arith.constant 0 : i32
    %c0_i32_0 = arith.constant 0 : i32
    %c0_i32_1 = arith.constant 0 : i32
    return %c0_i32, %c0_i32_0 : i32, i32
  }
  func.func @transform_12(%arg0: i32) -> (i32, i32) {
    %c0_i32 = arith.constant 0 : i32
    %c0_i32_0 = arith.constant 0 : i32
    %c0_i32_1 = arith.constant 0 : i32
    return %c0_i32, %c0_i32_0 : i32, i32
  }
  func.func @transform_13(%arg0: i32) -> (i32, i32, i32, i32) {
    %c0_i32 = arith.constant 0 : i32
    %c0_i32_0 = arith.constant 0 : i32
    %c0_i32_1 = arith.constant 0 : i32
    %c0_i32_2 = arith.constant 0 : i32
    return %arg0, %c0_i32, %c0_i32_0, %c0_i32_1 : i32, i32, i32, i32
  }
}

module attributes {stable_mosaic.version = 11 : i64} {
  func.func @kernel(%arg0: i32, %arg1: memref<1x8x8x128xf32, #tpu.memory_space<vmem>>, %arg2: memref<9x128x128xbf16, #tpu.memory_space<vmem>>, %arg3: memref<1x128xf32, #tpu.memory_space<vmem>>, %arg4: memref<1x128xf32, #tpu.memory_space<vmem>>, %arg5: memref<1x128xf32, #tpu.memory_space<vmem>>, %arg6: memref<9x128x128xbf16, #tpu.memory_space<vmem>>, %arg7: memref<1x128xf32, #tpu.memory_space<vmem>>, %arg8: memref<1x128xf32, #tpu.memory_space<vmem>>, %arg9: memref<1x128xf32, #tpu.memory_space<vmem>>, %arg10: memref<9x128x256xbf16, #tpu.memory_space<vmem>>, %arg11: memref<1x256xf32, #tpu.memory_space<vmem>>, %arg12: memref<1x256xf32, #tpu.memory_space<vmem>>, %arg13: memref<1x256xf32, #tpu.memory_space<vmem>>, %arg14: memref<1x8x8x256xf32, #tpu.memory_space<vmem>>, %arg15: memref<10x17x128xf32, #tpu.memory_space<vmem>>) attributes {dimension_semantics = [#tpu.dimension_semantics<parallel>], iteration_bounds = array<i64: 2>, scalar_prefetch = 0 : i64, scratch_operands = 1 : i64, tpu.core_type = #tpu.core_type<tc>, window_params = [{transform_indices = @transform_0, window_bounds = array<i64: 1, 8, 8, 128>}, {pipeline_mode = #tpu.pipeline_mode<synchronous>, transform_indices = @transform_1, window_bounds = array<i64: 9, 128, 128>}, {pipeline_mode = #tpu.pipeline_mode<synchronous>, transform_indices = @transform_2, window_bounds = array<i64: 1, 128>}, {pipeline_mode = #tpu.pipeline_mode<synchronous>, transform_indices = @transform_3, window_bounds = array<i64: 1, 128>}, {pipeline_mode = #tpu.pipeline_mode<synchronous>, transform_indices = @transform_4, window_bounds = array<i64: 1, 128>}, {pipeline_mode = #tpu.pipeline_mode<synchronous>, transform_indices = @transform_5, window_bounds = array<i64: 9, 128, 128>}, {pipeline_mode = #tpu.pipeline_mode<synchronous>, transform_indices = @transform_6, window_bounds = array<i64: 1, 128>}, {pipeline_mode = #tpu.pipeline_mode<synchronous>, transform_indices = @transform_7, window_bounds = array<i64: 1, 128>}, {pipeline_mode = #tpu.pipeline_mode<synchronous>, transform_indices = @transform_8, window_bounds = array<i64: 1, 128>}, {pipeline_mode = #tpu.pipeline_mode<synchronous>, transform_indices = @transform_9, window_bounds = array<i64: 9, 128, 256>}, {pipeline_mode = #tpu.pipeline_mode<synchronous>, transform_indices = @transform_10, window_bounds = array<i64: 1, 256>}, {pipeline_mode = #tpu.pipeline_mode<synchronous>, transform_indices = @transform_11, window_bounds = array<i64: 1, 256>}, {pipeline_mode = #tpu.pipeline_mode<synchronous>, transform_indices = @transform_12, window_bounds = array<i64: 1, 256>}, {transform_indices = @transform_13, window_bounds = array<i64: 1, 8, 8, 256>}]} {
    %cst = arith.constant 0.000000e+00 : f32
    %0 = vector.broadcast %cst : f32 to vector<10x17x128xf32>
    %c0 = arith.constant 0 : index
    %c0_0 = arith.constant 0 : index
    %c0_1 = arith.constant 0 : index
    %1 = vector.load %arg15[%c0, %c0_0, %c0_1] : memref<10x17x128xf32, #tpu.memory_space<vmem>>, vector<10x17x128xf32>
    tpu.vector_store %arg15[%c0, %c0_0, %c0_1], %0 {strides = array<i32>} : memref<10x17x128xf32, #tpu.memory_space<vmem>>, vector<10x17x128xf32>,
    %c0_2 = arith.constant 0 : index
    %c0_3 = arith.constant 0 : index
    %c0_4 = arith.constant 0 : index
    %c0_5 = arith.constant 0 : index
    %2 = vector.load %arg1[%c0_2, %c0_3, %c0_4, %c0_5] : memref<1x8x8x128xf32, #tpu.memory_space<vmem>>, vector<1x8x8x128xf32>
    %3 = vector.shape_cast %2 : vector<1x8x8x128xf32> to vector<8x8x128xf32>
    %c1 = arith.constant 1 : index
    %c8 = arith.constant 8 : index
    %c0_6 = arith.constant 0 : index
    %4 = vector.load %arg15[%c1, %c8, %c0_6] : memref<10x17x128xf32, #tpu.memory_space<vmem>>, vector<8x8x128xf32>
    tpu.vector_store %arg15[%c1, %c8, %c0_6], %3 {strides = array<i32>} : memref<10x17x128xf32, #tpu.memory_space<vmem>>, vector<8x8x128xf32>,
    %cst_7 = arith.constant 0.000000e+00 : f32
    %5 = vector.broadcast %cst_7 : f32 to vector<64x128xf32>
    %c0_8 = arith.constant 0 : index
    %c7 = arith.constant 7 : index
    %c0_9 = arith.constant 0 : index
    %6 = vector.load %arg15[%c0_8, %c7, %c0_9] : memref<10x17x128xf32, #tpu.memory_space<vmem>>, vector<8x8x128xf32>
    %7 = vector.shape_cast %6 : vector<8x8x128xf32> to vector<64x128xf32>
    %8 = arith.truncf %7 : vector<64x128xf32> to vector<64x128xbf16>
    %c0_10 = arith.constant 0 : index
    %c0_11 = arith.constant 0 : index
    %c0_12 = arith.constant 0 : index
    %9 = vector.load %arg2[%c0_10, %c0_11, %c0_12] : memref<9x128x128xbf16, #tpu.memory_space<vmem>>, vector<1x128x128xbf16>
    %10 = vector.shape_cast %9 : vector<1x128x128xbf16> to vector<128x128xbf16>
    %cst_13 = arith.constant dense<0.000000e+00> : vector<64x128xf32>
    %11 = tpu.matmul %8, %10, %cst_13 {dimension_numbers = #tpu.dot_dimension_numbers<[1], [0], [0], [1], [0, 0, 1, 1], [], []>} : vector<64x128xbf16>, vector<128x128xbf16>, vector<64x128xf32> -> vector<64x128xf32>
    %12 = arith.addf %5, %11 : vector<64x128xf32>
    %c0_14 = arith.constant 0 : index
    %c8_15 = arith.constant 8 : index
    %c0_16 = arith.constant 0 : index
    %13 = vector.load %arg15[%c0_14, %c8_15, %c0_16] : memref<10x17x128xf32, #tpu.memory_space<vmem>>, vector<8x8x128xf32>
    %14 = vector.shape_cast %13 : vector<8x8x128xf32> to vector<64x128xf32>
    %15 = arith.truncf %14 : vector<64x128xf32> to vector<64x128xbf16>
    %c1_17 = arith.constant 1 : index
    %c0_18 = arith.constant 0 : index
    %c0_19 = arith.constant 0 : index
    %16 = vector.load %arg2[%c1_17, %c0_18, %c0_19] : memref<9x128x128xbf16, #tpu.memory_space<vmem>>, vector<1x128x128xbf16>
    %17 = vector.shape_cast %16 : vector<1x128x128xbf16> to vector<128x128xbf16>
    %cst_20 = arith.constant dense<0.000000e+00> : vector<64x128xf32>
    %18 = tpu.matmul %15, %17, %cst_20 {dimension_numbers = #tpu.dot_dimension_numbers<[1], [0], [0], [1], [0, 0, 1, 1], [], []>} : vector<64x128xbf16>, vector<128x128xbf16>, vector<64x128xf32> -> vector<64x128xf32>
    %19 = arith.addf %12, %18 : vector<64x128xf32>
    %c0_21 = arith.constant 0 : index
    %c9 = arith.constant 9 : index
    %c0_22 = arith.constant 0 : index
    %20 = vector.load %arg15[%c0_21, %c9, %c0_22] : memref<10x17x128xf32, #tpu.memory_space<vmem>>, vector<8x8x128xf32>
    %21 = vector.shape_cast %20 : vector<8x8x128xf32> to vector<64x128xf32>
    %22 = arith.truncf %21 : vector<64x128xf32> to vector<64x128xbf16>
    %c2 = arith.constant 2 : index
    %c0_23 = arith.constant 0 : index
    %c0_24 = arith.constant 0 : index
    %23 = vector.load %arg2[%c2, %c0_23, %c0_24] : memref<9x128x128xbf16, #tpu.memory_space<vmem>>, vector<1x128x128xbf16>
    %24 = vector.shape_cast %23 : vector<1x128x128xbf16> to vector<128x128xbf16>
    %cst_25 = arith.constant dense<0.000000e+00> : vector<64x128xf32>
    %25 = tpu.matmul %22, %24, %cst_25 {dimension_numbers = #tpu.dot_dimension_numbers<[1], [0], [0], [1], [0, 0, 1, 1], [], []>} : vector<64x128xbf16>, vector<128x128xbf16>, vector<64x128xf32> -> vector<64x128xf32>
    %26 = arith.addf %19, %25 : vector<64x128xf32>
    %c1_26 = arith.constant 1 : index
    %c7_27 = arith.constant 7 : index
    %c0_28 = arith.constant 0 : index
    %27 = vector.load %arg15[%c1_26, %c7_27, %c0_28] : memref<10x17x128xf32, #tpu.memory_space<vmem>>, vector<8x8x128xf32>
    %28 = vector.shape_cast %27 : vector<8x8x128xf32> to vector<64x128xf32>
    %29 = arith.truncf %28 : vector<64x128xf32> to vector<64x128xbf16>
    %c3 = arith.constant 3 : index
    %c0_29 = arith.constant 0 : index
    %c0_30 = arith.constant 0 : index
    %30 = vector.load %arg2[%c3, %c0_29, %c0_30] : memref<9x128x128xbf16, #tpu.memory_space<vmem>>, vector<1x128x128xbf16>
    %31 = vector.shape_cast %30 : vector<1x128x128xbf16> to vector<128x128xbf16>
    %cst_31 = arith.constant dense<0.000000e+00> : vector<64x128xf32>
    %32 = tpu.matmul %29, %31, %cst_31 {dimension_numbers = #tpu.dot_dimension_numbers<[1], [0], [0], [1], [0, 0, 1, 1], [], []>} : vector<64x128xbf16>, vector<128x128xbf16>, vector<64x128xf32> -> vector<64x128xf32>
    %33 = arith.addf %26, %32 : vector<64x128xf32>
    %c1_32 = arith.constant 1 : index
    %c8_33 = arith.constant 8 : index
    %c0_34 = arith.constant 0 : index
    %34 = vector.load %arg15[%c1_32, %c8_33, %c0_34] : memref<10x17x128xf32, #tpu.memory_space<vmem>>, vector<8x8x128xf32>
    %35 = vector.shape_cast %34 : vector<8x8x128xf32> to vector<64x128xf32>
    %36 = arith.truncf %35 : vector<64x128xf32> to vector<64x128xbf16>
    %c4 = arith.constant 4 : index
    %c0_35 = arith.constant 0 : index
    %c0_36 = arith.constant 0 : index
    %37 = vector.load %arg2[%c4, %c0_35, %c0_36] : memref<9x128x128xbf16, #tpu.memory_space<vmem>>, vector<1x128x128xbf16>
    %38 = vector.shape_cast %37 : vector<1x128x128xbf16> to vector<128x128xbf16>
    %cst_37 = arith.constant dense<0.000000e+00> : vector<64x128xf32>
    %39 = tpu.matmul %36, %38, %cst_37 {dimension_numbers = #tpu.dot_dimension_numbers<[1], [0], [0], [1], [0, 0, 1, 1], [], []>} : vector<64x128xbf16>, vector<128x128xbf16>, vector<64x128xf32> -> vector<64x128xf32>
    %40 = arith.addf %33, %39 : vector<64x128xf32>
    %c1_38 = arith.constant 1 : index
    %c9_39 = arith.constant 9 : index
    %c0_40 = arith.constant 0 : index
    %41 = vector.load %arg15[%c1_38, %c9_39, %c0_40] : memref<10x17x128xf32, #tpu.memory_space<vmem>>, vector<8x8x128xf32>
    %42 = vector.shape_cast %41 : vector<8x8x128xf32> to vector<64x128xf32>
    %43 = arith.truncf %42 : vector<64x128xf32> to vector<64x128xbf16>
    %c5 = arith.constant 5 : index
    %c0_41 = arith.constant 0 : index
    %c0_42 = arith.constant 0 : index
    %44 = vector.load %arg2[%c5, %c0_41, %c0_42] : memref<9x128x128xbf16, #tpu.memory_space<vmem>>, vector<1x128x128xbf16>
    %45 = vector.shape_cast %44 : vector<1x128x128xbf16> to vector<128x128xbf16>
    %cst_43 = arith.constant dense<0.000000e+00> : vector<64x128xf32>
    %46 = tpu.matmul %43, %45, %cst_43 {dimension_numbers = #tpu.dot_dimension_numbers<[1], [0], [0], [1], [0, 0, 1, 1], [], []>} : vector<64x128xbf16>, vector<128x128xbf16>, vector<64x128xf32> -> vector<64x128xf32>
    %47 = arith.addf %40, %46 : vector<64x128xf32>
    %c2_44 = arith.constant 2 : index
    %c7_45 = arith.constant 7 : index
    %c0_46 = arith.constant 0 : index
    %48 = vector.load %arg15[%c2_44, %c7_45, %c0_46] : memref<10x17x128xf32, #tpu.memory_space<vmem>>, vector<8x8x128xf32>
    %49 = vector.shape_cast %48 : vector<8x8x128xf32> to vector<64x128xf32>
    %50 = arith.truncf %49 : vector<64x128xf32> to vector<64x128xbf16>
    %c6 = arith.constant 6 : index
    %c0_47 = arith.constant 0 : index
    %c0_48 = arith.constant 0 : index
    %51 = vector.load %arg2[%c6, %c0_47, %c0_48] : memref<9x128x128xbf16, #tpu.memory_space<vmem>>, vector<1x128x128xbf16>
    %52 = vector.shape_cast %51 : vector<1x128x128xbf16> to vector<128x128xbf16>
    %cst_49 = arith.constant dense<0.000000e+00> : vector<64x128xf32>
    %53 = tpu.matmul %50, %52, %cst_49 {dimension_numbers = #tpu.dot_dimension_numbers<[1], [0], [0], [1], [0, 0, 1, 1], [], []>} : vector<64x128xbf16>, vector<128x128xbf16>, vector<64x128xf32> -> vector<64x128xf32>
    %54 = arith.addf %47, %53 : vector<64x128xf32>
    %c2_50 = arith.constant 2 : index
    %c8_51 = arith.constant 8 : index
    %c0_52 = arith.constant 0 : index
    %55 = vector.load %arg15[%c2_50, %c8_51, %c0_52] : memref<10x17x128xf32, #tpu.memory_space<vmem>>, vector<8x8x128xf32>
    %56 = vector.shape_cast %55 : vector<8x8x128xf32> to vector<64x128xf32>
    %57 = arith.truncf %56 : vector<64x128xf32> to vector<64x128xbf16>
    %c7_53 = arith.constant 7 : index
    %c0_54 = arith.constant 0 : index
    %c0_55 = arith.constant 0 : index
    %58 = vector.load %arg2[%c7_53, %c0_54, %c0_55] : memref<9x128x128xbf16, #tpu.memory_space<vmem>>, vector<1x128x128xbf16>
    %59 = vector.shape_cast %58 : vector<1x128x128xbf16> to vector<128x128xbf16>
    %cst_56 = arith.constant dense<0.000000e+00> : vector<64x128xf32>
    %60 = tpu.matmul %57, %59, %cst_56 {dimension_numbers = #tpu.dot_dimension_numbers<[1], [0], [0], [1], [0, 0, 1, 1], [], []>} : vector<64x128xbf16>, vector<128x128xbf16>, vector<64x128xf32> -> vector<64x128xf32>
    %61 = arith.addf %54, %60 : vector<64x128xf32>
    %c2_57 = arith.constant 2 : index
    %c9_58 = arith.constant 9 : index
    %c0_59 = arith.constant 0 : index
    %62 = vector.load %arg15[%c2_57, %c9_58, %c0_59] : memref<10x17x128xf32, #tpu.memory_space<vmem>>, vector<8x8x128xf32>
    %63 = vector.shape_cast %62 : vector<8x8x128xf32> to vector<64x128xf32>
    %64 = arith.truncf %63 : vector<64x128xf32> to vector<64x128xbf16>
    %c8_60 = arith.constant 8 : index
    %c0_61 = arith.constant 0 : index
    %c0_62 = arith.constant 0 : index
    %65 = vector.load %arg2[%c8_60, %c0_61, %c0_62] : memref<9x128x128xbf16, #tpu.memory_space<vmem>>, vector<1x128x128xbf16>
    %66 = vector.shape_cast %65 : vector<1x128x128xbf16> to vector<128x128xbf16>
    %cst_63 = arith.constant dense<0.000000e+00> : vector<64x128xf32>
    %67 = tpu.matmul %64, %66, %cst_63 {dimension_numbers = #tpu.dot_dimension_numbers<[1], [0], [0], [1], [0, 0, 1, 1], [], []>} : vector<64x128xbf16>, vector<128x128xbf16>, vector<64x128xf32> -> vector<64x128xf32>
    %68 = arith.addf %61, %67 : vector<64x128xf32>
    %c0_64 = arith.constant 0 : index
    %c0_65 = arith.constant 0 : index
    %69 = vector.load %arg3[%c0_64, %c0_65] : memref<1x128xf32, #tpu.memory_space<vmem>>, vector<1x128xf32>
    %70 = vector.broadcast %69 : vector<1x128xf32> to vector<64x128xf32>
    %71 = arith.addf %68, %70 : vector<64x128xf32>
    %cst_66 = arith.constant 0.000000e+00 : f32
    %72 = vector.broadcast %cst_66 : f32 to vector<64x128xf32>
    %73 = arith.maximumf %71, %72 : vector<64x128xf32>
    %c0_67 = arith.constant 0 : index
    %c0_68 = arith.constant 0 : index
    %74 = vector.load %arg4[%c0_67, %c0_68] : memref<1x128xf32, #tpu.memory_space<vmem>>, vector<1x128xf32>
    %75 = vector.broadcast %74 : vector<1x128xf32> to vector<64x128xf32>
    %76 = arith.mulf %73, %75 : vector<64x128xf32>
    %c0_69 = arith.constant 0 : index
    %c0_70 = arith.constant 0 : index
    %77 = vector.load %arg5[%c0_69, %c0_70] : memref<1x128xf32, #tpu.memory_space<vmem>>, vector<1x128xf32>
    %78 = vector.broadcast %77 : vector<1x128xf32> to vector<64x128xf32>
    %79 = arith.addf %76, %78 : vector<64x128xf32>
    %80 = vector.shape_cast %79 : vector<64x128xf32> to vector<8x8x128xf32>
    %c1_71 = arith.constant 1 : index
    %c8_72 = arith.constant 8 : index
    %c0_73 = arith.constant 0 : index
    %81 = vector.load %arg15[%c1_71, %c8_72, %c0_73] : memref<10x17x128xf32, #tpu.memory_space<vmem>>, vector<8x8x128xf32>
    tpu.vector_store %arg15[%c1_71, %c8_72, %c0_73], %80 {strides = array<i32>} : memref<10x17x128xf32, #tpu.memory_space<vmem>>, vector<8x8x128xf32>,
    %cst_74 = arith.constant 0.000000e+00 : f32
    %82 = vector.broadcast %cst_74 : f32 to vector<64x128xf32>
    %c0_75 = arith.constant 0 : index
    %c7_76 = arith.constant 7 : index
    %c0_77 = arith.constant 0 : index
    %83 = vector.load %arg15[%c0_75, %c7_76, %c0_77] : memref<10x17x128xf32, #tpu.memory_space<vmem>>, vector<8x8x128xf32>
    %84 = vector.shape_cast %83 : vector<8x8x128xf32> to vector<64x128xf32>
    %85 = arith.truncf %84 : vector<64x128xf32> to vector<64x128xbf16>
    %c0_78 = arith.constant 0 : index
    %c0_79 = arith.constant 0 : index
    %c0_80 = arith.constant 0 : index
    %86 = vector.load %arg6[%c0_78, %c0_79, %c0_80] : memref<9x128x128xbf16, #tpu.memory_space<vmem>>, vector<1x128x128xbf16>
    %87 = vector.shape_cast %86 : vector<1x128x128xbf16> to vector<128x128xbf16>
    %cst_81 = arith.constant dense<0.000000e+00> : vector<64x128xf32>
    %88 = tpu.matmul %85, %87, %cst_81 {dimension_numbers = #tpu.dot_dimension_numbers<[1], [0], [0], [1], [0, 0, 1, 1], [], []>} : vector<64x128xbf16>, vector<128x128xbf16>, vector<64x128xf32> -> vector<64x128xf32>
    %89 = arith.addf %82, %88 : vector<64x128xf32>
    %c0_82 = arith.constant 0 : index
    %c8_83 = arith.constant 8 : index
    %c0_84 = arith.constant 0 : index
    %90 = vector.load %arg15[%c0_82, %c8_83, %c0_84] : memref<10x17x128xf32, #tpu.memory_space<vmem>>, vector<8x8x128xf32>
    %91 = vector.shape_cast %90 : vector<8x8x128xf32> to vector<64x128xf32>
    %92 = arith.truncf %91 : vector<64x128xf32> to vector<64x128xbf16>
    %c1_85 = arith.constant 1 : index
    %c0_86 = arith.constant 0 : index
    %c0_87 = arith.constant 0 : index
    %93 = vector.load %arg6[%c1_85, %c0_86, %c0_87] : memref<9x128x128xbf16, #tpu.memory_space<vmem>>, vector<1x128x128xbf16>
    %94 = vector.shape_cast %93 : vector<1x128x128xbf16> to vector<128x128xbf16>
    %cst_88 = arith.constant dense<0.000000e+00> : vector<64x128xf32>
    %95 = tpu.matmul %92, %94, %cst_88 {dimension_numbers = #tpu.dot_dimension_numbers<[1], [0], [0], [1], [0, 0, 1, 1], [], []>} : vector<64x128xbf16>, vector<128x128xbf16>, vector<64x128xf32> -> vector<64x128xf32>
    %96 = arith.addf %89, %95 : vector<64x128xf32>
    %c0_89 = arith.constant 0 : index
    %c9_90 = arith.constant 9 : index
    %c0_91 = arith.constant 0 : index
    %97 = vector.load %arg15[%c0_89, %c9_90, %c0_91] : memref<10x17x128xf32, #tpu.memory_space<vmem>>, vector<8x8x128xf32>
    %98 = vector.shape_cast %97 : vector<8x8x128xf32> to vector<64x128xf32>
    %99 = arith.truncf %98 : vector<64x128xf32> to vector<64x128xbf16>
    %c2_92 = arith.constant 2 : index
    %c0_93 = arith.constant 0 : index
    %c0_94 = arith.constant 0 : index
    %100 = vector.load %arg6[%c2_92, %c0_93, %c0_94] : memref<9x128x128xbf16, #tpu.memory_space<vmem>>, vector<1x128x128xbf16>
    %101 = vector.shape_cast %100 : vector<1x128x128xbf16> to vector<128x128xbf16>
    %cst_95 = arith.constant dense<0.000000e+00> : vector<64x128xf32>
    %102 = tpu.matmul %99, %101, %cst_95 {dimension_numbers = #tpu.dot_dimension_numbers<[1], [0], [0], [1], [0, 0, 1, 1], [], []>} : vector<64x128xbf16>, vector<128x128xbf16>, vector<64x128xf32> -> vector<64x128xf32>
    %103 = arith.addf %96, %102 : vector<64x128xf32>
    %c1_96 = arith.constant 1 : index
    %c7_97 = arith.constant 7 : index
    %c0_98 = arith.constant 0 : index
    %104 = vector.load %arg15[%c1_96, %c7_97, %c0_98] : memref<10x17x128xf32, #tpu.memory_space<vmem>>, vector<8x8x128xf32>
    %105 = vector.shape_cast %104 : vector<8x8x128xf32> to vector<64x128xf32>
    %106 = arith.truncf %105 : vector<64x128xf32> to vector<64x128xbf16>
    %c3_99 = arith.constant 3 : index
    %c0_100 = arith.constant 0 : index
    %c0_101 = arith.constant 0 : index
    %107 = vector.load %arg6[%c3_99, %c0_100, %c0_101] : memref<9x128x128xbf16, #tpu.memory_space<vmem>>, vector<1x128x128xbf16>
    %108 = vector.shape_cast %107 : vector<1x128x128xbf16> to vector<128x128xbf16>
    %cst_102 = arith.constant dense<0.000000e+00> : vector<64x128xf32>
    %109 = tpu.matmul %106, %108, %cst_102 {dimension_numbers = #tpu.dot_dimension_numbers<[1], [0], [0], [1], [0, 0, 1, 1], [], []>} : vector<64x128xbf16>, vector<128x128xbf16>, vector<64x128xf32> -> vector<64x128xf32>
    %110 = arith.addf %103, %109 : vector<64x128xf32>
    %c1_103 = arith.constant 1 : index
    %c8_104 = arith.constant 8 : index
    %c0_105 = arith.constant 0 : index
    %111 = vector.load %arg15[%c1_103, %c8_104, %c0_105] : memref<10x17x128xf32, #tpu.memory_space<vmem>>, vector<8x8x128xf32>
    %112 = vector.shape_cast %111 : vector<8x8x128xf32> to vector<64x128xf32>
    %113 = arith.truncf %112 : vector<64x128xf32> to vector<64x128xbf16>
    %c4_106 = arith.constant 4 : index
    %c0_107 = arith.constant 0 : index
    %c0_108 = arith.constant 0 : index
    %114 = vector.load %arg6[%c4_106, %c0_107, %c0_108] : memref<9x128x128xbf16, #tpu.memory_space<vmem>>, vector<1x128x128xbf16>
    %115 = vector.shape_cast %114 : vector<1x128x128xbf16> to vector<128x128xbf16>
    %cst_109 = arith.constant dense<0.000000e+00> : vector<64x128xf32>
    %116 = tpu.matmul %113, %115, %cst_109 {dimension_numbers = #tpu.dot_dimension_numbers<[1], [0], [0], [1], [0, 0, 1, 1], [], []>} : vector<64x128xbf16>, vector<128x128xbf16>, vector<64x128xf32> -> vector<64x128xf32>
    %117 = arith.addf %110, %116 : vector<64x128xf32>
    %c1_110 = arith.constant 1 : index
    %c9_111 = arith.constant 9 : index
    %c0_112 = arith.constant 0 : index
    %118 = vector.load %arg15[%c1_110, %c9_111, %c0_112] : memref<10x17x128xf32, #tpu.memory_space<vmem>>, vector<8x8x128xf32>
    %119 = vector.shape_cast %118 : vector<8x8x128xf32> to vector<64x128xf32>
    %120 = arith.truncf %119 : vector<64x128xf32> to vector<64x128xbf16>
    %c5_113 = arith.constant 5 : index
    %c0_114 = arith.constant 0 : index
    %c0_115 = arith.constant 0 : index
    %121 = vector.load %arg6[%c5_113, %c0_114, %c0_115] : memref<9x128x128xbf16, #tpu.memory_space<vmem>>, vector<1x128x128xbf16>
    %122 = vector.shape_cast %121 : vector<1x128x128xbf16> to vector<128x128xbf16>
    %cst_116 = arith.constant dense<0.000000e+00> : vector<64x128xf32>
    %123 = tpu.matmul %120, %122, %cst_116 {dimension_numbers = #tpu.dot_dimension_numbers<[1], [0], [0], [1], [0, 0, 1, 1], [], []>} : vector<64x128xbf16>, vector<128x128xbf16>, vector<64x128xf32> -> vector<64x128xf32>
    %124 = arith.addf %117, %123 : vector<64x128xf32>
    %c2_117 = arith.constant 2 : index
    %c7_118 = arith.constant 7 : index
    %c0_119 = arith.constant 0 : index
    %125 = vector.load %arg15[%c2_117, %c7_118, %c0_119] : memref<10x17x128xf32, #tpu.memory_space<vmem>>, vector<8x8x128xf32>
    %126 = vector.shape_cast %125 : vector<8x8x128xf32> to vector<64x128xf32>
    %127 = arith.truncf %126 : vector<64x128xf32> to vector<64x128xbf16>
    %c6_120 = arith.constant 6 : index
    %c0_121 = arith.constant 0 : index
    %c0_122 = arith.constant 0 : index
    %128 = vector.load %arg6[%c6_120, %c0_121, %c0_122] : memref<9x128x128xbf16, #tpu.memory_space<vmem>>, vector<1x128x128xbf16>
    %129 = vector.shape_cast %128 : vector<1x128x128xbf16> to vector<128x128xbf16>
    %cst_123 = arith.constant dense<0.000000e+00> : vector<64x128xf32>
    %130 = tpu.matmul %127, %129, %cst_123 {dimension_numbers = #tpu.dot_dimension_numbers<[1], [0], [0], [1], [0, 0, 1, 1], [], []>} : vector<64x128xbf16>, vector<128x128xbf16>, vector<64x128xf32> -> vector<64x128xf32>
    %131 = arith.addf %124, %130 : vector<64x128xf32>
    %c2_124 = arith.constant 2 : index
    %c8_125 = arith.constant 8 : index
    %c0_126 = arith.constant 0 : index
    %132 = vector.load %arg15[%c2_124, %c8_125, %c0_126] : memref<10x17x128xf32, #tpu.memory_space<vmem>>, vector<8x8x128xf32>
    %133 = vector.shape_cast %132 : vector<8x8x128xf32> to vector<64x128xf32>
    %134 = arith.truncf %133 : vector<64x128xf32> to vector<64x128xbf16>
    %c7_127 = arith.constant 7 : index
    %c0_128 = arith.constant 0 : index
    %c0_129 = arith.constant 0 : index
    %135 = vector.load %arg6[%c7_127, %c0_128, %c0_129] : memref<9x128x128xbf16, #tpu.memory_space<vmem>>, vector<1x128x128xbf16>
    %136 = vector.shape_cast %135 : vector<1x128x128xbf16> to vector<128x128xbf16>
    %cst_130 = arith.constant dense<0.000000e+00> : vector<64x128xf32>
    %137 = tpu.matmul %134, %136, %cst_130 {dimension_numbers = #tpu.dot_dimension_numbers<[1], [0], [0], [1], [0, 0, 1, 1], [], []>} : vector<64x128xbf16>, vector<128x128xbf16>, vector<64x128xf32> -> vector<64x128xf32>
    %138 = arith.addf %131, %137 : vector<64x128xf32>
    %c2_131 = arith.constant 2 : index
    %c9_132 = arith.constant 9 : index
    %c0_133 = arith.constant 0 : index
    %139 = vector.load %arg15[%c2_131, %c9_132, %c0_133] : memref<10x17x128xf32, #tpu.memory_space<vmem>>, vector<8x8x128xf32>
    %140 = vector.shape_cast %139 : vector<8x8x128xf32> to vector<64x128xf32>
    %141 = arith.truncf %140 : vector<64x128xf32> to vector<64x128xbf16>
    %c8_134 = arith.constant 8 : index
    %c0_135 = arith.constant 0 : index
    %c0_136 = arith.constant 0 : index
    %142 = vector.load %arg6[%c8_134, %c0_135, %c0_136] : memref<9x128x128xbf16, #tpu.memory_space<vmem>>, vector<1x128x128xbf16>
    %143 = vector.shape_cast %142 : vector<1x128x128xbf16> to vector<128x128xbf16>
    %cst_137 = arith.constant dense<0.000000e+00> : vector<64x128xf32>
    %144 = tpu.matmul %141, %143, %cst_137 {dimension_numbers = #tpu.dot_dimension_numbers<[1], [0], [0], [1], [0, 0, 1, 1], [], []>} : vector<64x128xbf16>, vector<128x128xbf16>, vector<64x128xf32> -> vector<64x128xf32>
    %145 = arith.addf %138, %144 : vector<64x128xf32>
    %c0_138 = arith.constant 0 : index
    %c0_139 = arith.constant 0 : index
    %146 = vector.load %arg7[%c0_138, %c0_139] : memref<1x128xf32, #tpu.memory_space<vmem>>, vector<1x128xf32>
    %147 = vector.broadcast %146 : vector<1x128xf32> to vector<64x128xf32>
    %148 = arith.addf %145, %147 : vector<64x128xf32>
    %cst_140 = arith.constant 0.000000e+00 : f32
    %149 = vector.broadcast %cst_140 : f32 to vector<64x128xf32>
    %150 = arith.maximumf %148, %149 : vector<64x128xf32>
    %c0_141 = arith.constant 0 : index
    %c0_142 = arith.constant 0 : index
    %151 = vector.load %arg8[%c0_141, %c0_142] : memref<1x128xf32, #tpu.memory_space<vmem>>, vector<1x128xf32>
    %152 = vector.broadcast %151 : vector<1x128xf32> to vector<64x128xf32>
    %153 = arith.mulf %150, %152 : vector<64x128xf32>
    %c0_143 = arith.constant 0 : index
    %c0_144 = arith.constant 0 : index
    %154 = vector.load %arg9[%c0_143, %c0_144] : memref<1x128xf32, #tpu.memory_space<vmem>>, vector<1x128xf32>
    %155 = vector.broadcast %154 : vector<1x128xf32> to vector<64x128xf32>
    %156 = arith.addf %153, %155 : vector<64x128xf32>
    %157 = vector.shape_cast %156 : vector<64x128xf32> to vector<8x8x128xf32>
    %c1_145 = arith.constant 1 : index
    %c8_146 = arith.constant 8 : index
    %c0_147 = arith.constant 0 : index
    %158 = vector.load %arg15[%c1_145, %c8_146, %c0_147] : memref<10x17x128xf32, #tpu.memory_space<vmem>>, vector<8x8x128xf32>
    tpu.vector_store %arg15[%c1_145, %c8_146, %c0_147], %157 {strides = array<i32>} : memref<10x17x128xf32, #tpu.memory_space<vmem>>, vector<8x8x128xf32>,
    %cst_148 = arith.constant 0.000000e+00 : f32
    %159 = vector.broadcast %cst_148 : f32 to vector<64x256xf32>
    %c0_149 = arith.constant 0 : index
    %c7_150 = arith.constant 7 : index
    %c0_151 = arith.constant 0 : index
    %160 = vector.load %arg15[%c0_149, %c7_150, %c0_151] : memref<10x17x128xf32, #tpu.memory_space<vmem>>, vector<8x8x128xf32>
    %161 = vector.shape_cast %160 : vector<8x8x128xf32> to vector<64x128xf32>
    %162 = arith.truncf %161 : vector<64x128xf32> to vector<64x128xbf16>
    %c0_152 = arith.constant 0 : index
    %c0_153 = arith.constant 0 : index
    %c0_154 = arith.constant 0 : index
    %163 = vector.load %arg10[%c0_152, %c0_153, %c0_154] : memref<9x128x256xbf16, #tpu.memory_space<vmem>>, vector<1x128x256xbf16>
    %164 = vector.shape_cast %163 : vector<1x128x256xbf16> to vector<128x256xbf16>
    %cst_155 = arith.constant dense<0.000000e+00> : vector<64x256xf32>
    %165 = tpu.matmul %162, %164, %cst_155 {dimension_numbers = #tpu.dot_dimension_numbers<[1], [0], [0], [1], [0, 0, 1, 1], [], []>} : vector<64x128xbf16>, vector<128x256xbf16>, vector<64x256xf32> -> vector<64x256xf32>
    %166 = arith.addf %159, %165 : vector<64x256xf32>
    %c0_156 = arith.constant 0 : index
    %c8_157 = arith.constant 8 : index
    %c0_158 = arith.constant 0 : index
    %167 = vector.load %arg15[%c0_156, %c8_157, %c0_158] : memref<10x17x128xf32, #tpu.memory_space<vmem>>, vector<8x8x128xf32>
    %168 = vector.shape_cast %167 : vector<8x8x128xf32> to vector<64x128xf32>
    %169 = arith.truncf %168 : vector<64x128xf32> to vector<64x128xbf16>
    %c1_159 = arith.constant 1 : index
    %c0_160 = arith.constant 0 : index
    %c0_161 = arith.constant 0 : index
    %170 = vector.load %arg10[%c1_159, %c0_160, %c0_161] : memref<9x128x256xbf16, #tpu.memory_space<vmem>>, vector<1x128x256xbf16>
    %171 = vector.shape_cast %170 : vector<1x128x256xbf16> to vector<128x256xbf16>
    %cst_162 = arith.constant dense<0.000000e+00> : vector<64x256xf32>
    %172 = tpu.matmul %169, %171, %cst_162 {dimension_numbers = #tpu.dot_dimension_numbers<[1], [0], [0], [1], [0, 0, 1, 1], [], []>} : vector<64x128xbf16>, vector<128x256xbf16>, vector<64x256xf32> -> vector<64x256xf32>
    %173 = arith.addf %166, %172 : vector<64x256xf32>
    %c0_163 = arith.constant 0 : index
    %c9_164 = arith.constant 9 : index
    %c0_165 = arith.constant 0 : index
    %174 = vector.load %arg15[%c0_163, %c9_164, %c0_165] : memref<10x17x128xf32, #tpu.memory_space<vmem>>, vector<8x8x128xf32>
    %175 = vector.shape_cast %174 : vector<8x8x128xf32> to vector<64x128xf32>
    %176 = arith.truncf %175 : vector<64x128xf32> to vector<64x128xbf16>
    %c2_166 = arith.constant 2 : index
    %c0_167 = arith.constant 0 : index
    %c0_168 = arith.constant 0 : index
    %177 = vector.load %arg10[%c2_166, %c0_167, %c0_168] : memref<9x128x256xbf16, #tpu.memory_space<vmem>>, vector<1x128x256xbf16>
    %178 = vector.shape_cast %177 : vector<1x128x256xbf16> to vector<128x256xbf16>
    %cst_169 = arith.constant dense<0.000000e+00> : vector<64x256xf32>
    %179 = tpu.matmul %176, %178, %cst_169 {dimension_numbers = #tpu.dot_dimension_numbers<[1], [0], [0], [1], [0, 0, 1, 1], [], []>} : vector<64x128xbf16>, vector<128x256xbf16>, vector<64x256xf32> -> vector<64x256xf32>
    %180 = arith.addf %173, %179 : vector<64x256xf32>
    %c1_170 = arith.constant 1 : index
    %c7_171 = arith.constant 7 : index
    %c0_172 = arith.constant 0 : index
    %181 = vector.load %arg15[%c1_170, %c7_171, %c0_172] : memref<10x17x128xf32, #tpu.memory_space<vmem>>, vector<8x8x128xf32>
    %182 = vector.shape_cast %181 : vector<8x8x128xf32> to vector<64x128xf32>
    %183 = arith.truncf %182 : vector<64x128xf32> to vector<64x128xbf16>
    %c3_173 = arith.constant 3 : index
    %c0_174 = arith.constant 0 : index
    %c0_175 = arith.constant 0 : index
    %184 = vector.load %arg10[%c3_173, %c0_174, %c0_175] : memref<9x128x256xbf16, #tpu.memory_space<vmem>>, vector<1x128x256xbf16>
    %185 = vector.shape_cast %184 : vector<1x128x256xbf16> to vector<128x256xbf16>
    %cst_176 = arith.constant dense<0.000000e+00> : vector<64x256xf32>
    %186 = tpu.matmul %183, %185, %cst_176 {dimension_numbers = #tpu.dot_dimension_numbers<[1], [0], [0], [1], [0, 0, 1, 1], [], []>} : vector<64x128xbf16>, vector<128x256xbf16>, vector<64x256xf32> -> vector<64x256xf32>
    %187 = arith.addf %180, %186 : vector<64x256xf32>
    %c1_177 = arith.constant 1 : index
    %c8_178 = arith.constant 8 : index
    %c0_179 = arith.constant 0 : index
    %188 = vector.load %arg15[%c1_177, %c8_178, %c0_179] : memref<10x17x128xf32, #tpu.memory_space<vmem>>, vector<8x8x128xf32>
    %189 = vector.shape_cast %188 : vector<8x8x128xf32> to vector<64x128xf32>
    %190 = arith.truncf %189 : vector<64x128xf32> to vector<64x128xbf16>
    %c4_180 = arith.constant 4 : index
    %c0_181 = arith.constant 0 : index
    %c0_182 = arith.constant 0 : index
    %191 = vector.load %arg10[%c4_180, %c0_181, %c0_182] : memref<9x128x256xbf16, #tpu.memory_space<vmem>>, vector<1x128x256xbf16>
    %192 = vector.shape_cast %191 : vector<1x128x256xbf16> to vector<128x256xbf16>
    %cst_183 = arith.constant dense<0.000000e+00> : vector<64x256xf32>
    %193 = tpu.matmul %190, %192, %cst_183 {dimension_numbers = #tpu.dot_dimension_numbers<[1], [0], [0], [1], [0, 0, 1, 1], [], []>} : vector<64x128xbf16>, vector<128x256xbf16>, vector<64x256xf32> -> vector<64x256xf32>
    %194 = arith.addf %187, %193 : vector<64x256xf32>
    %c1_184 = arith.constant 1 : index
    %c9_185 = arith.constant 9 : index
    %c0_186 = arith.constant 0 : index
    %195 = vector.load %arg15[%c1_184, %c9_185, %c0_186] : memref<10x17x128xf32, #tpu.memory_space<vmem>>, vector<8x8x128xf32>
    %196 = vector.shape_cast %195 : vector<8x8x128xf32> to vector<64x128xf32>
    %197 = arith.truncf %196 : vector<64x128xf32> to vector<64x128xbf16>
    %c5_187 = arith.constant 5 : index
    %c0_188 = arith.constant 0 : index
    %c0_189 = arith.constant 0 : index
    %198 = vector.load %arg10[%c5_187, %c0_188, %c0_189] : memref<9x128x256xbf16, #tpu.memory_space<vmem>>, vector<1x128x256xbf16>
    %199 = vector.shape_cast %198 : vector<1x128x256xbf16> to vector<128x256xbf16>
    %cst_190 = arith.constant dense<0.000000e+00> : vector<64x256xf32>
    %200 = tpu.matmul %197, %199, %cst_190 {dimension_numbers = #tpu.dot_dimension_numbers<[1], [0], [0], [1], [0, 0, 1, 1], [], []>} : vector<64x128xbf16>, vector<128x256xbf16>, vector<64x256xf32> -> vector<64x256xf32>
    %201 = arith.addf %194, %200 : vector<64x256xf32>
    %c2_191 = arith.constant 2 : index
    %c7_192 = arith.constant 7 : index
    %c0_193 = arith.constant 0 : index
    %202 = vector.load %arg15[%c2_191, %c7_192, %c0_193] : memref<10x17x128xf32, #tpu.memory_space<vmem>>, vector<8x8x128xf32>
    %203 = vector.shape_cast %202 : vector<8x8x128xf32> to vector<64x128xf32>
    %204 = arith.truncf %203 : vector<64x128xf32> to vector<64x128xbf16>
    %c6_194 = arith.constant 6 : index
    %c0_195 = arith.constant 0 : index
    %c0_196 = arith.constant 0 : index
    %205 = vector.load %arg10[%c6_194, %c0_195, %c0_196] : memref<9x128x256xbf16, #tpu.memory_space<vmem>>, vector<1x128x256xbf16>
    %206 = vector.shape_cast %205 : vector<1x128x256xbf16> to vector<128x256xbf16>
    %cst_197 = arith.constant dense<0.000000e+00> : vector<64x256xf32>
    %207 = tpu.matmul %204, %206, %cst_197 {dimension_numbers = #tpu.dot_dimension_numbers<[1], [0], [0], [1], [0, 0, 1, 1], [], []>} : vector<64x128xbf16>, vector<128x256xbf16>, vector<64x256xf32> -> vector<64x256xf32>
    %208 = arith.addf %201, %207 : vector<64x256xf32>
    %c2_198 = arith.constant 2 : index
    %c8_199 = arith.constant 8 : index
    %c0_200 = arith.constant 0 : index
    %209 = vector.load %arg15[%c2_198, %c8_199, %c0_200] : memref<10x17x128xf32, #tpu.memory_space<vmem>>, vector<8x8x128xf32>
    %210 = vector.shape_cast %209 : vector<8x8x128xf32> to vector<64x128xf32>
    %211 = arith.truncf %210 : vector<64x128xf32> to vector<64x128xbf16>
    %c7_201 = arith.constant 7 : index
    %c0_202 = arith.constant 0 : index
    %c0_203 = arith.constant 0 : index
    %212 = vector.load %arg10[%c7_201, %c0_202, %c0_203] : memref<9x128x256xbf16, #tpu.memory_space<vmem>>, vector<1x128x256xbf16>
    %213 = vector.shape_cast %212 : vector<1x128x256xbf16> to vector<128x256xbf16>
    %cst_204 = arith.constant dense<0.000000e+00> : vector<64x256xf32>
    %214 = tpu.matmul %211, %213, %cst_204 {dimension_numbers = #tpu.dot_dimension_numbers<[1], [0], [0], [1], [0, 0, 1, 1], [], []>} : vector<64x128xbf16>, vector<128x256xbf16>, vector<64x256xf32> -> vector<64x256xf32>
    %215 = arith.addf %208, %214 : vector<64x256xf32>
    %c2_205 = arith.constant 2 : index
    %c9_206 = arith.constant 9 : index
    %c0_207 = arith.constant 0 : index
    %216 = vector.load %arg15[%c2_205, %c9_206, %c0_207] : memref<10x17x128xf32, #tpu.memory_space<vmem>>, vector<8x8x128xf32>
    %217 = vector.shape_cast %216 : vector<8x8x128xf32> to vector<64x128xf32>
    %218 = arith.truncf %217 : vector<64x128xf32> to vector<64x128xbf16>
    %c8_208 = arith.constant 8 : index
    %c0_209 = arith.constant 0 : index
    %c0_210 = arith.constant 0 : index
    %219 = vector.load %arg10[%c8_208, %c0_209, %c0_210] : memref<9x128x256xbf16, #tpu.memory_space<vmem>>, vector<1x128x256xbf16>
    %220 = vector.shape_cast %219 : vector<1x128x256xbf16> to vector<128x256xbf16>
    %cst_211 = arith.constant dense<0.000000e+00> : vector<64x256xf32>
    %221 = tpu.matmul %218, %220, %cst_211 {dimension_numbers = #tpu.dot_dimension_numbers<[1], [0], [0], [1], [0, 0, 1, 1], [], []>} : vector<64x128xbf16>, vector<128x256xbf16>, vector<64x256xf32> -> vector<64x256xf32>
    %222 = arith.addf %215, %221 : vector<64x256xf32>
    %c0_212 = arith.constant 0 : index
    %c0_213 = arith.constant 0 : index
    %223 = vector.load %arg11[%c0_212, %c0_213] : memref<1x256xf32, #tpu.memory_space<vmem>>, vector<1x256xf32>
    %224 = vector.broadcast %223 : vector<1x256xf32> to vector<64x256xf32>
    %225 = arith.addf %222, %224 : vector<64x256xf32>
    %cst_214 = arith.constant 0.000000e+00 : f32
    %226 = vector.broadcast %cst_214 : f32 to vector<64x256xf32>
    %227 = arith.maximumf %225, %226 : vector<64x256xf32>
    %c0_215 = arith.constant 0 : index
    %c0_216 = arith.constant 0 : index
    %228 = vector.load %arg12[%c0_215, %c0_216] : memref<1x256xf32, #tpu.memory_space<vmem>>, vector<1x256xf32>
    %229 = vector.broadcast %228 : vector<1x256xf32> to vector<64x256xf32>
    %230 = arith.mulf %227, %229 : vector<64x256xf32>
    %c0_217 = arith.constant 0 : index
    %c0_218 = arith.constant 0 : index
    %231 = vector.load %arg13[%c0_217, %c0_218] : memref<1x256xf32, #tpu.memory_space<vmem>>, vector<1x256xf32>
    %232 = vector.broadcast %231 : vector<1x256xf32> to vector<64x256xf32>
    %233 = arith.addf %230, %232 : vector<64x256xf32>
    %234 = vector.shape_cast %233 : vector<64x256xf32> to vector<1x8x8x256xf32>
    %c0_219 = arith.constant 0 : index
    %c0_220 = arith.constant 0 : index
    %c0_221 = arith.constant 0 : index
    %c0_222 = arith.constant 0 : index
    %235 = vector.load %arg14[%c0_219, %c0_220, %c0_221, %c0_222] : memref<1x8x8x256xf32, #tpu.memory_space<vmem>>, vector<1x8x8x256xf32>
    tpu.vector_store %arg14[%c0_219, %c0_220, %c0_221, %c0_222], %234 {strides = array<i32>} : memref<1x8x8x256xf32, #tpu.memory_space<vmem>>, vector<1x8x8x256xf32>,
    return
  }
  func.func @transform_0(%arg0: i32) -> (i32, i32, i32, i32) {
    %c0_i32 = arith.constant 0 : i32
    %c0_i32_0 = arith.constant 0 : i32
    %c0_i32_1 = arith.constant 0 : i32
    %c0_i32_2 = arith.constant 0 : i32
    return %arg0, %c0_i32, %c0_i32_0, %c0_i32_1 : i32, i32, i32, i32
  }
  func.func @transform_1(%arg0: i32) -> (i32, i32, i32) {
    %c0_i32 = arith.constant 0 : i32
    %c0_i32_0 = arith.constant 0 : i32
    %c0_i32_1 = arith.constant 0 : i32
    %c0_i32_2 = arith.constant 0 : i32
    return %c0_i32, %c0_i32_0, %c0_i32_1 : i32, i32, i32
  }
  func.func @transform_2(%arg0: i32) -> (i32, i32) {
    %c0_i32 = arith.constant 0 : i32
    %c0_i32_0 = arith.constant 0 : i32
    %c0_i32_1 = arith.constant 0 : i32
    return %c0_i32, %c0_i32_0 : i32, i32
  }
  func.func @transform_3(%arg0: i32) -> (i32, i32) {
    %c0_i32 = arith.constant 0 : i32
    %c0_i32_0 = arith.constant 0 : i32
    %c0_i32_1 = arith.constant 0 : i32
    return %c0_i32, %c0_i32_0 : i32, i32
  }
  func.func @transform_4(%arg0: i32) -> (i32, i32) {
    %c0_i32 = arith.constant 0 : i32
    %c0_i32_0 = arith.constant 0 : i32
    %c0_i32_1 = arith.constant 0 : i32
    return %c0_i32, %c0_i32_0 : i32, i32
  }
  func.func @transform_5(%arg0: i32) -> (i32, i32, i32) {
    %c0_i32 = arith.constant 0 : i32
    %c0_i32_0 = arith.constant 0 : i32
    %c0_i32_1 = arith.constant 0 : i32
    %c0_i32_2 = arith.constant 0 : i32
    return %c0_i32, %c0_i32_0, %c0_i32_1 : i32, i32, i32
  }
  func.func @transform_6(%arg0: i32) -> (i32, i32) {
    %c0_i32 = arith.constant 0 : i32
    %c0_i32_0 = arith.constant 0 : i32
    %c0_i32_1 = arith.constant 0 : i32
    return %c0_i32, %c0_i32_0 : i32, i32
  }
  func.func @transform_7(%arg0: i32) -> (i32, i32) {
    %c0_i32 = arith.constant 0 : i32
    %c0_i32_0 = arith.constant 0 : i32
    %c0_i32_1 = arith.constant 0 : i32
    return %c0_i32, %c0_i32_0 : i32, i32
  }
  func.func @transform_8(%arg0: i32) -> (i32, i32) {
    %c0_i32 = arith.constant 0 : i32
    %c0_i32_0 = arith.constant 0 : i32
    %c0_i32_1 = arith.constant 0 : i32
    return %c0_i32, %c0_i32_0 : i32, i32
  }
  func.func @transform_9(%arg0: i32) -> (i32, i32, i32) {
    %c0_i32 = arith.constant 0 : i32
    %c0_i32_0 = arith.constant 0 : i32
    %c0_i32_1 = arith.constant 0 : i32
    %c0_i32_2 = arith.constant 0 : i32
    return %c0_i32, %c0_i32_0, %c0_i32_1 : i32, i32, i32
  }
  func.func @transform_10(%arg0: i32) -> (i32, i32) {
    %c0_i32 = arith.constant 0 : i32
    %c0_i32_0 = arith.constant 0 : i32
    %c0_i32_1 = arith.constant 0 : i32
    return %c0_i32, %c0_i32_0 : i32, i32
  }
  func.func @transform_11(%arg0: i32) -> (i32, i32) {
    %c0_i32 = arith.constant 0 : i32
    %c0_i32_0 = arith.constant 0 : i32
    %c0_i32_1 = arith.constant 0 : i32
    return %c0_i32, %c0_i32_0 : i32, i32
  }
  func.func @transform_12(%arg0: i32) -> (i32, i32) {
    %c0_i32 = arith.constant 0 : i32
    %c0_i32_0 = arith.constant 0 : i32
    %c0_i32_1 = arith.constant 0 : i32
    return %c0_i32, %c0_i32_0 : i32, i32
  }
  func.func @transform_13(%arg0: i32) -> (i32, i32, i32, i32) {
    %c0_i32 = arith.constant 0 : i32
    %c0_i32_0 = arith.constant 0 : i32
    %c0_i32_1 = arith.constant 0 : i32
    %c0_i32_2 = arith.constant 0 : i32
    return %arg0, %c0_i32, %c0_i32_0, %c0_i32_1 : i32, i32, i32, i32
  }
}

module attributes {stable_mosaic.version = 11 : i64} {
  func.func @kernel(%arg0: i32, %arg1: memref<1x4x4x256xf32, #tpu.memory_space<vmem>>, %arg2: memref<9x256x256xbf16, #tpu.memory_space<vmem>>, %arg3: memref<1x256xf32, #tpu.memory_space<vmem>>, %arg4: memref<1x256xf32, #tpu.memory_space<vmem>>, %arg5: memref<1x256xf32, #tpu.memory_space<vmem>>, %arg6: memref<9x256x256xbf16, #tpu.memory_space<vmem>>, %arg7: memref<1x256xf32, #tpu.memory_space<vmem>>, %arg8: memref<1x256xf32, #tpu.memory_space<vmem>>, %arg9: memref<1x256xf32, #tpu.memory_space<vmem>>, %arg10: memref<256x128xbf16, #tpu.memory_space<vmem>>, %arg11: memref<1x128xf32, #tpu.memory_space<vmem>>, %arg12: memref<128x10xbf16, #tpu.memory_space<vmem>>, %arg13: memref<1x10xf32, #tpu.memory_space<vmem>>, %arg14: memref<1x1x10xf32, #tpu.memory_space<vmem>>, %arg15: memref<6x13x256xf32, #tpu.memory_space<vmem>>) attributes {dimension_semantics = [#tpu.dimension_semantics<parallel>], iteration_bounds = array<i64: 2>, scalar_prefetch = 0 : i64, scratch_operands = 1 : i64, tpu.core_type = #tpu.core_type<tc>, window_params = [{transform_indices = @transform_0, window_bounds = array<i64: 1, 4, 4, 256>}, {pipeline_mode = #tpu.pipeline_mode<synchronous>, transform_indices = @transform_1, window_bounds = array<i64: 9, 256, 256>}, {pipeline_mode = #tpu.pipeline_mode<synchronous>, transform_indices = @transform_2, window_bounds = array<i64: 1, 256>}, {pipeline_mode = #tpu.pipeline_mode<synchronous>, transform_indices = @transform_3, window_bounds = array<i64: 1, 256>}, {pipeline_mode = #tpu.pipeline_mode<synchronous>, transform_indices = @transform_4, window_bounds = array<i64: 1, 256>}, {pipeline_mode = #tpu.pipeline_mode<synchronous>, transform_indices = @transform_5, window_bounds = array<i64: 9, 256, 256>}, {pipeline_mode = #tpu.pipeline_mode<synchronous>, transform_indices = @transform_6, window_bounds = array<i64: 1, 256>}, {pipeline_mode = #tpu.pipeline_mode<synchronous>, transform_indices = @transform_7, window_bounds = array<i64: 1, 256>}, {pipeline_mode = #tpu.pipeline_mode<synchronous>, transform_indices = @transform_8, window_bounds = array<i64: 1, 256>}, {pipeline_mode = #tpu.pipeline_mode<synchronous>, transform_indices = @transform_9, window_bounds = array<i64: 256, 128>}, {pipeline_mode = #tpu.pipeline_mode<synchronous>, transform_indices = @transform_10, window_bounds = array<i64: 1, 128>}, {pipeline_mode = #tpu.pipeline_mode<synchronous>, transform_indices = @transform_11, window_bounds = array<i64: 128, 10>}, {pipeline_mode = #tpu.pipeline_mode<synchronous>, transform_indices = @transform_12, window_bounds = array<i64: 1, 10>}, {transform_indices = @transform_13, window_bounds = array<i64: 1, 1, 10>}]} {
    %cst = arith.constant 0.000000e+00 : f32
    %0 = vector.broadcast %cst : f32 to vector<6x13x256xf32>
    %c0 = arith.constant 0 : index
    %c0_0 = arith.constant 0 : index
    %c0_1 = arith.constant 0 : index
    %1 = vector.load %arg15[%c0, %c0_0, %c0_1] : memref<6x13x256xf32, #tpu.memory_space<vmem>>, vector<6x13x256xf32>
    tpu.vector_store %arg15[%c0, %c0_0, %c0_1], %0 {strides = array<i32>} : memref<6x13x256xf32, #tpu.memory_space<vmem>>, vector<6x13x256xf32>,
    %c0_2 = arith.constant 0 : index
    %c0_3 = arith.constant 0 : index
    %c0_4 = arith.constant 0 : index
    %c0_5 = arith.constant 0 : index
    %2 = vector.load %arg1[%c0_2, %c0_3, %c0_4, %c0_5] : memref<1x4x4x256xf32, #tpu.memory_space<vmem>>, vector<1x4x4x256xf32>
    %3 = vector.shape_cast %2 : vector<1x4x4x256xf32> to vector<4x4x256xf32>
    %c1 = arith.constant 1 : index
    %c8 = arith.constant 8 : index
    %c0_6 = arith.constant 0 : index
    %4 = vector.load %arg15[%c1, %c8, %c0_6] : memref<6x13x256xf32, #tpu.memory_space<vmem>>, vector<4x4x256xf32>
    tpu.vector_store %arg15[%c1, %c8, %c0_6], %3 {strides = array<i32>} : memref<6x13x256xf32, #tpu.memory_space<vmem>>, vector<4x4x256xf32>,
    %cst_7 = arith.constant 0.000000e+00 : f32
    %5 = vector.broadcast %cst_7 : f32 to vector<16x256xf32>
    %c0_8 = arith.constant 0 : index
    %c7 = arith.constant 7 : index
    %c0_9 = arith.constant 0 : index
    %6 = vector.load %arg15[%c0_8, %c7, %c0_9] : memref<6x13x256xf32, #tpu.memory_space<vmem>>, vector<4x4x256xf32>
    %7 = vector.shape_cast %6 : vector<4x4x256xf32> to vector<16x256xf32>
    %8 = arith.truncf %7 : vector<16x256xf32> to vector<16x256xbf16>
    %c0_10 = arith.constant 0 : index
    %c0_11 = arith.constant 0 : index
    %c0_12 = arith.constant 0 : index
    %9 = vector.load %arg2[%c0_10, %c0_11, %c0_12] : memref<9x256x256xbf16, #tpu.memory_space<vmem>>, vector<1x256x256xbf16>
    %10 = vector.shape_cast %9 : vector<1x256x256xbf16> to vector<256x256xbf16>
    %cst_13 = arith.constant dense<0.000000e+00> : vector<16x256xf32>
    %11 = tpu.matmul %8, %10, %cst_13 {dimension_numbers = #tpu.dot_dimension_numbers<[1], [0], [0], [1], [0, 0, 1, 1], [], []>} : vector<16x256xbf16>, vector<256x256xbf16>, vector<16x256xf32> -> vector<16x256xf32>
    %12 = arith.addf %5, %11 : vector<16x256xf32>
    %c0_14 = arith.constant 0 : index
    %c8_15 = arith.constant 8 : index
    %c0_16 = arith.constant 0 : index
    %13 = vector.load %arg15[%c0_14, %c8_15, %c0_16] : memref<6x13x256xf32, #tpu.memory_space<vmem>>, vector<4x4x256xf32>
    %14 = vector.shape_cast %13 : vector<4x4x256xf32> to vector<16x256xf32>
    %15 = arith.truncf %14 : vector<16x256xf32> to vector<16x256xbf16>
    %c1_17 = arith.constant 1 : index
    %c0_18 = arith.constant 0 : index
    %c0_19 = arith.constant 0 : index
    %16 = vector.load %arg2[%c1_17, %c0_18, %c0_19] : memref<9x256x256xbf16, #tpu.memory_space<vmem>>, vector<1x256x256xbf16>
    %17 = vector.shape_cast %16 : vector<1x256x256xbf16> to vector<256x256xbf16>
    %cst_20 = arith.constant dense<0.000000e+00> : vector<16x256xf32>
    %18 = tpu.matmul %15, %17, %cst_20 {dimension_numbers = #tpu.dot_dimension_numbers<[1], [0], [0], [1], [0, 0, 1, 1], [], []>} : vector<16x256xbf16>, vector<256x256xbf16>, vector<16x256xf32> -> vector<16x256xf32>
    %19 = arith.addf %12, %18 : vector<16x256xf32>
    %c0_21 = arith.constant 0 : index
    %c9 = arith.constant 9 : index
    %c0_22 = arith.constant 0 : index
    %20 = vector.load %arg15[%c0_21, %c9, %c0_22] : memref<6x13x256xf32, #tpu.memory_space<vmem>>, vector<4x4x256xf32>
    %21 = vector.shape_cast %20 : vector<4x4x256xf32> to vector<16x256xf32>
    %22 = arith.truncf %21 : vector<16x256xf32> to vector<16x256xbf16>
    %c2 = arith.constant 2 : index
    %c0_23 = arith.constant 0 : index
    %c0_24 = arith.constant 0 : index
    %23 = vector.load %arg2[%c2, %c0_23, %c0_24] : memref<9x256x256xbf16, #tpu.memory_space<vmem>>, vector<1x256x256xbf16>
    %24 = vector.shape_cast %23 : vector<1x256x256xbf16> to vector<256x256xbf16>
    %cst_25 = arith.constant dense<0.000000e+00> : vector<16x256xf32>
    %25 = tpu.matmul %22, %24, %cst_25 {dimension_numbers = #tpu.dot_dimension_numbers<[1], [0], [0], [1], [0, 0, 1, 1], [], []>} : vector<16x256xbf16>, vector<256x256xbf16>, vector<16x256xf32> -> vector<16x256xf32>
    %26 = arith.addf %19, %25 : vector<16x256xf32>
    %c1_26 = arith.constant 1 : index
    %c7_27 = arith.constant 7 : index
    %c0_28 = arith.constant 0 : index
    %27 = vector.load %arg15[%c1_26, %c7_27, %c0_28] : memref<6x13x256xf32, #tpu.memory_space<vmem>>, vector<4x4x256xf32>
    %28 = vector.shape_cast %27 : vector<4x4x256xf32> to vector<16x256xf32>
    %29 = arith.truncf %28 : vector<16x256xf32> to vector<16x256xbf16>
    %c3 = arith.constant 3 : index
    %c0_29 = arith.constant 0 : index
    %c0_30 = arith.constant 0 : index
    %30 = vector.load %arg2[%c3, %c0_29, %c0_30] : memref<9x256x256xbf16, #tpu.memory_space<vmem>>, vector<1x256x256xbf16>
    %31 = vector.shape_cast %30 : vector<1x256x256xbf16> to vector<256x256xbf16>
    %cst_31 = arith.constant dense<0.000000e+00> : vector<16x256xf32>
    %32 = tpu.matmul %29, %31, %cst_31 {dimension_numbers = #tpu.dot_dimension_numbers<[1], [0], [0], [1], [0, 0, 1, 1], [], []>} : vector<16x256xbf16>, vector<256x256xbf16>, vector<16x256xf32> -> vector<16x256xf32>
    %33 = arith.addf %26, %32 : vector<16x256xf32>
    %c1_32 = arith.constant 1 : index
    %c8_33 = arith.constant 8 : index
    %c0_34 = arith.constant 0 : index
    %34 = vector.load %arg15[%c1_32, %c8_33, %c0_34] : memref<6x13x256xf32, #tpu.memory_space<vmem>>, vector<4x4x256xf32>
    %35 = vector.shape_cast %34 : vector<4x4x256xf32> to vector<16x256xf32>
    %36 = arith.truncf %35 : vector<16x256xf32> to vector<16x256xbf16>
    %c4 = arith.constant 4 : index
    %c0_35 = arith.constant 0 : index
    %c0_36 = arith.constant 0 : index
    %37 = vector.load %arg2[%c4, %c0_35, %c0_36] : memref<9x256x256xbf16, #tpu.memory_space<vmem>>, vector<1x256x256xbf16>
    %38 = vector.shape_cast %37 : vector<1x256x256xbf16> to vector<256x256xbf16>
    %cst_37 = arith.constant dense<0.000000e+00> : vector<16x256xf32>
    %39 = tpu.matmul %36, %38, %cst_37 {dimension_numbers = #tpu.dot_dimension_numbers<[1], [0], [0], [1], [0, 0, 1, 1], [], []>} : vector<16x256xbf16>, vector<256x256xbf16>, vector<16x256xf32> -> vector<16x256xf32>
    %40 = arith.addf %33, %39 : vector<16x256xf32>
    %c1_38 = arith.constant 1 : index
    %c9_39 = arith.constant 9 : index
    %c0_40 = arith.constant 0 : index
    %41 = vector.load %arg15[%c1_38, %c9_39, %c0_40] : memref<6x13x256xf32, #tpu.memory_space<vmem>>, vector<4x4x256xf32>
    %42 = vector.shape_cast %41 : vector<4x4x256xf32> to vector<16x256xf32>
    %43 = arith.truncf %42 : vector<16x256xf32> to vector<16x256xbf16>
    %c5 = arith.constant 5 : index
    %c0_41 = arith.constant 0 : index
    %c0_42 = arith.constant 0 : index
    %44 = vector.load %arg2[%c5, %c0_41, %c0_42] : memref<9x256x256xbf16, #tpu.memory_space<vmem>>, vector<1x256x256xbf16>
    %45 = vector.shape_cast %44 : vector<1x256x256xbf16> to vector<256x256xbf16>
    %cst_43 = arith.constant dense<0.000000e+00> : vector<16x256xf32>
    %46 = tpu.matmul %43, %45, %cst_43 {dimension_numbers = #tpu.dot_dimension_numbers<[1], [0], [0], [1], [0, 0, 1, 1], [], []>} : vector<16x256xbf16>, vector<256x256xbf16>, vector<16x256xf32> -> vector<16x256xf32>
    %47 = arith.addf %40, %46 : vector<16x256xf32>
    %c2_44 = arith.constant 2 : index
    %c7_45 = arith.constant 7 : index
    %c0_46 = arith.constant 0 : index
    %48 = vector.load %arg15[%c2_44, %c7_45, %c0_46] : memref<6x13x256xf32, #tpu.memory_space<vmem>>, vector<4x4x256xf32>
    %49 = vector.shape_cast %48 : vector<4x4x256xf32> to vector<16x256xf32>
    %50 = arith.truncf %49 : vector<16x256xf32> to vector<16x256xbf16>
    %c6 = arith.constant 6 : index
    %c0_47 = arith.constant 0 : index
    %c0_48 = arith.constant 0 : index
    %51 = vector.load %arg2[%c6, %c0_47, %c0_48] : memref<9x256x256xbf16, #tpu.memory_space<vmem>>, vector<1x256x256xbf16>
    %52 = vector.shape_cast %51 : vector<1x256x256xbf16> to vector<256x256xbf16>
    %cst_49 = arith.constant dense<0.000000e+00> : vector<16x256xf32>
    %53 = tpu.matmul %50, %52, %cst_49 {dimension_numbers = #tpu.dot_dimension_numbers<[1], [0], [0], [1], [0, 0, 1, 1], [], []>} : vector<16x256xbf16>, vector<256x256xbf16>, vector<16x256xf32> -> vector<16x256xf32>
    %54 = arith.addf %47, %53 : vector<16x256xf32>
    %c2_50 = arith.constant 2 : index
    %c8_51 = arith.constant 8 : index
    %c0_52 = arith.constant 0 : index
    %55 = vector.load %arg15[%c2_50, %c8_51, %c0_52] : memref<6x13x256xf32, #tpu.memory_space<vmem>>, vector<4x4x256xf32>
    %56 = vector.shape_cast %55 : vector<4x4x256xf32> to vector<16x256xf32>
    %57 = arith.truncf %56 : vector<16x256xf32> to vector<16x256xbf16>
    %c7_53 = arith.constant 7 : index
    %c0_54 = arith.constant 0 : index
    %c0_55 = arith.constant 0 : index
    %58 = vector.load %arg2[%c7_53, %c0_54, %c0_55] : memref<9x256x256xbf16, #tpu.memory_space<vmem>>, vector<1x256x256xbf16>
    %59 = vector.shape_cast %58 : vector<1x256x256xbf16> to vector<256x256xbf16>
    %cst_56 = arith.constant dense<0.000000e+00> : vector<16x256xf32>
    %60 = tpu.matmul %57, %59, %cst_56 {dimension_numbers = #tpu.dot_dimension_numbers<[1], [0], [0], [1], [0, 0, 1, 1], [], []>} : vector<16x256xbf16>, vector<256x256xbf16>, vector<16x256xf32> -> vector<16x256xf32>
    %61 = arith.addf %54, %60 : vector<16x256xf32>
    %c2_57 = arith.constant 2 : index
    %c9_58 = arith.constant 9 : index
    %c0_59 = arith.constant 0 : index
    %62 = vector.load %arg15[%c2_57, %c9_58, %c0_59] : memref<6x13x256xf32, #tpu.memory_space<vmem>>, vector<4x4x256xf32>
    %63 = vector.shape_cast %62 : vector<4x4x256xf32> to vector<16x256xf32>
    %64 = arith.truncf %63 : vector<16x256xf32> to vector<16x256xbf16>
    %c8_60 = arith.constant 8 : index
    %c0_61 = arith.constant 0 : index
    %c0_62 = arith.constant 0 : index
    %65 = vector.load %arg2[%c8_60, %c0_61, %c0_62] : memref<9x256x256xbf16, #tpu.memory_space<vmem>>, vector<1x256x256xbf16>
    %66 = vector.shape_cast %65 : vector<1x256x256xbf16> to vector<256x256xbf16>
    %cst_63 = arith.constant dense<0.000000e+00> : vector<16x256xf32>
    %67 = tpu.matmul %64, %66, %cst_63 {dimension_numbers = #tpu.dot_dimension_numbers<[1], [0], [0], [1], [0, 0, 1, 1], [], []>} : vector<16x256xbf16>, vector<256x256xbf16>, vector<16x256xf32> -> vector<16x256xf32>
    %68 = arith.addf %61, %67 : vector<16x256xf32>
    %c0_64 = arith.constant 0 : index
    %c0_65 = arith.constant 0 : index
    %69 = vector.load %arg3[%c0_64, %c0_65] : memref<1x256xf32, #tpu.memory_space<vmem>>, vector<1x256xf32>
    %70 = vector.broadcast %69 : vector<1x256xf32> to vector<16x256xf32>
    %71 = arith.addf %68, %70 : vector<16x256xf32>
    %cst_66 = arith.constant 0.000000e+00 : f32
    %72 = vector.broadcast %cst_66 : f32 to vector<16x256xf32>
    %73 = arith.maximumf %71, %72 : vector<16x256xf32>
    %c0_67 = arith.constant 0 : index
    %c0_68 = arith.constant 0 : index
    %74 = vector.load %arg4[%c0_67, %c0_68] : memref<1x256xf32, #tpu.memory_space<vmem>>, vector<1x256xf32>
    %75 = vector.broadcast %74 : vector<1x256xf32> to vector<16x256xf32>
    %76 = arith.mulf %73, %75 : vector<16x256xf32>
    %c0_69 = arith.constant 0 : index
    %c0_70 = arith.constant 0 : index
    %77 = vector.load %arg5[%c0_69, %c0_70] : memref<1x256xf32, #tpu.memory_space<vmem>>, vector<1x256xf32>
    %78 = vector.broadcast %77 : vector<1x256xf32> to vector<16x256xf32>
    %79 = arith.addf %76, %78 : vector<16x256xf32>
    %80 = vector.shape_cast %79 : vector<16x256xf32> to vector<4x4x256xf32>
    %c1_71 = arith.constant 1 : index
    %c8_72 = arith.constant 8 : index
    %c0_73 = arith.constant 0 : index
    %81 = vector.load %arg15[%c1_71, %c8_72, %c0_73] : memref<6x13x256xf32, #tpu.memory_space<vmem>>, vector<4x4x256xf32>
    tpu.vector_store %arg15[%c1_71, %c8_72, %c0_73], %80 {strides = array<i32>} : memref<6x13x256xf32, #tpu.memory_space<vmem>>, vector<4x4x256xf32>,
    %cst_74 = arith.constant 0.000000e+00 : f32
    %82 = vector.broadcast %cst_74 : f32 to vector<16x256xf32>
    %c0_75 = arith.constant 0 : index
    %c7_76 = arith.constant 7 : index
    %c0_77 = arith.constant 0 : index
    %83 = vector.load %arg15[%c0_75, %c7_76, %c0_77] : memref<6x13x256xf32, #tpu.memory_space<vmem>>, vector<4x4x256xf32>
    %84 = vector.shape_cast %83 : vector<4x4x256xf32> to vector<16x256xf32>
    %85 = arith.truncf %84 : vector<16x256xf32> to vector<16x256xbf16>
    %c0_78 = arith.constant 0 : index
    %c0_79 = arith.constant 0 : index
    %c0_80 = arith.constant 0 : index
    %86 = vector.load %arg6[%c0_78, %c0_79, %c0_80] : memref<9x256x256xbf16, #tpu.memory_space<vmem>>, vector<1x256x256xbf16>
    %87 = vector.shape_cast %86 : vector<1x256x256xbf16> to vector<256x256xbf16>
    %cst_81 = arith.constant dense<0.000000e+00> : vector<16x256xf32>
    %88 = tpu.matmul %85, %87, %cst_81 {dimension_numbers = #tpu.dot_dimension_numbers<[1], [0], [0], [1], [0, 0, 1, 1], [], []>} : vector<16x256xbf16>, vector<256x256xbf16>, vector<16x256xf32> -> vector<16x256xf32>
    %89 = arith.addf %82, %88 : vector<16x256xf32>
    %c0_82 = arith.constant 0 : index
    %c8_83 = arith.constant 8 : index
    %c0_84 = arith.constant 0 : index
    %90 = vector.load %arg15[%c0_82, %c8_83, %c0_84] : memref<6x13x256xf32, #tpu.memory_space<vmem>>, vector<4x4x256xf32>
    %91 = vector.shape_cast %90 : vector<4x4x256xf32> to vector<16x256xf32>
    %92 = arith.truncf %91 : vector<16x256xf32> to vector<16x256xbf16>
    %c1_85 = arith.constant 1 : index
    %c0_86 = arith.constant 0 : index
    %c0_87 = arith.constant 0 : index
    %93 = vector.load %arg6[%c1_85, %c0_86, %c0_87] : memref<9x256x256xbf16, #tpu.memory_space<vmem>>, vector<1x256x256xbf16>
    %94 = vector.shape_cast %93 : vector<1x256x256xbf16> to vector<256x256xbf16>
    %cst_88 = arith.constant dense<0.000000e+00> : vector<16x256xf32>
    %95 = tpu.matmul %92, %94, %cst_88 {dimension_numbers = #tpu.dot_dimension_numbers<[1], [0], [0], [1], [0, 0, 1, 1], [], []>} : vector<16x256xbf16>, vector<256x256xbf16>, vector<16x256xf32> -> vector<16x256xf32>
    %96 = arith.addf %89, %95 : vector<16x256xf32>
    %c0_89 = arith.constant 0 : index
    %c9_90 = arith.constant 9 : index
    %c0_91 = arith.constant 0 : index
    %97 = vector.load %arg15[%c0_89, %c9_90, %c0_91] : memref<6x13x256xf32, #tpu.memory_space<vmem>>, vector<4x4x256xf32>
    %98 = vector.shape_cast %97 : vector<4x4x256xf32> to vector<16x256xf32>
    %99 = arith.truncf %98 : vector<16x256xf32> to vector<16x256xbf16>
    %c2_92 = arith.constant 2 : index
    %c0_93 = arith.constant 0 : index
    %c0_94 = arith.constant 0 : index
    %100 = vector.load %arg6[%c2_92, %c0_93, %c0_94] : memref<9x256x256xbf16, #tpu.memory_space<vmem>>, vector<1x256x256xbf16>
    %101 = vector.shape_cast %100 : vector<1x256x256xbf16> to vector<256x256xbf16>
    %cst_95 = arith.constant dense<0.000000e+00> : vector<16x256xf32>
    %102 = tpu.matmul %99, %101, %cst_95 {dimension_numbers = #tpu.dot_dimension_numbers<[1], [0], [0], [1], [0, 0, 1, 1], [], []>} : vector<16x256xbf16>, vector<256x256xbf16>, vector<16x256xf32> -> vector<16x256xf32>
    %103 = arith.addf %96, %102 : vector<16x256xf32>
    %c1_96 = arith.constant 1 : index
    %c7_97 = arith.constant 7 : index
    %c0_98 = arith.constant 0 : index
    %104 = vector.load %arg15[%c1_96, %c7_97, %c0_98] : memref<6x13x256xf32, #tpu.memory_space<vmem>>, vector<4x4x256xf32>
    %105 = vector.shape_cast %104 : vector<4x4x256xf32> to vector<16x256xf32>
    %106 = arith.truncf %105 : vector<16x256xf32> to vector<16x256xbf16>
    %c3_99 = arith.constant 3 : index
    %c0_100 = arith.constant 0 : index
    %c0_101 = arith.constant 0 : index
    %107 = vector.load %arg6[%c3_99, %c0_100, %c0_101] : memref<9x256x256xbf16, #tpu.memory_space<vmem>>, vector<1x256x256xbf16>
    %108 = vector.shape_cast %107 : vector<1x256x256xbf16> to vector<256x256xbf16>
    %cst_102 = arith.constant dense<0.000000e+00> : vector<16x256xf32>
    %109 = tpu.matmul %106, %108, %cst_102 {dimension_numbers = #tpu.dot_dimension_numbers<[1], [0], [0], [1], [0, 0, 1, 1], [], []>} : vector<16x256xbf16>, vector<256x256xbf16>, vector<16x256xf32> -> vector<16x256xf32>
    %110 = arith.addf %103, %109 : vector<16x256xf32>
    %c1_103 = arith.constant 1 : index
    %c8_104 = arith.constant 8 : index
    %c0_105 = arith.constant 0 : index
    %111 = vector.load %arg15[%c1_103, %c8_104, %c0_105] : memref<6x13x256xf32, #tpu.memory_space<vmem>>, vector<4x4x256xf32>
    %112 = vector.shape_cast %111 : vector<4x4x256xf32> to vector<16x256xf32>
    %113 = arith.truncf %112 : vector<16x256xf32> to vector<16x256xbf16>
    %c4_106 = arith.constant 4 : index
    %c0_107 = arith.constant 0 : index
    %c0_108 = arith.constant 0 : index
    %114 = vector.load %arg6[%c4_106, %c0_107, %c0_108] : memref<9x256x256xbf16, #tpu.memory_space<vmem>>, vector<1x256x256xbf16>
    %115 = vector.shape_cast %114 : vector<1x256x256xbf16> to vector<256x256xbf16>
    %cst_109 = arith.constant dense<0.000000e+00> : vector<16x256xf32>
    %116 = tpu.matmul %113, %115, %cst_109 {dimension_numbers = #tpu.dot_dimension_numbers<[1], [0], [0], [1], [0, 0, 1, 1], [], []>} : vector<16x256xbf16>, vector<256x256xbf16>, vector<16x256xf32> -> vector<16x256xf32>
    %117 = arith.addf %110, %116 : vector<16x256xf32>
    %c1_110 = arith.constant 1 : index
    %c9_111 = arith.constant 9 : index
    %c0_112 = arith.constant 0 : index
    %118 = vector.load %arg15[%c1_110, %c9_111, %c0_112] : memref<6x13x256xf32, #tpu.memory_space<vmem>>, vector<4x4x256xf32>
    %119 = vector.shape_cast %118 : vector<4x4x256xf32> to vector<16x256xf32>
    %120 = arith.truncf %119 : vector<16x256xf32> to vector<16x256xbf16>
    %c5_113 = arith.constant 5 : index
    %c0_114 = arith.constant 0 : index
    %c0_115 = arith.constant 0 : index
    %121 = vector.load %arg6[%c5_113, %c0_114, %c0_115] : memref<9x256x256xbf16, #tpu.memory_space<vmem>>, vector<1x256x256xbf16>
    %122 = vector.shape_cast %121 : vector<1x256x256xbf16> to vector<256x256xbf16>
    %cst_116 = arith.constant dense<0.000000e+00> : vector<16x256xf32>
    %123 = tpu.matmul %120, %122, %cst_116 {dimension_numbers = #tpu.dot_dimension_numbers<[1], [0], [0], [1], [0, 0, 1, 1], [], []>} : vector<16x256xbf16>, vector<256x256xbf16>, vector<16x256xf32> -> vector<16x256xf32>
    %124 = arith.addf %117, %123 : vector<16x256xf32>
    %c2_117 = arith.constant 2 : index
    %c7_118 = arith.constant 7 : index
    %c0_119 = arith.constant 0 : index
    %125 = vector.load %arg15[%c2_117, %c7_118, %c0_119] : memref<6x13x256xf32, #tpu.memory_space<vmem>>, vector<4x4x256xf32>
    %126 = vector.shape_cast %125 : vector<4x4x256xf32> to vector<16x256xf32>
    %127 = arith.truncf %126 : vector<16x256xf32> to vector<16x256xbf16>
    %c6_120 = arith.constant 6 : index
    %c0_121 = arith.constant 0 : index
    %c0_122 = arith.constant 0 : index
    %128 = vector.load %arg6[%c6_120, %c0_121, %c0_122] : memref<9x256x256xbf16, #tpu.memory_space<vmem>>, vector<1x256x256xbf16>
    %129 = vector.shape_cast %128 : vector<1x256x256xbf16> to vector<256x256xbf16>
    %cst_123 = arith.constant dense<0.000000e+00> : vector<16x256xf32>
    %130 = tpu.matmul %127, %129, %cst_123 {dimension_numbers = #tpu.dot_dimension_numbers<[1], [0], [0], [1], [0, 0, 1, 1], [], []>} : vector<16x256xbf16>, vector<256x256xbf16>, vector<16x256xf32> -> vector<16x256xf32>
    %131 = arith.addf %124, %130 : vector<16x256xf32>
    %c2_124 = arith.constant 2 : index
    %c8_125 = arith.constant 8 : index
    %c0_126 = arith.constant 0 : index
    %132 = vector.load %arg15[%c2_124, %c8_125, %c0_126] : memref<6x13x256xf32, #tpu.memory_space<vmem>>, vector<4x4x256xf32>
    %133 = vector.shape_cast %132 : vector<4x4x256xf32> to vector<16x256xf32>
    %134 = arith.truncf %133 : vector<16x256xf32> to vector<16x256xbf16>
    %c7_127 = arith.constant 7 : index
    %c0_128 = arith.constant 0 : index
    %c0_129 = arith.constant 0 : index
    %135 = vector.load %arg6[%c7_127, %c0_128, %c0_129] : memref<9x256x256xbf16, #tpu.memory_space<vmem>>, vector<1x256x256xbf16>
    %136 = vector.shape_cast %135 : vector<1x256x256xbf16> to vector<256x256xbf16>
    %cst_130 = arith.constant dense<0.000000e+00> : vector<16x256xf32>
    %137 = tpu.matmul %134, %136, %cst_130 {dimension_numbers = #tpu.dot_dimension_numbers<[1], [0], [0], [1], [0, 0, 1, 1], [], []>} : vector<16x256xbf16>, vector<256x256xbf16>, vector<16x256xf32> -> vector<16x256xf32>
    %138 = arith.addf %131, %137 : vector<16x256xf32>
    %c2_131 = arith.constant 2 : index
    %c9_132 = arith.constant 9 : index
    %c0_133 = arith.constant 0 : index
    %139 = vector.load %arg15[%c2_131, %c9_132, %c0_133] : memref<6x13x256xf32, #tpu.memory_space<vmem>>, vector<4x4x256xf32>
    %140 = vector.shape_cast %139 : vector<4x4x256xf32> to vector<16x256xf32>
    %141 = arith.truncf %140 : vector<16x256xf32> to vector<16x256xbf16>
    %c8_134 = arith.constant 8 : index
    %c0_135 = arith.constant 0 : index
    %c0_136 = arith.constant 0 : index
    %142 = vector.load %arg6[%c8_134, %c0_135, %c0_136] : memref<9x256x256xbf16, #tpu.memory_space<vmem>>, vector<1x256x256xbf16>
    %143 = vector.shape_cast %142 : vector<1x256x256xbf16> to vector<256x256xbf16>
    %cst_137 = arith.constant dense<0.000000e+00> : vector<16x256xf32>
    %144 = tpu.matmul %141, %143, %cst_137 {dimension_numbers = #tpu.dot_dimension_numbers<[1], [0], [0], [1], [0, 0, 1, 1], [], []>} : vector<16x256xbf16>, vector<256x256xbf16>, vector<16x256xf32> -> vector<16x256xf32>
    %145 = arith.addf %138, %144 : vector<16x256xf32>
    %c0_138 = arith.constant 0 : index
    %c0_139 = arith.constant 0 : index
    %146 = vector.load %arg7[%c0_138, %c0_139] : memref<1x256xf32, #tpu.memory_space<vmem>>, vector<1x256xf32>
    %147 = vector.broadcast %146 : vector<1x256xf32> to vector<16x256xf32>
    %148 = arith.addf %145, %147 : vector<16x256xf32>
    %cst_140 = arith.constant 0.000000e+00 : f32
    %149 = vector.broadcast %cst_140 : f32 to vector<16x256xf32>
    %150 = arith.maximumf %148, %149 : vector<16x256xf32>
    %c0_141 = arith.constant 0 : index
    %c0_142 = arith.constant 0 : index
    %151 = vector.load %arg8[%c0_141, %c0_142] : memref<1x256xf32, #tpu.memory_space<vmem>>, vector<1x256xf32>
    %152 = vector.broadcast %151 : vector<1x256xf32> to vector<16x256xf32>
    %153 = arith.mulf %150, %152 : vector<16x256xf32>
    %c0_143 = arith.constant 0 : index
    %c0_144 = arith.constant 0 : index
    %154 = vector.load %arg9[%c0_143, %c0_144] : memref<1x256xf32, #tpu.memory_space<vmem>>, vector<1x256xf32>
    %155 = vector.broadcast %154 : vector<1x256xf32> to vector<16x256xf32>
    %156 = arith.addf %153, %155 : vector<16x256xf32>
    %cst_145 = arith.constant dense<0.000000e+00> : vector<256xf32>
    %157 = vector.multi_reduction <add>, %156, %cst_145 [0] : vector<16x256xf32> to vector<256xf32>
    %158 = vector.shape_cast %157 : vector<256xf32> to vector<1x256xf32>
    %cst_146 = arith.constant 1.600000e+01 : f32
    %159 = vector.broadcast %cst_146 : f32 to vector<1x256xf32>
    %160 = arith.divf %158, %159 : vector<1x256xf32>
    %161 = arith.truncf %160 : vector<1x256xf32> to vector<1x256xbf16>
    %c0_147 = arith.constant 0 : index
    %c0_148 = arith.constant 0 : index
    %162 = vector.load %arg10[%c0_147, %c0_148] : memref<256x128xbf16, #tpu.memory_space<vmem>>, vector<256x128xbf16>
    %cst_149 = arith.constant dense<0.000000e+00> : vector<1x128xf32>
    %163 = tpu.matmul %161, %162, %cst_149 {dimension_numbers = #tpu.dot_dimension_numbers<[1], [0], [0], [1], [0, 0, 1, 1], [], []>} : vector<1x256xbf16>, vector<256x128xbf16>, vector<1x128xf32> -> vector<1x128xf32>
    %c0_150 = arith.constant 0 : index
    %c0_151 = arith.constant 0 : index
    %164 = vector.load %arg11[%c0_150, %c0_151] : memref<1x128xf32, #tpu.memory_space<vmem>>, vector<1x128xf32>
    %165 = arith.addf %163, %164 : vector<1x128xf32>
    %cst_152 = arith.constant 0.000000e+00 : f32
    %166 = vector.broadcast %cst_152 : f32 to vector<1x128xf32>
    %167 = arith.maximumf %165, %166 : vector<1x128xf32>
    %168 = arith.truncf %167 : vector<1x128xf32> to vector<1x128xbf16>
    %c0_153 = arith.constant 0 : index
    %c0_154 = arith.constant 0 : index
    %169 = vector.load %arg12[%c0_153, %c0_154] : memref<128x10xbf16, #tpu.memory_space<vmem>>, vector<128x10xbf16>
    %cst_155 = arith.constant dense<0.000000e+00> : vector<1x10xf32>
    %170 = tpu.matmul %168, %169, %cst_155 {dimension_numbers = #tpu.dot_dimension_numbers<[1], [0], [0], [1], [0, 0, 1, 1], [], []>} : vector<1x128xbf16>, vector<128x10xbf16>, vector<1x10xf32> -> vector<1x10xf32>
    %c0_156 = arith.constant 0 : index
    %c0_157 = arith.constant 0 : index
    %171 = vector.load %arg13[%c0_156, %c0_157] : memref<1x10xf32, #tpu.memory_space<vmem>>, vector<1x10xf32>
    %172 = arith.addf %170, %171 : vector<1x10xf32>
    %cst_158 = arith.constant 0.000000e+00 : f32
    %173 = vector.broadcast %cst_158 : f32 to vector<1x10xf32>
    %174 = arith.maximumf %172, %173 : vector<1x10xf32>
    %175 = vector.shape_cast %174 : vector<1x10xf32> to vector<1x1x10xf32>
    %c0_159 = arith.constant 0 : index
    %c0_160 = arith.constant 0 : index
    %c0_161 = arith.constant 0 : index
    %176 = vector.load %arg14[%c0_159, %c0_160, %c0_161] : memref<1x1x10xf32, #tpu.memory_space<vmem>>, vector<1x1x10xf32>
    tpu.vector_store %arg14[%c0_159, %c0_160, %c0_161], %175 {strides = array<i32>} : memref<1x1x10xf32, #tpu.memory_space<vmem>>, vector<1x1x10xf32>,
    return
  }
  func.func @transform_0(%arg0: i32) -> (i32, i32, i32, i32) {
    %c0_i32 = arith.constant 0 : i32
    %c0_i32_0 = arith.constant 0 : i32
    %c0_i32_1 = arith.constant 0 : i32
    %c0_i32_2 = arith.constant 0 : i32
    return %arg0, %c0_i32, %c0_i32_0, %c0_i32_1 : i32, i32, i32, i32
  }
  func.func @transform_1(%arg0: i32) -> (i32, i32, i32) {
    %c0_i32 = arith.constant 0 : i32
    %c0_i32_0 = arith.constant 0 : i32
    %c0_i32_1 = arith.constant 0 : i32
    %c0_i32_2 = arith.constant 0 : i32
    return %c0_i32, %c0_i32_0, %c0_i32_1 : i32, i32, i32
  }
  func.func @transform_2(%arg0: i32) -> (i32, i32) {
    %c0_i32 = arith.constant 0 : i32
    %c0_i32_0 = arith.constant 0 : i32
    %c0_i32_1 = arith.constant 0 : i32
    return %c0_i32, %c0_i32_0 : i32, i32
  }
  func.func @transform_3(%arg0: i32) -> (i32, i32) {
    %c0_i32 = arith.constant 0 : i32
    %c0_i32_0 = arith.constant 0 : i32
    %c0_i32_1 = arith.constant 0 : i32
    return %c0_i32, %c0_i32_0 : i32, i32
  }
  func.func @transform_4(%arg0: i32) -> (i32, i32) {
    %c0_i32 = arith.constant 0 : i32
    %c0_i32_0 = arith.constant 0 : i32
    %c0_i32_1 = arith.constant 0 : i32
    return %c0_i32, %c0_i32_0 : i32, i32
  }
  func.func @transform_5(%arg0: i32) -> (i32, i32, i32) {
    %c0_i32 = arith.constant 0 : i32
    %c0_i32_0 = arith.constant 0 : i32
    %c0_i32_1 = arith.constant 0 : i32
    %c0_i32_2 = arith.constant 0 : i32
    return %c0_i32, %c0_i32_0, %c0_i32_1 : i32, i32, i32
  }
  func.func @transform_6(%arg0: i32) -> (i32, i32) {
    %c0_i32 = arith.constant 0 : i32
    %c0_i32_0 = arith.constant 0 : i32
    %c0_i32_1 = arith.constant 0 : i32
    return %c0_i32, %c0_i32_0 : i32, i32
  }
  func.func @transform_7(%arg0: i32) -> (i32, i32) {
    %c0_i32 = arith.constant 0 : i32
    %c0_i32_0 = arith.constant 0 : i32
    %c0_i32_1 = arith.constant 0 : i32
    return %c0_i32, %c0_i32_0 : i32, i32
  }
  func.func @transform_8(%arg0: i32) -> (i32, i32) {
    %c0_i32 = arith.constant 0 : i32
    %c0_i32_0 = arith.constant 0 : i32
    %c0_i32_1 = arith.constant 0 : i32
    return %c0_i32, %c0_i32_0 : i32, i32
  }
  func.func @transform_9(%arg0: i32) -> (i32, i32) {
    %c0_i32 = arith.constant 0 : i32
    %c0_i32_0 = arith.constant 0 : i32
    %c0_i32_1 = arith.constant 0 : i32
    return %c0_i32, %c0_i32_0 : i32, i32
  }
  func.func @transform_10(%arg0: i32) -> (i32, i32) {
    %c0_i32 = arith.constant 0 : i32
    %c0_i32_0 = arith.constant 0 : i32
    %c0_i32_1 = arith.constant 0 : i32
    return %c0_i32, %c0_i32_0 : i32, i32
  }
  func.func @transform_11(%arg0: i32) -> (i32, i32) {
    %c0_i32 = arith.constant 0 : i32
    %c0_i32_0 = arith.constant 0 : i32
    %c0_i32_1 = arith.constant 0 : i32
    return %c0_i32, %c0_i32_0 : i32, i32
  }
  func.func @transform_12(%arg0: i32) -> (i32, i32) {
    %c0_i32 = arith.constant 0 : i32
    %c0_i32_0 = arith.constant 0 : i32
    %c0_i32_1 = arith.constant 0 : i32
    return %c0_i32, %c0_i32_0 : i32, i32
  }
  func.func @transform_13(%arg0: i32) -> (i32, i32, i32) {
    %c0_i32 = arith.constant 0 : i32
    %c0_i32_0 = arith.constant 0 : i32
    %c0_i32_1 = arith.constant 0 : i32
    return %arg0, %c0_i32, %c0_i32_0 : i32, i32, i32
  }
}

</mosaic_0001>

<bundles_post_ra>
// kernel: forward.4
= control target key start
LH: loop header
LB: loop body
LE: loop exit
PB: predicated region body
PF: predicated region fallthrough
CT: control target
= control target key end

     0   :  { %s7247_s25 = smov 0   ;;  %s8754_s0 = inlined_call_operand.vmem [shape: f32[2,8,8,128], index: 0, kind: input, shape index: {}]   ;;  %s8755_s1 = inlined_call_operand.vmem [shape: bf16[9,128,128], index: 1, kind: input, shape index: {}]   ;;  %s8756_s2 = inlined_call_operand.vmem [shape: f32[1,128], index: 2, kind: input, shape index: {}]   ;;  %s8757_s3 = inlined_call_operand.vmem [shape: f32[1,128], index: 3, kind: input, shape index: {}]   ;;  %s8758_s4 = inlined_call_operand.vmem [shape: f32[1,128], index: 4, kind: input, shape index: {}]   ;;  %s8759_s5 = inlined_call_operand.vmem [shape: bf16[9,128,128], index: 5, kind: input, shape index: {}]   ;;  %s8760_s6 = inlined_call_operand.vmem [shape: f32[1,128], index: 6, kind: input, shape index: {}]   ;;  %s8761_s7 = inlined_call_operand.vmem [shape: f32[1,128], index: 7, kind: input, shape index: {}]   ;;  %s8762_s8 = inlined_call_operand.vmem [shape: f32[1,128], index: 8, kind: input, shape index: {}]   ;;  %s8763_s9 = inlined_call_operand.vmem [shape: bf16[9,128,256], index: 9, kind: input, shape index: {}]   ;;  %s8764_s10 = inlined_call_operand.vmem [shape: f32[1,256], index: 10, kind: input, shape index: {}]   ;;  %s8765_s11 = inlined_call_operand.vmem [shape: f32[1,256], index: 11, kind: input, shape index: {}]   ;;  %s8766_s12 = inlined_call_operand.vmem [shape: f32[1,256], index: 12, kind: input, shape index: {}]   ;;  %s8767_s13 = inlined_call_operand.vmem [shape: f32[2,8,8,256], index: 13, kind: output, shape index: {}]  }
   0x1 LB: > { %s5198_s26 = sadd.s32 4294967295, %s7173_s25   ;;  %p5202_p0 = scmp.ge.s32.totalorder %s7173_s25, 1  ;;  %s7173_s25 = sphi %s7247_s25, %s23_s25  }
   0x2   : > { %p387_p1 = scmp.lt.s32.totalorder %s7173_s25, 3 }
   0x4   : > { %p388_p2 = pnand %p5202_p0, %p387_p1 }
   0x5   : > { %v6803_v0 = vld [vmem:[%s8755_s1 + $0x40] sm:$0xff] (!%p388_p2)   ;;  %v6805_v2 = vld [vmem:[%s8755_s1 + $0x48] sm:$0xff] (!%p388_p2)   ;;  %p7266_p3 = scmp.lt.s32.totalorder (!%p388_p2), %s5198_s26, 1  ;;  %v7175_v3 = vmov (!%p388_p2), 0.0   ;;  %v6807_v5 = vld [vmem:[%s8755_s1 + $0x50] sm:$0xff] (!%p388_p2)  }
   0x6   : > { %391 = sbr.rel (%p388_p2) target bundleno = 1376 (0x560), region = 72  ;;  %v6804_v1 = vld [vmem:[%s8755_s1 + $0x140] sm:$0xff] (!%p388_p2)   ;;  %6105 = vmatprep.subr.bf16.mxu1 (!%p388_p2), %v6803_v0  ;;  %443 = vst [vmem:[#allocation2 + $0x8] sm:$0xff] (!%p388_p2), %v7175_v3  ;;  %442 = vst [vmem:[#allocation2] sm:$0xff] (!%p388_p2), %v7175_v3  ;;  %v6806_v4 = vld [vmem:[%s8755_s1 + $0x148] sm:$0xff] (!%p388_p2)  }
   0x7   : > { %444 = vst [vmem:[#allocation2 + $0x10] sm:$0x1] (!%p388_p2), %v7175_v3  ;;  %445 = vst [vmem:[#allocation2 + $0x18] sm:$0xff] (!%p388_p2), %v7175_v3  ;;  %6225 = vmatprep.subr.bf16.mxu0 (!%p388_p2), %v6804_v1  ;;  %6106 = vmatpush3.bf16.msra.mxu1 (!%p388_p2), %v6803_v0  ;;  %v6808_v6 = vld [vmem:[%s8755_s1 + $0x150] sm:$0xff] (!%p388_p2)   ;;  %v6809_v7 = vld [vmem:[%s8755_s1 + $0x58] sm:$0xff] (!%p388_p2)  }
   0x8   : > { %447 = vst [vmem:[#allocation2 + $0x28] sm:$0x1] (!%p388_p2), %v7175_v3  ;;  %448 = vst [vmem:[#allocation2 + $0x30] sm:$0xff] (!%p388_p2), %v7175_v3  ;;  %6226 = vmatpush3.bf16.msra.mxu0 (!%p388_p2), %v6804_v1  ;;  %6107 = vmatprep.subr.bf16.mxu1 (!%p388_p2), %v6805_v2  ;;  %v6810_v8 = vld [vmem:[%s8755_s1 + $0x158] sm:$0xff] (!%p388_p2)   ;;  %v6811_v9 = vld [vmem:[%s8755_s1 + $0x60] sm:$0xff] (!%p388_p2)  }
   0x9   : > { %450 = vst [vmem:[#allocation2 + $0x40] sm:$0x1] (!%p388_p2), %v7175_v3  ;;  %451 = vst [vmem:[#allocation2 + $0x48] sm:$0xff] (!%p388_p2), %v7175_v3  ;;  %6227 = vmatprep.subr.bf16.mxu0 (!%p388_p2), %v6806_v4  ;;  %v6812_v10 = vld [vmem:[%s8755_s1 + $0x160] sm:$0xff] (!%p388_p2)   ;;  %v6813_v11 = vld [vmem:[%s8755_s1 + $0x68] sm:$0xff] (!%p388_p2)  }
   0xa   : > { %453 = vst [vmem:[#allocation2 + $0x58] sm:$0x1] (!%p388_p2), %v7175_v3  ;;  %454 = vst [vmem:[#allocation2 + $0x60] sm:$0xff] (!%p388_p2), %v7175_v3  ;;  %v6814_v13 = vld [vmem:[%s8755_s1 + $0x168] sm:$0xff] (!%p388_p2)   ;;  %v6815_v18 = vld [vmem:[%s8755_s1 + $0x70] sm:$0xff] (!%p388_p2)  }
   0xb   : > { %456 = vst [vmem:[#allocation2 + $0x70] sm:$0x1] (!%p388_p2), %v7175_v3  ;;  %457 = vst [vmem:[#allocation2 + $0x78] sm:$0xff] (!%p388_p2), %v7175_v3  ;;  %6108 = vmatpush3.bf16.msra.mxu1 (!%p388_p2), %v6805_v2  ;;  %v6816_v19 = vld [vmem:[%s8755_s1 + $0x170] sm:$0xff] (!%p388_p2)   ;;  %v6817_v20 = vld [vmem:[%s8755_s1 + $0x78] sm:$0xff] (!%p388_p2)  }
   0xc   : > { %459 = vst [vmem:[#allocation2 + $0x88] sm:$0x1] (!%p388_p2), %v7175_v3  ;;  %460 = vst [vmem:[#allocation2 + $0x90] sm:$0xff] (!%p388_p2), %v7175_v3  ;;  %6228 = vmatpush3.bf16.msra.mxu0 (!%p388_p2), %v6806_v4  ;;  %6109 = vmatprep.subr.bf16.mxu1 (!%p388_p2), %v6807_v5  ;;  %v6818_v22 = vld [vmem:[%s8755_s1 + $0x178] sm:$0xff] (!%p388_p2)   ;;  %v6819_v25 = vld [vmem:[%s8755_s1] sm:$0xff] (!%p388_p2)  }
   0xd   : > { %462 = vst [vmem:[#allocation2 + $0xa0] sm:$0x1] %v7175_v3  ;;  %463 = vst [vmem:[#allocation2 + $0xa8] sm:$0xff] %v7175_v3  ;;  %s8770_s26 = smov (!%p7266_p3, %s5198_s26), 1  ;;  %6229 = vmatprep.subr.bf16.mxu0 %v6808_v6  ;;  %v6820_v28 = vld [vmem:[%s8755_s1 + $0x180] sm:$0xff]   ;;  %v6821_v32 = vld [vmem:[%s8755_s1 + $0x8] sm:$0xff]  }
   0xe   : > { %465 = vst [vmem:[#allocation2 + $0xb8] sm:$0x1] %v7175_v3  ;;  %466 = vst [vmem:[#allocation2 + $0xc0] sm:$0xff] %v7175_v3  ;;  %s5887_s29 = sshll.u32 %s8770_s26, 6  ;;  %v6822_v36 = vld [vmem:[%s8755_s1 + $0x188] sm:$0xff]   ;;  %v6823_v42 = vld [vmem:[%s8755_s1 + $0x10] sm:$0xff]  }
   0xf   : > { %468 = vst [vmem:[#allocation2 + $0xd0] sm:$0x1] %v7175_v3  ;;  %469 = vst [vmem:[#allocation2 + $0xd8] sm:$0xff] %v7175_v3  ;;  %6110 = vmatpush3.bf16.msra.mxu1 %v6807_v5  ;;  %s7323_s19 = scalar_lea.vmem %s8754_s0, %s5887_s29  ;;  %v6824_v43 = vld [vmem:[%s8755_s1 + $0x190] sm:$0xff]   ;;  %v489_v44 = vld [vmem:[#allocation2 + $0x7] sm:$0xff]  ;;  %s5888_s27 = sshll.u32 %s8770_s26, 7 }
  0x10   : > { %470 = vst [vmem:[#allocation2 + $0xe0] sm:$0xff] %v7175_v3  ;;  %471 = vst [vmem:[#allocation2 + $0xe8] sm:$0x1] %v7175_v3  ;;  %6230 = vmatpush3.bf16.msra.mxu0 %v6808_v6  ;;  %6111 = vmatprep.subr.bf16.mxu1 %v6809_v7  ;;  %v7329_v12 = vld [vmem:[%s7323_s19] sm:$0xff]  ;;  %v7338_v15 = vld [vmem:[%s7323_s19 + $0x8] sm:$0xff] }
  0x11   : > { %6231 = vmatprep.subr.bf16.mxu0 %v6810_v8  ;;  %481 = vst [vmem:[#allocation2 + $0x20] sm:$0xff] %v7329_v12  ;;  %v525_v14 = vpack.c.bf16 %v7329_v12, %v7175_v3  ;;  %482 = vst [vmem:[#allocation2 + $0x38] sm:$0xff] %v7338_v15  ;;  %v7342_v16 = vld [vmem:[%s7323_s19 + $0x10] sm:$0xff]  ;;  %v7346_v17 = vld [vmem:[%s7323_s19 + $0x18] sm:$0xff]  ;;  %v1080_v33 = vpack.c.bf16 %v7338_v15, %v7329_v12 }
  0x12   : > { %483 = vst [vmem:[#allocation2 + $0x50] sm:$0xff] %v7342_v16  ;;  %484 = vst [vmem:[#allocation2 + $0x68] sm:$0xff] %v7346_v17  ;;  %v7379_v29 = vpack.c.bf16 %v7342_v16, %v7338_v15  ;;  %v7382_v30 = vld [vmem:[%s7323_s19 + $0x20] sm:$0xff]  ;;  %v1081_v34 = vpack.c.bf16 %v7346_v17, %v7342_v16  ;;  %v7395_v35 = vld [vmem:[%s7323_s19 + $0x28] sm:$0xff] }
  0x13   : > { %6112 = vmatpush3.bf16.msra.mxu1 %v6809_v7  ;;  %6121 = vmatprep.mubr.bf16.mxu1 %v525_v14  ;;  %485 = vst [vmem:[#allocation2 + $0x80] sm:$0xff] %v7382_v30  ;;  %v7402_v37 = vpack.c.bf16 %v7382_v30, %v7346_v17  ;;  %486 = vst [vmem:[#allocation2 + $0x98] sm:$0xff] %v7395_v35  ;;  %v7406_v38 = vld [vmem:[%s7323_s19 + $0x30] sm:$0xff]  ;;  %v7409_v39 = vld [vmem:[%s7323_s19 + $0x38] sm:$0xff]  ;;  %v1082_v40 = vpack.c.bf16 %v7395_v35, %v7382_v30  ;;  %s8690_s19 = scalar_lea.vmem %s8767_s13, %s5888_s27 }
  0x14   : > { %6232 = vmatpush3.bf16.msra.mxu0 %v6810_v8  ;;  %6113 = vmatprep.subr.bf16.mxu1 %v6811_v9  ;;  %487 = vst [vmem:[#allocation2 + $0xb0] sm:$0xff] %v7406_v38  ;;  %488 = vst [vmem:[#allocation2 + $0xc8] sm:$0xff] %v7409_v39  ;;  %v1083_v41 = vpack.c.bf16 %v7409_v39, %v7406_v38  ;;  %v6825_v45 = vld [vmem:[%s8755_s1 + $0x18] sm:$0xff]   ;;  %v7432_v47 = vpack.c.bf16 %v7406_v38, %v7395_v35  ;;  %v6827_v59 = vld [vmem:[%s8755_s1 + $0x20] sm:$0xff]  }
  0x15   : > { %6233 = vmatprep.subr.bf16.mxu0 %v6812_v10  ;;  %v6826_v51 = vld [vmem:[%s8755_s1 + $0x198] sm:$0xff]   ;;  %v6828_v60 = vld [vmem:[%s8755_s1 + $0x1a0] sm:$0xff]   ;;  %v6829_v61 = vld [vmem:[%s8755_s1 + $0x28] sm:$0xff]  }
  0x16   : > { %v6830_v62 = vld [vmem:[%s8755_s1 + $0x1a8] sm:$0xff]   ;;  %v6831_v63 = vld [vmem:[%s8755_s1 + $0x30] sm:$0xff]   ;;  %v6833_v1 = vld [vmem:[%s8755_s1 + $0x38] sm:$0xff]  }
  0x17   : > { %6114 = vmatpush3.bf16.msra.mxu1 %v6811_v9  ;;  %v6832_v0 = vld [vmem:[%s8755_s1 + $0x1b0] sm:$0xff]   ;;  %v6834_v2 = vld [vmem:[%s8755_s1 + $0x1b8] sm:$0xff]   ;;  %v6835_v4 = vld [vmem:[%s8755_s1 + $0x80] sm:$0xff]  }
  0x18   : > { %6234 = vmatpush3.bf16.msra.mxu0 %v6812_v10  ;;  %6115 = vmatprep.subr.bf16.mxu1 %v6813_v11  ;;  %v7358_v21 = vld [vmem:[#allocation2 + $0x21] sm:$0xff]  ;;  %v7363_v23 = vld [vmem:[#allocation2 + $0x39] sm:$0xff]  ;;  %v6839_v14 = vld [vmem:[%s8755_s1 + $0x90] sm:$0xff]  }
  0x19   : > { %6235 = vmatprep.subr.bf16.mxu0 %v6814_v13  ;;  %v1230_v24 = vpack.c.bf16 %v7363_v23, %v7358_v21  ;;  %v7370_v26 = vld [vmem:[#allocation2 + $0x51] sm:$0xff]  ;;  %v7372_v27 = vld [vmem:[#allocation2 + $0x69] sm:$0xff]  ;;  %v7434_v48 = vld [vmem:[#allocation2 + $0x1f] sm:$0xff] }
  0x1a   : > { %v1231_v31 = vpack.c.bf16 %v7372_v27, %v7370_v26  ;;  %v7428_v46 = vld [vmem:[#allocation2 + $0x81] sm:$0xff]  ;;  %v7436_v49 = vld [vmem:[#allocation2 + $0x37] sm:$0xff]  ;;  %v7438_v50 = vld [vmem:[#allocation2 + $0x4f] sm:$0xff]  ;;  %v497_v57 = vpack.c.bf16 %v7434_v48, %v489_v44 }
  0x1b   : > { %6116 = vmatpush3.bf16.msra.mxu1 %v6813_v11  ;;  %6241 = vmatprep.mubr.bf16.mxu0 %v1230_v24  ;;  %v7443_v52 = vld [vmem:[#allocation2 + $0x99] sm:$0xff]  ;;  %v7447_v54 = vld [vmem:[#allocation2 + $0xb1] sm:$0xff]  ;;  %v7449_v55 = vld [vmem:[#allocation2 + $0xc9] sm:$0xff]  ;;  %v1381_v58 = vpack.c.bf16 %v7438_v50, %v7436_v49 }
  0x1c   : > { %6236 = vmatpush3.bf16.msra.mxu0 %v6814_v13  ;;  %6117 = vmatprep.subr.bf16.mxu1 %v6815_v18  ;;  %v1232_v53 = vpack.c.bf16 %v7443_v52, %v7428_v46  ;;  %v1233_v56 = vpack.c.bf16 %v7449_v55, %v7447_v54  ;;  %v7484_v5 = vld [vmem:[#allocation2 + $0x67] sm:$0xff]  ;;  %v7486_v6 = vld [vmem:[#allocation2 + $0x7f] sm:$0xff]  ;;  %v7491_v8 = vld [vmem:[#allocation2 + $0x97] sm:$0xff] }
  0x1d   : > { %6237 = vmatprep.subr.bf16.mxu0 %v6816_v19  ;;  %v6836_v7 = vld [vmem:[%s8755_s1 + $0x1c0] sm:$0xff]   ;;  %v1382_v9 = vpack.c.bf16 %v7486_v6, %v7484_v5  ;;  %v7495_v10 = vld [vmem:[#allocation2 + $0xaf] sm:$0xff]  ;;  %v6878_v17 = vld [vmem:[%s8759_s5 + $0x58] sm:$0xff]  }
  0x1e   : > { %v6837_v11 = vld [vmem:[%s8755_s1 + $0x88] sm:$0xff]   ;;  %v6847_v44 = vld [vmem:[%s8755_s1 + $0xb0] sm:$0xff]   ;;  %v6875_v12 = vld [vmem:[%s8759_s5 + $0x40] sm:$0xff]  }
  0x1f   : > { %6118 = vmatpush3.bf16.msra.mxu1 %v6815_v18  ;;  %v6838_v13 = vld [vmem:[%s8755_s1 + $0x1c8] sm:$0xff]   ;;  %v1383_v18 = vpack.c.bf16 %v7495_v10, %v7491_v8  ;;  %v6877_v16 = vld [vmem:[%s8759_s5 + $0x50] sm:$0xff]   ;;  %v6879_v30 = vld [vmem:[%s8759_s5 + $0x60] sm:$0xff]  }
  0x20   : > { %6238 = vmatpush3.bf16.msra.mxu0 %v6816_v19  ;;  %6119 = vmatprep.subr.bf16.mxu1 %v6817_v20  ;;  %v7508_v19 = vld [vmem:[#allocation2 + $0xc7] sm:$0xff]  ;;  %v6882_v35 = vld [vmem:[%s8759_s5 + $0x78] sm:$0xff]  }
  0x21   : > { %6239 = vmatprep.subr.bf16.mxu0 %v6818_v22  ;;  %v772_v24 = vld [vmem:[#allocation2 + $0x9] sm:$0xff]  ;;  %v7676_v38 = vld [vmem:[%s8759_s5] sm:$0xff]  }
  0x22   : > { %v6876_v15 = vld [vmem:[%s8759_s5 + $0x48] sm:$0xff]  }
  0x23   : > { %6120 = vmatpush3.bf16.msra.mxu1 %v6817_v20  ;;  %v1380_v20 = vld [vmem:[#allocation2 + $0xdf] sm:$0xff] }
  0x24   : > { %6240 = vmatpush3.bf16.msra.mxu0 %v6818_v22  ;;  %6129 = vmatprep.subr.bf16.mxu1 %v6819_v25  ;;  %v6840_v22 = vld [vmem:[%s8755_s1 + $0x1d0] sm:$0xff]  }
  0x25   : > { %6249 = vmatprep.subr.bf16.mxu0 %v6820_v28 }
  0x26   : > { %6122 = vmatmul.mubr.bf16.vlgmr.msra.gmra.mrb[0].mxu1 %v7379_v29 }
  0x27   : > { %6130 = vmatpush3.bf16.msra.mxu1 %v6819_v25  ;;  %6242 = vmatmul.mubr.bf16.vlgmr.msra.gmra.mrb[0].mxu0 %v1231_v31  ;;  %v1384_v25 = vpack.c.bf16 %v1380_v20, %v7508_v19  ;;  %v6842_v31 = vld [vmem:[%s8755_s1 + $0x1d8] sm:$0xff]  }
  0x28   : > { %6250 = vmatpush3.bf16.msra.mxu0 %v6820_v28  ;;  %6131 = vmatprep.subr.bf16.mxu1 %v6821_v32  ;;  %v6841_v28 = vld [vmem:[%s8755_s1 + $0x98] sm:$0xff]  }
  0x29   : > { %6251 = vmatprep.subr.bf16.mxu0 %v6822_v36  ;;  %6125 = vmatprep.mubr.bf16.mxu1 %v7402_v37 }
  0x2a   : > { %6245 = vmatprep.mubr.bf16.mxu0 %v1232_v53  ;;  %v6851_v53 = vld [vmem:[%s8755_s1 + $0xc0] sm:$0xff]  }
  0x2b   : > { %6132 = vmatpush3.bf16.msra.mxu1 %v6821_v32  ;;  %v780_v32 = vpack.c.bf16 %v7358_v21, %v772_v24  ;;  %v6845_v21 = vld [vmem:[%s8755_s1 + $0xa8] sm:$0xff]  }
  0x2c   : > { %6252 = vmatpush3.bf16.msra.mxu0 %v6822_v36  ;;  %6133 = vmatprep.subr.bf16.mxu1 %v6823_v42  ;;  %v6843_v36 = vld [vmem:[%s8755_s1 + $0xa0] sm:$0xff]  }
  0x2d   : > { %6253 = vmatprep.subr.bf16.mxu0 %v6824_v43 }
  0x2e   : > { %6126 = vmatmul.mubr.bf16.gmra.mrb[4].mxu1 %v7432_v47 }
  0x2f   : > { %6134 = vmatpush3.bf16.msra.mxu1 %v6823_v42  ;;  %6246 = vmatmul.mubr.bf16.gmra.mrb[4].mxu0 %v1233_v56  ;;  %v6844_v42 = vld [vmem:[%s8755_s1 + $0x1e0] sm:$0xff]  }
  0x30   : > { %6254 = vmatpush3.bf16.msra.mxu0 %v6824_v43  ;;  %6135 = vmatprep.subr.bf16.mxu1 %v6825_v45  ;;  %v6846_v43 = vld [vmem:[%s8755_s1 + $0x1e8] sm:$0xff]   ;;  %v6852_v56 = vld [vmem:[%s8755_s1 + $0x200] sm:$0xff]  }
  0x31   : > { %6255 = vmatprep.subr.bf16.mxu0 %v6826_v51  ;;  %6145 = vmatprep.mubr.bf16.mxu1 %v497_v57  ;;  %v781_v57 = vpack.c.bf16 %v7370_v26, %v7363_v23  ;;  %v782_v23 = vpack.c.bf16 %v7428_v46, %v7372_v27  ;;  %v6856_v26 = vld [vmem:[%s8755_s1 + $0x210] sm:$0xff]   ;;  %v783_v27 = vpack.c.bf16 %v7447_v54, %v7443_v52  ;;  %v6860_v52 = vld [vmem:[%s8755_s1 + $0x220] sm:$0xff]  }
  0x32   : > { %6265 = vmatprep.mubr.bf16.mxu0 %v1381_v58  ;;  %v1534_v46 = vpack.c.bf16 %v7175_v3, %v7409_v39  ;;  %v6861_v3 = vld [vmem:[%s8755_s1 + $0xe8] sm:$0xff]   ;;  %v6864_v54 = vld [vmem:[%s8755_s1 + $0x230] sm:$0xff]  }
  0x33   : > { %6136 = vmatpush3.bf16.msra.mxu1 %v6825_v45  ;;  %v6849_v45 = vld [vmem:[%s8755_s1 + $0xb8] sm:$0xff]  }
  0x34   : > { %6256 = vmatpush3.bf16.msra.mxu0 %v6826_v51  ;;  %6137 = vmatprep.subr.bf16.mxu1 %v6827_v59  ;;  %v6850_v51 = vld [vmem:[%s8755_s1 + $0x1f8] sm:$0xff]  }
  0x35   : > { %6257 = vmatprep.subr.bf16.mxu0 %v6828_v60 }
  0x37   : > { %6138 = vmatpush3.bf16.msra.mxu1 %v6827_v59  ;;  %v6854_v59 = vld [vmem:[%s8755_s1 + $0x208] sm:$0xff]  }
  0x38   : > { %6258 = vmatpush3.bf16.msra.mxu0 %v6828_v60  ;;  %6139 = vmatprep.subr.bf16.mxu1 %v6829_v61  ;;  %v6855_v60 = vld [vmem:[%s8755_s1 + $0xd0] sm:$0xff]  }
  0x39   : > { %6259 = vmatprep.subr.bf16.mxu0 %v6830_v62 }
  0x3b   : > { %6140 = vmatpush3.bf16.msra.mxu1 %v6829_v61  ;;  %v6857_v61 = vld [vmem:[%s8755_s1 + $0xd8] sm:$0xff]  }
  0x3c   : > { %6260 = vmatpush3.bf16.msra.mxu0 %v6830_v62  ;;  %6141 = vmatprep.subr.bf16.mxu1 %v6831_v63  ;;  %v930_v62 = vpack.c.bf16 %v7436_v49, %v7434_v48  ;;  %v6862_v48 = vld [vmem:[%s8755_s1 + $0x228] sm:$0xff]   ;;  %v6863_v49 = vld [vmem:[%s8755_s1 + $0xf0] sm:$0xff]  }
  0x3d   : > { %6261 = vmatprep.subr.bf16.mxu0 %v6832_v0 }
  0x3f   : > { %6142 = vmatpush3.bf16.msra.mxu1 %v6831_v63  ;;  %v6865_v63 = vld [vmem:[%s8755_s1 + $0xf8] sm:$0xff]  }
  0x40   : > { %6262 = vmatpush3.bf16.msra.mxu0 %v6832_v0  ;;  %6143 = vmatprep.subr.bf16.mxu1 %v6833_v1  ;;  %v6866_v0 = vld [vmem:[%s8755_s1 + $0x238] sm:$0xff]  }
  0x41   : > { %6263 = vmatprep.subr.bf16.mxu0 %v6834_v2 }
  0x43   : > { %6144 = vmatpush3.bf16.msra.mxu1 %v6833_v1  ;;  %v6867_v1 = vld [vmem:[%s8755_s1 + $0x100] sm:$0xff]  }
  0x44   : > { %6264 = vmatpush3.bf16.msra.mxu0 %v6834_v2  ;;  %6153 = vmatprep.subr.bf16.mxu1 %v6835_v4  ;;  %v931_v2 = vpack.c.bf16 %v7484_v5, %v7438_v50  ;;  %v6870_v50 = vld [vmem:[%s8755_s1 + $0x118] sm:$0xff]   ;;  %v933_v5 = vpack.c.bf16 %v7508_v19, %v7495_v10  ;;  %v6872_v10 = vld [vmem:[%s8755_s1 + $0x128] sm:$0xff]  }
  0x45   : > { %6273 = vmatprep.subr.bf16.mxu0 %v6836_v7 }
  0x46   : > { %6146 = vmatmul.mubr.bf16.vlgmr.msra.gmra.mrb[0].mxu1 %v1381_v58  ;;  %v6853_v58 = vld [vmem:[%s8755_s1 + $0xc8] sm:$0xff]  }
  0x47   : > { %6154 = vmatpush3.bf16.msra.mxu1 %v6835_v4  ;;  %6266 = vmatmul.mubr.bf16.vlgmr.msra.gmra.mrb[0].mxu0 %v1382_v9  ;;  %v6868_v4 = vld [vmem:[%s8755_s1 + $0x108] sm:$0xff]  }
  0x48   : > { %6274 = vmatpush3.bf16.msra.mxu0 %v6836_v7  ;;  %6155 = vmatprep.subr.bf16.mxu1 %v6837_v11  ;;  %v932_v7 = vpack.c.bf16 %v7491_v8, %v7486_v6  ;;  %v6871_v8 = vld [vmem:[%s8755_s1 + $0x120] sm:$0xff]  }
  0x49   : > { %6275 = vmatprep.subr.bf16.mxu0 %v6838_v13  ;;  %6149 = vmatprep.mubr.bf16.mxu1 %v1382_v9  ;;  %v6869_v9 = vld [vmem:[%s8755_s1 + $0x110] sm:$0xff]  }
  0x4a   : > { %6269 = vmatprep.mubr.bf16.mxu0 %v1383_v18 }
  0x4b   : > { %6156 = vmatpush3.bf16.msra.mxu1 %v6837_v11  ;;  %v1680_v11 = vld [vmem:[#allocation2 + $0xe1] sm:$0xff] }
  0x4c   : > { %6276 = vmatpush3.bf16.msra.mxu0 %v6838_v13  ;;  %6157 = vmatprep.subr.bf16.mxu1 %v6839_v14  ;;  %v1684_v6 = vpack.c.bf16 %v1680_v11, %v7449_v55  ;;  %v6873_v55 = vld [vmem:[%s8755_s1 + $0x130] sm:$0xff]   ;;  %v6874_v13 = vld [vmem:[%s8755_s1 + $0x138] sm:$0xff]  }
  0x4d   : > { %6277 = vmatprep.subr.bf16.mxu0 %v6840_v22 }
  0x4e   : > { %6150 = vmatmul.mubr.bf16.gmra.mrb[4].mxu1 %v1383_v18 }
  0x4f   : > { %6158 = vmatpush3.bf16.msra.mxu1 %v6839_v14  ;;  %6270 = vmatmul.mubr.bf16.gmra.mrb[4].mxu0 %v1384_v25  ;;  %v5407_v25 = vld [vmem:[%s8756_s2] ss:$0 sm:$0xff] }
  0x50   : > { %6278 = vmatpush3.bf16.msra.mxu0 %v6840_v22  ;;  %6159 = vmatprep.subr.bf16.mxu1 %v6841_v28 }
  0x51   : > { %6279 = vmatprep.subr.bf16.mxu0 %v6842_v31  ;;  %6169 = vmatprep.mubr.bf16.mxu1 %v780_v32 }
  0x52   : > { %6289 = vmatprep.mubr.bf16.mxu0 %v7379_v29  ;;  %v6848_v29 = vld [vmem:[%s8755_s1 + $0x1f0] sm:$0xff]  }
  0x53   : > { %6160 = vmatpush3.bf16.msra.mxu1 %v6841_v28 }
  0x54   : > { %6280 = vmatpush3.bf16.msra.mxu0 %v6842_v31  ;;  %6161 = vmatprep.subr.bf16.mxu1 %v6843_v36 }
  0x55   : > { %6281 = vmatprep.subr.bf16.mxu0 %v6844_v42 }
  0x57   : > { %6162 = vmatpush3.bf16.msra.mxu1 %v6843_v36 }
  0x58   : > { %6282 = vmatpush3.bf16.msra.mxu0 %v6844_v42  ;;  %6163 = vmatprep.subr.bf16.mxu1 %v6845_v21 }
  0x59   : > { %6283 = vmatprep.subr.bf16.mxu0 %v6846_v43 }
  0x5b   : > { %6164 = vmatpush3.bf16.msra.mxu1 %v6845_v21 }
  0x5c   : > { %6284 = vmatpush3.bf16.msra.mxu0 %v6846_v43  ;;  %6165 = vmatprep.subr.bf16.mxu1 %v6847_v44 }
  0x5d   : > { %6285 = vmatprep.subr.bf16.mxu0 %v6848_v29 }
  0x5f   : > { %6166 = vmatpush3.bf16.msra.mxu1 %v6847_v44  ;;  %v5408_v44 = vld [vmem:[%s8757_s3] ss:$0 sm:$0xff] }
  0x60   : > { %6286 = vmatpush3.bf16.msra.mxu0 %v6848_v29  ;;  %6167 = vmatprep.subr.bf16.mxu1 %v6849_v45 }
  0x61   : > { %6287 = vmatprep.subr.bf16.mxu0 %v6850_v51 }
  0x63   : > { %6168 = vmatpush3.bf16.msra.mxu1 %v6849_v45 }
  0x64   : > { %6288 = vmatpush3.bf16.msra.mxu0 %v6850_v51  ;;  %6177 = vmatprep.subr.bf16.mxu1 %v6851_v53 }
  0x65   : > { %6297 = vmatprep.subr.bf16.mxu0 %v6852_v56 }
  0x66   : > { %6170 = vmatmul.mubr.bf16.vlgmr.msra.gmra.mrb[0].mxu1 %v781_v57 }
  0x67   : > { %6178 = vmatpush3.bf16.msra.mxu1 %v6851_v53  ;;  %6290 = vmatmul.mubr.bf16.vlgmr.msra.gmra.mrb[0].mxu0 %v7402_v37  ;;  %v6858_v37 = vld [vmem:[%s8755_s1 + $0x218] sm:$0xff]  }
  0x68   : > { %6298 = vmatpush3.bf16.msra.mxu0 %v6852_v56  ;;  %6179 = vmatprep.subr.bf16.mxu1 %v6853_v58  ;;  %v5409_v56 = vld [vmem:[%s8758_s4] ss:$0 sm:$0xff] }
  0x69   : > { %6299 = vmatprep.subr.bf16.mxu0 %v6854_v59  ;;  %6293 = vmatprep.mubr.bf16.mxu0 %v7432_v47  ;;  %v6859_v47 = vld [vmem:[%s8755_s1 + $0xe0] sm:$0xff]  }
  0x6a   : > { %6173 = vmatprep.mubr.bf16.mxu1 %v782_v23 }
  0x6b   : > { %6180 = vmatpush3.bf16.msra.mxu1 %v6853_v58 }
  0x6c   : > { %6300 = vmatpush3.bf16.msra.mxu0 %v6854_v59  ;;  %6181 = vmatprep.subr.bf16.mxu1 %v6855_v60 }
  0x6d   : > { %6301 = vmatprep.subr.bf16.mxu0 %v6856_v26 }
  0x6e   : > { %6174 = vmatmul.mubr.bf16.gmra.mrb[4].mxu1 %v783_v27 }
  0x6f   : > { %6182 = vmatpush3.bf16.msra.mxu1 %v6855_v60  ;;  %6294 = vmatmul.mubr.bf16.gmra.mrb[4].mxu0 %v1534_v46 }
  0x70   : > { %6302 = vmatpush3.bf16.msra.mxu0 %v6856_v26  ;;  %6183 = vmatprep.subr.bf16.mxu1 %v6857_v61 }
  0x71   : > { %6303 = vmatprep.subr.bf16.mxu0 %v6858_v37  ;;  %6313 = vmatprep.mubr.bf16.mxu0 %v781_v57 }
  0x72   : > { %6193 = vmatprep.mubr.bf16.mxu1 %v930_v62 }
  0x73   : > { %6184 = vmatpush3.bf16.msra.mxu1 %v6857_v61 }
  0x74   : > { %6304 = vmatpush3.bf16.msra.mxu0 %v6858_v37  ;;  %6185 = vmatprep.subr.bf16.mxu1 %v6859_v47 }
  0x75   : > { %6305 = vmatprep.subr.bf16.mxu0 %v6860_v52 }
  0x77   : > { %6186 = vmatpush3.bf16.msra.mxu1 %v6859_v47 }
  0x78   : > { %6306 = vmatpush3.bf16.msra.mxu0 %v6860_v52  ;;  %6187 = vmatprep.subr.bf16.mxu1 %v6861_v3 }
  0x79   : > { %6307 = vmatprep.subr.bf16.mxu0 %v6862_v48 }
  0x7b   : > { %6188 = vmatpush3.bf16.msra.mxu1 %v6861_v3 }
  0x7c   : > { %6308 = vmatpush3.bf16.msra.mxu0 %v6862_v48  ;;  %6189 = vmatprep.subr.bf16.mxu1 %v6863_v49 }
  0x7d   : > { %6309 = vmatprep.subr.bf16.mxu0 %v6864_v54 }
  0x7f   : > { %6190 = vmatpush3.bf16.msra.mxu1 %v6863_v49 }
  0x80   : > { %6310 = vmatpush3.bf16.msra.mxu0 %v6864_v54  ;;  %6191 = vmatprep.subr.bf16.mxu1 %v6865_v63 }
  0x81   : > { %6311 = vmatprep.subr.bf16.mxu0 %v6866_v0 }
  0x83   : > { %6192 = vmatpush3.bf16.msra.mxu1 %v6865_v63 }
  0x84   : > { %6312 = vmatpush3.bf16.msra.mxu0 %v6866_v0  ;;  %6201 = vmatprep.subr.bf16.mxu1 %v6867_v1 }
  0x86   : > { %6194 = vmatmul.mubr.bf16.vlgmr.msra.gmra.mrb[0].mxu1 %v931_v2 }
  0x87   : > { %6314 = vmatmul.mubr.bf16.vlgmr.msra.gmra.mrb[0].mxu0 %v782_v23  ;;  %6202 = vmatpush3.bf16.msra.mxu1 %v6867_v1 }
  0x88   : > { %6203 = vmatprep.subr.bf16.mxu1 %v6868_v4  ;;  %6317 = vmatprep.mubr.bf16.mxu0 %v783_v27 }
  0x89   : > { %6197 = vmatprep.mubr.bf16.mxu1 %v932_v7  ;;  %v7698_v7 = vld [vmem:[#allocation2 + $0x8] sm:$0xff] }
  0x8b   : > { %6204 = vmatpush3.bf16.msra.mxu1 %v6868_v4 }
  0x8c   : > { %6205 = vmatprep.subr.bf16.mxu1 %v6869_v9 }
  0x8e   : > { %6198 = vmatmul.mubr.bf16.gmra.mrb[4].mxu1 %v933_v5 }
  0x8f   : > { %6318 = vmatmul.mubr.bf16.gmra.mrb[4].mxu0 %v1684_v6  ;;  %6206 = vmatpush3.bf16.msra.mxu1 %v6869_v9 }
  0x90   : > { %6207 = vmatprep.subr.bf16.mxu1 %v6870_v50  ;;  %6217 = vmatprep.mubr.bf16.mxu1 %v1080_v33  ;;  %v6880_v33 = vld [vmem:[%s8759_s5 + $0x68] sm:$0xff]  }
  0x93   : > { %6208 = vmatpush3.bf16.msra.mxu1 %v6870_v50 }
  0x94   : > { %6209 = vmatprep.subr.bf16.mxu1 %v6871_v8 }
  0x97   : > { %6210 = vmatpush3.bf16.msra.mxu1 %v6871_v8 }
  0x98   : > { %6211 = vmatprep.subr.bf16.mxu1 %v6872_v10 }
  0x9b   : > { %6212 = vmatpush3.bf16.msra.mxu1 %v6872_v10 }
  0x9c   : > { %6213 = vmatprep.subr.bf16.mxu1 %v6873_v55 }
  0x9f   : > { %6214 = vmatpush3.bf16.msra.mxu1 %v6873_v55  ;;  %v6884_v55 = vld [vmem:[%s8759_s5 + $0x8] sm:$0xff]  }
  0xa0   : > { %6215 = vmatprep.subr.bf16.mxu1 %v6874_v13 }
  0xa3   : > { %6216 = vmatpush3.bf16.msra.mxu1 %v6874_v13 }
  0xa4   : > { %6321 = vmatprep.subr.bf16.mxu1 %v6875_v12 }
  0xa6   : > { %6218 = vmatmul.mubr.bf16.vlgmr.msra.gmra.mrb[0].mxu1 %v1081_v34  ;;  %v6881_v34 = vld [vmem:[%s8759_s5 + $0x70] sm:$0xff]  }
  0xa7   : > { %6221 = vmatprep.mubr.bf16.mxu1 %v1082_v40  ;;  %6322 = vmatpush3.bf16.msra.mxu1 %v6875_v12 }
  0xa8   : > { %6323 = vmatprep.subr.bf16.mxu1 %v6876_v15 }
  0xab   : > { %6324 = vmatpush3.bf16.msra.mxu1 %v6876_v15 }
  0xac   : > { %6325 = vmatprep.subr.bf16.mxu1 %v6877_v16 }
  0xae   : > { %6222 = vmatmul.mubr.bf16.gmra.mrb[4].mxu1 %v1083_v41 }
  0xaf   : > { %6326 = vmatpush3.bf16.msra.mxu1 %v6877_v16 }
  0xb0   : > { %6327 = vmatprep.subr.bf16.mxu1 %v6878_v17 }
  0xb3   : > { %6328 = vmatpush3.bf16.msra.mxu1 %v6878_v17 }
  0xb4   : > { %6329 = vmatprep.subr.bf16.mxu1 %v6879_v30 }
  0xb7   : > { %6330 = vmatpush3.bf16.msra.mxu1 %v6879_v30 }
  0xb8   : > { %6331 = vmatprep.subr.bf16.mxu1 %v6880_v33 }
  0xbb   : > { %6332 = vmatpush3.bf16.msra.mxu1 %v6880_v33 }
  0xbc   : > { %6333 = vmatprep.subr.bf16.mxu1 %v6881_v34 }
  0xbf   : > { %6334 = vmatpush3.bf16.msra.mxu1 %v6881_v34 }
  0xc0   : > { %6335 = vmatprep.subr.bf16.mxu1 %v6882_v35 }
  0xc3   : > { %6336 = vmatpush3.bf16.msra.mxu1 %v6882_v35 }
  0xc4   : > { %6345 = vmatprep.subr.bf16.mxu1 %v7676_v38 }
 0x15a   : > { %v6315_v39 = vpop.f32.mrb[0].mxu0 }
 0x15b   : > { %v1784_v40 = vpop.f32.mrb[1].mxu0 }
 0x15c   : > { %v6316_v41 = vpop.f32.mrb[2].mxu0 }
 0x15d   : > { %v1787_v14 = vpop.f32.mrb[3].mxu0 }
 0x162   : > { %v6319_v18 = vpop.f32.mrb[4].mxu0 }
 0x163   : > { %v1800_v19 = vpop.f32.mrb[5].mxu0 }
 0x164   : > { %v6320_v20 = vpop.f32.mrb[6].mxu0 }
 0x165   : > { %v1803_v22 = vpop.f32.mrb[7].mxu0 }
 0x179   : > { %v6219_v24 = vpop.f32.mrb[0].mxu1 }
 0x17a   : > { %v6537_v28 = vadd.f32 %v6315_v39, %v6219_v24  ;;  %v1183_v31 = vpop.f32.mrb[1].mxu1  ;;  %v6885_v39 = vld [vmem:[%s8759_s5 + $0x10] sm:$0xff]  }
 0x17b   : > { %v6538_v32 = vadd.f32 %v1784_v40, %v1183_v31  ;;  %v6220_v36 = vpop.f32.mrb[2].mxu1  ;;  %v6888_v31 = vld [vmem:[%s8759_s5 + $0x28] sm:$0xff]  }
 0x17c   : > { %v1832_v42 = vadd.f32 %v6537_v28, %v5407_v25  ;;  %v6539_v21 = vadd.f32 %v6316_v41, %v6220_v36  ;;  %v1186_v43 = vpop.f32.mrb[3].mxu1  ;;  %v6887_v28 = vld [vmem:[%s8759_s5 + $0x20] sm:$0xff]   ;;  %v6890_v36 = vld [vmem:[%s8759_s5 + $0x38] sm:$0xff]  }
 0x17d   : > { %v1830_v29 = vadd.f32 %v6538_v32, %v5407_v25  ;;  %v6540_v45 = vadd.f32 %v1787_v14, %v1186_v43  ;;  %v6889_v32 = vld [vmem:[%s8759_s5 + $0x30] sm:$0xff]  }
 0x17e   : > { %v1840_v51 = vmax.f32 %v1832_v42, 0.0  ;;  %v1833_v53 = vadd.f32 %v6539_v21, %v5407_v25  ;;  %v6891_v42 = vld [vmem:[%s8759_s5 + $0x80] sm:$0xff]  }
 0x17f   : > { %v1838_v57 = vmax.f32 %v1830_v29, 0.0  ;;  %v1831_v58 = vadd.f32 %v6540_v45, %v5407_v25 }
 0x180   : > { %v1855_v59 = vmul.f32 %v5408_v44, %v1840_v51  ;;  %v1841_v60 = vmax.f32 %v1833_v53, 0.0  ;;  %v6892_v51 = vld [vmem:[%s8759_s5 + $0x88] sm:$0xff]  }
 0x181   : > { %v1853_v23 = vmul.f32 %v5408_v44, %v1838_v57  ;;  %v1839_v26 = vmax.f32 %v1831_v58, 0.0  ;;  %v6223_v61 = vpop.f32.mrb[4].mxu1 }
 0x182   : > { %v7688_v27 = vadd.f32 %v5409_v56, %v1855_v59  ;;  %v1856_v37 = vmul.f32 %v5408_v44, %v1841_v60  ;;  %v6541_v46 = vadd.f32 %v6319_v18, %v6223_v61  ;;  %v1199_v47 = vpop.f32.mrb[5].mxu1 }
 0x183   : > { %v7690_v62 = vadd.f32 %v5409_v56, %v1853_v23  ;;  %v1854_v52 = vmul.f32 %v5408_v44, %v1839_v26  ;;  %v6542_v3 = vadd.f32 %v1800_v19, %v1199_v47  ;;  %v6224_v48 = vpop.f32.mrb[6].mxu1  ;;  %v6894_v23 = vld [vmem:[%s8759_s5 + $0x98] sm:$0xff]   ;;  %v7165_v26 = vld [vmem:[#allocation2 + $0x9] sm:$0xff] }
 0x184   : > { %1878 = vst [vmem:[#allocation2 + $0x50] sm:$0xff] %v7688_v27  ;;  %v7693_v49 = vadd.f32 %v5409_v56, %v1856_v37  ;;  %v1836_v54 = vadd.f32 %v6541_v46, %v5407_v25  ;;  %v6543_v63 = vadd.f32 %v6320_v20, %v6224_v48  ;;  %v1202_v0 = vpop.f32.mrb[7].mxu1  ;;  %v6886_v20 = vld [vmem:[%s8759_s5 + $0x18] sm:$0xff]   ;;  %v6895_v37 = vld [vmem:[%s8759_s5 + $0xa0] sm:$0xff]   ;;  %v6896_v46 = vld [vmem:[%s8759_s5 + $0xa8] sm:$0xff]  }
 0x185   : > { %1876 = vst [vmem:[#allocation2 + $0x20] sm:$0xff] %v7690_v62  ;;  %v7696_v1 = vadd.f32 %v5409_v56, %v1854_v52  ;;  %v1834_v2 = vadd.f32 %v6542_v3, %v5407_v25  ;;  %v6544_v4 = vadd.f32 %v1803_v22, %v1202_v0  ;;  %v1920_v9 = vpack.c.bf16 %v7690_v62, %v7698_v7  ;;  %v7164_v22 = vld [vmem:[#allocation2 + $0x7] sm:$0xff]  ;;  %v6897_v47 = vld [vmem:[%s8759_s5 + $0xb0] sm:$0xff]   ;;  %v6898_v52 = vld [vmem:[%s8759_s5 + $0xb8] sm:$0xff]  }
 0x186   : > { %1879 = vst [vmem:[#allocation2 + $0x68] sm:$0xff] %v7693_v49  ;;  %v1844_v11 = vmax.f32 %v1836_v54, 0.0  ;;  %v1837_v50 = vadd.f32 %v6543_v63, %v5407_v25  ;;  %v2476_v5 = vpack.c.bf16 %v7693_v49, %v7688_v27  ;;  %v6899_v3 = vld [vmem:[%s8759_s5 + $0xc0] sm:$0xff]  }
 0x187   : > { %1877 = vst [vmem:[#allocation2 + $0x38] sm:$0xff] %v7696_v1  ;;  %v1842_v6 = vmax.f32 %v1834_v2, 0.0  ;;  %v1835_v8 = vadd.f32 %v6544_v4, %v5407_v25  ;;  %6337 = vmatprep.mubr.bf16.mxu1 %v1920_v9  ;;  %v7708_v10 = vpack.c.bf16 %v7688_v27, %v7696_v1  ;;  %v2475_v13 = vpack.c.bf16 %v7696_v1, %v7690_v62  ;;  %v6900_v4 = vld [vmem:[%s8759_s5 + $0xc8] sm:$0xff]   ;;  %v6914_v62 = vld [vmem:[%s8759_s5 + $0x138] sm:$0xff]   ;;  %v6915_v1 = vld [vmem:[%s8759_s5 + $0x140] sm:$0xff]  }
 0x188   : > { %v1859_v12 = vmul.f32 %v5408_v44, %v1844_v11  ;;  %v1845_v15 = vmax.f32 %v1837_v50, 0.0  ;;  %v6901_v11 = vld [vmem:[%s8759_s5 + $0xd0] sm:$0xff]  }
 0x189   : > { %v1857_v16 = vmul.f32 %v5408_v44, %v1842_v6  ;;  %v1843_v17 = vmax.f32 %v1835_v8, 0.0  ;;  %6338 = vmatmul.mubr.bf16.vlgmr.msra.gmra.mrb[8].mxu1 %v7708_v10 }
 0x18a   : > { %v7716_v30 = vadd.f32 %v5409_v56, %v1859_v12  ;;  %v1860_v33 = vmul.f32 %v5408_v44, %v1845_v15  ;;  %6346 = vmatpush3.bf16.msra.mxu1 %v7676_v38  ;;  %v6903_v15 = vld [vmem:[%s8759_s5 + $0xe0] sm:$0xff]  }
 0x18b   : > { %v7719_v34 = vadd.f32 %v5409_v56, %v1857_v16  ;;  %v1858_v35 = vmul.f32 %v5408_v44, %v1843_v17  ;;  %6347 = vmatprep.subr.bf16.mxu1 %v6884_v55  ;;  %v7771_v44 = vld [vmem:[#allocation2 + $0x4f] sm:$0xff] }
 0x18c   : > { %1882 = vst [vmem:[#allocation2 + $0xb0] sm:$0xff] %v7716_v30  ;;  %v7725_v40 = vadd.f32 %v5409_v56, %v1860_v33  ;;  %v7734_v38 = vld [vmem:[#allocation2 + $0x1f] sm:$0xff]  ;;  %v7825_v63 = vld [vmem:[#allocation2 + $0x51] sm:$0xff]  ;;  %v6904_v16 = vld [vmem:[%s8759_s5 + $0xe8] sm:$0xff]  }
 0x18d   : > { %1880 = vst [vmem:[#allocation2 + $0x80] sm:$0xff] %v7719_v34  ;;  %v7728_v41 = vadd.f32 %v5409_v56, %v1858_v35  ;;  %v7732_v14 = vpack.c.bf16 %v7719_v34, %v7693_v49  ;;  %v1892_v24 = vpack.c.bf16 %v7734_v38, %v7164_v22  ;;  %v7777_v45 = vld [vmem:[#allocation2 + $0x67] sm:$0xff]  ;;  %v6893_v56 = vld [vmem:[%s8759_s5 + $0x90] sm:$0xff]   ;;  %v6906_v33 = vld [vmem:[%s8759_s5 + $0xf8] sm:$0xff]  }
 0x18e   : > { %1883 = vst [vmem:[#allocation2 + $0xc8] sm:$0xff] %v7725_v40  ;;  %6348 = vmatpush3.bf16.msra.mxu1 %v6884_v55  ;;  %v2478_v18 = vpack.c.bf16 %v7725_v40, %v7716_v30  ;;  %v7767_v21 = vld [vmem:[#allocation2 + $0x37] sm:$0xff]  ;;  %v7793_v58 = vld [vmem:[#allocation2 + $0x21] sm:$0xff]  ;;  %v7831_v2 = vld [vmem:[#allocation2 + $0x69] sm:$0xff] }
 0x18f   : > { %1881 = vst [vmem:[#allocation2 + $0x98] sm:$0xff] %v7728_v41  ;;  %6341 = vmatprep.mubr.bf16.mxu1 %v7732_v14  ;;  %6349 = vmatprep.subr.bf16.mxu1 %v6885_v39  ;;  %v7743_v19 = vpack.c.bf16 %v7716_v30, %v7728_v41  ;;  %v2477_v25 = vpack.c.bf16 %v7728_v41, %v7719_v34  ;;  %v7821_v48 = vld [vmem:[#allocation2 + $0x39] sm:$0xff]  ;;  %v6905_v17 = vld [vmem:[%s8759_s5 + $0xf0] sm:$0xff]  }
 0x190   : > { %v7775_v29 = vpack.c.bf16 %v7771_v44, %v7767_v21  ;;  %v2175_v61 = vpack.c.bf16 %v7793_v58, %v7165_v26  ;;  %v7829_v0 = vpack.c.bf16 %v7825_v63, %v7821_v48  ;;  %v6902_v55 = vld [vmem:[%s8759_s5 + $0xd8] sm:$0xff]   ;;  %v2325_v12 = vpack.c.bf16 %v7767_v21, %v7734_v38  ;;  %v6907_v35 = vld [vmem:[%s8759_s5 + $0x100] sm:$0xff]   ;;  %v6908_v38 = vld [vmem:[%s8759_s5 + $0x108] sm:$0xff]  }
 0x191   : > { %6342 = vmatmul.mubr.bf16.gmra.mrb[12].mxu1 %v7743_v19  ;;  %v6909_v22 = vld [vmem:[%s8759_s5 + $0x110] sm:$0xff]   ;;  %v2625_v27 = vpack.c.bf16 %v7821_v48, %v7793_v58  ;;  %v6947_v49 = vld [vmem:[%s8763_s9 + $0x80] ss:$8 sps:$4 sm:$0xff]  }
 0x192   : > { %6350 = vmatpush3.bf16.msra.mxu1 %v6885_v39  ;;  %6361 = vmatprep.mubr.bf16.mxu1 %v1892_v24  ;;  %v2326_v39 = vpack.c.bf16 %v7777_v45, %v7771_v44  ;;  %v6917_v21 = vld [vmem:[%s8759_s5 + $0x150] sm:$0xff]   ;;  %v6919_v30 = vld [vmem:[%s8759_s5 + $0x160] sm:$0xff]  }
 0x193   : > { %6351 = vmatprep.subr.bf16.mxu1 %v6886_v20  ;;  %v7795_v59 = vld [vmem:[#allocation2 + $0xaf] sm:$0xff]  ;;  %v6953_v44 = vld [vmem:[%s8763_s9 + $0xa0] ss:$8 sps:$4 sm:$0xff]  }
 0x194   : > { %v7769_v43 = vld [vmem:[#allocation2 + $0x7f] sm:$0xff]  ;;  %v7847_v6 = vld [vmem:[#allocation2 + $0xb1] sm:$0xff] }
 0x195   : > { %v7784_v53 = vpack.c.bf16 %v7769_v43, %v7777_v45  ;;  %v7823_v54 = vld [vmem:[#allocation2 + $0x81] sm:$0xff]  ;;  %v6952_v34 = vld [vmem:[%s8763_s9 + $0x94] ss:$8 sps:$4 sm:$0xff]   ;;  %v6950_v41 = vld [vmem:[%s8763_s9 + $0x90] ss:$8 sps:$4 sm:$0xff]  }
 0x196   : > { %6352 = vmatpush3.bf16.msra.mxu1 %v6886_v20  ;;  %v7791_v57 = vld [vmem:[#allocation2 + $0x97] sm:$0xff]  ;;  %v7838_v9 = vpack.c.bf16 %v7823_v54, %v7831_v2  ;;  %v7884_v24 = vld [vmem:[#allocation2 + $0xc7] sm:$0xff] }
 0x197   : > { %6353 = vmatprep.subr.bf16.mxu1 %v6887_v28  ;;  %v7799_v60 = vpack.c.bf16 %v7795_v59, %v7791_v57  ;;  %v7845_v50 = vld [vmem:[#allocation2 + $0x99] sm:$0xff]  ;;  %v2327_v20 = vpack.c.bf16 %v7791_v57, %v7769_v43  ;;  %v6929_v48 = vld [vmem:[%s8759_s5 + $0x1b0] sm:$0xff]  }
 0x198   : > { %v7851_v8 = vpack.c.bf16 %v7847_v6, %v7845_v50  ;;  %v6918_v43 = vld [vmem:[%s8759_s5 + $0x158] sm:$0xff]   ;;  %v6923_v58 = vld [vmem:[%s8759_s5 + $0x180] sm:$0xff]   ;;  %v2627_v26 = vpack.c.bf16 %v7845_v50, %v7823_v54 }
 0x199   : > { %v6958_v45 = vld [vmem:[%s8763_s9 + $0xb4] ss:$8 sps:$4 sm:$0xff]   ;;  %v6931_v54 = vld [vmem:[%s8759_s5 + $0x1c0] sm:$0xff]  }
 0x19a   : > { %6354 = vmatpush3.bf16.msra.mxu1 %v6887_v28  ;;  %v2328_v28 = vpack.c.bf16 %v7884_v24, %v7795_v59  ;;  %v6922_v57 = vld [vmem:[%s8759_s5 + $0x178] sm:$0xff]   ;;  %v2626_v59 = vpack.c.bf16 %v7831_v2, %v7825_v63  ;;  %v6932_v63 = vld [vmem:[%s8759_s5 + $0x1c8] sm:$0xff]   ;;  %v6933_v2 = vld [vmem:[%s8759_s5 + $0x1d0] sm:$0xff]  }
 0x19b   : > { %6355 = vmatprep.subr.bf16.mxu1 %v6888_v31  ;;  %v6934_v50 = vld [vmem:[%s8759_s5 + $0x1d8] sm:$0xff]  }
 0x19e   : > { %6356 = vmatpush3.bf16.msra.mxu1 %v6888_v31  ;;  %v6910_v31 = vld [vmem:[%s8759_s5 + $0x118] sm:$0xff]  }
 0x19f   : > { %6357 = vmatprep.subr.bf16.mxu1 %v6889_v32 }
 0x1a2   : > { %6358 = vmatpush3.bf16.msra.mxu1 %v6889_v32  ;;  %v6911_v32 = vld [vmem:[%s8759_s5 + $0x120] sm:$0xff]  }
 0x1a3   : > { %6359 = vmatprep.subr.bf16.mxu1 %v6890_v36 }
 0x1a6   : > { %6360 = vmatpush3.bf16.msra.mxu1 %v6890_v36  ;;  %v6912_v36 = vld [vmem:[%s8759_s5 + $0x128] sm:$0xff]  }
 0x1a7   : > { %6369 = vmatprep.subr.bf16.mxu1 %v6891_v42 }
 0x1a9   : > { %6362 = vmatmul.mubr.bf16.vlgmr.msra.gmra.mrb[8].mxu1 %v7775_v29 }
 0x1aa   : > { %6365 = vmatprep.mubr.bf16.mxu1 %v7784_v53  ;;  %6370 = vmatpush3.bf16.msra.mxu1 %v6891_v42  ;;  %v6913_v42 = vld [vmem:[%s8759_s5 + $0x130] sm:$0xff]  }
 0x1ab   : > { %6371 = vmatprep.subr.bf16.mxu1 %v6892_v51 }
 0x1ae   : > { %6372 = vmatpush3.bf16.msra.mxu1 %v6892_v51  ;;  %v6921_v51 = vld [vmem:[%s8759_s5 + $0x170] sm:$0xff]  }
 0x1af   : > { %6373 = vmatprep.subr.bf16.mxu1 %v6893_v56 }
 0x1b1   : > { %6366 = vmatmul.mubr.bf16.gmra.mrb[12].mxu1 %v7799_v60 }
 0x1b2   : > { %6374 = vmatpush3.bf16.msra.mxu1 %v6893_v56  ;;  %6385 = vmatprep.mubr.bf16.mxu1 %v2175_v61  ;;  %v6956_v56 = vld [vmem:[%s8763_s9 + $0xb0] ss:$8 sps:$4 sm:$0xff]  }
 0x1b3   : > { %6375 = vmatprep.subr.bf16.mxu1 %v6894_v23  ;;  %v6925_v61 = vld [vmem:[%s8759_s5 + $0x190] sm:$0xff]  }
 0x1b6   : > { %6376 = vmatpush3.bf16.msra.mxu1 %v6894_v23  ;;  %v6924_v23 = vld [vmem:[%s8759_s5 + $0x188] sm:$0xff]  }
 0x1b7   : > { %6377 = vmatprep.subr.bf16.mxu1 %v6895_v37 }
 0x1ba   : > { %6378 = vmatpush3.bf16.msra.mxu1 %v6895_v37  ;;  %v7978_v37 = vld [vmem:[#allocation2 + $0xc9] sm:$0xff] }
 0x1bb   : > { %6379 = vmatprep.subr.bf16.mxu1 %v6896_v46 }
 0x1be   : > { %6380 = vmatpush3.bf16.msra.mxu1 %v6896_v46  ;;  %v2628_v46 = vpack.c.bf16 %v7978_v37, %v7847_v6  ;;  %v6937_v6 = vld [vmem:[%s8759_s5 + $0x1f0] sm:$0xff]  }
 0x1bf   : > { %6381 = vmatprep.subr.bf16.mxu1 %v6897_v47 }
 0x1c2   : > { %6382 = vmatpush3.bf16.msra.mxu1 %v6897_v47  ;;  %v6926_v47 = vld [vmem:[%s8759_s5 + $0x198] sm:$0xff]  }
 0x1c3   : > { %6383 = vmatprep.subr.bf16.mxu1 %v6898_v52 }
 0x1c6   : > { %6384 = vmatpush3.bf16.msra.mxu1 %v6898_v52  ;;  %v6927_v52 = vld [vmem:[%s8759_s5 + $0x1a0] sm:$0xff]  }
 0x1c7   : > { %6393 = vmatprep.subr.bf16.mxu1 %v6899_v3 }
 0x1c9   : > { %6386 = vmatmul.mubr.bf16.vlgmr.msra.gmra.mrb[8].mxu1 %v7829_v0 }
 0x1ca   : > { %6389 = vmatprep.mubr.bf16.mxu1 %v7838_v9  ;;  %6394 = vmatpush3.bf16.msra.mxu1 %v6899_v3  ;;  %v6928_v3 = vld [vmem:[%s8759_s5 + $0x1a8] sm:$0xff]  }
 0x1cb   : > { %6395 = vmatprep.subr.bf16.mxu1 %v6900_v4 }
 0x1ce   : > { %6396 = vmatpush3.bf16.msra.mxu1 %v6900_v4  ;;  %v2774_v4 = vld [vmem:[#allocation2 + $0xdf] sm:$0xff] }
 0x1cf   : > { %6397 = vmatprep.subr.bf16.mxu1 %v6901_v11 }
 0x1d1   : > { %6390 = vmatmul.mubr.bf16.gmra.mrb[12].mxu1 %v7851_v8 }
 0x1d2   : > { %6398 = vmatpush3.bf16.msra.mxu1 %v6901_v11  ;;  %6409 = vmatprep.mubr.bf16.mxu1 %v2325_v12  ;;  %v2778_v11 = vpack.c.bf16 %v2774_v4, %v7884_v24  ;;  %v6940_v12 = vld [vmem:[%s8759_s5 + $0x208] sm:$0xff]   ;;  %v6970_v24 = vld [vmem:[%s8763_s9 + $0xf4] ss:$8 sps:$4 sm:$0xff]  }
 0x1d3   : > { %6399 = vmatprep.subr.bf16.mxu1 %v6902_v55 }
 0x1d6   : > { %6400 = vmatpush3.bf16.msra.mxu1 %v6902_v55  ;;  %v6939_v55 = vld [vmem:[%s8759_s5 + $0x200] sm:$0xff]  }
 0x1d7   : > { %6401 = vmatprep.subr.bf16.mxu1 %v6903_v15 }
 0x1da   : > { %6402 = vmatpush3.bf16.msra.mxu1 %v6903_v15  ;;  %v6941_v15 = vld [vmem:[%s8759_s5 + $0x210] sm:$0xff]  }
 0x1db   : > { %6403 = vmatprep.subr.bf16.mxu1 %v6904_v16 }
 0x1de   : > { %6404 = vmatpush3.bf16.msra.mxu1 %v6904_v16  ;;  %v2928_v16 = vpack.c.bf16 %v7698_v7, %v7725_v40  ;;  %v6944_v40 = vld [vmem:[%s8759_s5 + $0x228] sm:$0xff]  }
 0x1df   : > { %6405 = vmatprep.subr.bf16.mxu1 %v6905_v17 }
 0x1e2   : > { %6406 = vmatpush3.bf16.msra.mxu1 %v6905_v17  ;;  %v6942_v17 = vld [vmem:[%s8759_s5 + $0x218] sm:$0xff]  }
 0x1e3   : > { %6407 = vmatprep.subr.bf16.mxu1 %v6906_v33 }
 0x1e6   : > { %6408 = vmatpush3.bf16.msra.mxu1 %v6906_v33  ;;  %v3074_v33 = vld [vmem:[#allocation2 + $0xe1] sm:$0xff] }
 0x1e7   : > { %6417 = vmatprep.subr.bf16.mxu1 %v6907_v35 }
 0x1e9   : > { %6410 = vmatmul.mubr.bf16.vlgmr.msra.gmra.mrb[8].mxu1 %v2326_v39  ;;  %v6961_v39 = vld [vmem:[%s8763_s9 + $0xc4] ss:$8 sps:$4 sm:$0xff]  }
 0x1ea   : > { %6413 = vmatprep.mubr.bf16.mxu1 %v2327_v20  ;;  %6418 = vmatpush3.bf16.msra.mxu1 %v6907_v35  ;;  %v3078_v35 = vpack.c.bf16 %v3074_v33, %v7978_v37  ;;  %v6967_v20 = vld [vmem:[%s8763_s9 + $0xe4] ss:$8 sps:$4 sm:$0xff]   ;;  %v6971_v37 = vld [vmem:[%s8763_s9] ss:$8 sps:$4 sm:$0xff]   ;;  %v6982_v33 = vld [vmem:[%s8763_s9 + $0x34] ss:$8 sps:$4 sm:$0xff]  }
 0x1eb   : > { %6419 = vmatprep.subr.bf16.mxu1 %v6908_v38 }
 0x1ee   : > { %6420 = vmatpush3.bf16.msra.mxu1 %v6908_v38  ;;  %v6959_v38 = vld [vmem:[%s8763_s9 + $0xc0] ss:$8 sps:$4 sm:$0xff]  }
 0x1ef   : > { %6421 = vmatprep.subr.bf16.mxu1 %v6909_v22 }
 0x1f1   : > { %6414 = vmatmul.mubr.bf16.gmra.mrb[12].mxu1 %v2328_v28  ;;  %v6968_v28 = vld [vmem:[%s8763_s9 + $0xf0] ss:$8 sps:$4 sm:$0xff]  }
 0x1f2   : > { %6422 = vmatpush3.bf16.msra.mxu1 %v6909_v22  ;;  %6433 = vmatprep.mubr.bf16.mxu1 %v2475_v13  ;;  %v6916_v13 = vld [vmem:[%s8759_s5 + $0x148] sm:$0xff]  }
 0x1f3   : > { %6423 = vmatprep.subr.bf16.mxu1 %v6910_v31  ;;  %v6965_v22 = vld [vmem:[%s8763_s9 + $0xe0] ss:$8 sps:$4 sm:$0xff]  }
 0x1f6   : > { %6424 = vmatpush3.bf16.msra.mxu1 %v6910_v31  ;;  %v6973_v31 = vld [vmem:[%s8763_s9 + $0x4] ss:$8 sps:$4 sm:$0xff]  }
 0x1f7   : > { %6425 = vmatprep.subr.bf16.mxu1 %v6911_v32 }
 0x1fa   : > { %6426 = vmatpush3.bf16.msra.mxu1 %v6911_v32  ;;  %v7176_v32 = vmov 0  }
 0x1fb   : > { %6427 = vmatprep.subr.bf16.mxu1 %v6912_v36  ;;  %3447 = vmatprep.mubr.bf16.mxu0 %v7176_v32 }
 0x1fe   : > { %6428 = vmatpush3.bf16.msra.mxu1 %v6912_v36  ;;  %v5610_v36 = vld [vmem:[%s8760_s6] ss:$0 sm:$0xff] }
 0x1ff   : > { %6429 = vmatprep.subr.bf16.mxu1 %v6913_v42 }
 0x202   : > { %6430 = vmatpush3.bf16.msra.mxu1 %v6913_v42 }
 0x203   : > { %6431 = vmatprep.subr.bf16.mxu1 %v6914_v62 }
 0x206   : > { %6432 = vmatpush3.bf16.msra.mxu1 %v6914_v62 }
 0x207   : > { %6441 = vmatprep.subr.bf16.mxu1 %v6915_v1 }
 0x209   : > { %6434 = vmatmul.mubr.bf16.vlgmr.msra.gmra.mrb[8].mxu1 %v2476_v5  ;;  %v6949_v5 = vld [vmem:[%s8763_s9 + $0x84] ss:$8 sps:$4 sm:$0xff]  }
 0x20a   : > { %6437 = vmatprep.mubr.bf16.mxu1 %v2477_v25  ;;  %6442 = vmatpush3.bf16.msra.mxu1 %v6915_v1  ;;  %v6920_v25 = vld [vmem:[%s8759_s5 + $0x168] sm:$0xff]  }
 0x20b   : > { %6443 = vmatprep.subr.bf16.mxu1 %v6916_v13  ;;  %3415 = vmatprep.subr.bf16.mxu0 %v6949_v5 }
 0x20c   : > { %3416 = vmatpush1.bf16.msra.mxu0 %v6947_v49 }
 0x20d   : > { %3417 = vmatprep.subr.bf16.mxu0 %v6952_v34  ;;  %v5612_v34 = vld [vmem:[%s8762_s8] ss:$0 sm:$0xff] }
 0x20e   : > { %6444 = vmatpush3.bf16.msra.mxu1 %v6916_v13  ;;  %v5611_v13 = vld [vmem:[%s8761_s7] ss:$0 sm:$0xff] }
 0x20f   : > { %6445 = vmatprep.subr.bf16.mxu1 %v6917_v21 }
 0x210   : > { %3418 = vmatpush1.bf16.msra.mxu0 %v6950_v41 }
 0x211   : > { %6438 = vmatmul.mubr.bf16.gmra.mrb[12].mxu1 %v2478_v18  ;;  %v6955_v18 = vld [vmem:[%s8763_s9 + $0xa4] ss:$8 sps:$4 sm:$0xff]  }
 0x212   : > { %6446 = vmatpush3.bf16.msra.mxu1 %v6917_v21  ;;  %6457 = vmatprep.mubr.bf16.mxu1 %v2625_v27 }
 0x213   : > { %6447 = vmatprep.subr.bf16.mxu1 %v6918_v43  ;;  %3419 = vmatprep.subr.bf16.mxu0 %v6955_v18 }
 0x214   : > { %3420 = vmatpush1.bf16.msra.mxu0 %v6953_v44 }
 0x215   : > { %3421 = vmatprep.subr.bf16.mxu0 %v6958_v45 }
 0x216   : > { %6448 = vmatpush3.bf16.msra.mxu1 %v6918_v43 }
 0x217   : > { %6449 = vmatprep.subr.bf16.mxu1 %v6919_v30 }
 0x218   : > { %3422 = vmatpush1.bf16.msra.mxu0 %v6956_v56 }
 0x219   : > { %3423 = vmatprep.subr.bf16.mxu0 %v6961_v39 }
 0x21a   : > { %6450 = vmatpush3.bf16.msra.mxu1 %v6919_v30 }
 0x21b   : > { %6451 = vmatprep.subr.bf16.mxu1 %v6920_v25 }
 0x21c   : > { %3424 = vmatpush1.bf16.msra.mxu0 %v6959_v38 }
 0x21e   : > { %6452 = vmatpush3.bf16.msra.mxu1 %v6920_v25 }
 0x21f   : > { %6453 = vmatprep.subr.bf16.mxu1 %v6921_v51 }
 0x222   : > { %6454 = vmatpush3.bf16.msra.mxu1 %v6921_v51 }
 0x223   : > { %6455 = vmatprep.subr.bf16.mxu1 %v6922_v57 }
 0x226   : > { %6456 = vmatpush3.bf16.msra.mxu1 %v6922_v57 }
 0x227   : > { %6465 = vmatprep.subr.bf16.mxu1 %v6923_v58 }
 0x229   : > { %6458 = vmatmul.mubr.bf16.vlgmr.msra.gmra.mrb[8].mxu1 %v2626_v59 }
 0x22a   : > { %6461 = vmatprep.mubr.bf16.mxu1 %v2627_v26  ;;  %6466 = vmatpush3.bf16.msra.mxu1 %v6923_v58 }
 0x22b   : > { %6467 = vmatprep.subr.bf16.mxu1 %v6924_v23 }
 0x22e   : > { %6468 = vmatpush3.bf16.msra.mxu1 %v6924_v23 }
 0x22f   : > { %6469 = vmatprep.subr.bf16.mxu1 %v6925_v61 }
 0x231   : > { %6462 = vmatmul.mubr.bf16.gmra.mrb[12].mxu1 %v2628_v46 }
 0x232   : > { %6470 = vmatpush3.bf16.msra.mxu1 %v6925_v61  ;;  %6481 = vmatprep.mubr.bf16.mxu1 %v7775_v29  ;;  %v6930_v29 = vld [vmem:[%s8759_s5 + $0x1b8] sm:$0xff]  }
 0x233   : > { %6471 = vmatprep.subr.bf16.mxu1 %v6926_v47 }
 0x236   : > { %6472 = vmatpush3.bf16.msra.mxu1 %v6926_v47 }
 0x237   : > { %6473 = vmatprep.subr.bf16.mxu1 %v6927_v52 }
 0x23a   : > { %6474 = vmatpush3.bf16.msra.mxu1 %v6927_v52 }
 0x23b   : > { %6475 = vmatprep.subr.bf16.mxu1 %v6928_v3 }
 0x23e   : > { %6476 = vmatpush3.bf16.msra.mxu1 %v6928_v3 }
 0x23f   : > { %6477 = vmatprep.subr.bf16.mxu1 %v6929_v48 }
 0x242   : > { %6478 = vmatpush3.bf16.msra.mxu1 %v6929_v48  ;;  %v6976_v48 = vld [vmem:[%s8763_s9 + $0x14] ss:$8 sps:$4 sm:$0xff]  }
 0x243   : > { %6479 = vmatprep.subr.bf16.mxu1 %v6930_v29 }
 0x246   : > { %6480 = vmatpush3.bf16.msra.mxu1 %v6930_v29 }
 0x247   : > { %6489 = vmatprep.subr.bf16.mxu1 %v6931_v54 }
 0x249   : > { %6482 = vmatmul.mubr.bf16.vlgmr.msra.gmra.mrb[8].mxu1 %v7784_v53  ;;  %v6935_v53 = vld [vmem:[%s8759_s5 + $0x1e0] sm:$0xff]  }
 0x24a   : > { %6485 = vmatprep.mubr.bf16.mxu1 %v7799_v60  ;;  %6490 = vmatpush3.bf16.msra.mxu1 %v6931_v54  ;;  %v6936_v60 = vld [vmem:[%s8759_s5 + $0x1e8] sm:$0xff]  }
 0x24b   : > { %6491 = vmatprep.subr.bf16.mxu1 %v6932_v63 }
 0x24e   : > { %6492 = vmatpush3.bf16.msra.mxu1 %v6932_v63 }
 0x24f   : > { %6493 = vmatprep.subr.bf16.mxu1 %v6933_v2 }
 0x251   : > { %6486 = vmatmul.mubr.bf16.gmra.mrb[12].mxu1 %v2778_v11 }
 0x252   : > { %6494 = vmatpush3.bf16.msra.mxu1 %v6933_v2  ;;  %6505 = vmatprep.mubr.bf16.mxu1 %v7708_v10  ;;  %v6938_v10 = vld [vmem:[%s8759_s5 + $0x1f8] sm:$0xff]  }
 0x253   : > { %6495 = vmatprep.subr.bf16.mxu1 %v6934_v50 }
 0x256   : > { %6496 = vmatpush3.bf16.msra.mxu1 %v6934_v50 }
 0x257   : > { %6497 = vmatprep.subr.bf16.mxu1 %v6935_v53 }
 0x25a   : > { %6498 = vmatpush3.bf16.msra.mxu1 %v6935_v53 }
 0x25b   : > { %6499 = vmatprep.subr.bf16.mxu1 %v6936_v60 }
 0x25e   : > { %6500 = vmatpush3.bf16.msra.mxu1 %v6936_v60 }
 0x25f   : > { %6501 = vmatprep.subr.bf16.mxu1 %v6937_v6 }
 0x262   : > { %6502 = vmatpush3.bf16.msra.mxu1 %v6937_v6  ;;  %v6974_v6 = vld [vmem:[%s8763_s9 + $0x10] ss:$8 sps:$4 sm:$0xff]  }
 0x263   : > { %6503 = vmatprep.subr.bf16.mxu1 %v6938_v10 }
 0x266   : > { %6504 = vmatpush3.bf16.msra.mxu1 %v6938_v10 }
 0x267   : > { %6513 = vmatprep.subr.bf16.mxu1 %v6939_v55 }
 0x269   : > { %6506 = vmatmul.mubr.bf16.vlgmr.msra.gmra.mrb[8].mxu1 %v7732_v14  ;;  %v6943_v14 = vld [vmem:[%s8759_s5 + $0x220] sm:$0xff]  }
 0x26a   : > { %6509 = vmatprep.mubr.bf16.mxu1 %v7743_v19  ;;  %6514 = vmatpush3.bf16.msra.mxu1 %v6939_v55  ;;  %v6945_v19 = vld [vmem:[%s8759_s5 + $0x230] sm:$0xff]  }
 0x26b   : > { %6515 = vmatprep.subr.bf16.mxu1 %v6940_v12 }
 0x26e   : > { %6516 = vmatpush3.bf16.msra.mxu1 %v6940_v12  ;;  %v6979_v12 = vld [vmem:[%s8763_s9 + $0x24] ss:$8 sps:$4 sm:$0xff]  }
 0x26f   : > { %6517 = vmatprep.subr.bf16.mxu1 %v6941_v15 }
 0x271   : > { %6510 = vmatmul.mubr.bf16.gmra.mrb[12].mxu1 %v2928_v16 }
 0x272   : > { %6518 = vmatpush3.bf16.msra.mxu1 %v6941_v15  ;;  %6529 = vmatprep.mubr.bf16.mxu1 %v7829_v0  ;;  %v6946_v0 = vld [vmem:[%s8759_s5 + $0x238] sm:$0xff]  }
 0x273   : > { %6519 = vmatprep.subr.bf16.mxu1 %v6942_v17 }
 0x276   : > { %6520 = vmatpush3.bf16.msra.mxu1 %v6942_v17 }
 0x277   : > { %6521 = vmatprep.subr.bf16.mxu1 %v6943_v14 }
 0x27a   : > { %6522 = vmatpush3.bf16.msra.mxu1 %v6943_v14 }
 0x27b   : > { %6523 = vmatprep.subr.bf16.mxu1 %v6944_v40 }
 0x27e   : > { %6524 = vmatpush3.bf16.msra.mxu1 %v6944_v40 }
 0x27f   : > { %6525 = vmatprep.subr.bf16.mxu1 %v6945_v19 }
 0x282   : > { %6526 = vmatpush3.bf16.msra.mxu1 %v6945_v19  ;;  %v6977_v19 = vld [vmem:[%s8763_s9 + $0x20] ss:$8 sps:$4 sm:$0xff]  }
 0x283   : > { %6527 = vmatprep.subr.bf16.mxu1 %v6946_v0 }
 0x286   : > { %6528 = vmatpush3.bf16.msra.mxu1 %v6946_v0 }
 0x289   : > { %6530 = vmatmul.mubr.bf16.vlgmr.msra.gmra.mrb[8].mxu1 %v7838_v9  ;;  %v6964_v9 = vld [vmem:[%s8763_s9 + $0xd4] ss:$8 sps:$4 sm:$0xff]  }
 0x28a   : > { %6533 = vmatprep.mubr.bf16.mxu1 %v7851_v8  ;;  %v6962_v8 = vld [vmem:[%s8763_s9 + $0xd0] ss:$8 sps:$4 sm:$0xff]   ;;  %3425 = vmatprep.subr.bf16.mxu0 %v6964_v9 }
 0x28b   : > { %3426 = vmatpush1.bf16.msra.mxu0 %v6962_v8 }
 0x28c   : > { %3427 = vmatprep.subr.bf16.mxu0 %v6967_v20 }
 0x28f   : > { %3428 = vmatpush1.bf16.msra.mxu0 %v6965_v22 }
 0x290   : > { %3429 = vmatprep.subr.bf16.mxu0 %v6970_v24 }
 0x291   : > { %6534 = vmatmul.mubr.bf16.gmra.mrb[12].mxu1 %v3078_v35 }
 0x293   : > { %3430 = vmatpush1.bf16.msra.mxu0 %v6968_v28  ;;  %v6980_v28 = vld [vmem:[%s8763_s9 + $0x30] ss:$8 sps:$4 sm:$0xff]  }
 0x294   : > { %3568 = vmatprep.subr.bf16.mxu0 %v6973_v31 }
 0x35c   : > { %v6531_v42 = vpop.f32.mrb[8].mxu1 }
 0x35d   : > { %v3226_v62 = vadd.f32 %v6531_v42, %v5610_v36  ;;  %v3178_v1 = vpop.f32.mrb[9].mxu1  ;;  %v6985_v42 = vld [vmem:[%s8763_s9 + $0x44] ss:$8 sps:$4 sm:$0xff]  }
 0x35e   : > { %v3224_v21 = vadd.f32 %v5610_v36, %v3178_v1  ;;  %v6532_v43 = vpop.f32.mrb[10].mxu1  ;;  %v6988_v1 = vld [vmem:[%s8763_s9 + $0x54] ss:$8 sps:$4 sm:$0xff]  }
 0x35f   : > { %v3234_v27 = vmax.f32 %v3226_v62, 0.0  ;;  %v3227_v49 = vadd.f32 %v6532_v43, %v5610_v36  ;;  %v3181_v5 = vpop.f32.mrb[11].mxu1  ;;  %v6983_v62 = vld [vmem:[%s8763_s9 + $0x40] ss:$8 sps:$4 sm:$0xff]  }
 0x360   : > { %v3232_v30 = vmax.f32 %v3224_v21, 0.0  ;;  %v3225_v41 = vadd.f32 %v5610_v36, %v3181_v5  ;;  %v6989_v5 = vld [vmem:[%s8763_s9 + $0x60] ss:$8 sps:$4 sm:$0xff]  }
 0x361   : > { %v3249_v18 = vmul.f32 %v5611_v13, %v3234_v27  ;;  %v3235_v25 = vmax.f32 %v3227_v49, 0.0  ;;  %v6986_v27 = vld [vmem:[%s8763_s9 + $0x50] ss:$8 sps:$4 sm:$0xff]   ;;  %v6991_v49 = vld [vmem:[%s8763_s9 + $0x64] ss:$8 sps:$4 sm:$0xff]  }
 0x362   : > { %v3247_v44 = vmul.f32 %v5611_v13, %v3232_v30  ;;  %v3233_v45 = vmax.f32 %v3225_v41, 0.0  ;;  %v6992_v30 = vld [vmem:[%s8763_s9 + $0x70] ss:$8 sps:$4 sm:$0xff]   ;;  %v6997_v41 = vld [vmem:[%s8763_s9 + $0x104] ss:$8 sps:$4 sm:$0xff]  }
 0x363   : > { %v8095_v51 = vadd.f32 %v5612_v34, %v3249_v18  ;;  %v3250_v56 = vmul.f32 %v5611_v13, %v3235_v25  ;;  %v3278_v18 = vld [vmem:[#allocation2 + $0x7] sm:$0xff] }
 0x364   : > { %v8097_v57 = vadd.f32 %v5612_v34, %v3247_v44  ;;  %v3248_v58 = vmul.f32 %v5611_v13, %v3233_v45  ;;  %v6535_v59 = vpop.f32.mrb[12].mxu1  ;;  %v6995_v44 = vld [vmem:[%s8763_s9 + $0x100] ss:$8 sps:$4 sm:$0xff]  }
 0x365   : > { %3272 = vst [vmem:[#allocation2 + $0x50] sm:$0xff] %v8095_v51  ;;  %v8100_v23 = vadd.f32 %v5612_v34, %v3250_v56  ;;  %v3230_v26 = vadd.f32 %v6535_v59, %v5610_v36  ;;  %v3194_v61 = vpop.f32.mrb[13].mxu1  ;;  %v7000_v56 = vld [vmem:[%s8763_s9 + $0x114] ss:$8 sps:$4 sm:$0xff]   ;;  %v7003_v59 = vld [vmem:[%s8763_s9 + $0x124] ss:$8 sps:$4 sm:$0xff]  }
 0x366   : > { %3270 = vst [vmem:[#allocation2 + $0x20] sm:$0xff] %v8097_v57  ;;  %v8106_v46 = vadd.f32 %v5612_v34, %v3248_v58  ;;  %v3228_v47 = vadd.f32 %v5610_v36, %v3194_v61  ;;  %v6536_v52 = vpop.f32.mrb[14].mxu1  ;;  %v3314_v3 = vpack.c.bf16 %v8097_v57, %v7698_v7  ;;  %v6998_v58 = vld [vmem:[%s8763_s9 + $0x110] ss:$8 sps:$4 sm:$0xff]   ;;  %v7001_v61 = vld [vmem:[%s8763_s9 + $0x120] ss:$8 sps:$4 sm:$0xff]  }
 0x367   : > { %3273 = vst [vmem:[#allocation2 + $0x68] sm:$0xff] %v8100_v23  ;;  %v3238_v29 = vmax.f32 %v3230_v26, 0.0  ;;  %v3231_v54 = vadd.f32 %v6536_v52, %v5610_v36  ;;  %v3197_v63 = vpop.f32.mrb[15].mxu1  ;;  %v4046_v2 = vpack.c.bf16 %v8100_v23, %v8095_v51  ;;  %v7006_v52 = vld [vmem:[%s8763_s9 + $0x134] ss:$8 sps:$4 sm:$0xff]  }
 0x368   : > { %3271 = vst [vmem:[#allocation2 + $0x38] sm:$0xff] %v8106_v46  ;;  %v3236_v4 = vmax.f32 %v3228_v47, 0.0  ;;  %v3229_v11 = vadd.f32 %v5610_v36, %v3197_v63  ;;  %3448 = vmatmul.mubr.bf16.vlgmr.msra.gmra.mrb[8].mxu0 %v3314_v3  ;;  %v3315_v7 = vpack.c.bf16 %v8095_v51, %v8106_v46  ;;  %v4045_v50 = vpack.c.bf16 %v8106_v46, %v8097_v57  ;;  %v7004_v3 = vld [vmem:[%s8763_s9 + $0x130] ss:$8 sps:$4 sm:$0xff]   ;;  %v7078_v57 = vld [vmem:[%s8763_s9 + $0x2b4] ss:$8 sps:$4 sm:$0xff]  }
 0x369   : > { %v3253_v53 = vmul.f32 %v5611_v13, %v3238_v29  ;;  %v3239_v60 = vmax.f32 %v3231_v54, 0.0  ;;  %3569 = vmatpush1.bf16.msra.mxu0 %v6971_v37  ;;  %3457 = vmatprep.mubr.bf16.mxu0 %v7176_v32  ;;  %v7007_v54 = vld [vmem:[%s8763_s9 + $0x140] ss:$8 sps:$4 sm:$0xff]   ;;  %v7076_v46 = vld [vmem:[%s8763_s9 + $0x2b0] ss:$8 sps:$4 sm:$0xff]  }
 0x36a   : > { %v3251_v10 = vmul.f32 %v5611_v13, %v3236_v4  ;;  %v3237_v55 = vmax.f32 %v3229_v11, 0.0  ;;  %3570 = vmatprep.subr.bf16.mxu0 %v6976_v48  ;;  %v7009_v48 = vld [vmem:[%s8763_s9 + $0x144] ss:$8 sps:$4 sm:$0xff]   ;;  %v7012_v11 = vld [vmem:[%s8763_s9 + $0x154] ss:$8 sps:$4 sm:$0xff]  }
 0x36b   : > { %v8128_v15 = vadd.f32 %v5612_v34, %v3253_v53  ;;  %v3254_v16 = vmul.f32 %v5611_v13, %v3239_v60  ;;  %v7015_v53 = vld [vmem:[%s8763_s9 + $0x164] ss:$8 sps:$4 sm:$0xff]   ;;  %v7084_v51 = vld [vmem:[%s8763_s9 + $0x2d4] ss:$8 sps:$4 sm:$0xff]  }
 0x36c   : > { %v8130_v17 = vadd.f32 %v5612_v34, %v3251_v10  ;;  %v3252_v14 = vmul.f32 %v5611_v13, %v3237_v55  ;;  %v8146_v39 = vld [vmem:[#allocation2 + $0x51] sm:$0xff] }
 0x36d   : > { %3276 = vst [vmem:[#allocation2 + $0xb0] sm:$0xff] %v8128_v15  ;;  %v8133_v40 = vadd.f32 %v5612_v34, %v3254_v16  ;;  %3571 = vmatpush1.bf16.msra.mxu0 %v6974_v6  ;;  %v8160_v24 = vld [vmem:[#allocation2 + $0x21] sm:$0xff]  ;;  %v8226_v37 = vld [vmem:[#allocation2 + $0x4f] sm:$0xff] }
 0x36e   : > { %3274 = vst [vmem:[#allocation2 + $0x80] sm:$0xff] %v8130_v17  ;;  %v8139_v0 = vadd.f32 %v5612_v34, %v3252_v14  ;;  %3572 = vmatprep.subr.bf16.mxu0 %v6979_v12  ;;  %v3316_v35 = vpack.c.bf16 %v8130_v17, %v8100_v23  ;;  %v8148_v38 = vld [vmem:[#allocation2 + $0x69] sm:$0xff]  ;;  %v6994_v34 = vld [vmem:[%s8763_s9 + $0x74] ss:$8 sps:$4 sm:$0xff]  }
 0x36f   : > { %3277 = vst [vmem:[#allocation2 + $0xc8] sm:$0xff] %v8133_v40  ;;  %v8151_v9 = vld [vmem:[#allocation2 + $0x39] sm:$0xff]  ;;  %v4048_v8 = vpack.c.bf16 %v8133_v40, %v8128_v15  ;;  %v4244_v20 = vpack.c.bf16 %v8148_v38, %v8146_v39  ;;  %v8248_v63 = vld [vmem:[#allocation2 + $0x67] sm:$0xff] }
 0x370   : > { %3275 = vst [vmem:[#allocation2 + $0x98] sm:$0xff] %v8139_v0  ;;  %3458 = vmatmul.mubr.bf16.gmra.mrb[12].mxu0 %v3315_v7  ;;  %v3317_v22 = vpack.c.bf16 %v8128_v15, %v8139_v0  ;;  %v4047_v31 = vpack.c.bf16 %v8139_v0, %v8130_v17  ;;  %v4243_v36 = vpack.c.bf16 %v8151_v9, %v8160_v24  ;;  %v8205_v25 = vld [vmem:[#allocation2 + $0x1f] sm:$0xff]  ;;  %v8221_v26 = vld [vmem:[#allocation2 + $0x37] sm:$0xff] }
 0x371   : > { %3573 = vmatpush1.bf16.msra.mxu0 %v6977_v19  ;;  %3467 = vmatprep.mubr.bf16.mxu0 %v7176_v32  ;;  %v3286_v45 = vpack.c.bf16 %v8205_v25, %v3278_v18  ;;  %v8230_v47 = vpack.c.bf16 %v8226_v37, %v8221_v26  ;;  %v7010_v7 = vld [vmem:[%s8763_s9 + $0x150] ss:$8 sps:$4 sm:$0xff]   ;;  %v7013_v6 = vld [vmem:[%s8763_s9 + $0x160] ss:$8 sps:$4 sm:$0xff]   ;;  %v7018_v12 = vld [vmem:[%s8763_s9 + $0x174] ss:$8 sps:$4 sm:$0xff]  }
 0x372   : > { %3574 = vmatprep.subr.bf16.mxu0 %v6982_v33  ;;  %v7016_v16 = vld [vmem:[%s8763_s9 + $0x170] ss:$8 sps:$4 sm:$0xff]   ;;  %v7021_v14 = vld [vmem:[%s8763_s9 + $0x184] ss:$8 sps:$4 sm:$0xff]   ;;  %v7019_v33 = vld [vmem:[%s8763_s9 + $0x180] ss:$8 sps:$4 sm:$0xff]  }
 0x373   : > { %v3641_v19 = vld [vmem:[#allocation2 + $0x9] sm:$0xff]  ;;  %v7090_v17 = vld [vmem:[%s8763_s9 + $0x2f4] ss:$8 sps:$4 sm:$0xff]  }
 0x374   : > { %v8270_v10 = vld [vmem:[#allocation2 + $0xaf] sm:$0xff] }
 0x375   : > { %3575 = vmatpush1.bf16.msra.mxu0 %v6980_v28  ;;  %v8179_v13 = vld [vmem:[#allocation2 + $0x81] sm:$0xff]  ;;  %v7022_v28 = vld [vmem:[%s8763_s9 + $0x190] ss:$8 sps:$4 sm:$0xff]   ;;  %v7096_v15 = vld [vmem:[%s8763_s9 + $0x314] ss:$8 sps:$4 sm:$0xff]  }
 0x376   : > { %3576 = vmatprep.subr.bf16.mxu0 %v6985_v42  ;;  %v8243_v29 = vld [vmem:[#allocation2 + $0x7f] sm:$0xff]  ;;  %v7034_v18 = vld [vmem:[%s8763_s9 + $0x1d0] ss:$8 sps:$4 sm:$0xff]  }
 0x377   : > { %v8181_v21 = vld [vmem:[#allocation2 + $0x99] sm:$0xff]  ;;  %v8252_v4 = vpack.c.bf16 %v8243_v29, %v8248_v63  ;;  %v7027_v42 = vld [vmem:[%s8763_s9 + $0x1a4] ss:$8 sps:$4 sm:$0xff]  }
 0x378   : > { %3468 = vmatmul.mubr.bf16.gmra.mrb[16].mxu0 %v3316_v35  ;;  %v4245_v43 = vpack.c.bf16 %v8181_v21, %v8179_v13  ;;  %v8265_v60 = vld [vmem:[#allocation2 + $0x97] sm:$0xff]  ;;  %v3649_v35 = vpack.c.bf16 %v8160_v24, %v3641_v19  ;;  %v7063_v19 = vld [vmem:[%s8763_s9 + $0x264] ss:$8 sps:$4 sm:$0xff]  }
 0x379   : > { %3577 = vmatpush1.bf16.msra.mxu0 %v6983_v62  ;;  %3477 = vmatprep.mubr.bf16.mxu0 %v7176_v32  ;;  %v8274_v55 = vpack.c.bf16 %v8270_v10, %v8265_v60  ;;  %v7025_v62 = vld [vmem:[%s8763_s9 + $0x1a0] ss:$8 sps:$4 sm:$0xff]   ;;  %v7082_v23 = vld [vmem:[%s8763_s9 + $0x2d0] ss:$8 sps:$4 sm:$0xff]  }
 0x37a   : > { %3578 = vmatprep.subr.bf16.mxu0 %v6988_v1  ;;  %v8306_v1 = vpack.c.bf16 %v8146_v39, %v8151_v9  ;;  %v7088_v0 = vld [vmem:[%s8763_s9 + $0x2f0] ss:$8 sps:$4 sm:$0xff]   ;;  %v7102_v9 = vld [vmem:[%s8763_s9 + $0x334] ss:$8 sps:$4 sm:$0xff]  }
 0x37b   : > { %v7094_v40 = vld [vmem:[%s8763_s9 + $0x310] ss:$8 sps:$4 sm:$0xff]   ;;  %v7108_v39 = vld [vmem:[%s8763_s9 + $0x354] ss:$8 sps:$4 sm:$0xff]  }
 0x37c   : > { %v7100_v24 = vld [vmem:[%s8763_s9 + $0x330] ss:$8 sps:$4 sm:$0xff]  }
 0x37d   : > { %3579 = vmatpush1.bf16.msra.mxu0 %v6986_v27  ;;  %v7030_v27 = vld [vmem:[%s8763_s9 + $0x1b4] ss:$8 sps:$4 sm:$0xff]  }
 0x37e   : > { %3580 = vmatprep.subr.bf16.mxu0 %v6991_v49  ;;  %v7028_v49 = vld [vmem:[%s8763_s9 + $0x1b0] ss:$8 sps:$4 sm:$0xff]  }
 0x380   : > { %3478 = vmatmul.mubr.bf16.gmra.mrb[20].mxu0 %v3317_v22  ;;  %v7024_v22 = vld [vmem:[%s8763_s9 + $0x194] ss:$8 sps:$4 sm:$0xff]  }
 0x381   : > { %3581 = vmatpush1.bf16.msra.mxu0 %v6989_v5  ;;  %3600 = vmatprep.mubr.bf16.mxu0 %v7176_v32  ;;  %v7033_v5 = vld [vmem:[%s8763_s9 + $0x1c4] ss:$8 sps:$4 sm:$0xff]  }
 0x382   : > { %3582 = vmatprep.subr.bf16.mxu0 %v6994_v34  ;;  %v7031_v34 = vld [vmem:[%s8763_s9 + $0x1c0] ss:$8 sps:$4 sm:$0xff]  }
 0x385   : > { %3583 = vmatpush1.bf16.msra.mxu0 %v6992_v30  ;;  %v8324_v30 = vpack.c.bf16 %v8179_v13, %v8148_v38  ;;  %v7106_v38 = vld [vmem:[%s8763_s9 + $0x350] ss:$8 sps:$4 sm:$0xff]   ;;  %v7109_v13 = vld [vmem:[%s8763_s9 + $0x360] ss:$8 sps:$4 sm:$0xff]  }
 0x386   : > { %3750 = vmatprep.subr.bf16.mxu0 %v6997_v41  ;;  %v7036_v41 = vld [vmem:[%s8763_s9 + $0x1d4] ss:$8 sps:$4 sm:$0xff]  }
 0x388   : > { %3601 = vmatmul.mubr.bf16.vlgmr.msra.gmra.mrb[8].mxu0 %v3286_v45  ;;  %v7037_v45 = vld [vmem:[%s8763_s9 + $0x1e0] ss:$8 sps:$4 sm:$0xff]  }
 0x389   : > { %3751 = vmatpush1.bf16.msra.mxu0 %v6995_v44  ;;  %3610 = vmatprep.mubr.bf16.mxu0 %v7176_v32  ;;  %v7039_v44 = vld [vmem:[%s8763_s9 + $0x1e4] ss:$8 sps:$4 sm:$0xff]  }
 0x38a   : > { %3752 = vmatprep.subr.bf16.mxu0 %v7000_v56  ;;  %v8340_v56 = vld [vmem:[#allocation2 + $0xb1] sm:$0xff] }
 0x38d   : > { %3753 = vmatpush1.bf16.msra.mxu0 %v6998_v58  ;;  %v8344_v58 = vpack.c.bf16 %v8340_v56, %v8181_v21 }
 0x38e   : > { %3754 = vmatprep.subr.bf16.mxu0 %v7003_v59  ;;  %v7042_v59 = vld [vmem:[%s8763_s9 + $0x1f4] ss:$8 sps:$4 sm:$0xff]  }
 0x390   : > { %3611 = vmatmul.mubr.bf16.gmra.mrb[12].mxu0 %v8230_v47 }
 0x391   : > { %3755 = vmatpush1.bf16.msra.mxu0 %v7001_v61  ;;  %3620 = vmatprep.mubr.bf16.mxu0 %v7176_v32  ;;  %v7040_v61 = vld [vmem:[%s8763_s9 + $0x1f0] ss:$8 sps:$4 sm:$0xff]  }
 0x392   : > { %3756 = vmatprep.subr.bf16.mxu0 %v7006_v52  ;;  %v7045_v52 = vld [vmem:[%s8763_s9 + $0x204] ss:$8 sps:$4 sm:$0xff]  }
 0x395   : > { %3757 = vmatpush1.bf16.msra.mxu0 %v7004_v3  ;;  %v7043_v3 = vld [vmem:[%s8763_s9 + $0x200] ss:$8 sps:$4 sm:$0xff]  }
 0x396   : > { %3758 = vmatprep.subr.bf16.mxu0 %v7009_v48  ;;  %v3847_v48 = vpack.c.bf16 %v8221_v26, %v8205_v25  ;;  %v7049_v25 = vld [vmem:[%s8763_s9 + $0x220] ss:$8 sps:$4 sm:$0xff]   ;;  %v3848_v26 = vpack.c.bf16 %v8248_v63, %v8226_v37  ;;  %v3849_v63 = vpack.c.bf16 %v8265_v60, %v8243_v29 }
 0x397   : > { %v7055_v37 = vld [vmem:[%s8763_s9 + $0x240] ss:$8 sps:$4 sm:$0xff]  }
 0x398   : > { %3621 = vmatmul.mubr.bf16.gmra.mrb[16].mxu0 %v8252_v4  ;;  %v7061_v29 = vld [vmem:[%s8763_s9 + $0x260] ss:$8 sps:$4 sm:$0xff]  }
 0x399   : > { %3759 = vmatpush1.bf16.msra.mxu0 %v7007_v54  ;;  %3630 = vmatprep.mubr.bf16.mxu0 %v7176_v32  ;;  %v7048_v54 = vld [vmem:[%s8763_s9 + $0x214] ss:$8 sps:$4 sm:$0xff]  }
 0x39a   : > { %3760 = vmatprep.subr.bf16.mxu0 %v7012_v11  ;;  %v7046_v11 = vld [vmem:[%s8763_s9 + $0x210] ss:$8 sps:$4 sm:$0xff]  }
 0x39d   : > { %3761 = vmatpush1.bf16.msra.mxu0 %v7010_v7  ;;  %v7051_v7 = vld [vmem:[%s8763_s9 + $0x224] ss:$8 sps:$4 sm:$0xff]  }
 0x39e   : > { %3762 = vmatprep.subr.bf16.mxu0 %v7015_v53  ;;  %v7054_v53 = vld [vmem:[%s8763_s9 + $0x234] ss:$8 sps:$4 sm:$0xff]  }
 0x3a0   : > { %3631 = vmatmul.mubr.bf16.gmra.mrb[20].mxu0 %v8274_v55 }
 0x3a1   : > { %3763 = vmatpush1.bf16.msra.mxu0 %v7013_v6  ;;  %3782 = vmatprep.mubr.bf16.mxu0 %v7176_v32  ;;  %v7052_v6 = vld [vmem:[%s8763_s9 + $0x230] ss:$8 sps:$4 sm:$0xff]  }
 0x3a2   : > { %3764 = vmatprep.subr.bf16.mxu0 %v7018_v12  ;;  %v7057_v12 = vld [vmem:[%s8763_s9 + $0x244] ss:$8 sps:$4 sm:$0xff]  }
 0x3a5   : > { %3765 = vmatpush1.bf16.msra.mxu0 %v7016_v16  ;;  %v7060_v16 = vld [vmem:[%s8763_s9 + $0x254] ss:$8 sps:$4 sm:$0xff]  }
 0x3a6   : > { %3948 = vmatprep.subr.bf16.mxu0 %v7021_v14  ;;  %v7058_v14 = vld [vmem:[%s8763_s9 + $0x250] ss:$8 sps:$4 sm:$0xff]  }
 0x3a8   : > { %3783 = vmatmul.mubr.bf16.vlgmr.msra.gmra.mrb[8].mxu0 %v3649_v35  ;;  %v7066_v35 = vld [vmem:[%s8763_s9 + $0x274] ss:$8 sps:$4 sm:$0xff]  }
 0x3a9   : > { %3949 = vmatpush1.bf16.msra.mxu0 %v7019_v33  ;;  %3792 = vmatprep.mubr.bf16.mxu0 %v7176_v32  ;;  %v8402_v33 = vld [vmem:[#allocation2 + $0xc7] sm:$0xff] }
 0x3aa   : > { %3950 = vmatprep.subr.bf16.mxu0 %v7024_v22  ;;  %v3850_v60 = vpack.c.bf16 %v8402_v33, %v8270_v10  ;;  %v7064_v22 = vld [vmem:[%s8763_s9 + $0x270] ss:$8 sps:$4 sm:$0xff]   ;;  %v7067_v10 = vld [vmem:[%s8763_s9 + $0x280] ss:$8 sps:$4 sm:$0xff]  }
 0x3ad   : > { %3951 = vmatpush1.bf16.msra.mxu0 %v7022_v28  ;;  %v7069_v28 = vld [vmem:[%s8763_s9 + $0x284] ss:$8 sps:$4 sm:$0xff]  }
 0x3ae   : > { %3952 = vmatprep.subr.bf16.mxu0 %v7027_v42  ;;  %v7072_v42 = vld [vmem:[%s8763_s9 + $0x294] ss:$8 sps:$4 sm:$0xff]  }
 0x3b0   : > { %3793 = vmatmul.mubr.bf16.gmra.mrb[12].mxu0 %v8306_v1 }
 0x3b1   : > { %3953 = vmatpush1.bf16.msra.mxu0 %v7025_v62  ;;  %3802 = vmatprep.mubr.bf16.mxu0 %v7176_v32  ;;  %v7070_v62 = vld [vmem:[%s8763_s9 + $0x290] ss:$8 sps:$4 sm:$0xff]  }
 0x3b2   : > { %3954 = vmatprep.subr.bf16.mxu0 %v7030_v27  ;;  %v7075_v27 = vld [vmem:[%s8763_s9 + $0x2a4] ss:$8 sps:$4 sm:$0xff]  }
 0x3b5   : > { %3955 = vmatpush1.bf16.msra.mxu0 %v7028_v49  ;;  %v7073_v49 = vld [vmem:[%s8763_s9 + $0x2a0] ss:$8 sps:$4 sm:$0xff]  }
 0x3b6   : > { %3956 = vmatprep.subr.bf16.mxu0 %v7033_v5  ;;  %v7079_v5 = vld [vmem:[%s8763_s9 + $0x2c0] ss:$8 sps:$4 sm:$0xff]  }
 0x3b8   : > { %3803 = vmatmul.mubr.bf16.gmra.mrb[16].mxu0 %v8324_v30 }
 0x3b9   : > { %3957 = vmatpush1.bf16.msra.mxu0 %v7031_v34  ;;  %3812 = vmatprep.mubr.bf16.mxu0 %v7176_v32  ;;  %v7085_v34 = vld [vmem:[%s8763_s9 + $0x2e0] ss:$8 sps:$4 sm:$0xff]  }
 0x3ba   : > { %3958 = vmatprep.subr.bf16.mxu0 %v7036_v41  ;;  %v7091_v41 = vld [vmem:[%s8763_s9 + $0x300] ss:$8 sps:$4 sm:$0xff]  }
 0x3bd   : > { %3959 = vmatpush1.bf16.msra.mxu0 %v7034_v18  ;;  %v7097_v18 = vld [vmem:[%s8763_s9 + $0x320] ss:$8 sps:$4 sm:$0xff]  }
 0x3be   : > { %3960 = vmatprep.subr.bf16.mxu0 %v7039_v44  ;;  %v7103_v44 = vld [vmem:[%s8763_s9 + $0x340] ss:$8 sps:$4 sm:$0xff]  }
 0x3c0   : > { %3813 = vmatmul.mubr.bf16.gmra.mrb[20].mxu0 %v8344_v58 }
 0x3c1   : > { %3961 = vmatpush1.bf16.msra.mxu0 %v7037_v45  ;;  %3980 = vmatprep.mubr.bf16.mxu0 %v7176_v32  ;;  %v8531_v45 = vld [vmem:[#allocation2 + $0xc9] sm:$0xff] }
 0x3c2   : > { %3962 = vmatprep.subr.bf16.mxu0 %v7042_v59  ;;  %v4246_v21 = vpack.c.bf16 %v8531_v45, %v8340_v56  ;;  %v7112_v59 = vld [vmem:[%s8763_s9 + $0x370] ss:$8 sps:$4 sm:$0xff]   ;;  %v7115_v56 = vld [vmem:[%s8763_s9 + $0x380] ss:$8 sps:$4 sm:$0xff]  }
 0x3c5   : > { %3963 = vmatpush1.bf16.msra.mxu0 %v7040_v61  ;;  %v7117_v61 = vld [vmem:[%s8763_s9 + $0x384] ss:$8 sps:$4 sm:$0xff]  }
 0x3c6   : > { %4146 = vmatprep.subr.bf16.mxu0 %v7045_v52  ;;  %v7120_v52 = vld [vmem:[%s8763_s9 + $0x394] ss:$8 sps:$4 sm:$0xff]  }
 0x3c8   : > { %3981 = vmatmul.mubr.bf16.vlgmr.msra.gmra.mrb[8].mxu0 %v3847_v48  ;;  %v7123_v48 = vld [vmem:[%s8763_s9 + $0x3a4] ss:$8 sps:$4 sm:$0xff]  }
 0x3c9   : > { %4147 = vmatpush1.bf16.msra.mxu0 %v7043_v3  ;;  %3990 = vmatprep.mubr.bf16.mxu0 %v7176_v32  ;;  %v7118_v3 = vld [vmem:[%s8763_s9 + $0x390] ss:$8 sps:$4 sm:$0xff]  }
 0x3ca   : > { %4148 = vmatprep.subr.bf16.mxu0 %v7048_v54  ;;  %v7121_v54 = vld [vmem:[%s8763_s9 + $0x3a0] ss:$8 sps:$4 sm:$0xff]  }
 0x3cd   : > { %4149 = vmatpush1.bf16.msra.mxu0 %v7046_v11  ;;  %v7124_v11 = vld [vmem:[%s8763_s9 + $0x3b0] ss:$8 sps:$4 sm:$0xff]  }
 0x3ce   : > { %4150 = vmatprep.subr.bf16.mxu0 %v7051_v7  ;;  %v7129_v7 = vld [vmem:[%s8763_s9 + $0x3c4] ss:$8 sps:$4 sm:$0xff]  }
 0x3d0   : > { %3991 = vmatmul.mubr.bf16.gmra.mrb[12].mxu0 %v3848_v26  ;;  %v7130_v26 = vld [vmem:[%s8763_s9 + $0x3d0] ss:$8 sps:$4 sm:$0xff]  }
 0x3d1   : > { %4151 = vmatpush1.bf16.msra.mxu0 %v7049_v25  ;;  %4000 = vmatprep.mubr.bf16.mxu0 %v7176_v32  ;;  %v7127_v25 = vld [vmem:[%s8763_s9 + $0x3c0] ss:$8 sps:$4 sm:$0xff]  }
 0x3d2   : > { %4152 = vmatprep.subr.bf16.mxu0 %v7054_v53  ;;  %v7135_v53 = vld [vmem:[%s8763_s9 + $0x3e4] ss:$8 sps:$4 sm:$0xff]  }
 0x3d5   : > { %4153 = vmatpush1.bf16.msra.mxu0 %v7052_v6  ;;  %v4440_v6 = vld [vmem:[#allocation2 + $0xdf] sm:$0xff] }
 0x3d6   : > { %4154 = vmatprep.subr.bf16.mxu0 %v7057_v12  ;;  %v7133_v12 = vld [vmem:[%s8763_s9 + $0x3e0] ss:$8 sps:$4 sm:$0xff]  }
 0x3d8   : > { %4001 = vmatmul.mubr.bf16.gmra.mrb[16].mxu0 %v3849_v63  ;;  %v7136_v63 = vld [vmem:[%s8763_s9 + $0x3f0] ss:$8 sps:$4 sm:$0xff]  }
 0x3d9   : > { %4155 = vmatpush1.bf16.msra.mxu0 %v7055_v37  ;;  %4010 = vmatprep.mubr.bf16.mxu0 %v7176_v32  ;;  %v7138_v37 = vld [vmem:[%s8763_s9 + $0x3f4] ss:$8 sps:$4 sm:$0xff]  }
 0x3da   : > { %4156 = vmatprep.subr.bf16.mxu0 %v7060_v16  ;;  %v7141_v16 = vld [vmem:[%s8763_s9 + $0x404] ss:$8 sps:$4 sm:$0xff]  }
 0x3dd   : > { %4157 = vmatpush1.bf16.msra.mxu0 %v7058_v14  ;;  %v4631_v14 = vld [vmem:[#allocation2 + $0x38] sm:$0xff] }
 0x3de   : > { %4158 = vmatprep.subr.bf16.mxu0 %v7063_v19  ;;  %v7139_v19 = vld [vmem:[%s8763_s9 + $0x400] ss:$8 sps:$4 sm:$0xff]  }
 0x3e0   : > { %4011 = vmatmul.mubr.bf16.gmra.mrb[20].mxu0 %v3850_v60  ;;  %v7144_v60 = vld [vmem:[%s8763_s9 + $0x414] ss:$8 sps:$4 sm:$0xff]  }
 0x3e1   : > { %4159 = vmatpush1.bf16.msra.mxu0 %v7061_v29  ;;  %4178 = vmatprep.mubr.bf16.mxu0 %v7176_v32 }
 0x3e2   : > { %4160 = vmatprep.subr.bf16.mxu0 %v7066_v35  ;;  %v7142_v35 = vld [vmem:[%s8763_s9 + $0x410] ss:$8 sps:$4 sm:$0xff]  }
 0x3e5   : > { %4161 = vmatpush1.bf16.msra.mxu0 %v7064_v22  ;;  %v7147_v22 = vld [vmem:[%s8763_s9 + $0x424] ss:$8 sps:$4 sm:$0xff]  }
 0x3e6   : > { %4344 = vmatprep.subr.bf16.mxu0 %v7069_v28  ;;  %v4634_v28 = vld [vmem:[#allocation2 + $0x80] sm:$0xff] }
 0x3e8   : > { %4179 = vmatmul.mubr.bf16.vlgmr.msra.gmra.mrb[8].mxu0 %v4045_v50  ;;  %v7081_v50 = vld [vmem:[%s8763_s9 + $0x2c4] ss:$8 sps:$4 sm:$0xff]  }
 0x3e9   : > { %4345 = vmatpush1.bf16.msra.mxu0 %v7067_v10  ;;  %4188 = vmatprep.mubr.bf16.mxu0 %v7176_v32  ;;  %v7145_v10 = vld [vmem:[%s8763_s9 + $0x420] ss:$8 sps:$4 sm:$0xff]  }
 0x3ea   : > { %4346 = vmatprep.subr.bf16.mxu0 %v7072_v42  ;;  %v4633_v42 = vld [vmem:[#allocation2 + $0x68] sm:$0xff] }
 0x3ed   : > { %4347 = vmatpush1.bf16.msra.mxu0 %v7070_v62  ;;  %v4640_v62 = vpack.c.bf16 %v4634_v28, %v4633_v42 }
 0x3ee   : > { %4348 = vmatprep.subr.bf16.mxu0 %v7075_v27  ;;  %v7150_v27 = vld [vmem:[%s8763_s9 + $0x434] ss:$8 sps:$4 sm:$0xff]  }
 0x3f0   : > { %4189 = vmatmul.mubr.bf16.gmra.mrb[12].mxu0 %v4046_v2  ;;  %v7087_v2 = vld [vmem:[%s8763_s9 + $0x2e4] ss:$8 sps:$4 sm:$0xff]  }
 0x3f1   : > { %4349 = vmatpush1.bf16.msra.mxu0 %v7073_v49  ;;  %4198 = vmatprep.mubr.bf16.mxu0 %v7176_v32  ;;  %v7148_v49 = vld [vmem:[%s8763_s9 + $0x430] ss:$8 sps:$4 sm:$0xff]  }
 0x3f2   : > { %4350 = vmatprep.subr.bf16.mxu0 %v7078_v57  ;;  %v7153_v57 = vld [vmem:[%s8763_s9 + $0x444] ss:$8 sps:$4 sm:$0xff]  }
 0x3f5   : > { %4351 = vmatpush1.bf16.msra.mxu0 %v7076_v46  ;;  %v4635_v46 = vld [vmem:[#allocation2 + $0x98] sm:$0xff] }
 0x3f6   : > { %4352 = vmatprep.subr.bf16.mxu0 %v7081_v50  ;;  %v7151_v50 = vld [vmem:[%s8763_s9 + $0x440] ss:$8 sps:$4 sm:$0xff]  }
 0x3f8   : > { %4199 = vmatmul.mubr.bf16.gmra.mrb[16].mxu0 %v4047_v31  ;;  %v7093_v31 = vld [vmem:[%s8763_s9 + $0x304] ss:$8 sps:$4 sm:$0xff]  }
 0x3f9   : > { %4353 = vmatpush1.bf16.msra.mxu0 %v7079_v5  ;;  %4208 = vmatprep.mubr.bf16.mxu0 %v7176_v32  ;;  %v4636_v5 = vld [vmem:[#allocation2 + $0xb0] sm:$0xff] }
 0x3fa   : > { %4354 = vmatprep.subr.bf16.mxu0 %v7084_v51  ;;  %v4641_v51 = vpack.c.bf16 %v4636_v5, %v4635_v46 }
 0x3fd   : > { %4355 = vmatpush1.bf16.msra.mxu0 %v7082_v23  ;;  %v7156_v23 = vld [vmem:[%s8763_s9 + $0x454] ss:$8 sps:$4 sm:$0xff]  }
 0x3fe   : > { %4356 = vmatprep.subr.bf16.mxu0 %v7087_v2  ;;  %v7154_v2 = vld [vmem:[%s8763_s9 + $0x450] ss:$8 sps:$4 sm:$0xff]  }
 0x400   : > { %4209 = vmatmul.mubr.bf16.gmra.mrb[20].mxu0 %v4048_v8  ;;  %v7099_v8 = vld [vmem:[%s8763_s9 + $0x324] ss:$8 sps:$4 sm:$0xff]  }
 0x401   : > { %4357 = vmatpush1.bf16.msra.mxu0 %v7085_v34  ;;  %4376 = vmatprep.mubr.bf16.mxu0 %v7176_v32  ;;  %v7159_v34 = vld [vmem:[%s8763_s9 + $0x464] ss:$8 sps:$4 sm:$0xff]  }
 0x402   : > { %4358 = vmatprep.subr.bf16.mxu0 %v7090_v17  ;;  %v4637_v17 = vld [vmem:[#allocation2 + $0xc8] sm:$0xff] }
 0x405   : > { %4359 = vmatpush1.bf16.msra.mxu0 %v7088_v0  ;;  %v7157_v0 = vld [vmem:[%s8763_s9 + $0x460] ss:$8 sps:$4 sm:$0xff]  }
 0x406   : > { %4542 = vmatprep.subr.bf16.mxu0 %v7093_v31  ;;  %v7166_v31 = vld [vmem:[#allocation2 + $0x8] sm:$0xff] }
 0x408   : > { %4377 = vmatmul.mubr.bf16.vlgmr.msra.gmra.mrb[8].mxu0 %v4243_v36  ;;  %v7105_v36 = vld [vmem:[%s8763_s9 + $0x344] ss:$8 sps:$4 sm:$0xff]  }
 0x409   : > { %4543 = vmatpush1.bf16.msra.mxu0 %v7091_v41  ;;  %4386 = vmatprep.mubr.bf16.mxu0 %v7176_v32  ;;  %v4642_v41 = vpack.c.bf16 %v7166_v31, %v4637_v17 }
 0x40a   : > { %4544 = vmatprep.subr.bf16.mxu0 %v7096_v15  ;;  %v7162_v15 = vld [vmem:[%s8763_s9 + $0x474] ss:$8 sps:$4 sm:$0xff]  }
 0x40d   : > { %4545 = vmatpush1.bf16.msra.mxu0 %v7094_v40  ;;  %v7160_v40 = vld [vmem:[%s8763_s9 + $0x470] ss:$8 sps:$4 sm:$0xff]  }
 0x40e   : > { %4546 = vmatprep.subr.bf16.mxu0 %v7099_v8  ;;  %v4836_v8 = vld [vmem:[#allocation2 + $0xe1] sm:$0xff] }
 0x410   : > { %4387 = vmatmul.mubr.bf16.gmra.mrb[12].mxu0 %v4244_v20  ;;  %v7111_v20 = vld [vmem:[%s8763_s9 + $0x364] ss:$8 sps:$4 sm:$0xff]  }
 0x411   : > { %4547 = vmatpush1.bf16.msra.mxu0 %v7097_v18  ;;  %4396 = vmatprep.mubr.bf16.mxu0 %v7176_v32  ;;  %v4840_v18 = vpack.c.bf16 %v4836_v8, %v8531_v45 }
 0x412   : > { %4548 = vmatprep.subr.bf16.mxu0 %v7102_v9  ;;  %v5029_v9 = vlaneseq }
 0x415   : > { %4549 = vmatpush1.bf16.msra.mxu0 %v7100_v24  ;;  %v5030_v24 = vshrl.u32 %v5029_v9, 7 }
 0x416   : > { %4550 = vmatprep.subr.bf16.mxu0 %v7105_v36 }
 0x417   : > { %v5031_v36 = vsub.s32 0, %v5030_v24 }
 0x418   : > { %4397 = vmatmul.mubr.bf16.gmra.mrb[16].mxu0 %v4245_v43  ;;  %v7114_v43 = vld [vmem:[%s8763_s9 + $0x374] ss:$8 sps:$4 sm:$0xff]  }
 0x419   : > { %4551 = vmatpush1.bf16.msra.mxu0 %v7103_v44  ;;  %4406 = vmatprep.mubr.bf16.mxu0 %v7176_v32  ;;  %v5035_v44 = vsub.s32 1, %v5030_v24 }
 0x41a   : > { %4552 = vmatprep.subr.bf16.mxu0 %v7108_v39 }
 0x41d   : > { %4553 = vmatpush1.bf16.msra.mxu0 %v7106_v38  ;;  %v5099_v38 = vld [vmem:[%s8766_s12] sm:$0x3] }
 0x41e   : > { %4554 = vmatprep.subr.bf16.mxu0 %v7111_v20 }
 0x420   : > { %4407 = vmatmul.mubr.bf16.gmra.mrb[20].mxu0 %v4246_v21 }
 0x421   : > { %4555 = vmatpush1.bf16.msra.mxu0 %v7109_v13  ;;  %4574 = vmatprep.mubr.bf16.mxu0 %v7176_v32 }
 0x422   : > { %4556 = vmatprep.subr.bf16.mxu0 %v7114_v43 }
 0x425   : > { %4557 = vmatpush1.bf16.msra.mxu0 %v7112_v59 }
 0x426   : > { %4740 = vmatprep.subr.bf16.mxu0 %v7117_v61 }
 0x428   : > { %4575 = vmatmul.mubr.bf16.vlgmr.msra.gmra.mrb[8].mxu0 %v8230_v47  ;;  %v7126_v47 = vld [vmem:[%s8763_s9 + $0x3b4] ss:$8 sps:$4 sm:$0xff]  }
 0x429   : > { %4741 = vmatpush1.bf16.msra.mxu0 %v7115_v56  ;;  %4584 = vmatprep.mubr.bf16.mxu0 %v7176_v32  ;;  %v8680_v56 = vrot.slane %v5099_v38, %v5031_v36 }
 0x42a   : > { %4742 = vmatprep.subr.bf16.mxu0 %v7120_v52 }
 0x42d   : > { %4743 = vmatpush1.bf16.msra.mxu0 %v7118_v3 }
 0x42e   : > { %4744 = vmatprep.subr.bf16.mxu0 %v7123_v48 }
 0x430   : > { %4585 = vmatmul.mubr.bf16.gmra.mrb[12].mxu0 %v8252_v4  ;;  %v7132_v4 = vld [vmem:[%s8763_s9 + $0x3d4] ss:$8 sps:$4 sm:$0xff]  }
 0x431   : > { %4745 = vmatpush1.bf16.msra.mxu0 %v7121_v54  ;;  %4594 = vmatprep.mubr.bf16.mxu0 %v7176_v32  ;;  %v8683_v54 = vrot.slane %v5099_v38, %v5035_v44 }
 0x432   : > { %4746 = vmatprep.subr.bf16.mxu0 %v7126_v47 }
 0x435   : > { %4747 = vmatpush1.bf16.msra.mxu0 %v7124_v11 }
 0x436   : > { %4748 = vmatprep.subr.bf16.mxu0 %v7129_v7 }
 0x438   : > { %4595 = vmatmul.mubr.bf16.gmra.mrb[16].mxu0 %v8274_v55  ;;  %v4444_v55 = vpack.c.bf16 %v4440_v6, %v8402_v33  ;;  %v4632_v33 = vld [vmem:[#allocation2 + $0x50] sm:$0xff] }
 0x439   : > { %4749 = vmatpush1.bf16.msra.mxu0 %v7127_v25  ;;  %4604 = vmatprep.mubr.bf16.mxu0 %v7176_v32  ;;  %v4639_v29 = vpack.c.bf16 %v4632_v33, %v4631_v14 }
 0x43a   : > { %4750 = vmatprep.subr.bf16.mxu0 %v7132_v4 }
 0x43d   : > { %4751 = vmatpush1.bf16.msra.mxu0 %v7130_v26 }
 0x43e   : > { %4752 = vmatprep.subr.bf16.mxu0 %v7135_v53 }
 0x440   : > { %4605 = vmatmul.mubr.bf16.gmra.mrb[20].mxu0 %v4444_v55 }
 0x441   : > { %4753 = vmatpush1.bf16.msra.mxu0 %v7133_v12  ;;  %4772 = vmatprep.mubr.bf16.mxu0 %v7176_v32 }
 0x442   : > { %4754 = vmatprep.subr.bf16.mxu0 %v7138_v37 }
 0x445   : > { %4755 = vmatpush1.bf16.msra.mxu0 %v7136_v63 }
 0x446   : > { %4938 = vmatprep.subr.bf16.mxu0 %v7141_v16 }
 0x448   : > { %4773 = vmatmul.mubr.bf16.vlgmr.msra.gmra.mrb[8].mxu0 %v4639_v29 }
 0x449   : > { %4939 = vmatpush1.bf16.msra.mxu0 %v7139_v19  ;;  %4782 = vmatprep.mubr.bf16.mxu0 %v7176_v32 }
 0x44a   : > { %4940 = vmatprep.subr.bf16.mxu0 %v7144_v60 }
 0x44d   : > { %4941 = vmatpush1.bf16.msra.mxu0 %v7142_v35 }
 0x44e   : > { %4942 = vmatprep.subr.bf16.mxu0 %v7147_v22 }
 0x450   : > { %4783 = vmatmul.mubr.bf16.gmra.mrb[12].mxu0 %v4640_v62 }
 0x451   : > { %4943 = vmatpush1.bf16.msra.mxu0 %v7145_v10  ;;  %4792 = vmatprep.mubr.bf16.mxu0 %v7176_v32 }
 0x452   : > { %4944 = vmatprep.subr.bf16.mxu0 %v7150_v27 }
 0x455   : > { %4945 = vmatpush1.bf16.msra.mxu0 %v7148_v49 }
 0x456   : > { %4946 = vmatprep.subr.bf16.mxu0 %v7153_v57 }
 0x458   : > { %4793 = vmatmul.mubr.bf16.gmra.mrb[16].mxu0 %v4641_v51 }
 0x459   : > { %4947 = vmatpush1.bf16.msra.mxu0 %v7151_v50  ;;  %4802 = vmatprep.mubr.bf16.mxu0 %v7176_v32 }
 0x45a   : > { %4948 = vmatprep.subr.bf16.mxu0 %v7156_v23 }
 0x45d   : > { %4949 = vmatpush1.bf16.msra.mxu0 %v7154_v2 }
 0x45e   : > { %4950 = vmatprep.subr.bf16.mxu0 %v7159_v34 }
 0x460   : > { %4803 = vmatmul.mubr.bf16.gmra.mrb[20].mxu0 %v4642_v41 }
 0x461   : > { %4951 = vmatpush1.bf16.msra.mxu0 %v7157_v0  ;;  %4970 = vmatprep.mubr.bf16.mxu0 %v7176_v32 }
 0x462   : > { %4952 = vmatprep.subr.bf16.mxu0 %v7162_v15 }
 0x465   : > { %4953 = vmatpush1.bf16.msra.mxu0 %v7160_v40 }
 0x468   : > { %4971 = vmatmul.mubr.bf16.vlgmr.msra.gmra.mrb[8].mxu0 %v8306_v1  ;;  %v5027_v1 = vld [vmem:[%s8764_s10] sm:$0x3] }
 0x469   : > { %4980 = vmatprep.mubr.bf16.mxu0 %v7176_v32 }
 0x470   : > { %4981 = vmatmul.mubr.bf16.gmra.mrb[12].mxu0 %v8324_v30  ;;  %v8663_v30 = vrot.slane %v5027_v1, %v5031_v36 }
 0x471   : > { %4990 = vmatprep.mubr.bf16.mxu0 %v7176_v32 }
 0x478   : > { %4991 = vmatmul.mubr.bf16.gmra.mrb[16].mxu0 %v8344_v58  ;;  %v5071_v58 = vld [vmem:[%s8765_s11] sm:$0x3] }
 0x479   : > { %5000 = vmatprep.mubr.bf16.mxu0 %v7176_v32  ;;  %v8668_v32 = vrot.slane %v5027_v1, %v5035_v44  ;;  %v8674_v45 = vrot.slane %v5071_v58, %v5031_v36  ;;  %v8677_v43 = vrot.slane %v5071_v58, %v5035_v44 }
 0x480   : > { %5001 = vmatmul.mubr.bf16.gmra.mrb[20].mxu0 %v4840_v18 }
 0x53b   : > { %v4972_v39 = vpop.f32.mrb[8].mxu0 }
 0x53c   : > { %v5039_v20 = vadd.f32 %v8663_v30, %v4972_v39  ;;  %v4974_v13 = vpop.f32.mrb[9].mxu0 }
 0x53d   : > { %v5040_v21 = vadd.f32 %v8668_v32, %v4974_v13  ;;  %v4976_v59 = vpop.f32.mrb[10].mxu0 }
 0x53e   : > { %v5055_v61 = vmax.f32 %v5039_v20, 0.0  ;;  %v5041_v52 = vadd.f32 %v8663_v30, %v4976_v59  ;;  %v4978_v3 = vpop.f32.mrb[11].mxu0 }
 0x53f   : > { %v5056_v48 = vmax.f32 %v5040_v21, 0.0  ;;  %v5042_v47 = vadd.f32 %v8668_v32, %v4978_v3 }
 0x540   : > { %v5083_v11 = vmul.f32 %v8674_v45, %v5055_v61  ;;  %v5057_v7 = vmax.f32 %v5041_v52, 0.0 }
 0x541   : > { %v5084_v25 = vmul.f32 %v8677_v43, %v5056_v48  ;;  %v5058_v4 = vmax.f32 %v5042_v47, 0.0 }
 0x542   : > { %v5111_v26 = vadd.f32 %v8680_v56, %v5083_v11  ;;  %v5085_v53 = vmul.f32 %v8674_v45, %v5057_v7 }
 0x543   : > { %v5112_v6 = vadd.f32 %v8683_v54, %v5084_v25  ;;  %v5086_v12 = vmul.f32 %v8677_v43, %v5058_v4  ;;  %v4982_v55 = vpop.f32.mrb[12].mxu0 }
 0x544   : > { %5127 = vst [vmem:[%s8690_s19] sm:$0xff] %v5111_v26  ;;  %v5113_v37 = vadd.f32 %v8680_v56, %v5085_v53  ;;  %v5043_v63 = vadd.f32 %v8663_v30, %v4982_v55  ;;  %v4984_v16 = vpop.f32.mrb[13].mxu0 }
 0x545   : > { %5128 = vst [vmem:[%s8690_s19 + $0x8] sm:$0xff] %v5112_v6  ;;  %v5114_v14 = vadd.f32 %v8683_v54, %v5086_v12  ;;  %v5044_v19 = vadd.f32 %v8668_v32, %v4984_v16  ;;  %v4986_v33 = vpop.f32.mrb[14].mxu0 }
 0x546   : > { %5129 = vst [vmem:[%s8690_s19 + $0x10] sm:$0xff] %v5113_v37  ;;  %v5059_v29 = vmax.f32 %v5043_v63, 0.0  ;;  %v5045_v60 = vadd.f32 %v8663_v30, %v4986_v33  ;;  %v4988_v35 = vpop.f32.mrb[15].mxu0 }
 0x547   : > { %5130 = vst [vmem:[%s8690_s19 + $0x18] sm:$0xff] %v5114_v14  ;;  %v5060_v22 = vmax.f32 %v5044_v19, 0.0  ;;  %v5046_v28 = vadd.f32 %v8668_v32, %v4988_v35 }
 0x548   : > { %v5087_v10 = vmul.f32 %v8674_v45, %v5059_v29  ;;  %v5061_v42 = vmax.f32 %v5045_v60, 0.0 }
 0x549   : > { %v5088_v62 = vmul.f32 %v8677_v43, %v5060_v22  ;;  %v5062_v27 = vmax.f32 %v5046_v28, 0.0 }
 0x54a   : > { %v5115_v49 = vadd.f32 %v8680_v56, %v5087_v10  ;;  %v5089_v57 = vmul.f32 %v8674_v45, %v5061_v42 }
 0x54b   : > { %v5116_v46 = vadd.f32 %v8683_v54, %v5088_v62  ;;  %v5090_v50 = vmul.f32 %v8677_v43, %v5062_v27  ;;  %v4992_v5 = vpop.f32.mrb[16].mxu0 }
 0x54c   : > { %5131 = vst [vmem:[%s8690_s19 + $0x20] sm:$0xff] %v5115_v49  ;;  %v5117_v51 = vadd.f32 %v8680_v56, %v5089_v57  ;;  %v5047_v23 = vadd.f32 %v8663_v30, %v4992_v5  ;;  %v4994_v2 = vpop.f32.mrb[17].mxu0 }
 0x54d   : > { %5132 = vst [vmem:[%s8690_s19 + $0x28] sm:$0xff] %v5116_v46  ;;  %v5118_v34 = vadd.f32 %v8683_v54, %v5090_v50  ;;  %v5048_v17 = vadd.f32 %v8668_v32, %v4994_v2  ;;  %v4996_v0 = vpop.f32.mrb[18].mxu0 }
 0x54e   : > { %5133 = vst [vmem:[%s8690_s19 + $0x30] sm:$0xff] %v5117_v51  ;;  %v5063_v31 = vmax.f32 %v5047_v23, 0.0  ;;  %v5049_v41 = vadd.f32 %v8663_v30, %v4996_v0  ;;  %v4998_v15 = vpop.f32.mrb[19].mxu0 }
 0x54f   : > { %5134 = vst [vmem:[%s8690_s19 + $0x38] sm:$0xff] %v5118_v34  ;;  %v5064_v40 = vmax.f32 %v5048_v17, 0.0  ;;  %v5050_v8 = vadd.f32 %v8668_v32, %v4998_v15 }
 0x550   : > { %v5091_v18 = vmul.f32 %v8674_v45, %v5063_v31  ;;  %v5065_v9 = vmax.f32 %v5049_v41, 0.0 }
 0x551   : > { %v5092_v24 = vmul.f32 %v8677_v43, %v5064_v40  ;;  %v5066_v36 = vmax.f32 %v5050_v8, 0.0 }
 0x552   : > { %v5119_v1 = vadd.f32 %v8680_v56, %v5091_v18  ;;  %v5093_v44 = vmul.f32 %v8674_v45, %v5065_v9 }
 0x553   : > { %v5120_v58 = vadd.f32 %v8683_v54, %v5092_v24  ;;  %v5094_v39 = vmul.f32 %v8677_v43, %v5066_v36  ;;  %v5002_v38 = vpop.f32.mrb[20].mxu0 }
 0x554   : > { %5135 = vst [vmem:[%s8690_s19 + $0x40] sm:$0xff] %v5119_v1  ;;  %v5121_v20 = vadd.f32 %v8680_v56, %v5093_v44  ;;  %v5051_v13 = vadd.f32 %v8663_v30, %v5002_v38  ;;  %v5004_v21 = vpop.f32.mrb[21].mxu0 }
 0x555   : > { %5136 = vst [vmem:[%s8690_s19 + $0x48] sm:$0xff] %v5120_v58  ;;  %v5122_v59 = vadd.f32 %v8683_v54, %v5094_v39  ;;  %v5052_v61 = vadd.f32 %v8668_v32, %v5004_v21  ;;  %v5006_v52 = vpop.f32.mrb[22].mxu0 }
 0x556   : > { %5137 = vst [vmem:[%s8690_s19 + $0x50] sm:$0xff] %v5121_v20  ;;  %v5067_v3 = vmax.f32 %v5051_v13, 0.0  ;;  %v5053_v48 = vadd.f32 %v8663_v30, %v5006_v52  ;;  %v5008_v47 = vpop.f32.mrb[23].mxu0 }
 0x557   : > { %5138 = vst [vmem:[%s8690_s19 + $0x58] sm:$0xff] %v5122_v59  ;;  %v5068_v11 = vmax.f32 %v5052_v61, 0.0  ;;  %v5054_v7 = vadd.f32 %v8668_v32, %v5008_v47 }
 0x558   : > { %v5095_v25 = vmul.f32 %v8674_v45, %v5067_v3  ;;  %v5069_v4 = vmax.f32 %v5053_v48, 0.0 }
 0x559   : > { %v5096_v26 = vmul.f32 %v8677_v43, %v5068_v11  ;;  %v5070_v53 = vmax.f32 %v5054_v7, 0.0 }
 0x55a   : > { %v5123_v6 = vadd.f32 %v8680_v56, %v5095_v25  ;;  %v5097_v12 = vmul.f32 %v8674_v45, %v5069_v4 }
 0x55b   : > { %v5124_v55 = vadd.f32 %v8683_v54, %v5096_v26  ;;  %v5098_v30 = vmul.f32 %v8677_v43, %v5070_v53 }
 0x55c   : > { %5139 = vst [vmem:[%s8690_s19 + $0x60] sm:$0xff] %v5123_v6  ;;  %v5125_v37 = vadd.f32 %v8680_v56, %v5097_v12 }
 0x55d   : > { %5140 = vst [vmem:[%s8690_s19 + $0x68] sm:$0xff] %v5124_v55  ;;  %v5126_v32 = vadd.f32 %v8683_v54, %v5098_v30 }
 0x55e   : > { %5141 = vst [vmem:[%s8690_s19 + $0x70] sm:$0xff] %v5125_v37 }
 0x55f   : > { %5142 = vst [vmem:[%s8690_s19 + $0x78] sm:$0xff] %v5126_v32 }
 0x560 PF: > { %s23_s25 = sadd.s32 1, %s7173_s25  }
 0x561   : > { %p20_p4 = scmp.ge.s32.totalorder %s23_s25, 4  }
 0x563   :  { %22 = sbr.rel (!%p20_p4) target bundleno = 1 (0x1), region = 128 }

// kernel: forward.3
= control target key start
LH: loop header
LB: loop body
LE: loop exit
PB: predicated region body
PF: predicated region fallthrough
CT: control target
= control target key end

     0   :  { %s9357_s25 = smov 0   ;;  %s10979_s0 = inlined_call_operand.vmem [shape: f32[2,16,16,9], index: 0, kind: input, shape index: {}]   ;;  %s10980_s1 = inlined_call_operand.vmem [shape: bf16[9,64], index: 1, kind: input, shape index: {}]   ;;  %s10981_s2 = inlined_call_operand.vmem [shape: f32[1,64], index: 2, kind: input, shape index: {}]   ;;  %s10982_s3 = inlined_call_operand.vmem [shape: f32[1,64], index: 3, kind: input, shape index: {}]   ;;  %s10983_s4 = inlined_call_operand.vmem [shape: f32[1,64], index: 4, kind: input, shape index: {}]   ;;  %s10984_s5 = inlined_call_operand.vmem [shape: bf16[9,64,64], index: 5, kind: input, shape index: {}]   ;;  %s10985_s6 = inlined_call_operand.vmem [shape: f32[1,64], index: 6, kind: input, shape index: {}]   ;;  %s10986_s7 = inlined_call_operand.vmem [shape: f32[1,64], index: 7, kind: input, shape index: {}]   ;;  %s10987_s8 = inlined_call_operand.vmem [shape: f32[1,64], index: 8, kind: input, shape index: {}]   ;;  %s10988_s9 = inlined_call_operand.vmem [shape: bf16[9,64,128], index: 9, kind: input, shape index: {}]   ;;  %s10989_s10 = inlined_call_operand.vmem [shape: f32[1,128], index: 10, kind: input, shape index: {}]   ;;  %s10990_s11 = inlined_call_operand.vmem [shape: f32[1,128], index: 11, kind: input, shape index: {}]   ;;  %s10991_s12 = inlined_call_operand.vmem [shape: f32[1,128], index: 12, kind: input, shape index: {}]   ;;  %s10992_s13 = inlined_call_operand.vmem [shape: f32[2,16,16,128], index: 13, kind: output, shape index: {}]  }
   0x1 LB: > { %s7022_s26 = sadd.s32 4294967295, %s9283_s25   ;;  %p7026_p0 = scmp.ge.s32.totalorder %s9283_s25, 1  ;;  %s9283_s25 = sphi %s9357_s25, %s23_s25  }
   0x2   : > { %p387_p1 = scmp.lt.s32.totalorder %s9283_s25, 3 }
   0x4   : > { %p388_p2 = pnand %p7026_p0, %p387_p1 }
   0x5   : > { %v9204_v0 = vld [vmem:[%s10980_s1] sm:$0x1f] (!%p388_p2)   ;;  %vm627_vm0 = vcmask (!%p388_p2), 1043456   ;;  %vm628_vm1 = vcmask (!%p388_p2), 1044480   ;;  %p431_p3 = scmp.lt.s32.totalorder (!%p388_p2), %s7022_s26, 1  ;;  %v9285_v1 = vmov (!%p388_p2), 65535  }
   0x6   : > { %391 = sbr.rel (%p388_p2) target bundleno = 1791 (0x6ff), region = 72  ;;  %v629_v2 = vsel (!%p388_p2), %vm627_vm0, 4294967295, %v9285_v1  ;;  %v9371_v3 = vld [vmem:[%s10984_s5 + $0x20] sm:$0xff] (!%p388_p2)   ;;  %vm442_vm2 = vcmask (!%p388_p2), 523264   ;;  %v9286_v6 = vmov (!%p388_p2), 0.0   ;;  %vm578_vm3 = vcmask (!%p388_p2), 72704  }
   0x7   : > { %v630_v4 = vsel (!%p388_p2), %vm628_vm1, %v629_v2, 0  ;;  %453 = vst.msk [vmem:[#allocation2 + $0x48] sm:$0xff] (!%p388_p2), %vm442_vm2, %v9286_v6  ;;  %443 = vst.msk [vmem:[#allocation2] sm:$0xff] (!%p388_p2), %vm442_vm2, %v9286_v6  ;;  %v9206_v28 = vld [vmem:[%s10984_s5 + $0x28] sm:$0xff] (!%p388_p2)   ;;  %v9207_v56 = vld [vmem:[%s10984_s5 + $0x30] sm:$0xff] (!%p388_p2)   ;;  %vm446_vm4 = vcmask (!%p388_p2), 516096  }
   0x8   : > { %v9375_v5 = vand.u32 (!%p388_p2), %v9204_v0, %v630_v4  ;;  %444 = vst.msk [vmem:[#allocation2 + $0x8] sm:$0xff] (!%p388_p2), %vm442_vm2, %v9286_v6  ;;  %445 = vst.msk [vmem:[#allocation2 + $0x10] sm:$0xff] (!%p388_p2), %vm442_vm2, %v9286_v6  ;;  %v9208_v57 = vld [vmem:[%s10984_s5 + $0x38] sm:$0xff] (!%p388_p2)   ;;  %v9560_v61 = vld [vmem:[%s10984_s5] sm:$0xff] (!%p388_p2)  }
   0x9   : > { %448 = vst.msk [vmem:[#allocation2 + $0x20] sm:$0xff] (!%p388_p2), %vm442_vm2, %v9286_v6  ;;  %449 = vst.msk [vmem:[#allocation2 + $0x28] sm:$0xff] (!%p388_p2), %vm442_vm2, %v9286_v6  ;;  %v9602_v62 = vld [vmem:[%s10981_s2] ss:$0 sm:$0xff] (!%p388_p2) }
   0xa   : > { %450 = vst.msk [vmem:[#allocation2 + $0x30] sm:$0xff] (!%p388_p2), %vm442_vm2, %v9286_v6  ;;  %452 = vst.msk [vmem:[#allocation2 + $0x40] sm:$0xff] (!%p388_p2), %vm442_vm2, %v9286_v6  ;;  %7926 = vmatprep.subr.bf16.mxu0 (!%p388_p2), %v9375_v5  ;;  %8680 = vmatprep.subr.bf16.mxu1 (!%p388_p2), %v9375_v5  ;;  %v9608_v2 = vld [vmem:[%s10982_s3] ss:$0 sm:$0xff] (!%p388_p2) }
   0xb   : > { %454 = vst.msk [vmem:[#allocation2 + $0x50] sm:$0xff] (!%p388_p2), %vm442_vm2, %v9286_v6  ;;  %456 = vst.msk [vmem:[#allocation2 + $0x60] sm:$0xff] (!%p388_p2), %vm442_vm2, %v9286_v6  ;;  %7927 = vmatpush3.bf16.msra.mxu0 (!%p388_p2), %v9375_v5  ;;  %8681 = vmatpush3.bf16.msra.mxu1 (!%p388_p2), %v9375_v5 }
   0xc   : > { %457 = vst.msk [vmem:[#allocation2 + $0x68] sm:$0xff] (!%p388_p2), %vm442_vm2, %v9286_v6  ;;  %458 = vst.msk [vmem:[#allocation2 + $0x70] sm:$0xff] (!%p388_p2), %vm442_vm2, %v9286_v6  ;;  %7960 = vmatprep.subr.bf16.mxu1 (!%p388_p2), %v9371_v3 }
   0xd   : > { %s10994_s26 = smov (!%p431_p3, %s7022_s26), 1  ;;  %460 = vst.msk [vmem:[#allocation2 + $0x80] sm:$0xff] %vm442_vm2, %v9286_v6  ;;  %461 = vst.msk [vmem:[#allocation2 + $0x88] sm:$0xff] %vm442_vm2, %v9286_v6 }
   0xe   : > { %s7547_s14 = sshll.u32 %s10994_s26, 8  ;;  %462 = vst.msk [vmem:[#allocation2 + $0x90] sm:$0xff] %vm442_vm2, %v9286_v6  ;;  %464 = vst.msk [vmem:[#allocation2 + $0xa0] sm:$0xff] %vm442_vm2, %v9286_v6 }
   0xf   : > { %465 = vst.msk [vmem:[#allocation2 + $0xa8] sm:$0xff] %vm442_vm2, %v9286_v6  ;;  %466 = vst.msk [vmem:[#allocation2 + $0xb0] sm:$0xff] %vm442_vm2, %v9286_v6  ;;  %s9492_s17 = scalar_lea.vmem %s10979_s0, %s7547_s14  ;;  %v994_v58 = vld [vmem:[#allocation2 + $0x8] sm:$0xff]  ;;  %v995_v59 = vld [vmem:[#allocation2 + $0x10] sm:$0xff]  ;;  %s10851_s28 = scalar_lea.vmem %s10992_s13, %s7547_s14 }
  0x10   : > { %468 = vst.msk [vmem:[#allocation2 + $0xc0] sm:$0xff] %vm442_vm2, %v9286_v6  ;;  %469 = vst.msk [vmem:[#allocation2 + $0xc8] sm:$0xff] %vm442_vm2, %v9286_v6  ;;  %v516_v7 = vld [vmem:[%s9492_s17] sm:$0xff]  ;;  %v517_v8 = vld [vmem:[%s9492_s17 + $0x8] sm:$0xff]  ;;  %v1026_v60 = vpack.c.bf16 %v995_v59, %v994_v58 }
  0x11   : > { %470 = vst.msk [vmem:[#allocation2 + $0xd0] sm:$0xff] %vm442_vm2, %v9286_v6  ;;  %472 = vst.msk [vmem:[#allocation2 + $0xe0] sm:$0xff] %vm442_vm2, %v9286_v6  ;;  %v518_v9 = vld [vmem:[%s9492_s17 + $0x10] sm:$0xff]  ;;  %v548_v10 = vpack.c.bf16 %v517_v8, %v516_v7  ;;  %v519_v11 = vld [vmem:[%s9492_s17 + $0x18] sm:$0xff] }
  0x12   : > { %473 = vst.msk [vmem:[#allocation2 + $0xe8] sm:$0xff] %vm442_vm2, %v9286_v6  ;;  %474 = vst.msk [vmem:[#allocation2 + $0xf0] sm:$0xff] %vm442_vm2, %v9286_v6  ;;  %v520_v12 = vld [vmem:[%s9492_s17 + $0x20] sm:$0xff]  ;;  %v521_v13 = vld [vmem:[%s9492_s17 + $0x28] sm:$0xff]  ;;  %v549_v14 = vpack.c.bf16 %v519_v11, %v518_v9 }
  0x13   : > { %476 = vst.msk [vmem:[#allocation2 + $0x100] sm:$0xff] %vm442_vm2, %v9286_v6  ;;  %477 = vst.msk [vmem:[#allocation2 + $0x108] sm:$0xff] %vm442_vm2, %v9286_v6  ;;  %v550_v15 = vpack.c.bf16 %v521_v13, %v520_v12  ;;  %7928 = vmatprep.mubr.msk.bf16.mxu0 %vm578_vm3, %v548_v10  ;;  %v522_v16 = vld [vmem:[%s9492_s17 + $0x30] sm:$0xff]  ;;  %v523_v17 = vld [vmem:[%s9492_s17 + $0x38] sm:$0xff] }
  0x14   : > { %478 = vst.msk [vmem:[#allocation2 + $0x110] sm:$0xff] %vm442_vm2, %v9286_v6  ;;  %480 = vst.msk [vmem:[#allocation2 + $0x120] sm:$0xff] %vm442_vm2, %v9286_v6  ;;  %7929 = vmatmul.mubr.msk.bf16.vlgmr.msra.gmra.mrb[0].mxu0 %vm578_vm3, %v549_v14  ;;  %v524_v18 = vld [vmem:[%s9492_s17 + $0x40] sm:$0xff]  ;;  %v525_v19 = vld [vmem:[%s9492_s17 + $0x48] sm:$0xff]  ;;  %v551_v29 = vpack.c.bf16 %v523_v17, %v522_v16 }
  0x15   : > { %481 = vst.msk [vmem:[#allocation2 + $0x128] sm:$0xff] %vm442_vm2, %v9286_v6  ;;  %482 = vst.msk [vmem:[#allocation2 + $0x130] sm:$0xff] %vm442_vm2, %v9286_v6  ;;  %7932 = vmatprep.mubr.msk.bf16.mxu0 %vm578_vm3, %v550_v15  ;;  %v532_v20 = vld [vmem:[%s9492_s17 + $0x80] sm:$0xff]  ;;  %v533_v21 = vld [vmem:[%s9492_s17 + $0x88] sm:$0xff]  ;;  %v552_v31 = vpack.c.bf16 %v525_v19, %v524_v18 }
  0x16   : > { %484 = vst.msk [vmem:[#allocation2 + $0x140] sm:$0xff] %vm442_vm2, %v9286_v6  ;;  %485 = vst.msk [vmem:[#allocation2 + $0x148] sm:$0xff] %vm442_vm2, %v9286_v6  ;;  %v556_v22 = vpack.c.bf16 %v533_v21, %v532_v20  ;;  %v534_v23 = vld [vmem:[%s9492_s17 + $0x90] sm:$0xff]  ;;  %v535_v24 = vld [vmem:[%s9492_s17 + $0x98] sm:$0xff] }
  0x17   : > { %486 = vst.msk [vmem:[#allocation2 + $0x150] sm:$0xff] %vm442_vm2, %v9286_v6  ;;  %488 = vst.msk [vmem:[#allocation2 + $0x160] sm:$0xff] %vm442_vm2, %v9286_v6  ;;  %v536_v25 = vld [vmem:[%s9492_s17 + $0xa0] sm:$0xff]  ;;  %v557_v26 = vpack.c.bf16 %v535_v24, %v534_v23  ;;  %v537_v27 = vld [vmem:[%s9492_s17 + $0xa8] sm:$0xff] }
  0x18   : > { %489 = vst.msk [vmem:[#allocation2 + $0x168] sm:$0xff] %vm442_vm2, %v9286_v6  ;;  %490 = vst.msk [vmem:[#allocation2 + $0x170] sm:$0xff] %vm442_vm2, %v9286_v6  ;;  %7944 = vmatprep.mubr.msk.bf16.mxu1 %vm578_vm3, %v556_v22  ;;  %v558_v30 = vpack.c.bf16 %v537_v27, %v536_v25  ;;  %v538_v32 = vld [vmem:[%s9492_s17 + $0xb0] sm:$0xff]  ;;  %v539_v33 = vld [vmem:[%s9492_s17 + $0xb8] sm:$0xff] }
  0x19   : > { %492 = vst.msk [vmem:[#allocation2 + $0x180] sm:$0xff] %vm442_vm2, %v9286_v6  ;;  %493 = vst.msk [vmem:[#allocation2 + $0x188] sm:$0xff] %vm442_vm2, %v9286_v6  ;;  %7945 = vmatmul.mubr.msk.bf16.vlgmr.msra.gmra.mrb[0].mxu1 %vm578_vm3, %v557_v26  ;;  %v540_v34 = vld [vmem:[%s9492_s17 + $0xc0] sm:$0xff]  ;;  %v541_v35 = vld [vmem:[%s9492_s17 + $0xc8] sm:$0xff]  ;;  %v559_v40 = vpack.c.bf16 %v539_v33, %v538_v32 }
  0x1a   : > { %494 = vst.msk [vmem:[#allocation2 + $0x190] sm:$0xff] %vm442_vm2, %v9286_v6  ;;  %496 = vst.msk [vmem:[#allocation2 + $0x1a0] sm:$0xff] %vm442_vm2, %v9286_v6  ;;  %7948 = vmatprep.mubr.msk.bf16.mxu1 %vm578_vm3, %v558_v30  ;;  %7961 = vmatpush3.bf16.msra.mxu1 %v9371_v3  ;;  %v526_v36 = vld [vmem:[%s9492_s17 + $0x50] sm:$0xff]  ;;  %v527_v37 = vld [vmem:[%s9492_s17 + $0x58] sm:$0xff]  ;;  %v560_v41 = vpack.c.bf16 %v541_v35, %v540_v34 }
  0x1b   : > { %497 = vst.msk [vmem:[#allocation2 + $0x1a8] sm:$0xff] %vm442_vm2, %v9286_v6  ;;  %498 = vst.msk [vmem:[#allocation2 + $0x1b0] sm:$0xff] %vm442_vm2, %v9286_v6  ;;  %7962 = vmatprep.subr.bf16.mxu1 %v9206_v28  ;;  %v528_v38 = vld [vmem:[%s9492_s17 + $0x60] sm:$0xff]  ;;  %v529_v39 = vld [vmem:[%s9492_s17 + $0x68] sm:$0xff]  ;;  %v553_v42 = vpack.c.bf16 %v527_v37, %v526_v36 }
  0x1c   : > { %500 = vst.msk [vmem:[#allocation2 + $0x1c0] sm:$0xff] %vm442_vm2, %v9286_v6  ;;  %501 = vst.msk [vmem:[#allocation2 + $0x1c8] sm:$0xff] %vm442_vm2, %v9286_v6  ;;  %7933 = vmatmul.mubr.msk.bf16.gmra.mrb[4].mxu0 %vm578_vm3, %v551_v29  ;;  %v542_v43 = vld [vmem:[%s9492_s17 + $0xd0] sm:$0xff]  ;;  %v543_v44 = vld [vmem:[%s9492_s17 + $0xd8] sm:$0xff]  ;;  %v554_v45 = vpack.c.bf16 %v529_v39, %v528_v38 }
  0x1d   : > { %502 = vst.msk [vmem:[#allocation2 + $0x1d0] sm:$0xff] %vm442_vm2, %v9286_v6  ;;  %504 = vst.msk [vmem:[#allocation2 + $0x1e0] sm:$0xff] %vm442_vm2, %v9286_v6  ;;  %7936 = vmatprep.mubr.msk.bf16.mxu0 %vm578_vm3, %v552_v31  ;;  %v544_v46 = vld [vmem:[%s9492_s17 + $0xe0] sm:$0xff]  ;;  %v545_v47 = vld [vmem:[%s9492_s17 + $0xe8] sm:$0xff]  ;;  %v561_v50 = vpack.c.bf16 %v543_v44, %v542_v43 }
  0x1e   : > { %505 = vst.msk [vmem:[#allocation2 + $0x1e8] sm:$0xff] %vm442_vm2, %v9286_v6  ;;  %506 = vst.msk [vmem:[#allocation2 + $0x1f0] sm:$0xff] %vm442_vm2, %v9286_v6  ;;  %7963 = vmatpush3.bf16.msra.mxu1 %v9206_v28  ;;  %v530_v48 = vld [vmem:[%s9492_s17 + $0x70] sm:$0xff]  ;;  %v531_v49 = vld [vmem:[%s9492_s17 + $0x78] sm:$0xff]  ;;  %v562_v51 = vpack.c.bf16 %v545_v47, %v544_v46 }
  0x1f   : > { %508 = vst.msk [vmem:[#allocation2 + $0x200] sm:$0xff] %vm442_vm2, %v9286_v6  ;;  %509 = vst.msk [vmem:[#allocation2 + $0x208] sm:$0xff] %vm442_vm2, %v9286_v6  ;;  %v555_v52 = vpack.c.bf16 %v531_v49, %v530_v48  ;;  %v546_v53 = vld [vmem:[%s9492_s17 + $0xf0] sm:$0xff]  ;;  %v547_v54 = vld [vmem:[%s9492_s17 + $0xf8] sm:$0xff]  ;;  %7964 = vmatprep.subr.bf16.mxu1 %v9207_v56 }
  0x20   : > { %510 = vst.msk [vmem:[#allocation2 + $0x210] sm:$0xff] %vm442_vm2, %v9286_v6  ;;  %512 = vst.msk [vmem:[#allocation2 + $0x220] sm:$0xff] %vm442_vm2, %v9286_v6  ;;  %v563_v55 = vpack.c.bf16 %v547_v54, %v546_v53  ;;  %v9615_v8 = vld [vmem:[%s10983_s4] ss:$0 sm:$0xff] }
  0x21   : > { %513 = vst.msk [vmem:[#allocation2 + $0x228] sm:$0xff] %vm442_vm2, %v9286_v6  ;;  %514 = vst.msk [vmem:[#allocation2 + $0x230] sm:$0xff] %vm442_vm2, %v9286_v6  ;;  %7949 = vmatmul.mubr.msk.bf16.gmra.mrb[4].mxu1 %vm578_vm3, %v559_v40 }
  0x22   : > { %7952 = vmatprep.mubr.msk.bf16.mxu1 %vm578_vm3, %v560_v41  ;;  %7965 = vmatpush3.bf16.msra.mxu1 %v9207_v56  ;;  %447 = vst.msk [vmem:[#allocation2 + $0x18] sm:$0x1] %vm446_vm4, %v9286_v6  ;;  %451 = vst.msk [vmem:[#allocation2 + $0x38] sm:$0x1] %vm446_vm4, %v9286_v6 }
  0x23   : > { %7966 = vmatprep.subr.bf16.mxu1 %v9208_v57  ;;  %455 = vst.msk [vmem:[#allocation2 + $0x58] sm:$0x1] %vm446_vm4, %v9286_v6  ;;  %459 = vst.msk [vmem:[#allocation2 + $0x78] sm:$0x1] %vm446_vm4, %v9286_v6 }
  0x24   : > { %7937 = vmatmul.mubr.msk.bf16.gmra.mrb[8].mxu0 %vm578_vm3, %v553_v42  ;;  %463 = vst.msk [vmem:[#allocation2 + $0x98] sm:$0x1] %vm446_vm4, %v9286_v6  ;;  %467 = vst.msk [vmem:[#allocation2 + $0xb8] sm:$0x1] %vm446_vm4, %v9286_v6 }
  0x25   : > { %7940 = vmatprep.mubr.msk.bf16.mxu0 %vm578_vm3, %v554_v45  ;;  %471 = vst.msk [vmem:[#allocation2 + $0xd8] sm:$0x1] %vm446_vm4, %v9286_v6  ;;  %475 = vst.msk [vmem:[#allocation2 + $0xf8] sm:$0x1] %vm446_vm4, %v9286_v6 }
  0x26   : > { %7967 = vmatpush3.bf16.msra.mxu1 %v9208_v57  ;;  %479 = vst.msk [vmem:[#allocation2 + $0x118] sm:$0x1] %vm446_vm4, %v9286_v6  ;;  %483 = vst.msk [vmem:[#allocation2 + $0x138] sm:$0x1] %vm446_vm4, %v9286_v6 }
  0x27   : > { %8000 = vmatprep.subr.bf16.mxu1 %v9560_v61  ;;  %487 = vst.msk [vmem:[#allocation2 + $0x158] sm:$0x1] %vm446_vm4, %v9286_v6  ;;  %491 = vst.msk [vmem:[#allocation2 + $0x178] sm:$0x1] %vm446_vm4, %v9286_v6 }
  0x28   : > { %495 = vst.msk [vmem:[#allocation2 + $0x198] sm:$0x1] %vm446_vm4, %v9286_v6  ;;  %499 = vst.msk [vmem:[#allocation2 + $0x1b8] sm:$0x1] %vm446_vm4, %v9286_v6 }
  0x29   : > { %7953 = vmatmul.mubr.msk.bf16.gmra.mrb[8].mxu1 %vm578_vm3, %v561_v50  ;;  %503 = vst.msk [vmem:[#allocation2 + $0x1d8] sm:$0x1] %vm446_vm4, %v9286_v6  ;;  %507 = vst.msk [vmem:[#allocation2 + $0x1f8] sm:$0x1] %vm446_vm4, %v9286_v6 }
  0x2a   : > { %7956 = vmatprep.mubr.msk.bf16.mxu1 %vm578_vm3, %v562_v51  ;;  %511 = vst.msk [vmem:[#allocation2 + $0x218] sm:$0x1] %vm446_vm4, %v9286_v6  ;;  %515 = vst.msk [vmem:[#allocation2 + $0x238] sm:$0x1] %vm446_vm4, %v9286_v6 }
  0x2c   : > { %7941 = vmatmul.mubr.msk.bf16.gmra.mrb[12].mxu0 %vm578_vm3, %v555_v52 }
  0x31   : > { %7957 = vmatmul.mubr.msk.bf16.gmra.mrb[12].mxu1 %vm578_vm3, %v563_v55 }
  0x32   : > { %7968 = vmatprep.mubr.msk.bf16.mxu1 %vm442_vm2, %v1026_v60 }
  0xe7   : > { %v7930_v63 = vpop.f32.mrb[0].mxu0 }
  0xe8   : > { %v677_v0 = vadd.f32 %v7930_v63, %v9602_v62  ;;  %v668_v1 = vpop.f32.mrb[1].mxu0 }
  0xe9   : > { %v669_v3 = vadd.f32 %v9602_v62, %v668_v1  ;;  %v7931_v4 = vpop.f32.mrb[2].mxu0 }
  0xea   : > { %v797_v5 = vmax.f32 %v677_v0, 0.0  ;;  %v680_v6 = vadd.f32 %v7931_v4, %v9602_v62  ;;  %v671_v7 = vpop.f32.mrb[3].mxu0 }
  0xeb   : > { %v795_v9 = vmax.f32 %v669_v3, 0.0  ;;  %v672_v10 = vadd.f32 %v9602_v62, %v671_v7 }
  0xec   : > { %v836_v11 = vmul.f32 %v9608_v2, %v797_v5  ;;  %v798_v12 = vmax.f32 %v680_v6, 0.0  ;;  %v7946_v13 = vpop.f32.mrb[0].mxu1 }
  0xed   : > { %v834_v14 = vmul.f32 %v9608_v2, %v795_v9  ;;  %v796_v15 = vmax.f32 %v672_v10, 0.0  ;;  %v741_v16 = vadd.f32 %v7946_v13, %v9602_v62  ;;  %v732_v17 = vpop.f32.mrb[1].mxu1 }
  0xee   : > { %v875_v18 = vadd.f32 %v9615_v8, %v836_v11  ;;  %v837_v19 = vmul.f32 %v9608_v2, %v798_v12  ;;  %v733_v20 = vadd.f32 %v9602_v62, %v732_v17  ;;  %v7947_v21 = vpop.f32.mrb[2].mxu1 }
  0xef   : > { %v873_v22 = vadd.f32 %v9615_v8, %v834_v14  ;;  %v835_v23 = vmul.f32 %v9608_v2, %v796_v15  ;;  %v7934_v24 = vpop.f32.mrb[4].mxu0  ;;  %v813_v25 = vmax.f32 %v741_v16, 0.0  ;;  %v744_v26 = vadd.f32 %v7947_v21, %v9602_v62  ;;  %v735_v27 = vpop.f32.mrb[3].mxu1 }
  0xf0   : > { %908 = vst.msk [vmem:[#allocation2 + $0x48] sm:$0xff] %vm442_vm2, %v875_v18  ;;  %v876_v28 = vadd.f32 %v9615_v8, %v837_v19  ;;  %v693_v29 = vadd.f32 %v7934_v24, %v9602_v62  ;;  %v684_v30 = vpop.f32.mrb[5].mxu0  ;;  %v811_v31 = vmax.f32 %v733_v20, 0.0  ;;  %v736_v32 = vadd.f32 %v9602_v62, %v735_v27 }
  0xf1   : > { %906 = vst.msk [vmem:[#allocation2 + $0x28] sm:$0xff] %vm442_vm2, %v873_v22  ;;  %v874_v33 = vadd.f32 %v9615_v8, %v835_v23  ;;  %v685_v34 = vadd.f32 %v9602_v62, %v684_v30  ;;  %v7935_v35 = vpop.f32.mrb[6].mxu0  ;;  %v852_v36 = vmul.f32 %v9608_v2, %v813_v25  ;;  %v814_v37 = vmax.f32 %v744_v26, 0.0 }
  0xf2   : > { %909 = vst.msk [vmem:[#allocation2 + $0x50] sm:$0xff] %vm442_vm2, %v876_v28  ;;  %v801_v38 = vmax.f32 %v693_v29, 0.0  ;;  %v696_v39 = vadd.f32 %v7935_v35, %v9602_v62  ;;  %v687_v40 = vpop.f32.mrb[7].mxu0  ;;  %v850_v41 = vmul.f32 %v9608_v2, %v811_v31  ;;  %v812_v42 = vmax.f32 %v736_v32, 0.0  ;;  %v9210_v31 = vld [vmem:[%s10984_s5 + $0x8] sm:$0xff]  }
  0xf3   : > { %907 = vst.msk [vmem:[#allocation2 + $0x30] sm:$0xff] %vm442_vm2, %v874_v33  ;;  %v799_v43 = vmax.f32 %v685_v34, 0.0  ;;  %v688_v44 = vadd.f32 %v9602_v62, %v687_v40  ;;  %v891_v45 = vadd.f32 %v9615_v8, %v852_v36  ;;  %v853_v46 = vmul.f32 %v9608_v2, %v814_v37 }
  0xf4   : > { %v840_v47 = vmul.f32 %v9608_v2, %v801_v38  ;;  %v802_v48 = vmax.f32 %v696_v39, 0.0  ;;  %v889_v49 = vadd.f32 %v9615_v8, %v850_v41  ;;  %v851_v50 = vmul.f32 %v9608_v2, %v812_v42  ;;  %v7950_v51 = vpop.f32.mrb[4].mxu1 }
  0xf5   : > { %v838_v52 = vmul.f32 %v9608_v2, %v799_v43  ;;  %v800_v53 = vmax.f32 %v688_v44, 0.0  ;;  %924 = vst.msk [vmem:[#allocation2 + $0x148] sm:$0xff] %vm442_vm2, %v891_v45  ;;  %v892_v54 = vadd.f32 %v9615_v8, %v853_v46  ;;  %v757_v55 = vadd.f32 %v7950_v51, %v9602_v62  ;;  %v748_v56 = vpop.f32.mrb[5].mxu1 }
  0xf6   : > { %v879_v57 = vadd.f32 %v9615_v8, %v840_v47  ;;  %v841_v58 = vmul.f32 %v9608_v2, %v802_v48  ;;  %922 = vst.msk [vmem:[#allocation2 + $0x128] sm:$0xff] %vm442_vm2, %v889_v49  ;;  %v890_v59 = vadd.f32 %v9615_v8, %v851_v50  ;;  %v749_v60 = vadd.f32 %v9602_v62, %v748_v56  ;;  %v7951_v63 = vpop.f32.mrb[6].mxu1 }
  0xf7   : > { %v877_v0 = vadd.f32 %v9615_v8, %v838_v52  ;;  %v839_v1 = vmul.f32 %v9608_v2, %v800_v53  ;;  %v7938_v3 = vpop.f32.mrb[8].mxu0  ;;  %925 = vst.msk [vmem:[#allocation2 + $0x150] sm:$0xff] %vm442_vm2, %v892_v54  ;;  %v817_v4 = vmax.f32 %v757_v55, 0.0  ;;  %v760_v5 = vadd.f32 %v7951_v63, %v9602_v62  ;;  %v751_v6 = vpop.f32.mrb[7].mxu1  ;;  %v998_v16 = vld [vmem:[#allocation2 + $0x48] sm:$0xff] }
  0xf8   : > { %912 = vst.msk [vmem:[#allocation2 + $0x88] sm:$0xff] %vm442_vm2, %v879_v57  ;;  %v880_v7 = vadd.f32 %v9615_v8, %v841_v58  ;;  %v709_v9 = vadd.f32 %v7938_v3, %v9602_v62  ;;  %v700_v10 = vpop.f32.mrb[9].mxu0  ;;  %923 = vst.msk [vmem:[#allocation2 + $0x130] sm:$0xff] %vm442_vm2, %v890_v59  ;;  %v815_v11 = vmax.f32 %v749_v60, 0.0  ;;  %v752_v12 = vadd.f32 %v9602_v62, %v751_v6  ;;  %v996_v23 = vld [vmem:[#allocation2 + $0x28] sm:$0xff] }
  0xf9   : > { %910 = vst.msk [vmem:[#allocation2 + $0x68] sm:$0xff] %vm442_vm2, %v877_v0  ;;  %v878_v13 = vadd.f32 %v9615_v8, %v839_v1  ;;  %v701_v14 = vadd.f32 %v9602_v62, %v700_v10  ;;  %v7939_v15 = vpop.f32.mrb[10].mxu0  ;;  %v999_v17 = vld [vmem:[#allocation2 + $0x50] sm:$0xff]  ;;  %v856_v18 = vmul.f32 %v9608_v2, %v817_v4  ;;  %v818_v19 = vmax.f32 %v760_v5, 0.0 }
  0xfa   : > { %913 = vst.msk [vmem:[#allocation2 + $0x90] sm:$0xff] %vm442_vm2, %v880_v7  ;;  %v805_v20 = vmax.f32 %v709_v9, 0.0  ;;  %v712_v21 = vadd.f32 %v7939_v15, %v9602_v62  ;;  %v703_v22 = vpop.f32.mrb[11].mxu0  ;;  %v997_v24 = vld [vmem:[#allocation2 + $0x30] sm:$0xff]  ;;  %v9669_v25 = vpack.c.bf16 %v999_v17, %v998_v16  ;;  %v854_v26 = vmul.f32 %v9608_v2, %v815_v11 }
  0xfb   : > { %911 = vst.msk [vmem:[#allocation2 + $0x70] sm:$0xff] %vm442_vm2, %v878_v13  ;;  %v803_v27 = vmax.f32 %v701_v14, 0.0  ;;  %v704_v28 = vadd.f32 %v9602_v62, %v703_v22  ;;  %v9674_v29 = vpack.c.bf16 %v997_v24, %v996_v23  ;;  %v895_v30 = vadd.f32 %v9615_v8, %v856_v18 }
  0xfc   : > { %v844_v32 = vmul.f32 %v9608_v2, %v805_v20  ;;  %v806_v33 = vmax.f32 %v712_v21, 0.0  ;;  %v893_v34 = vadd.f32 %v9615_v8, %v854_v26  ;;  %v857_v35 = vmul.f32 %v9608_v2, %v818_v19  ;;  %v7954_v36 = vpop.f32.mrb[8].mxu1  ;;  %v9212_v20 = vld [vmem:[%s10984_s5 + $0x18] sm:$0xff]  }
  0xfd   : > { %v842_v37 = vmul.f32 %v9608_v2, %v803_v27  ;;  %v804_v38 = vmax.f32 %v704_v28, 0.0  ;;  %7969 = vmatmul.mubr.msk.bf16.vlgmr.msra.gmra.mrb[16].mxu1 %vm442_vm2, %v9674_v29  ;;  %928 = vst.msk [vmem:[#allocation2 + $0x188] sm:$0xff] %vm442_vm2, %v895_v30  ;;  %v816_v39 = vmax.f32 %v752_v12, 0.0  ;;  %v773_v40 = vadd.f32 %v7954_v36, %v9602_v62  ;;  %v764_v41 = vpop.f32.mrb[9].mxu1 }
  0xfe   : > { %v883_v42 = vadd.f32 %v9615_v8, %v844_v32  ;;  %v845_v43 = vmul.f32 %v9608_v2, %v806_v33  ;;  %8001 = vmatpush3.bf16.msra.mxu1 %v9560_v61  ;;  %7972 = vmatprep.mubr.msk.bf16.mxu1 %vm442_vm2, %v9669_v25  ;;  %926 = vst.msk [vmem:[#allocation2 + $0x168] sm:$0xff] %vm442_vm2, %v893_v34  ;;  %v7955_v45 = vpop.f32.mrb[10].mxu1  ;;  %v9211_v61 = vld [vmem:[%s10984_s5 + $0x10] sm:$0xff]  }
  0xff   : > { %v896_v44 = vadd.f32 %v9615_v8, %v857_v35  ;;  %v881_v46 = vadd.f32 %v9615_v8, %v842_v37  ;;  %v843_v47 = vmul.f32 %v9608_v2, %v804_v38  ;;  %v7942_v48 = vpop.f32.mrb[12].mxu0  ;;  %8002 = vmatprep.subr.bf16.mxu1 %v9210_v31  ;;  %v855_v49 = vmul.f32 %v9608_v2, %v816_v39  ;;  %v767_v51 = vpop.f32.mrb[11].mxu1  ;;  %v1002_v60 = vld [vmem:[#allocation2 + $0x88] sm:$0xff] }
 0x100   : > { %v821_v50 = vmax.f32 %v773_v40, 0.0  ;;  %916 = vst.msk [vmem:[#allocation2 + $0xc8] sm:$0xff] %vm442_vm2, %v883_v42  ;;  %v884_v52 = vadd.f32 %v9615_v8, %v845_v43  ;;  %v725_v53 = vadd.f32 %v7942_v48, %v9602_v62  ;;  %v716_v54 = vpop.f32.mrb[13].mxu0  ;;  %v765_v55 = vadd.f32 %v9602_v62, %v764_v41  ;;  %v1000_v6 = vld [vmem:[#allocation2 + $0x68] sm:$0xff]  ;;  %v9749_v41 = vld [vmem:[%s10984_s5 + $0x40] sm:$0xff]  }
 0x101   : > { %929 = vst.msk [vmem:[#allocation2 + $0x190] sm:$0xff] %vm442_vm2, %v896_v44  ;;  %v776_v56 = vadd.f32 %v7955_v45, %v9602_v62  ;;  %914 = vst.msk [vmem:[#allocation2 + $0xa8] sm:$0xff] %vm442_vm2, %v881_v46  ;;  %v882_v57 = vadd.f32 %v9615_v8, %v843_v47  ;;  %v717_v58 = vadd.f32 %v9602_v62, %v716_v54  ;;  %v7943_v59 = vpop.f32.mrb[14].mxu0  ;;  %v1003_v63 = vld [vmem:[#allocation2 + $0x90] sm:$0xff] }
 0x102   : > { %v894_v0 = vadd.f32 %v9615_v8, %v855_v49  ;;  %v860_v1 = vmul.f32 %v9608_v2, %v821_v50  ;;  %917 = vst.msk [vmem:[#allocation2 + $0xd0] sm:$0xff] %vm442_vm2, %v884_v52  ;;  %v809_v3 = vmax.f32 %v725_v53, 0.0  ;;  %v728_v4 = vadd.f32 %v7943_v59, %v9602_v62  ;;  %v719_v5 = vpop.f32.mrb[15].mxu0  ;;  %v1001_v7 = vld [vmem:[#allocation2 + $0x70] sm:$0xff]  ;;  %8003 = vmatpush3.bf16.msra.mxu1 %v9210_v31 }
 0x103   : > { %v9714_v9 = vpack.c.bf16 %v1003_v63, %v1002_v60  ;;  %v819_v10 = vmax.f32 %v765_v55, 0.0  ;;  %915 = vst.msk [vmem:[#allocation2 + $0xb0] sm:$0xff] %vm442_vm2, %v882_v57  ;;  %v807_v11 = vmax.f32 %v717_v58, 0.0  ;;  %v720_v12 = vadd.f32 %v9602_v62, %v719_v5  ;;  %8004 = vmatprep.subr.bf16.mxu1 %v9211_v61 }
 0x104   : > { %v9718_v13 = vpack.c.bf16 %v1001_v7, %v1000_v6  ;;  %927 = vst.msk [vmem:[#allocation2 + $0x170] sm:$0xff] %vm442_vm2, %v894_v0  ;;  %v899_v14 = vadd.f32 %v9615_v8, %v860_v1  ;;  %v848_v15 = vmul.f32 %v9608_v2, %v809_v3  ;;  %v810_v16 = vmax.f32 %v728_v4, 0.0  ;;  %v7958_v19 = vpop.f32.mrb[12].mxu1  ;;  %v1014_v7 = vld [vmem:[#allocation2 + $0x148] sm:$0xff] }
 0x105   : > { %v858_v17 = vmul.f32 %v9608_v2, %v819_v10  ;;  %v822_v18 = vmax.f32 %v776_v56, 0.0  ;;  %v846_v21 = vmul.f32 %v9608_v2, %v807_v11  ;;  %v808_v22 = vmax.f32 %v720_v12, 0.0  ;;  %v780_v26 = vpop.f32.mrb[13].mxu1  ;;  %v1015_v10 = vld [vmem:[#allocation2 + $0x150] sm:$0xff] }
 0x106   : > { %7973 = vmatmul.mubr.msk.bf16.gmra.mrb[20].mxu1 %vm442_vm2, %v9718_v13  ;;  %932 = vst.msk [vmem:[#allocation2 + $0x1c8] sm:$0xff] %vm442_vm2, %v899_v14  ;;  %v768_v23 = vadd.f32 %v9602_v62, %v767_v51  ;;  %v789_v24 = vadd.f32 %v7958_v19, %v9602_v62  ;;  %v887_v27 = vadd.f32 %v9615_v8, %v848_v15  ;;  %v7959_v32 = vpop.f32.mrb[14].mxu1  ;;  %v1016_v14 = vld [vmem:[#allocation2 + $0x168] sm:$0xff] }
 0x107   : > { %v849_v28 = vmul.f32 %v9608_v2, %v810_v16  ;;  %7976 = vmatprep.mubr.msk.bf16.mxu1 %vm442_vm2, %v9714_v9  ;;  %v897_v30 = vadd.f32 %v9615_v8, %v858_v17  ;;  %v861_v31 = vmul.f32 %v9608_v2, %v822_v18  ;;  %v885_v33 = vadd.f32 %v9615_v8, %v846_v21  ;;  %v783_v37 = vpop.f32.mrb[15].mxu1  ;;  %v1018_v16 = vld [vmem:[#allocation2 + $0x188] sm:$0xff] }
 0x108   : > { %v847_v34 = vmul.f32 %v9608_v2, %v808_v22  ;;  %v820_v35 = vmax.f32 %v768_v23, 0.0  ;;  %v825_v36 = vmax.f32 %v789_v24, 0.0  ;;  %8005 = vmatpush3.bf16.msra.mxu1 %v9211_v61  ;;  %920 = vst.msk [vmem:[#allocation2 + $0x108] sm:$0xff] %vm442_vm2, %v887_v27  ;;  %v781_v40 = vadd.f32 %v9602_v62, %v780_v26  ;;  %v1004_v47 = vld [vmem:[#allocation2 + $0xa8] sm:$0xff]  ;;  %v1019_v17 = vld [vmem:[#allocation2 + $0x190] sm:$0xff] }
 0x109   : > { %v888_v38 = vadd.f32 %v9615_v8, %v849_v28  ;;  %930 = vst.msk [vmem:[#allocation2 + $0x1a8] sm:$0xff] %vm442_vm2, %v897_v30  ;;  %v900_v39 = vadd.f32 %v9615_v8, %v861_v31  ;;  %8006 = vmatprep.subr.bf16.mxu1 %v9212_v20  ;;  %918 = vst.msk [vmem:[#allocation2 + $0xe8] sm:$0xff] %vm442_vm2, %v885_v33  ;;  %v1007_v43 = vld [vmem:[#allocation2 + $0xd0] sm:$0xff]  ;;  %v792_v46 = vadd.f32 %v7959_v32, %v9602_v62  ;;  %v1006_v61 = vld [vmem:[#allocation2 + $0xc8] sm:$0xff] }
 0x10a   : > { %v886_v42 = vadd.f32 %v9615_v8, %v847_v34  ;;  %v859_v44 = vmul.f32 %v9608_v2, %v820_v35  ;;  %v864_v45 = vmul.f32 %v9608_v2, %v825_v36  ;;  %v1005_v48 = vld [vmem:[#allocation2 + $0xb0] sm:$0xff]  ;;  %v823_v49 = vmax.f32 %v781_v40, 0.0  ;;  %v938_v27 = vld [vmem:[#allocation2 + $0x7] sm:$0xff] }
 0x10b   : > { %921 = vst.msk [vmem:[#allocation2 + $0x110] sm:$0xff] %vm442_vm2, %v888_v38  ;;  %933 = vst.msk [vmem:[#allocation2 + $0x1d0] sm:$0xff] %vm442_vm2, %v900_v39  ;;  %v784_v50 = vadd.f32 %v9602_v62, %v783_v37  ;;  %v9760_v51 = vpack.c.bf16 %v1005_v48, %v1004_v47  ;;  %v826_v54 = vmax.f32 %v792_v46, 0.0  ;;  %v9764_v55 = vpack.c.bf16 %v1007_v43, %v1006_v61  ;;  %v1017_v15 = vld [vmem:[#allocation2 + $0x170] sm:$0xff]  ;;  %v940_v36 = vld [vmem:[#allocation2 + $0x27] sm:$0xff] }
 0x10c   : > { %919 = vst.msk [vmem:[#allocation2 + $0xf0] sm:$0xff] %vm442_vm2, %v886_v42  ;;  %v898_v52 = vadd.f32 %v9615_v8, %v859_v44  ;;  %v903_v53 = vadd.f32 %v9615_v8, %v864_v45  ;;  %8007 = vmatpush3.bf16.msra.mxu1 %v9212_v20  ;;  %v862_v56 = vmul.f32 %v9608_v2, %v823_v49  ;;  %v939_v28 = vld [vmem:[#allocation2 + $0xf] sm:$0xff]  ;;  %v942_v38 = vld [vmem:[#allocation2 + $0x47] sm:$0xff] }
 0x10d   : > { %v824_v57 = vmax.f32 %v784_v50, 0.0  ;;  %8040 = vmatprep.subr.bf16.mxu1 %v9749_v41  ;;  %v865_v62 = vmul.f32 %v9608_v2, %v826_v54  ;;  %v9792_v12 = vpack.c.bf16 %v1015_v10, %v1014_v7  ;;  %v9798_v18 = vpack.c.bf16 %v1017_v15, %v1016_v14  ;;  %v1022_v22 = vld [vmem:[#allocation2 + $0x1c8] sm:$0xff]  ;;  %v9215_v42 = vld [vmem:[%s10984_s5 + $0x50] sm:$0xff]   ;;  %v9217_v49 = vld [vmem:[%s10984_s5 + $0x60] sm:$0xff]  }
 0x10e   : > { %7977 = vmatmul.mubr.msk.bf16.gmra.mrb[24].mxu1 %vm442_vm2, %v9760_v51  ;;  %931 = vst.msk [vmem:[#allocation2 + $0x1b0] sm:$0xff] %vm442_vm2, %v898_v52  ;;  %936 = vst.msk [vmem:[#allocation2 + $0x208] sm:$0xff] %vm442_vm2, %v903_v53  ;;  %v901_v58 = vadd.f32 %v9615_v8, %v862_v56  ;;  %v9800_v19 = vpack.c.bf16 %v1019_v17, %v1018_v16  ;;  %v970_v32 = vpack.c.bf16 %v939_v28, %v938_v27  ;;  %v941_v34 = vld [vmem:[#allocation2 + $0x2f] sm:$0xff]  ;;  %v944_v45 = vld [vmem:[#allocation2 + $0x67] sm:$0xff] }
 0x10f   : > { %7980 = vmatprep.mubr.msk.bf16.mxu1 %vm442_vm2, %v9764_v55  ;;  %v863_v59 = vmul.f32 %v9608_v2, %v824_v57  ;;  %v904_v60 = vadd.f32 %v9615_v8, %v865_v62  ;;  %v1010_v5 = vld [vmem:[#allocation2 + $0x108] sm:$0xff]  ;;  %v9819_v37 = vpack.c.bf16 %v941_v34, %v940_v36 }
 0x110   : > { %934 = vst.msk [vmem:[#allocation2 + $0x1e8] sm:$0xff] %vm442_vm2, %v901_v58  ;;  %v1008_v1 = vld [vmem:[#allocation2 + $0xe8] sm:$0xff] }
 0x111   : > { %v902_v63 = vadd.f32 %v9615_v8, %v863_v59  ;;  %937 = vst.msk [vmem:[#allocation2 + $0x210] sm:$0xff] %vm442_vm2, %v904_v60  ;;  %v1012_v2 = vld [vmem:[#allocation2 + $0x128] sm:$0xff]  ;;  %v1013_v8 = vld [vmem:[#allocation2 + $0x130] sm:$0xff] }
 0x112   : > { %v1011_v0 = vld [vmem:[#allocation2 + $0x110] sm:$0xff]  ;;  %v9790_v11 = vpack.c.bf16 %v1013_v8, %v1012_v2  ;;  %v1020_v20 = vld [vmem:[#allocation2 + $0x1a8] sm:$0xff] }
 0x113   : > { %v1009_v3 = vld [vmem:[#allocation2 + $0xf0] sm:$0xff]  ;;  %935 = vst.msk [vmem:[#allocation2 + $0x1f0] sm:$0xff] %vm442_vm2, %v902_v63  ;;  %v9784_v6 = vpack.c.bf16 %v1011_v0, %v1010_v5  ;;  %v9214_v39 = vld [vmem:[%s10984_s5 + $0x48] sm:$0xff]  }
 0x114   : > { %v9782_v4 = vpack.c.bf16 %v1009_v3, %v1008_v1  ;;  %v1023_v23 = vld [vmem:[#allocation2 + $0x1d0] sm:$0xff]  ;;  %v946_v47 = vld [vmem:[#allocation2 + $0x87] sm:$0xff] }
 0x115   : > { %v1021_v21 = vld [vmem:[#allocation2 + $0x1b0] sm:$0xff]  ;;  %v9808_v26 = vpack.c.bf16 %v1023_v23, %v1022_v22  ;;  %v948_v52 = vld [vmem:[#allocation2 + $0xa7] sm:$0xff] }
 0x116   : > { %7981 = vmatmul.mubr.msk.bf16.gmra.mrb[28].mxu1 %vm442_vm2, %v9782_v4  ;;  %v9806_v24 = vpack.c.bf16 %v1021_v21, %v1020_v20  ;;  %v943_v35 = vld [vmem:[#allocation2 + $0x4f] sm:$0xff]  ;;  %v950_v54 = vld [vmem:[#allocation2 + $0xc7] sm:$0xff] }
 0x117   : > { %7984 = vmatprep.mubr.msk.bf16.mxu1 %vm442_vm2, %v9784_v6  ;;  %v1024_v30 = vld [vmem:[#allocation2 + $0x1e8] sm:$0xff]  ;;  %v9824_v40 = vpack.c.bf16 %v943_v35, %v942_v38 }
 0x118   : > { %v945_v43 = vld [vmem:[#allocation2 + $0x6f] sm:$0xff]  ;;  %v952_v58 = vld [vmem:[#allocation2 + $0xe7] sm:$0xff] }
 0x119   : > { %v947_v44 = vld [vmem:[#allocation2 + $0x8f] sm:$0xff]  ;;  %v9834_v46 = vpack.c.bf16 %v945_v43, %v944_v45  ;;  %v954_v60 = vld [vmem:[#allocation2 + $0x107] sm:$0xff] }
 0x11a   : > { %v1025_v31 = vld [vmem:[#allocation2 + $0x1f0] sm:$0xff]  ;;  %v9839_v48 = vpack.c.bf16 %v947_v44, %v946_v47  ;;  %v956_v0 = vld [vmem:[#allocation2 + $0x127] sm:$0xff] }
 0x11b   : > { %v9814_v33 = vpack.c.bf16 %v1025_v31, %v1024_v30  ;;  %v949_v50 = vld [vmem:[#allocation2 + $0xaf] sm:$0xff]  ;;  %v958_v3 = vld [vmem:[#allocation2 + $0x147] sm:$0xff] }
 0x11c   : > { %v951_v61 = vld [vmem:[#allocation2 + $0xcf] sm:$0xff]  ;;  %v9848_v53 = vpack.c.bf16 %v949_v50, %v948_v52  ;;  %v960_v7 = vld [vmem:[#allocation2 + $0x167] sm:$0xff] }
 0x11d   : > { %v9850_v56 = vpack.c.bf16 %v951_v61, %v950_v54  ;;  %v953_v57 = vld [vmem:[#allocation2 + $0xef] sm:$0xff]  ;;  %v962_v14 = vld [vmem:[#allocation2 + $0x187] sm:$0xff] }
 0x11e   : > { %7985 = vmatmul.mubr.msk.bf16.gmra.mrb[32].mxu1 %vm442_vm2, %v9790_v11  ;;  %v955_v62 = vld [vmem:[#allocation2 + $0x10f] sm:$0xff]  ;;  %v9856_v59 = vpack.c.bf16 %v953_v57, %v952_v58  ;;  %v964_v20 = vld [vmem:[#allocation2 + $0x1a7] sm:$0xff] }
 0x11f   : > { %7988 = vmatprep.mubr.msk.bf16.mxu1 %vm442_vm2, %v9792_v12  ;;  %v9858_v63 = vpack.c.bf16 %v955_v62, %v954_v60  ;;  %v957_v1 = vld [vmem:[#allocation2 + $0x12f] sm:$0xff]  ;;  %v966_v22 = vld [vmem:[#allocation2 + $0x1c7] sm:$0xff] }
 0x120   : > { %v959_v5 = vld [vmem:[#allocation2 + $0x14f] sm:$0xff]  ;;  %v9864_v2 = vpack.c.bf16 %v957_v1, %v956_v0  ;;  %v9221_v58 = vld [vmem:[%s10984_s5 + $0x80] sm:$0xff]  }
 0x121   : > { %v9866_v8 = vpack.c.bf16 %v959_v5, %v958_v3  ;;  %v961_v10 = vld [vmem:[#allocation2 + $0x16f] sm:$0xff] }
 0x122   : > { %v963_v15 = vld [vmem:[#allocation2 + $0x18f] sm:$0xff]  ;;  %v9872_v16 = vpack.c.bf16 %v961_v10, %v960_v7 }
 0x123   : > { %v9874_v17 = vpack.c.bf16 %v963_v15, %v962_v14  ;;  %v965_v21 = vld [vmem:[#allocation2 + $0x1af] sm:$0xff] }
 0x124   : > { %v967_v23 = vld [vmem:[#allocation2 + $0x1cf] sm:$0xff]  ;;  %v9880_v27 = vpack.c.bf16 %v965_v21, %v964_v20 }
 0x125   : > { %v9882_v28 = vpack.c.bf16 %v967_v23, %v966_v22  ;;  %v1517_v30 = vld [vmem:[#allocation2 + $0x9] sm:$0xff]  ;;  %v1518_v31 = vld [vmem:[#allocation2 + $0x11] sm:$0xff] }
 0x126   : > { %7989 = vmatmul.mubr.msk.bf16.gmra.mrb[36].mxu1 %vm442_vm2, %v9798_v18  ;;  %v969_v34 = vld [vmem:[#allocation2 + $0x1ef] sm:$0xff]  ;;  %v1549_v35 = vpack.c.bf16 %v1518_v31, %v1517_v30 }
 0x127   : > { %7992 = vmatprep.mubr.msk.bf16.mxu1 %vm442_vm2, %v9800_v19  ;;  %v1519_v38 = vld [vmem:[#allocation2 + $0x29] sm:$0xff]  ;;  %v1522_v43 = vld [vmem:[#allocation2 + $0x51] sm:$0xff] }
 0x128   : > { %v9218_v45 = vld [vmem:[%s10984_s5 + $0x68] sm:$0xff]   ;;  %v1524_v61 = vld [vmem:[#allocation2 + $0x71] sm:$0xff] }
 0x129   : > { %v1523_v50 = vld [vmem:[#allocation2 + $0x69] sm:$0xff]  ;;  %v1526_v54 = vld [vmem:[#allocation2 + $0x91] sm:$0xff] }
 0x12a   : > { %v1525_v52 = vld [vmem:[#allocation2 + $0x89] sm:$0xff]  ;;  %v9907_v57 = vpack.c.bf16 %v1524_v61, %v1523_v50  ;;  %v1528_v0 = vld [vmem:[#allocation2 + $0xb1] sm:$0xff] }
 0x12b   : > { %v9912_v62 = vpack.c.bf16 %v1526_v54, %v1525_v52  ;;  %v1527_v60 = vld [vmem:[#allocation2 + $0xa9] sm:$0xff]  ;;  %v1530_v3 = vld [vmem:[#allocation2 + $0xd1] sm:$0xff] }
 0x12c   : > { %v1529_v1 = vld [vmem:[#allocation2 + $0xc9] sm:$0xff]  ;;  %v9921_v5 = vpack.c.bf16 %v1528_v0, %v1527_v60  ;;  %v1532_v14 = vld [vmem:[#allocation2 + $0xf1] sm:$0xff] }
 0x12d   : > { %v9923_v7 = vpack.c.bf16 %v1530_v3, %v1529_v1  ;;  %v1531_v10 = vld [vmem:[#allocation2 + $0xe9] sm:$0xff]  ;;  %v1534_v20 = vld [vmem:[#allocation2 + $0x111] sm:$0xff] }
 0x12e   : > { %7993 = vmatmul.mubr.msk.bf16.gmra.mrb[40].mxu1 %vm442_vm2, %v9806_v24  ;;  %v1533_v15 = vld [vmem:[#allocation2 + $0x109] sm:$0xff]  ;;  %v9929_v21 = vpack.c.bf16 %v1532_v14, %v1531_v10  ;;  %v1536_v30 = vld [vmem:[#allocation2 + $0x131] sm:$0xff] }
 0x12f   : > { %7996 = vmatprep.mubr.msk.bf16.mxu1 %vm442_vm2, %v9808_v26  ;;  %v9931_v22 = vpack.c.bf16 %v1534_v20, %v1533_v15  ;;  %v1535_v23 = vld [vmem:[#allocation2 + $0x129] sm:$0xff]  ;;  %v1544_v61 = vld [vmem:[#allocation2 + $0x1b1] sm:$0xff] }
 0x130   : > { %v1537_v31 = vld [vmem:[#allocation2 + $0x149] sm:$0xff]  ;;  %v1546_v54 = vld [vmem:[#allocation2 + $0x1d1] sm:$0xff] }
 0x131   : > { %v1543_v50 = vld [vmem:[#allocation2 + $0x1a9] sm:$0xff]  ;;  %v1548_v1 = vld [vmem:[#allocation2 + $0x1f1] sm:$0xff] }
 0x132   : > { %v1545_v52 = vld [vmem:[#allocation2 + $0x1c9] sm:$0xff] }
 0x133   : > { %v9955_v60 = vpack.c.bf16 %v1546_v54, %v1545_v52  ;;  %v1547_v0 = vld [vmem:[#allocation2 + $0x1e9] sm:$0xff]  ;;  %v9240_v52 = vld [vmem:[%s10984_s5 + $0x118] sm:$0xff]  }
 0x134   : > { %v9961_v3 = vpack.c.bf16 %v1548_v1, %v1547_v0  ;;  %v9222_v10 = vld [vmem:[%s10984_s5 + $0x88] sm:$0xff]   ;;  %v9223_v14 = vld [vmem:[%s10984_s5 + $0x90] sm:$0xff]  }
 0x135   : > { %v1869_v15 = vld [vmem:[#allocation2 + $0x207] sm:$0xff]  ;;  %v1870_v20 = vld [vmem:[#allocation2 + $0x20f] sm:$0xff] }
 0x136   : > { %7997 = vmatmul.mubr.msk.bf16.gmra.mrb[44].mxu1 %vm442_vm2, %v9814_v33  ;;  %v3139_v0 = vld [vmem:[#allocation2 + $0xf0] sm:$0xff] }
 0x137   : > { %8008 = vmatprep.mubr.msk.bf16.mxu1 %vm442_vm2, %v970_v32  ;;  %v968_v32 = vld [vmem:[#allocation2 + $0x1e7] sm:$0xff]  ;;  %v3141_v1 = vld [vmem:[#allocation2 + $0x110] sm:$0xff] }
 0x138   : > { %v9888_v36 = vpack.c.bf16 %v969_v34, %v968_v32  ;;  %v1538_v32 = vld [vmem:[#allocation2 + $0x151] sm:$0xff]  ;;  %v9937_v34 = vpack.c.bf16 %v1536_v30, %v1535_v23  ;;  %v10007_v23 = vpack.c.bf16 %v1870_v20, %v1869_v15  ;;  %v9226_v30 = vld [vmem:[%s10984_s5 + $0xa8] sm:$0xff]  }
 0x139   : > { %v3142_v15 = vld [vmem:[#allocation2 + $0x128] sm:$0xff]  ;;  %v3143_v20 = vld [vmem:[#allocation2 + $0x130] sm:$0xff] }
 0x13e   : > { %8009 = vmatmul.mubr.msk.bf16.vlgmr.msra.gmra.mrb[16].mxu1 %vm442_vm2, %v9819_v37 }
 0x13f   : > { %8041 = vmatpush3.bf16.msra.mxu1 %v9749_v41  ;;  %8012 = vmatprep.mubr.msk.bf16.mxu1 %vm442_vm2, %v9824_v40  ;;  %v9216_v41 = vld [vmem:[%s10984_s5 + $0x58] sm:$0xff]  }
 0x140   : > { %8042 = vmatprep.subr.bf16.mxu1 %v9214_v39 }
 0x143   : > { %8043 = vmatpush3.bf16.msra.mxu1 %v9214_v39  ;;  %v1520_v39 = vld [vmem:[#allocation2 + $0x31] sm:$0xff] }
 0x144   : > { %8044 = vmatprep.subr.bf16.mxu1 %v9215_v42  ;;  %v9893_v44 = vpack.c.bf16 %v1520_v39, %v1519_v38  ;;  %v1539_v38 = vld [vmem:[#allocation2 + $0x169] sm:$0xff]  ;;  %v1540_v39 = vld [vmem:[#allocation2 + $0x171] sm:$0xff] }
 0x146   : > { %8013 = vmatmul.mubr.msk.bf16.gmra.mrb[20].mxu1 %vm442_vm2, %v9834_v46 }
 0x147   : > { %8016 = vmatprep.mubr.msk.bf16.mxu1 %vm442_vm2, %v9839_v48  ;;  %8045 = vmatpush3.bf16.msra.mxu1 %v9215_v42  ;;  %v1521_v42 = vld [vmem:[#allocation2 + $0x49] sm:$0xff] }
 0x148   : > { %8046 = vmatprep.subr.bf16.mxu1 %v9216_v41  ;;  %v9898_v47 = vpack.c.bf16 %v1522_v43, %v1521_v42  ;;  %v1541_v42 = vld [vmem:[#allocation2 + $0x189] sm:$0xff]  ;;  %v1542_v43 = vld [vmem:[#allocation2 + $0x191] sm:$0xff] }
 0x14b   : > { %8047 = vmatpush3.bf16.msra.mxu1 %v9216_v41  ;;  %v9219_v41 = vld [vmem:[%s10984_s5 + $0x70] sm:$0xff]  }
 0x14c   : > { %8080 = vmatprep.subr.bf16.mxu1 %v9217_v49 }
 0x14e   : > { %8017 = vmatmul.mubr.msk.bf16.gmra.mrb[24].mxu1 %vm442_vm2, %v9848_v53 }
 0x14f   : > { %8020 = vmatprep.mubr.msk.bf16.mxu1 %vm442_vm2, %v9850_v56 }
 0x156   : > { %8021 = vmatmul.mubr.msk.bf16.gmra.mrb[28].mxu1 %vm442_vm2, %v9856_v59 }
 0x157   : > { %8024 = vmatprep.mubr.msk.bf16.mxu1 %vm442_vm2, %v9858_v63 }
 0x15e   : > { %8025 = vmatmul.mubr.msk.bf16.gmra.mrb[32].mxu1 %vm442_vm2, %v9864_v2 }
 0x15f   : > { %8028 = vmatprep.mubr.msk.bf16.mxu1 %vm442_vm2, %v9866_v8 }
 0x166   : > { %8029 = vmatmul.mubr.msk.bf16.gmra.mrb[36].mxu1 %vm442_vm2, %v9872_v16 }
 0x167   : > { %8032 = vmatprep.mubr.msk.bf16.mxu1 %vm442_vm2, %v9874_v17 }
 0x16e   : > { %8033 = vmatmul.mubr.msk.bf16.gmra.mrb[40].mxu1 %vm442_vm2, %v9880_v27 }
 0x16f   : > { %8036 = vmatprep.mubr.msk.bf16.mxu1 %vm442_vm2, %v9882_v28 }
 0x176   : > { %8037 = vmatmul.mubr.msk.bf16.gmra.mrb[44].mxu1 %vm442_vm2, %v9888_v36 }
 0x177   : > { %8048 = vmatprep.mubr.msk.bf16.mxu1 %vm442_vm2, %v1549_v35  ;;  %v9939_v35 = vpack.c.bf16 %v1538_v32, %v1537_v31  ;;  %v9227_v31 = vld [vmem:[%s10984_s5 + $0xb0] sm:$0xff]  }
 0x17e   : > { %8049 = vmatmul.mubr.msk.bf16.vlgmr.msra.gmra.mrb[16].mxu1 %vm442_vm2, %v9893_v44 }
 0x17f   : > { %8081 = vmatpush3.bf16.msra.mxu1 %v9217_v49  ;;  %8052 = vmatprep.mubr.msk.bf16.mxu1 %vm442_vm2, %v9898_v47  ;;  %v9220_v49 = vld [vmem:[%s10984_s5 + $0x78] sm:$0xff]  }
 0x180   : > { %8082 = vmatprep.subr.bf16.mxu1 %v9218_v45 }
 0x183   : > { %8083 = vmatpush3.bf16.msra.mxu1 %v9218_v45  ;;  %v9945_v45 = vpack.c.bf16 %v1540_v39, %v1539_v38  ;;  %v9239_v38 = vld [vmem:[%s10984_s5 + $0x110] sm:$0xff]  }
 0x184   : > { %8084 = vmatprep.subr.bf16.mxu1 %v9219_v41  ;;  %v3135_v39 = vld [vmem:[#allocation2 + $0xb0] sm:$0xff] }
 0x186   : > { %8053 = vmatmul.mubr.msk.bf16.gmra.mrb[20].mxu1 %vm442_vm2, %v9907_v57 }
 0x187   : > { %8056 = vmatprep.mubr.msk.bf16.mxu1 %vm442_vm2, %v9912_v62  ;;  %8085 = vmatpush3.bf16.msra.mxu1 %v9219_v41  ;;  %v9947_v41 = vpack.c.bf16 %v1542_v43, %v1541_v42  ;;  %v3137_v42 = vld [vmem:[#allocation2 + $0xd0] sm:$0xff]  ;;  %v3134_v43 = vld [vmem:[#allocation2 + $0xa8] sm:$0xff] }
 0x188   : > { %8086 = vmatprep.subr.bf16.mxu1 %v9220_v49 }
 0x18b   : > { %8087 = vmatpush3.bf16.msra.mxu1 %v9220_v49  ;;  %v9953_v49 = vpack.c.bf16 %v1544_v61, %v1543_v50  ;;  %v3163_v50 = vpack.c.bf16 %v3135_v39, %v3134_v43  ;;  %v3136_v61 = vld [vmem:[#allocation2 + $0xc8] sm:$0xff] }
 0x18c   : > { %8120 = vmatprep.subr.bf16.mxu1 %v9221_v58  ;;  %v3164_v54 = vpack.c.bf16 %v3137_v42, %v3136_v61 }
 0x18e   : > { %8057 = vmatmul.mubr.msk.bf16.gmra.mrb[24].mxu1 %vm442_vm2, %v9921_v5 }
 0x18f   : > { %8060 = vmatprep.mubr.msk.bf16.mxu1 %vm442_vm2, %v9923_v7 }
 0x196   : > { %8061 = vmatmul.mubr.msk.bf16.gmra.mrb[28].mxu1 %vm442_vm2, %v9929_v21 }
 0x197   : > { %8064 = vmatprep.mubr.msk.bf16.mxu1 %vm442_vm2, %v9931_v22 }
 0x19e   : > { %8065 = vmatmul.mubr.msk.bf16.gmra.mrb[32].mxu1 %vm442_vm2, %v9937_v34 }
 0x19f   : > { %8068 = vmatprep.mubr.msk.bf16.mxu1 %vm442_vm2, %v9939_v35 }
 0x1a6   : > { %8069 = vmatmul.mubr.msk.bf16.gmra.mrb[36].mxu1 %vm442_vm2, %v9945_v45 }
 0x1a7   : > { %8072 = vmatprep.mubr.msk.bf16.mxu1 %vm442_vm2, %v9947_v41 }
 0x1ae   : > { %8073 = vmatmul.mubr.msk.bf16.gmra.mrb[40].mxu1 %vm442_vm2, %v9953_v49 }
 0x1af   : > { %8076 = vmatprep.mubr.msk.bf16.mxu1 %vm442_vm2, %v9955_v60 }
 0x1b6   : > { %8077 = vmatmul.mubr.msk.bf16.gmra.mrb[44].mxu1 %vm442_vm2, %v9961_v3 }
 0x1b7   : > { %8088 = vmatprep.mubr.msk.bf16.mxu1 %vm442_vm2, %v9819_v37  ;;  %v9224_v37 = vld [vmem:[%s10984_s5 + $0x98] sm:$0xff]  }
 0x1be   : > { %8089 = vmatmul.mubr.msk.bf16.vlgmr.msra.gmra.mrb[16].mxu1 %vm442_vm2, %v9824_v40 }
 0x1bf   : > { %8121 = vmatpush3.bf16.msra.mxu1 %v9221_v58  ;;  %8092 = vmatprep.mubr.msk.bf16.mxu1 %vm442_vm2, %v9834_v46  ;;  %v9225_v58 = vld [vmem:[%s10984_s5 + $0xa0] sm:$0xff]  }
 0x1c0   : > { %8122 = vmatprep.subr.bf16.mxu1 %v9222_v10 }
 0x1c3   : > { %8123 = vmatpush3.bf16.msra.mxu1 %v9222_v10  ;;  %v3138_v10 = vld [vmem:[#allocation2 + $0xe8] sm:$0xff] }
 0x1c4   : > { %8124 = vmatprep.subr.bf16.mxu1 %v9223_v14 }
 0x1c6   : > { %8093 = vmatmul.mubr.msk.bf16.gmra.mrb[20].mxu1 %vm442_vm2, %v9839_v48 }
 0x1c7   : > { %8096 = vmatprep.mubr.msk.bf16.mxu1 %vm442_vm2, %v9848_v53  ;;  %8125 = vmatpush3.bf16.msra.mxu1 %v9223_v14  ;;  %v3165_v14 = vpack.c.bf16 %v3139_v0, %v3138_v10 }
 0x1c8   : > { %8126 = vmatprep.subr.bf16.mxu1 %v9224_v37 }
 0x1cb   : > { %8127 = vmatpush3.bf16.msra.mxu1 %v9224_v37  ;;  %v3140_v37 = vld [vmem:[#allocation2 + $0x108] sm:$0xff] }
 0x1cc   : > { %8160 = vmatprep.subr.bf16.mxu1 %v9225_v58 }
 0x1ce   : > { %8097 = vmatmul.mubr.msk.bf16.gmra.mrb[24].mxu1 %vm442_vm2, %v9850_v56 }
 0x1cf   : > { %8100 = vmatprep.mubr.msk.bf16.mxu1 %vm442_vm2, %v9856_v59 }
 0x1d6   : > { %8101 = vmatmul.mubr.msk.bf16.gmra.mrb[28].mxu1 %vm442_vm2, %v9858_v63 }
 0x1d7   : > { %8104 = vmatprep.mubr.msk.bf16.mxu1 %vm442_vm2, %v9864_v2 }
 0x1de   : > { %8105 = vmatmul.mubr.msk.bf16.gmra.mrb[32].mxu1 %vm442_vm2, %v9866_v8 }
 0x1df   : > { %8108 = vmatprep.mubr.msk.bf16.mxu1 %vm442_vm2, %v9872_v16 }
 0x1e6   : > { %8109 = vmatmul.mubr.msk.bf16.gmra.mrb[36].mxu1 %vm442_vm2, %v9874_v17 }
 0x1e7   : > { %8112 = vmatprep.mubr.msk.bf16.mxu1 %vm442_vm2, %v9880_v27 }
 0x1ee   : > { %8113 = vmatmul.mubr.msk.bf16.gmra.mrb[40].mxu1 %vm442_vm2, %v9882_v28 }
 0x1ef   : > { %8116 = vmatprep.mubr.msk.bf16.mxu1 %vm442_vm2, %v9888_v36 }
 0x1f6   : > { %8117 = vmatmul.mubr.msk.bf16.gmra.mrb[44].mxu1 %vm442_vm2, %v10007_v23 }
 0x1f7   : > { %8128 = vmatprep.mubr.msk.bf16.mxu1 %vm442_vm2, %v9674_v29  ;;  %v9228_v29 = vld [vmem:[%s10984_s5 + $0xb8] sm:$0xff]  }
 0x1fe   : > { %8129 = vmatmul.mubr.msk.bf16.vlgmr.msra.gmra.mrb[16].mxu1 %vm442_vm2, %v9669_v25  ;;  %v9229_v25 = vld [vmem:[%s10984_s5 + $0xc0] sm:$0xff]  }
 0x1ff   : > { %8161 = vmatpush3.bf16.msra.mxu1 %v9225_v58  ;;  %8132 = vmatprep.mubr.msk.bf16.mxu1 %vm442_vm2, %v9718_v13  ;;  %v2192_v13 = vld [vmem:[#allocation2 + $0x210] sm:$0xff]  ;;  %v3166_v58 = vpack.c.bf16 %v3141_v1, %v3140_v37 }
 0x200   : > { %8162 = vmatprep.subr.bf16.mxu1 %v9226_v30 }
 0x203   : > { %8163 = vmatpush3.bf16.msra.mxu1 %v9226_v30  ;;  %v3145_v30 = vld [vmem:[#allocation2 + $0x150] sm:$0xff] }
 0x204   : > { %8164 = vmatprep.subr.bf16.mxu1 %v9227_v31 }
 0x206   : > { %8133 = vmatmul.mubr.msk.bf16.gmra.mrb[20].mxu1 %vm442_vm2, %v9714_v9  ;;  %v2191_v9 = vld [vmem:[#allocation2 + $0x208] sm:$0xff] }
 0x207   : > { %8136 = vmatprep.mubr.msk.bf16.mxu1 %vm442_vm2, %v9760_v51  ;;  %8165 = vmatpush3.bf16.msra.mxu1 %v9227_v31  ;;  %v10053_v51 = vpack.c.bf16 %v2192_v13, %v2191_v9  ;;  %v3167_v31 = vpack.c.bf16 %v3143_v20, %v3142_v15  ;;  %v3147_v9 = vld [vmem:[#allocation2 + $0x170] sm:$0xff]  ;;  %v3148_v13 = vld [vmem:[#allocation2 + $0x188] sm:$0xff] }
 0x208   : > { %8166 = vmatprep.subr.bf16.mxu1 %v9228_v29 }
 0x20b   : > { %8167 = vmatpush3.bf16.msra.mxu1 %v9228_v29 }
 0x20c   : > { %8200 = vmatprep.subr.bf16.mxu1 %v9229_v25 }
 0x20e   : > { %8137 = vmatmul.mubr.msk.bf16.gmra.mrb[24].mxu1 %vm442_vm2, %v9764_v55  ;;  %v9230_v55 = vld [vmem:[%s10984_s5 + $0xc8] sm:$0xff]  }
 0x20f   : > { %8140 = vmatprep.mubr.msk.bf16.mxu1 %vm442_vm2, %v9782_v4  ;;  %v9231_v4 = vld [vmem:[%s10984_s5 + $0xd0] sm:$0xff]  }
 0x216   : > { %8141 = vmatmul.mubr.msk.bf16.gmra.mrb[28].mxu1 %vm442_vm2, %v9784_v6  ;;  %v9232_v6 = vld [vmem:[%s10984_s5 + $0xd8] sm:$0xff]  }
 0x217   : > { %8144 = vmatprep.mubr.msk.bf16.mxu1 %vm442_vm2, %v9790_v11  ;;  %v9233_v11 = vld [vmem:[%s10984_s5 + $0xe0] sm:$0xff]  }
 0x21e   : > { %8145 = vmatmul.mubr.msk.bf16.gmra.mrb[32].mxu1 %vm442_vm2, %v9792_v12  ;;  %v2513_v12 = vld [vmem:[#allocation2 + $0x209] sm:$0xff] }
 0x21f   : > { %8148 = vmatprep.mubr.msk.bf16.mxu1 %vm442_vm2, %v9798_v18  ;;  %v2514_v18 = vld [vmem:[#allocation2 + $0x211] sm:$0xff] }
 0x226   : > { %8149 = vmatmul.mubr.msk.bf16.gmra.mrb[36].mxu1 %vm442_vm2, %v9800_v19  ;;  %v10099_v19 = vpack.c.bf16 %v2514_v18, %v2513_v12  ;;  %v3151_v12 = vld [vmem:[#allocation2 + $0x1b0] sm:$0xff]  ;;  %v3152_v18 = vld [vmem:[#allocation2 + $0x1c8] sm:$0xff] }
 0x227   : > { %8152 = vmatprep.mubr.msk.bf16.mxu1 %vm442_vm2, %v9806_v24  ;;  %v9234_v24 = vld [vmem:[%s10984_s5 + $0xe8] sm:$0xff]  }
 0x22e   : > { %8153 = vmatmul.mubr.msk.bf16.gmra.mrb[40].mxu1 %vm442_vm2, %v9808_v26  ;;  %v9235_v26 = vld [vmem:[%s10984_s5 + $0xf0] sm:$0xff]  }
 0x22f   : > { %8156 = vmatprep.mubr.msk.bf16.mxu1 %vm442_vm2, %v9814_v33  ;;  %v9236_v33 = vld [vmem:[%s10984_s5 + $0xf8] sm:$0xff]  }
 0x236   : > { %8157 = vmatmul.mubr.msk.bf16.gmra.mrb[44].mxu1 %vm442_vm2, %v10053_v51 }
 0x237   : > { %8168 = vmatprep.mubr.msk.bf16.mxu1 %vm442_vm2, %v9893_v44  ;;  %v9238_v44 = vld [vmem:[%s10984_s5 + $0x108] sm:$0xff]  }
 0x23e   : > { %8169 = vmatmul.mubr.msk.bf16.vlgmr.msra.gmra.mrb[16].mxu1 %vm442_vm2, %v9898_v47 }
 0x23f   : > { %8201 = vmatpush3.bf16.msra.mxu1 %v9229_v25  ;;  %8172 = vmatprep.mubr.msk.bf16.mxu1 %vm442_vm2, %v9907_v57  ;;  %v3146_v25 = vld [vmem:[#allocation2 + $0x168] sm:$0xff] }
 0x240   : > { %8202 = vmatprep.subr.bf16.mxu1 %v9230_v55 }
 0x243   : > { %8203 = vmatpush3.bf16.msra.mxu1 %v9230_v55  ;;  %v3149_v55 = vld [vmem:[#allocation2 + $0x190] sm:$0xff] }
 0x244   : > { %8204 = vmatprep.subr.bf16.mxu1 %v9231_v4 }
 0x246   : > { %8173 = vmatmul.mubr.msk.bf16.gmra.mrb[20].mxu1 %vm442_vm2, %v9912_v62 }
 0x247   : > { %8176 = vmatprep.mubr.msk.bf16.mxu1 %vm442_vm2, %v9921_v5  ;;  %8205 = vmatpush3.bf16.msra.mxu1 %v9231_v4  ;;  %v3169_v4 = vpack.c.bf16 %v3147_v9, %v3146_v25 }
 0x248   : > { %8206 = vmatprep.subr.bf16.mxu1 %v9232_v6 }
 0x24b   : > { %8207 = vmatpush3.bf16.msra.mxu1 %v9232_v6  ;;  %v3170_v6 = vpack.c.bf16 %v3149_v55, %v3148_v13 }
 0x24c   : > { %8240 = vmatprep.subr.bf16.mxu1 %v9233_v11 }
 0x24e   : > { %8177 = vmatmul.mubr.msk.bf16.gmra.mrb[24].mxu1 %vm442_vm2, %v9923_v7 }
 0x24f   : > { %8180 = vmatprep.mubr.msk.bf16.mxu1 %vm442_vm2, %v9929_v21 }
 0x256   : > { %8181 = vmatmul.mubr.msk.bf16.gmra.mrb[28].mxu1 %vm442_vm2, %v9931_v22 }
 0x257   : > { %8184 = vmatprep.mubr.msk.bf16.mxu1 %vm442_vm2, %v9937_v34 }
 0x25e   : > { %8185 = vmatmul.mubr.msk.bf16.gmra.mrb[32].mxu1 %vm442_vm2, %v9939_v35 }
 0x25f   : > { %8188 = vmatprep.mubr.msk.bf16.mxu1 %vm442_vm2, %v9945_v45 }
 0x266   : > { %8189 = vmatmul.mubr.msk.bf16.gmra.mrb[36].mxu1 %vm442_vm2, %v9947_v41 }
 0x267   : > { %8192 = vmatprep.mubr.msk.bf16.mxu1 %vm442_vm2, %v9953_v49 }
 0x26e   : > { %8193 = vmatmul.mubr.msk.bf16.gmra.mrb[40].mxu1 %vm442_vm2, %v9955_v60 }
 0x26f   : > { %8196 = vmatprep.mubr.msk.bf16.mxu1 %vm442_vm2, %v9961_v3 }
 0x276   : > { %8197 = vmatmul.mubr.msk.bf16.gmra.mrb[44].mxu1 %vm442_vm2, %v10099_v19 }
 0x277   : > { %8208 = vmatprep.mubr.msk.bf16.mxu1 %vm442_vm2, %v9824_v40  ;;  %v9237_v40 = vld [vmem:[%s10984_s5 + $0x100] sm:$0xff]  }
 0x27e   : > { %8209 = vmatmul.mubr.msk.bf16.vlgmr.msra.gmra.mrb[16].mxu1 %vm442_vm2, %v9834_v46  ;;  %v2836_v46 = vld [vmem:[#allocation2 + $0x227] sm:$0xff] }
 0x27f   : > { %8241 = vmatpush3.bf16.msra.mxu1 %v9233_v11  ;;  %8212 = vmatprep.mubr.msk.bf16.mxu1 %vm442_vm2, %v9839_v48  ;;  %v2837_v48 = vld [vmem:[#allocation2 + $0x22f] sm:$0xff] }
 0x280   : > { %8242 = vmatprep.subr.bf16.mxu1 %v9234_v24  ;;  %v3150_v11 = vld [vmem:[#allocation2 + $0x1a8] sm:$0xff] }
 0x283   : > { %8243 = vmatpush3.bf16.msra.mxu1 %v9234_v24  ;;  %v3153_v24 = vld [vmem:[#allocation2 + $0x1d0] sm:$0xff] }
 0x284   : > { %8244 = vmatprep.subr.bf16.mxu1 %v9235_v26 }
 0x286   : > { %8213 = vmatmul.mubr.msk.bf16.gmra.mrb[20].mxu1 %vm442_vm2, %v9848_v53  ;;  %v2853_v53 = vpack.c.bf16 %v2837_v48, %v2836_v46  ;;  %v3155_v46 = vld [vmem:[#allocation2 + $0x1f0] sm:$0xff] }
 0x287   : > { %8216 = vmatprep.mubr.msk.bf16.mxu1 %vm442_vm2, %v9850_v56  ;;  %8245 = vmatpush3.bf16.msra.mxu1 %v9235_v26  ;;  %v3129_v56 = vld [vmem:[#allocation2 + $0x50] sm:$0xff]  ;;  %v3171_v26 = vpack.c.bf16 %v3151_v12, %v3150_v11 }
 0x288   : > { %8246 = vmatprep.subr.bf16.mxu1 %v9236_v33 }
 0x28b   : > { %8247 = vmatpush3.bf16.msra.mxu1 %v9236_v33  ;;  %v3172_v33 = vpack.c.bf16 %v3153_v24, %v3152_v18 }
 0x28c   : > { %8280 = vmatprep.subr.bf16.mxu1 %v9237_v40 }
 0x28e   : > { %8217 = vmatmul.mubr.msk.bf16.gmra.mrb[24].mxu1 %vm442_vm2, %v9856_v59  ;;  %v3128_v59 = vld [vmem:[#allocation2 + $0x48] sm:$0xff] }
 0x28f   : > { %8220 = vmatprep.mubr.msk.bf16.mxu1 %vm442_vm2, %v9858_v63  ;;  %v3160_v63 = vpack.c.bf16 %v3129_v56, %v3128_v59  ;;  %v3159_v56 = vld [vmem:[#allocation2 + $0x230] sm:$0xff] }
 0x296   : > { %8221 = vmatmul.mubr.msk.bf16.gmra.mrb[28].mxu1 %vm442_vm2, %v9864_v2  ;;  %v9241_v2 = vld [vmem:[%s10988_s9 + $0x20] sm:$0xff]  }
 0x297   : > { %8224 = vmatprep.mubr.msk.bf16.mxu1 %vm442_vm2, %v9866_v8  ;;  %v9242_v8 = vld [vmem:[%s10988_s9 + $0x28] sm:$0xff]   ;;  %8320 = vmatprep.subr.bf16.mxu0 %v9241_v2 }
 0x298   : > { %8321 = vmatpush3.bf16.msra.mxu0 %v9241_v2 }
 0x299   : > { %8322 = vmatprep.subr.bf16.mxu0 %v9242_v8 }
 0x29c   : > { %8323 = vmatpush3.bf16.msra.mxu0 %v9242_v8 }
 0x29e   : > { %8225 = vmatmul.mubr.msk.bf16.gmra.mrb[32].mxu1 %vm442_vm2, %v9872_v16  ;;  %v3131_v16 = vld [vmem:[#allocation2 + $0x70] sm:$0xff] }
 0x29f   : > { %8228 = vmatprep.mubr.msk.bf16.mxu1 %vm442_vm2, %v9874_v17  ;;  %v3133_v17 = vld [vmem:[#allocation2 + $0x90] sm:$0xff] }
 0x2a6   : > { %8229 = vmatmul.mubr.msk.bf16.gmra.mrb[36].mxu1 %vm442_vm2, %v9880_v27  ;;  %v3130_v27 = vld [vmem:[#allocation2 + $0x68] sm:$0xff] }
 0x2a7   : > { %8232 = vmatprep.mubr.msk.bf16.mxu1 %vm442_vm2, %v9882_v28  ;;  %v3161_v28 = vpack.c.bf16 %v3131_v16, %v3130_v27  ;;  %v10238_v16 = vld [vmem:[%s10987_s8] ss:$0 sm:$0xff] }
 0x2ae   : > { %8233 = vmatmul.mubr.msk.bf16.gmra.mrb[40].mxu1 %vm442_vm2, %v9888_v36  ;;  %v3132_v36 = vld [vmem:[#allocation2 + $0x88] sm:$0xff] }
 0x2af   : > { %8236 = vmatprep.mubr.msk.bf16.mxu1 %vm442_vm2, %v10007_v23  ;;  %v3162_v32 = vpack.c.bf16 %v3133_v17, %v3132_v36  ;;  %v3144_v23 = vld [vmem:[#allocation2 + $0x148] sm:$0xff] }
 0x2b0   : > { %v3168_v29 = vpack.c.bf16 %v3145_v30, %v3144_v23 }
 0x2b6   : > { %8237 = vmatmul.mubr.msk.bf16.gmra.mrb[44].mxu1 %vm442_vm2, %v2853_v53  ;;  %v3158_v53 = vld [vmem:[#allocation2 + $0x228] sm:$0xff] }
 0x2b7   : > { %8248 = vmatprep.mubr.msk.bf16.mxu1 %vm442_vm2, %v3160_v63  ;;  %v3175_v59 = vpack.c.bf16 %v3159_v56, %v3158_v53 }
 0x2be   : > { %8249 = vmatmul.mubr.msk.bf16.vlgmr.msra.gmra.mrb[16].mxu1 %vm442_vm2, %v3161_v28 }
 0x2bf   : > { %8281 = vmatpush3.bf16.msra.mxu1 %v9237_v40  ;;  %8252 = vmatprep.mubr.msk.bf16.mxu1 %vm442_vm2, %v3162_v32  ;;  %v3154_v40 = vld [vmem:[#allocation2 + $0x1e8] sm:$0xff] }
 0x2c0   : > { %8282 = vmatprep.subr.bf16.mxu1 %v9238_v44  ;;  %v3173_v48 = vpack.c.bf16 %v3155_v46, %v3154_v40 }
 0x2c3   : > { %8283 = vmatpush3.bf16.msra.mxu1 %v9238_v44 }
 0x2c4   : > { %8284 = vmatprep.subr.bf16.mxu1 %v9239_v38 }
 0x2c6   : > { %8253 = vmatmul.mubr.msk.bf16.gmra.mrb[20].mxu1 %vm442_vm2, %v3163_v50 }
 0x2c7   : > { %8256 = vmatprep.mubr.msk.bf16.mxu1 %vm442_vm2, %v3164_v54  ;;  %8285 = vmatpush3.bf16.msra.mxu1 %v9239_v38 }
 0x2c8   : > { %8286 = vmatprep.subr.bf16.mxu1 %v9240_v52 }
 0x2cb   : > { %8287 = vmatpush3.bf16.msra.mxu1 %v9240_v52 }
 0x2ce   : > { %8257 = vmatmul.mubr.msk.bf16.gmra.mrb[24].mxu1 %vm442_vm2, %v3165_v14 }
 0x2cf   : > { %8260 = vmatprep.mubr.msk.bf16.mxu1 %vm442_vm2, %v3166_v58 }
 0x2d6   : > { %8261 = vmatmul.mubr.msk.bf16.gmra.mrb[28].mxu1 %vm442_vm2, %v3167_v31 }
 0x2d7   : > { %8264 = vmatprep.mubr.msk.bf16.mxu1 %vm442_vm2, %v3168_v29 }
 0x2de   : > { %8265 = vmatmul.mubr.msk.bf16.gmra.mrb[32].mxu1 %vm442_vm2, %v3169_v4 }
 0x2df   : > { %8268 = vmatprep.mubr.msk.bf16.mxu1 %vm442_vm2, %v3170_v6 }
 0x2e6   : > { %8269 = vmatmul.mubr.msk.bf16.gmra.mrb[36].mxu1 %vm442_vm2, %v3171_v26 }
 0x2e7   : > { %8272 = vmatprep.mubr.msk.bf16.mxu1 %vm442_vm2, %v3172_v33 }
 0x2ee   : > { %8273 = vmatmul.mubr.msk.bf16.gmra.mrb[40].mxu1 %vm442_vm2, %v3173_v48 }
 0x2ef   : > { %8276 = vmatprep.mubr.msk.bf16.mxu1 %vm442_vm2, %v10053_v51 }
 0x2f6   : > { %8277 = vmatmul.mubr.msk.bf16.gmra.mrb[44].mxu1 %vm442_vm2, %v3175_v59 }
 0x2f7   : > { %8288 = vmatprep.mubr.msk.bf16.mxu1 %vm442_vm2, %v9898_v47  ;;  %v3480_v47 = vld [vmem:[#allocation2 + $0x229] sm:$0xff] }
 0x2fe   : > { %8289 = vmatmul.mubr.msk.bf16.vlgmr.msra.gmra.mrb[16].mxu1 %vm442_vm2, %v9907_v57  ;;  %v3481_v57 = vld [vmem:[#allocation2 + $0x231] sm:$0xff] }
 0x2ff   : > { %8292 = vmatprep.mubr.msk.bf16.mxu1 %vm442_vm2, %v9912_v62  ;;  %v3497_v62 = vpack.c.bf16 %v3481_v57, %v3480_v47 }
 0x306   : > { %8293 = vmatmul.mubr.msk.bf16.gmra.mrb[20].mxu1 %vm442_vm2, %v9921_v5  ;;  %v9243_v5 = vld [vmem:[%s10988_s9 + $0x30] sm:$0xff]  }
 0x307   : > { %8296 = vmatprep.mubr.msk.bf16.mxu1 %vm442_vm2, %v9923_v7  ;;  %8324 = vmatprep.subr.bf16.mxu0 %v9243_v5  ;;  %v9244_v7 = vld [vmem:[%s10988_s9 + $0x38] sm:$0xff]  }
 0x308   : > { %8325 = vmatpush3.bf16.msra.mxu0 %v9243_v5  ;;  %v9246_v5 = vld [vmem:[%s10988_s9 + $0x8] sm:$0xff]  }
 0x309   : > { %8326 = vmatprep.subr.bf16.mxu0 %v9244_v7 }
 0x30c   : > { %8327 = vmatpush3.bf16.msra.mxu0 %v9244_v7 }
 0x30e   : > { %8297 = vmatmul.mubr.msk.bf16.gmra.mrb[24].mxu1 %vm442_vm2, %v9929_v21  ;;  %v4009_v21 = vld [vmem:[#allocation2 + $0x8] sm:$0xff] }
 0x30f   : > { %8300 = vmatprep.mubr.msk.bf16.mxu1 %vm442_vm2, %v9931_v22  ;;  %v4010_v22 = vld [vmem:[#allocation2 + $0x10] sm:$0xff] }
 0x316   : > { %8301 = vmatmul.mubr.msk.bf16.gmra.mrb[28].mxu1 %vm442_vm2, %v9937_v34  ;;  %v10218_v34 = vld [vmem:[%s10988_s9] sm:$0xff]  }
 0x317   : > { %8304 = vmatprep.mubr.msk.bf16.mxu1 %vm442_vm2, %v9939_v35  ;;  %v4041_v35 = vpack.c.bf16 %v4010_v22, %v4009_v21  ;;  %8360 = vmatprep.subr.bf16.mxu0 %v10218_v34 }
 0x319   : > { %8328 = vmatprep.mubr.msk.bf16.mxu0 %vm442_vm2, %v4041_v35 }
 0x31e   : > { %8305 = vmatmul.mubr.msk.bf16.gmra.mrb[32].mxu1 %vm442_vm2, %v9945_v45  ;;  %v10225_v45 = vld [vmem:[%s10985_s6] ss:$0 sm:$0xff] }
 0x31f   : > { %8308 = vmatprep.mubr.msk.bf16.mxu1 %vm442_vm2, %v9947_v41 }
 0x326   : > { %8309 = vmatmul.mubr.msk.bf16.gmra.mrb[36].mxu1 %vm442_vm2, %v9953_v49 }
 0x327   : > { %8312 = vmatprep.mubr.msk.bf16.mxu1 %vm442_vm2, %v9955_v60 }
 0x32e   : > { %8313 = vmatmul.mubr.msk.bf16.gmra.mrb[40].mxu1 %vm442_vm2, %v9961_v3  ;;  %v10231_v3 = vld [vmem:[%s10986_s7] ss:$0 sm:$0xff] }
 0x32f   : > { %8316 = vmatprep.mubr.msk.bf16.mxu1 %vm442_vm2, %v10099_v19 }
 0x336   : > { %8317 = vmatmul.mubr.msk.bf16.gmra.mrb[44].mxu1 %vm442_vm2, %v3497_v62 }
 0x3d1   : > { %v8290_v41 = vpop.f32.mrb[16].mxu1 }
 0x3d2   : > { %v3781_v49 = vadd.f32 %v8290_v41, %v10225_v45  ;;  %v3613_v60 = vpop.f32.mrb[17].mxu1 }
 0x3d3   : > { %v3779_v51 = vadd.f32 %v10225_v45, %v3613_v60  ;;  %v8291_v19 = vpop.f32.mrb[18].mxu1 }
 0x3d4   : > { %v3813_v63 = vmax.f32 %v3781_v49, 0.0  ;;  %v3782_v2 = vadd.f32 %v8291_v19, %v10225_v45  ;;  %v3616_v8 = vpop.f32.mrb[19].mxu1 }
 0x3d5   : > { %v3811_v17 = vmax.f32 %v3779_v51, 0.0  ;;  %v3780_v27 = vadd.f32 %v10225_v45, %v3616_v8 }
 0x3d6   : > { %v3852_v28 = vmul.f32 %v10231_v3, %v3813_v63  ;;  %v3814_v36 = vmax.f32 %v3782_v2, 0.0  ;;  %v9247_v2 = vld [vmem:[%s10988_s9 + $0x10] sm:$0xff]  }
 0x3d7   : > { %v3850_v44 = vmul.f32 %v10231_v3, %v3811_v17  ;;  %v3812_v32 = vmax.f32 %v3780_v27, 0.0 }
 0x3d8   : > { %v3891_v38 = vadd.f32 %v10238_v16, %v3852_v28  ;;  %v3853_v39 = vmul.f32 %v10231_v3, %v3814_v36 }
 0x3d9   : > { %v3889_v42 = vadd.f32 %v10238_v16, %v3850_v44  ;;  %v3851_v43 = vmul.f32 %v10231_v3, %v3812_v32  ;;  %v8294_v50 = vpop.f32.mrb[20].mxu1 }
 0x3da   : > { %3923 = vst.msk [vmem:[#allocation2 + $0x48] sm:$0xff] %vm442_vm2, %v3891_v38  ;;  %v3892_v61 = vadd.f32 %v10238_v16, %v3853_v39  ;;  %v3785_v52 = vadd.f32 %v8294_v50, %v10225_v45  ;;  %v3629_v54 = vpop.f32.mrb[21].mxu1 }
 0x3db   : > { %3921 = vst.msk [vmem:[#allocation2 + $0x28] sm:$0xff] %vm442_vm2, %v3889_v42  ;;  %v3890_v0 = vadd.f32 %v10238_v16, %v3851_v43  ;;  %v3783_v1 = vadd.f32 %v10225_v45, %v3629_v54  ;;  %v8295_v10 = vpop.f32.mrb[22].mxu1 }
 0x3dc   : > { %3924 = vst.msk [vmem:[#allocation2 + $0x50] sm:$0xff] %vm442_vm2, %v3892_v61  ;;  %v3817_v14 = vmax.f32 %v3785_v52, 0.0  ;;  %v3786_v37 = vadd.f32 %v8295_v10, %v10225_v45  ;;  %v3632_v58 = vpop.f32.mrb[23].mxu1 }
 0x3dd   : > { %3922 = vst.msk [vmem:[#allocation2 + $0x30] sm:$0xff] %vm442_vm2, %v3890_v0  ;;  %v3815_v15 = vmax.f32 %v3783_v1, 0.0  ;;  %v3784_v20 = vadd.f32 %v10225_v45, %v3632_v58  ;;  %v9248_v0 = vld [vmem:[%s10988_s9 + $0x18] sm:$0xff]  }
 0x3de   : > { %v3856_v23 = vmul.f32 %v10231_v3, %v3817_v14  ;;  %v3818_v30 = vmax.f32 %v3786_v37, 0.0 }
 0x3df   : > { %v3854_v31 = vmul.f32 %v10231_v3, %v3815_v15  ;;  %v3816_v29 = vmax.f32 %v3784_v20, 0.0 }
 0x3e0   : > { %v3895_v25 = vadd.f32 %v10238_v16, %v3856_v23  ;;  %v3857_v9 = vmul.f32 %v10231_v3, %v3818_v30 }
 0x3e1   : > { %v3893_v13 = vadd.f32 %v10238_v16, %v3854_v31  ;;  %v3855_v55 = vmul.f32 %v10231_v3, %v3816_v29  ;;  %v8298_v4 = vpop.f32.mrb[24].mxu1  ;;  %v4013_v62 = vld [vmem:[#allocation2 + $0x48] sm:$0xff]  ;;  %v10324_v29 = vld [vmem:[%s10988_s9 + $0x40] sm:$0xff]  }
 0x3e2   : > { %3927 = vst.msk [vmem:[#allocation2 + $0x88] sm:$0xff] %vm442_vm2, %v3895_v25  ;;  %v3896_v6 = vadd.f32 %v10238_v16, %v3857_v9  ;;  %v3789_v11 = vadd.f32 %v8298_v4, %v10225_v45  ;;  %v3645_v12 = vpop.f32.mrb[25].mxu1  ;;  %v4011_v53 = vld [vmem:[#allocation2 + $0x28] sm:$0xff] }
 0x3e3   : > { %3925 = vst.msk [vmem:[#allocation2 + $0x68] sm:$0xff] %vm442_vm2, %v3893_v13  ;;  %v3894_v18 = vadd.f32 %v10238_v16, %v3855_v55  ;;  %v3787_v24 = vadd.f32 %v10225_v45, %v3645_v12  ;;  %v8299_v26 = vpop.f32.mrb[26].mxu1  ;;  %v4014_v33 = vld [vmem:[#allocation2 + $0x50] sm:$0xff] }
 0x3e4   : > { %3928 = vst.msk [vmem:[#allocation2 + $0x90] sm:$0xff] %vm442_vm2, %v3896_v6  ;;  %v3821_v40 = vmax.f32 %v3789_v11, 0.0  ;;  %v3790_v46 = vadd.f32 %v8299_v26, %v10225_v45  ;;  %v3648_v48 = vpop.f32.mrb[27].mxu1  ;;  %v4012_v56 = vld [vmem:[#allocation2 + $0x30] sm:$0xff]  ;;  %v10279_v22 = vpack.c.bf16 %v4014_v33, %v4013_v62 }
 0x3e5   : > { %3926 = vst.msk [vmem:[#allocation2 + $0x70] sm:$0xff] %vm442_vm2, %v3894_v18  ;;  %v3819_v59 = vmax.f32 %v3787_v24, 0.0  ;;  %v3788_v47 = vadd.f32 %v10225_v45, %v3648_v48  ;;  %v10273_v57 = vpack.c.bf16 %v4012_v56, %v4011_v53 }
 0x3e6   : > { %v3860_v7 = vmul.f32 %v10231_v3, %v3821_v40  ;;  %v3822_v21 = vmax.f32 %v3790_v46, 0.0 }
 0x3e7   : > { %v3858_v35 = vmul.f32 %v10231_v3, %v3819_v59  ;;  %v3820_v41 = vmax.f32 %v3788_v47, 0.0  ;;  %8329 = vmatmul.mubr.msk.bf16.vlgmr.msra.gmra.mrb[16].mxu0 %vm442_vm2, %v10273_v57 }
 0x3e8   : > { %v3899_v49 = vadd.f32 %v10238_v16, %v3860_v7  ;;  %v3861_v60 = vmul.f32 %v10231_v3, %v3822_v21  ;;  %8361 = vmatpush3.bf16.msra.mxu0 %v10218_v34  ;;  %8332 = vmatprep.mubr.msk.bf16.mxu0 %vm442_vm2, %v10279_v22 }
 0x3e9   : > { %v3897_v51 = vadd.f32 %v10238_v16, %v3858_v35  ;;  %v3859_v19 = vmul.f32 %v10231_v3, %v3820_v41  ;;  %v8302_v63 = vpop.f32.mrb[28].mxu1  ;;  %8362 = vmatprep.subr.bf16.mxu0 %v9246_v5  ;;  %v4017_v54 = vld [vmem:[#allocation2 + $0x88] sm:$0xff] }
 0x3ea   : > { %3931 = vst.msk [vmem:[#allocation2 + $0xc8] sm:$0xff] %vm442_vm2, %v3899_v49  ;;  %v3900_v8 = vadd.f32 %v10238_v16, %v3861_v60  ;;  %v3793_v17 = vadd.f32 %v8302_v63, %v10225_v45  ;;  %v3661_v34 = vpop.f32.mrb[29].mxu1  ;;  %v4015_v42 = vld [vmem:[#allocation2 + $0x68] sm:$0xff] }
 0x3eb   : > { %3929 = vst.msk [vmem:[#allocation2 + $0xa8] sm:$0xff] %vm442_vm2, %v3897_v51  ;;  %v3898_v27 = vadd.f32 %v10238_v16, %v3859_v19  ;;  %v3791_v28 = vadd.f32 %v10225_v45, %v3661_v34  ;;  %v8303_v36 = vpop.f32.mrb[30].mxu1  ;;  %v4018_v44 = vld [vmem:[#allocation2 + $0x90] sm:$0xff] }
 0x3ec   : > { %3932 = vst.msk [vmem:[#allocation2 + $0xd0] sm:$0xff] %vm442_vm2, %v3900_v8  ;;  %v3825_v32 = vmax.f32 %v3793_v17, 0.0  ;;  %v3794_v38 = vadd.f32 %v8303_v36, %v10225_v45  ;;  %v3664_v39 = vpop.f32.mrb[31].mxu1  ;;  %v4016_v43 = vld [vmem:[#allocation2 + $0x70] sm:$0xff]  ;;  %8363 = vmatpush3.bf16.msra.mxu0 %v9246_v5  ;;  %v10310_v14 = vpack.c.bf16 %v4018_v44, %v4017_v54 }
 0x3ed   : > { %3930 = vst.msk [vmem:[#allocation2 + $0xb0] sm:$0xff] %vm442_vm2, %v3898_v27  ;;  %v3823_v50 = vmax.f32 %v3791_v28, 0.0  ;;  %v3792_v61 = vadd.f32 %v10225_v45, %v3664_v39  ;;  %v10304_v52 = vpack.c.bf16 %v4016_v43, %v4015_v42  ;;  %8364 = vmatprep.subr.bf16.mxu0 %v9247_v2 }
 0x3ee   : > { %v3864_v1 = vmul.f32 %v10231_v3, %v3825_v32  ;;  %v3826_v10 = vmax.f32 %v3794_v38, 0.0 }
 0x3ef   : > { %v3862_v37 = vmul.f32 %v10231_v3, %v3823_v50  ;;  %v3824_v58 = vmax.f32 %v3792_v61, 0.0  ;;  %8333 = vmatmul.mubr.msk.bf16.gmra.mrb[20].mxu0 %vm442_vm2, %v10304_v52 }
 0x3f0   : > { %v3903_v15 = vadd.f32 %v10238_v16, %v3864_v1  ;;  %v3865_v20 = vmul.f32 %v10231_v3, %v3826_v10  ;;  %8336 = vmatprep.mubr.msk.bf16.mxu0 %vm442_vm2, %v10310_v14  ;;  %8365 = vmatpush3.bf16.msra.mxu0 %v9247_v2 }
 0x3f1   : > { %v3901_v23 = vadd.f32 %v10238_v16, %v3862_v37  ;;  %v3863_v30 = vmul.f32 %v10231_v3, %v3824_v58  ;;  %v8306_v31 = vpop.f32.mrb[32].mxu1  ;;  %8366 = vmatprep.subr.bf16.mxu0 %v9248_v0  ;;  %v4021_v53 = vld [vmem:[#allocation2 + $0xc8] sm:$0xff] }
 0x3f2   : > { %3935 = vst.msk [vmem:[#allocation2 + $0x108] sm:$0xff] %vm442_vm2, %v3903_v15  ;;  %v3904_v25 = vadd.f32 %v10238_v16, %v3865_v20  ;;  %v3797_v9 = vadd.f32 %v8306_v31, %v10225_v45  ;;  %v3677_v13 = vpop.f32.mrb[33].mxu1  ;;  %v4019_v26 = vld [vmem:[#allocation2 + $0xa8] sm:$0xff] }
 0x3f3   : > { %3933 = vst.msk [vmem:[#allocation2 + $0xe8] sm:$0xff] %vm442_vm2, %v3901_v23  ;;  %v3902_v55 = vadd.f32 %v10238_v16, %v3863_v30  ;;  %v3795_v4 = vadd.f32 %v10225_v45, %v3677_v13  ;;  %v8307_v6 = vpop.f32.mrb[34].mxu1  ;;  %v4022_v11 = vld [vmem:[#allocation2 + $0xd0] sm:$0xff] }
 0x3f4   : > { %3936 = vst.msk [vmem:[#allocation2 + $0x110] sm:$0xff] %vm442_vm2, %v3904_v25  ;;  %v3829_v12 = vmax.f32 %v3797_v9, 0.0  ;;  %v3798_v18 = vadd.f32 %v8307_v6, %v10225_v45  ;;  %v3680_v24 = vpop.f32.mrb[35].mxu1  ;;  %v4020_v33 = vld [vmem:[#allocation2 + $0xb0] sm:$0xff]  ;;  %8367 = vmatpush3.bf16.msra.mxu0 %v9248_v0  ;;  %v10340_v47 = vpack.c.bf16 %v4022_v11, %v4021_v53 }
 0x3f5   : > { %3934 = vst.msk [vmem:[#allocation2 + $0xf0] sm:$0xff] %vm442_vm2, %v3902_v55  ;;  %v3827_v40 = vmax.f32 %v3795_v4, 0.0  ;;  %v3796_v46 = vadd.f32 %v10225_v45, %v3680_v24  ;;  %v10336_v48 = vpack.c.bf16 %v4020_v33, %v4019_v26  ;;  %8400 = vmatprep.subr.bf16.mxu0 %v10324_v29 }
 0x3f6   : > { %v3868_v56 = vmul.f32 %v10231_v3, %v3829_v12  ;;  %v3830_v59 = vmax.f32 %v3798_v18, 0.0 }
 0x3f7   : > { %v3866_v62 = vmul.f32 %v10231_v3, %v3827_v40  ;;  %v3828_v5 = vmax.f32 %v3796_v46, 0.0  ;;  %8337 = vmatmul.mubr.msk.bf16.gmra.mrb[24].mxu0 %vm442_vm2, %v10336_v48 }
 0x3f8   : > { %v3907_v7 = vadd.f32 %v10238_v16, %v3868_v56  ;;  %v3869_v21 = vmul.f32 %v10231_v3, %v3830_v59  ;;  %8340 = vmatprep.mubr.msk.bf16.mxu0 %vm442_vm2, %v10340_v47 }
 0x3f9   : > { %v3905_v35 = vadd.f32 %v10238_v16, %v3866_v62  ;;  %v3867_v41 = vmul.f32 %v10231_v3, %v3828_v5  ;;  %v8310_v49 = vpop.f32.mrb[36].mxu1  ;;  %v4025_v42 = vld [vmem:[#allocation2 + $0x108] sm:$0xff] }
 0x3fa   : > { %3939 = vst.msk [vmem:[#allocation2 + $0x148] sm:$0xff] %vm442_vm2, %v3907_v7  ;;  %v3908_v60 = vadd.f32 %v10238_v16, %v3869_v21  ;;  %v3801_v51 = vadd.f32 %v8310_v49, %v10225_v45  ;;  %v3693_v19 = vpop.f32.mrb[37].mxu1  ;;  %v4023_v36 = vld [vmem:[#allocation2 + $0xe8] sm:$0xff] }
 0x3fb   : > { %3937 = vst.msk [vmem:[#allocation2 + $0x128] sm:$0xff] %vm442_vm2, %v3905_v35  ;;  %v3906_v63 = vadd.f32 %v10238_v16, %v3867_v41  ;;  %v3799_v2 = vadd.f32 %v10225_v45, %v3693_v19  ;;  %v8311_v8 = vpop.f32.mrb[38].mxu1  ;;  %v4026_v17 = vld [vmem:[#allocation2 + $0x110] sm:$0xff] }
 0x3fc   : > { %3940 = vst.msk [vmem:[#allocation2 + $0x150] sm:$0xff] %vm442_vm2, %v3908_v60  ;;  %v3833_v34 = vmax.f32 %v3801_v51, 0.0  ;;  %v3802_v27 = vadd.f32 %v8311_v8, %v10225_v45  ;;  %v3696_v28 = vpop.f32.mrb[39].mxu1  ;;  %v4024_v44 = vld [vmem:[#allocation2 + $0xf0] sm:$0xff]  ;;  %v10364_v61 = vpack.c.bf16 %v4026_v17, %v4025_v42 }
 0x3fd   : > { %3938 = vst.msk [vmem:[#allocation2 + $0x130] sm:$0xff] %vm442_vm2, %v3906_v63  ;;  %v3831_v32 = vmax.f32 %v3799_v2, 0.0  ;;  %v3800_v38 = vadd.f32 %v10225_v45, %v3696_v28  ;;  %v10361_v39 = vpack.c.bf16 %v4024_v44, %v4023_v36 }
 0x3fe   : > { %v3872_v43 = vmul.f32 %v10231_v3, %v3833_v34  ;;  %v3834_v50 = vmax.f32 %v3802_v27, 0.0 }
 0x3ff   : > { %v3870_v54 = vmul.f32 %v10231_v3, %v3831_v32  ;;  %v3832_v0 = vmax.f32 %v3800_v38, 0.0  ;;  %8341 = vmatmul.mubr.msk.bf16.gmra.mrb[28].mxu0 %vm442_vm2, %v10361_v39 }
 0x400   : > { %v3911_v1 = vadd.f32 %v10238_v16, %v3872_v43  ;;  %v3873_v10 = vmul.f32 %v10231_v3, %v3834_v50  ;;  %8344 = vmatprep.mubr.msk.bf16.mxu0 %vm442_vm2, %v10364_v61 }
 0x401   : > { %v3909_v37 = vadd.f32 %v10238_v16, %v3870_v54  ;;  %v3871_v58 = vmul.f32 %v10231_v3, %v3832_v0  ;;  %v8314_v15 = vpop.f32.mrb[40].mxu1  ;;  %v4029_v33 = vld [vmem:[#allocation2 + $0x148] sm:$0xff] }
 0x402   : > { %3943 = vst.msk [vmem:[#allocation2 + $0x188] sm:$0xff] %vm442_vm2, %v3911_v1  ;;  %v3912_v20 = vadd.f32 %v10238_v16, %v3873_v10  ;;  %v3805_v23 = vadd.f32 %v8314_v15, %v10225_v45  ;;  %v3709_v30 = vpop.f32.mrb[41].mxu1  ;;  %v4027_v11 = vld [vmem:[#allocation2 + $0x128] sm:$0xff] }
 0x403   : > { %3941 = vst.msk [vmem:[#allocation2 + $0x168] sm:$0xff] %vm442_vm2, %v3909_v37  ;;  %v3910_v31 = vadd.f32 %v10238_v16, %v3871_v58  ;;  %v3803_v25 = vadd.f32 %v10225_v45, %v3709_v30  ;;  %v8315_v9 = vpop.f32.mrb[42].mxu1  ;;  %v4030_v13 = vld [vmem:[#allocation2 + $0x150] sm:$0xff] }
 0x404   : > { %3944 = vst.msk [vmem:[#allocation2 + $0x190] sm:$0xff] %vm442_vm2, %v3912_v20  ;;  %v3837_v55 = vmax.f32 %v3805_v23, 0.0  ;;  %v3806_v4 = vadd.f32 %v8315_v9, %v10225_v45  ;;  %v3712_v6 = vpop.f32.mrb[43].mxu1  ;;  %v4028_v12 = vld [vmem:[#allocation2 + $0x130] sm:$0xff]  ;;  %v10388_v53 = vpack.c.bf16 %v4030_v13, %v4029_v33  ;;  %v3957_v33 = vld [vmem:[#allocation2 + $0x47] sm:$0xff] }
 0x405   : > { %3942 = vst.msk [vmem:[#allocation2 + $0x170] sm:$0xff] %vm442_vm2, %v3910_v31  ;;  %v3835_v18 = vmax.f32 %v3803_v25, 0.0  ;;  %v3804_v24 = vadd.f32 %v10225_v45, %v3712_v6  ;;  %v10385_v26 = vpack.c.bf16 %v4028_v12, %v4027_v11  ;;  %v3956_v11 = vld [vmem:[#allocation2 + $0x2f] sm:$0xff] }
 0x406   : > { %v3876_v40 = vmul.f32 %v10231_v3, %v3837_v55  ;;  %v3838_v46 = vmax.f32 %v3806_v4, 0.0  ;;  %v3958_v12 = vld [vmem:[#allocation2 + $0x4f] sm:$0xff] }
 0x407   : > { %v3874_v56 = vmul.f32 %v10231_v3, %v3835_v18  ;;  %v3836_v59 = vmax.f32 %v3804_v24, 0.0  ;;  %8345 = vmatmul.mubr.msk.bf16.gmra.mrb[32].mxu0 %vm442_vm2, %v10385_v26  ;;  %v3955_v18 = vld [vmem:[#allocation2 + $0x27] sm:$0xff] }
 0x408   : > { %v3915_v62 = vadd.f32 %v10238_v16, %v3876_v40  ;;  %v3877_v5 = vmul.f32 %v10231_v3, %v3838_v46  ;;  %8348 = vmatprep.mubr.msk.bf16.mxu0 %vm442_vm2, %v10388_v53  ;;  %v10442_v24 = vpack.c.bf16 %v3956_v11, %v3955_v18  ;;  %v9250_v40 = vld [vmem:[%s10988_s9 + $0x48] sm:$0xff]   ;;  %v10447_v46 = vpack.c.bf16 %v3958_v12, %v3957_v33 }
 0x409   : > { %v3913_v7 = vadd.f32 %v10238_v16, %v3874_v56  ;;  %v3875_v21 = vmul.f32 %v10231_v3, %v3836_v59  ;;  %v8318_v35 = vpop.f32.mrb[44].mxu1  ;;  %v4033_v38 = vld [vmem:[#allocation2 + $0x188] sm:$0xff]  ;;  %v9251_v56 = vld [vmem:[%s10988_s9 + $0x50] sm:$0xff]  }
 0x40a   : > { %3947 = vst.msk [vmem:[#allocation2 + $0x1c8] sm:$0xff] %vm442_vm2, %v3915_v62  ;;  %v3916_v41 = vadd.f32 %v10238_v16, %v3877_v5  ;;  %v3809_v49 = vadd.f32 %v8318_v35, %v10225_v45  ;;  %v3725_v60 = vpop.f32.mrb[45].mxu1  ;;  %v4031_v27 = vld [vmem:[#allocation2 + $0x168] sm:$0xff] }
 0x40b   : > { %3945 = vst.msk [vmem:[#allocation2 + $0x1a8] sm:$0xff] %vm442_vm2, %v3913_v7  ;;  %v3914_v51 = vadd.f32 %v10238_v16, %v3875_v21  ;;  %v3807_v19 = vadd.f32 %v10225_v45, %v3725_v60  ;;  %v8319_v63 = vpop.f32.mrb[46].mxu1  ;;  %v4034_v2 = vld [vmem:[#allocation2 + $0x190] sm:$0xff]  ;;  %v3959_v5 = vld [vmem:[#allocation2 + $0x67] sm:$0xff] }
 0x40c   : > { %3948 = vst.msk [vmem:[#allocation2 + $0x1d0] sm:$0xff] %vm442_vm2, %v3916_v41  ;;  %v3841_v8 = vmax.f32 %v3809_v49, 0.0  ;;  %v3810_v17 = vadd.f32 %v8319_v63, %v10225_v45  ;;  %v3728_v34 = vpop.f32.mrb[47].mxu1  ;;  %v4032_v28 = vld [vmem:[#allocation2 + $0x170] sm:$0xff]  ;;  %v10412_v50 = vpack.c.bf16 %v4034_v2, %v4033_v38  ;;  %v3961_v21 = vld [vmem:[#allocation2 + $0x87] sm:$0xff] }
 0x40d   : > { %3946 = vst.msk [vmem:[#allocation2 + $0x1b0] sm:$0xff] %vm442_vm2, %v3914_v51  ;;  %v3839_v36 = vmax.f32 %v3807_v19, 0.0  ;;  %v3808_v44 = vadd.f32 %v10225_v45, %v3728_v34  ;;  %v10409_v32 = vpack.c.bf16 %v4032_v28, %v4031_v27  ;;  %v3960_v59 = vld [vmem:[#allocation2 + $0x6f] sm:$0xff]  ;;  %v9253_v41 = vld [vmem:[%s10988_s9 + $0x60] sm:$0xff]  }
 0x40e   : > { %v3880_v42 = vmul.f32 %v10231_v3, %v3841_v8  ;;  %v3842_v43 = vmax.f32 %v3810_v17, 0.0  ;;  %v3962_v62 = vld [vmem:[#allocation2 + $0x8f] sm:$0xff]  ;;  %v10457_v7 = vpack.c.bf16 %v3960_v59, %v3959_v5  ;;  %v3963_v51 = vld [vmem:[#allocation2 + $0xa7] sm:$0xff] }
 0x40f   : > { %v3878_v54 = vmul.f32 %v10231_v3, %v3839_v36  ;;  %v3840_v0 = vmax.f32 %v3808_v44, 0.0  ;;  %8349 = vmatmul.mubr.msk.bf16.gmra.mrb[36].mxu0 %vm442_vm2, %v10409_v32  ;;  %v10462_v35 = vpack.c.bf16 %v3962_v62, %v3961_v21  ;;  %v3964_v49 = vld [vmem:[#allocation2 + $0xaf] sm:$0xff]  ;;  %v3965_v63 = vld [vmem:[#allocation2 + $0xc7] sm:$0xff] }
 0x410   : > { %v3919_v1 = vadd.f32 %v10238_v16, %v3880_v42  ;;  %v3881_v10 = vmul.f32 %v10231_v3, %v3842_v43  ;;  %8352 = vmatprep.mubr.msk.bf16.mxu0 %vm442_vm2, %v10412_v50  ;;  %v3966_v60 = vld [vmem:[#allocation2 + $0xcf] sm:$0xff]  ;;  %v10471_v19 = vpack.c.bf16 %v3964_v49, %v3963_v51  ;;  %v3967_v34 = vld [vmem:[#allocation2 + $0xe7] sm:$0xff] }
 0x411   : > { %v3917_v45 = vadd.f32 %v10238_v16, %v3878_v54  ;;  %v3879_v37 = vmul.f32 %v10231_v3, %v3840_v0  ;;  %v4037_v25 = vld [vmem:[#allocation2 + $0x1c8] sm:$0xff]  ;;  %v10473_v2 = vpack.c.bf16 %v3966_v60, %v3965_v63  ;;  %v4537_v59 = vld [vmem:[#allocation2 + $0x51] sm:$0xff] }
 0x412   : > { %3951 = vst.msk [vmem:[#allocation2 + $0x208] sm:$0xff] %vm442_vm2, %v3919_v1  ;;  %v3920_v58 = vadd.f32 %v10238_v16, %v3881_v10  ;;  %v4035_v23 = vld [vmem:[#allocation2 + $0x1a8] sm:$0xff]  ;;  %v4539_v60 = vld [vmem:[#allocation2 + $0x71] sm:$0xff] }
 0x413   : > { %3949 = vst.msk [vmem:[#allocation2 + $0x1e8] sm:$0xff] %vm442_vm2, %v3917_v45  ;;  %v3918_v15 = vadd.f32 %v10238_v16, %v3879_v37  ;;  %v4038_v20 = vld [vmem:[#allocation2 + $0x1d0] sm:$0xff]  ;;  %v3953_v3 = vld [vmem:[#allocation2 + $0x7] sm:$0xff] }
 0x414   : > { %3952 = vst.msk [vmem:[#allocation2 + $0x210] sm:$0xff] %vm442_vm2, %v3920_v58  ;;  %v4036_v30 = vld [vmem:[#allocation2 + $0x1b0] sm:$0xff]  ;;  %v10431_v9 = vpack.c.bf16 %v4038_v20, %v4037_v25  ;;  %v3969_v28 = vld [vmem:[#allocation2 + $0x107] sm:$0xff] }
 0x415   : > { %3950 = vst.msk [vmem:[#allocation2 + $0x1f0] sm:$0xff] %vm442_vm2, %v3918_v15  ;;  %v10429_v31 = vpack.c.bf16 %v4036_v30, %v4035_v23  ;;  %v3954_v16 = vld [vmem:[#allocation2 + $0xf] sm:$0xff]  ;;  %v3971_v42 = vld [vmem:[#allocation2 + $0x127] sm:$0xff] }
 0x416   : > { %v3985_v4 = vpack.c.bf16 %v3954_v16, %v3953_v3  ;;  %v3968_v8 = vld [vmem:[#allocation2 + $0xef] sm:$0xff]  ;;  %v3973_v54 = vld [vmem:[#allocation2 + $0x147] sm:$0xff] }
 0x417   : > { %8353 = vmatmul.mubr.msk.bf16.gmra.mrb[40].mxu0 %vm442_vm2, %v10429_v31  ;;  %v3970_v17 = vld [vmem:[#allocation2 + $0x10f] sm:$0xff]  ;;  %v10479_v27 = vpack.c.bf16 %v3968_v8, %v3967_v34  ;;  %v3975_v45 = vld [vmem:[#allocation2 + $0x167] sm:$0xff] }
 0x418   : > { %8356 = vmatprep.mubr.msk.bf16.mxu0 %vm442_vm2, %v10431_v9  ;;  %v10481_v36 = vpack.c.bf16 %v3970_v17, %v3969_v28  ;;  %v3972_v44 = vld [vmem:[#allocation2 + $0x12f] sm:$0xff]  ;;  %v3977_v58 = vld [vmem:[#allocation2 + $0x187] sm:$0xff] }
 0x419   : > { %v3974_v38 = vld [vmem:[#allocation2 + $0x14f] sm:$0xff]  ;;  %v10487_v43 = vpack.c.bf16 %v3972_v44, %v3971_v42  ;;  %v3979_v30 = vld [vmem:[#allocation2 + $0x1a7] sm:$0xff] }
 0x41a   : > { %v4039_v13 = vld [vmem:[#allocation2 + $0x1e8] sm:$0xff]  ;;  %v10489_v0 = vpack.c.bf16 %v3974_v38, %v3973_v54  ;;  %v4541_v63 = vld [vmem:[#allocation2 + $0x91] sm:$0xff]  ;;  %v9257_v34 = vld [vmem:[%s10988_s9 + $0x80] sm:$0xff]  }
 0x41b   : > { %v3976_v1 = vld [vmem:[#allocation2 + $0x16f] sm:$0xff]  ;;  %v3981_v3 = vld [vmem:[#allocation2 + $0x1c7] sm:$0xff] }
 0x41c   : > { %v4040_v55 = vld [vmem:[#allocation2 + $0x1f0] sm:$0xff]  ;;  %v10495_v37 = vpack.c.bf16 %v3976_v1, %v3975_v45  ;;  %v3983_v11 = vld [vmem:[#allocation2 + $0x1e7] sm:$0xff] }
 0x41d   : > { %v10437_v6 = vpack.c.bf16 %v4040_v55, %v4039_v13  ;;  %v3978_v10 = vld [vmem:[#allocation2 + $0x18f] sm:$0xff] }
 0x41e   : > { %v10497_v15 = vpack.c.bf16 %v3978_v10, %v3977_v58  ;;  %v3980_v20 = vld [vmem:[#allocation2 + $0x1af] sm:$0xff] }
 0x41f   : > { %8357 = vmatmul.mubr.msk.bf16.gmra.mrb[44].mxu0 %vm442_vm2, %v10437_v6  ;;  %v3982_v23 = vld [vmem:[#allocation2 + $0x1cf] sm:$0xff]  ;;  %v10503_v25 = vpack.c.bf16 %v3980_v20, %v3979_v30 }
 0x420   : > { %8368 = vmatprep.mubr.msk.bf16.mxu0 %vm442_vm2, %v3985_v4  ;;  %v10505_v16 = vpack.c.bf16 %v3982_v23, %v3981_v3  ;;  %v4532_v13 = vld [vmem:[#allocation2 + $0x9] sm:$0xff]  ;;  %v4533_v55 = vld [vmem:[#allocation2 + $0x11] sm:$0xff] }
 0x421   : > { %v3984_v4 = vld [vmem:[#allocation2 + $0x1ef] sm:$0xff]  ;;  %v4564_v12 = vpack.c.bf16 %v4533_v55, %v4532_v13 }
 0x422   : > { %v10511_v18 = vpack.c.bf16 %v3984_v4, %v3983_v11  ;;  %v4534_v33 = vld [vmem:[#allocation2 + $0x29] sm:$0xff]  ;;  %v4543_v44 = vld [vmem:[#allocation2 + $0xb1] sm:$0xff] }
 0x423   : > { %v9254_v5 = vld [vmem:[%s10988_s9 + $0x68] sm:$0xff]   ;;  %v4545_v42 = vld [vmem:[#allocation2 + $0xd1] sm:$0xff] }
 0x424   : > { %v4538_v49 = vld [vmem:[#allocation2 + $0x69] sm:$0xff]  ;;  %v4547_v45 = vld [vmem:[#allocation2 + $0xf1] sm:$0xff] }
 0x425   : > { %v4540_v51 = vld [vmem:[#allocation2 + $0x89] sm:$0xff]  ;;  %v10530_v8 = vpack.c.bf16 %v4539_v60, %v4538_v49  ;;  %v4549_v20 = vld [vmem:[#allocation2 + $0x111] sm:$0xff] }
 0x426   : > { %v10535_v17 = vpack.c.bf16 %v4541_v63, %v4540_v51  ;;  %v4542_v28 = vld [vmem:[#allocation2 + $0xa9] sm:$0xff]  ;;  %v4551_v13 = vld [vmem:[#allocation2 + $0x131] sm:$0xff] }
 0x427   : > { %8369 = vmatmul.mubr.msk.bf16.vlgmr.msra.gmra.mrb[16].mxu0 %vm442_vm2, %v10442_v24  ;;  %v4544_v38 = vld [vmem:[#allocation2 + $0xc9] sm:$0xff]  ;;  %v10544_v54 = vpack.c.bf16 %v4543_v44, %v4542_v28  ;;  %v4553_v4 = vld [vmem:[#allocation2 + $0x151] sm:$0xff] }
 0x428   : > { %8401 = vmatpush3.bf16.msra.mxu0 %v10324_v29  ;;  %8372 = vmatprep.mubr.msk.bf16.mxu0 %vm442_vm2, %v10447_v46  ;;  %v9252_v29 = vld [vmem:[%s10988_s9 + $0x58] sm:$0xff]   ;;  %v10546_v1 = vpack.c.bf16 %v4545_v42, %v4544_v38  ;;  %v4546_v10 = vld [vmem:[#allocation2 + $0xe9] sm:$0xff] }
 0x429   : > { %8402 = vmatprep.subr.bf16.mxu0 %v9250_v40  ;;  %v4548_v58 = vld [vmem:[#allocation2 + $0x109] sm:$0xff]  ;;  %v10552_v23 = vpack.c.bf16 %v4547_v45, %v4546_v10  ;;  %v4559_v60 = vld [vmem:[#allocation2 + $0x1b1] sm:$0xff] }
 0x42a   : > { %v10554_v30 = vpack.c.bf16 %v4549_v20, %v4548_v58  ;;  %v4550_v3 = vld [vmem:[#allocation2 + $0x129] sm:$0xff]  ;;  %v4561_v63 = vld [vmem:[#allocation2 + $0x1d1] sm:$0xff] }
 0x42b   : > { %v4552_v55 = vld [vmem:[#allocation2 + $0x149] sm:$0xff]  ;;  %v10560_v11 = vpack.c.bf16 %v4551_v13, %v4550_v3  ;;  %v4563_v38 = vld [vmem:[#allocation2 + $0x1f1] sm:$0xff] }
 0x42c   : > { %8403 = vmatpush3.bf16.msra.mxu0 %v9250_v40  ;;  %v4535_v40 = vld [vmem:[#allocation2 + $0x31] sm:$0xff]  ;;  %v4558_v49 = vld [vmem:[#allocation2 + $0x1a9] sm:$0xff] }
 0x42d   : > { %8404 = vmatprep.subr.bf16.mxu0 %v9251_v56  ;;  %v10516_v62 = vpack.c.bf16 %v4535_v40, %v4534_v33  ;;  %v4554_v33 = vld [vmem:[#allocation2 + $0x169] sm:$0xff]  ;;  %v4555_v40 = vld [vmem:[#allocation2 + $0x171] sm:$0xff] }
 0x42e   : > { %v4560_v51 = vld [vmem:[#allocation2 + $0x1c9] sm:$0xff] }
 0x42f   : > { %8373 = vmatmul.mubr.msk.bf16.gmra.mrb[20].mxu0 %vm442_vm2, %v10457_v7  ;;  %v10578_v28 = vpack.c.bf16 %v4561_v63, %v4560_v51  ;;  %v4562_v44 = vld [vmem:[#allocation2 + $0x1e9] sm:$0xff] }
 0x430   : > { %8376 = vmatprep.mubr.msk.bf16.mxu0 %vm442_vm2, %v10462_v35  ;;  %8405 = vmatpush3.bf16.msra.mxu0 %v9251_v56  ;;  %v4536_v56 = vld [vmem:[#allocation2 + $0x49] sm:$0xff]  ;;  %v10584_v42 = vpack.c.bf16 %v4563_v38, %v4562_v44 }
 0x431   : > { %8406 = vmatprep.subr.bf16.mxu0 %v9252_v29  ;;  %v10521_v21 = vpack.c.bf16 %v4537_v59, %v4536_v56  ;;  %v4556_v56 = vld [vmem:[#allocation2 + $0x189] sm:$0xff]  ;;  %v4557_v59 = vld [vmem:[#allocation2 + $0x191] sm:$0xff] }
 0x432   : > { %v9258_v10 = vld [vmem:[%s10988_s9 + $0x88] sm:$0xff]   ;;  %v9259_v45 = vld [vmem:[%s10988_s9 + $0x90] sm:$0xff]  }
 0x433   : > { %v4885_v58 = vld [vmem:[#allocation2 + $0x20f] sm:$0xff]  ;;  %v4884_v20 = vld [vmem:[#allocation2 + $0x207] sm:$0xff] }
 0x434   : > { %8407 = vmatpush3.bf16.msra.mxu0 %v9252_v29  ;;  %v9255_v29 = vld [vmem:[%s10988_s9 + $0x70] sm:$0xff]   ;;  %v10630_v3 = vpack.c.bf16 %v4885_v58, %v4884_v20  ;;  %v9262_v13 = vld [vmem:[%s10988_s9 + $0xa8] sm:$0xff]  }
 0x435   : > { %8440 = vmatprep.subr.bf16.mxu0 %v9253_v41  ;;  %v6153_v51 = vld [vmem:[#allocation2 + $0xf0] sm:$0xff]  ;;  %v6152_v44 = vld [vmem:[#allocation2 + $0xe8] sm:$0xff] }
 0x436   : > { %v6155_v63 = vld [vmem:[#allocation2 + $0x110] sm:$0xff]  ;;  %v6179_v38 = vpack.c.bf16 %v6153_v51, %v6152_v44  ;;  %v6156_v58 = vld [vmem:[#allocation2 + $0x128] sm:$0xff] }
 0x437   : > { %8377 = vmatmul.mubr.msk.bf16.gmra.mrb[24].mxu0 %vm442_vm2, %v10471_v19 }
 0x438   : > { %8380 = vmatprep.mubr.msk.bf16.mxu0 %vm442_vm2, %v10473_v2 }
 0x43f   : > { %8381 = vmatmul.mubr.msk.bf16.gmra.mrb[28].mxu0 %vm442_vm2, %v10479_v27 }
 0x440   : > { %8384 = vmatprep.mubr.msk.bf16.mxu0 %vm442_vm2, %v10481_v36 }
 0x447   : > { %8385 = vmatmul.mubr.msk.bf16.gmra.mrb[32].mxu0 %vm442_vm2, %v10487_v43 }
 0x448   : > { %8388 = vmatprep.mubr.msk.bf16.mxu0 %vm442_vm2, %v10489_v0 }
 0x44f   : > { %8389 = vmatmul.mubr.msk.bf16.gmra.mrb[36].mxu0 %vm442_vm2, %v10495_v37 }
 0x450   : > { %8392 = vmatprep.mubr.msk.bf16.mxu0 %vm442_vm2, %v10497_v15 }
 0x457   : > { %8393 = vmatmul.mubr.msk.bf16.gmra.mrb[40].mxu0 %vm442_vm2, %v10503_v25 }
 0x458   : > { %8396 = vmatprep.mubr.msk.bf16.mxu0 %vm442_vm2, %v10505_v16 }
 0x45f   : > { %8397 = vmatmul.mubr.msk.bf16.gmra.mrb[44].mxu0 %vm442_vm2, %v10511_v18 }
 0x460   : > { %8408 = vmatprep.mubr.msk.bf16.mxu0 %vm442_vm2, %v4564_v12  ;;  %v10562_v12 = vpack.c.bf16 %v4553_v4, %v4552_v55  ;;  %v9263_v55 = vld [vmem:[%s10988_s9 + $0xb0] sm:$0xff]  }
 0x461   : > { %v6149_v4 = vld [vmem:[#allocation2 + $0xb0] sm:$0xff] }
 0x467   : > { %8409 = vmatmul.mubr.msk.bf16.vlgmr.msra.gmra.mrb[16].mxu0 %vm442_vm2, %v10516_v62 }
 0x468   : > { %8441 = vmatpush3.bf16.msra.mxu0 %v9253_v41  ;;  %8412 = vmatprep.mubr.msk.bf16.mxu0 %vm442_vm2, %v10521_v21  ;;  %v9256_v41 = vld [vmem:[%s10988_s9 + $0x78] sm:$0xff]  }
 0x469   : > { %8442 = vmatprep.subr.bf16.mxu0 %v9254_v5 }
 0x46c   : > { %8443 = vmatpush3.bf16.msra.mxu0 %v9254_v5  ;;  %v10568_v5 = vpack.c.bf16 %v4555_v40, %v4554_v33  ;;  %v6151_v33 = vld [vmem:[#allocation2 + $0xd0] sm:$0xff]  ;;  %v6148_v40 = vld [vmem:[#allocation2 + $0xa8] sm:$0xff] }
 0x46d   : > { %8444 = vmatprep.subr.bf16.mxu0 %v9255_v29 }
 0x46f   : > { %8413 = vmatmul.mubr.msk.bf16.gmra.mrb[20].mxu0 %vm442_vm2, %v10530_v8 }
 0x470   : > { %8416 = vmatprep.mubr.msk.bf16.mxu0 %vm442_vm2, %v10535_v17  ;;  %8445 = vmatpush3.bf16.msra.mxu0 %v9255_v29  ;;  %v10570_v29 = vpack.c.bf16 %v4557_v59, %v4556_v56  ;;  %v6177_v56 = vpack.c.bf16 %v6149_v4, %v6148_v40  ;;  %v6150_v59 = vld [vmem:[#allocation2 + $0xc8] sm:$0xff] }
 0x471   : > { %8446 = vmatprep.subr.bf16.mxu0 %v9256_v41 }
 0x474   : > { %8447 = vmatpush3.bf16.msra.mxu0 %v9256_v41  ;;  %v10576_v41 = vpack.c.bf16 %v4559_v60, %v4558_v49  ;;  %v9276_v49 = vld [vmem:[%s10988_s9 + $0x118] sm:$0xff]   ;;  %v6178_v60 = vpack.c.bf16 %v6151_v33, %v6150_v59 }
 0x475   : > { %8480 = vmatprep.subr.bf16.mxu0 %v9257_v34 }
 0x477   : > { %8417 = vmatmul.mubr.msk.bf16.gmra.mrb[24].mxu0 %vm442_vm2, %v10544_v54 }
 0x478   : > { %8420 = vmatprep.mubr.msk.bf16.mxu0 %vm442_vm2, %v10546_v1 }
 0x47f   : > { %8421 = vmatmul.mubr.msk.bf16.gmra.mrb[28].mxu0 %vm442_vm2, %v10552_v23 }
 0x480   : > { %8424 = vmatprep.mubr.msk.bf16.mxu0 %vm442_vm2, %v10554_v30 }
 0x487   : > { %8425 = vmatmul.mubr.msk.bf16.gmra.mrb[32].mxu0 %vm442_vm2, %v10560_v11 }
 0x488   : > { %8428 = vmatprep.mubr.msk.bf16.mxu0 %vm442_vm2, %v10562_v12 }
 0x48f   : > { %8429 = vmatmul.mubr.msk.bf16.gmra.mrb[36].mxu0 %vm442_vm2, %v10568_v5 }
 0x490   : > { %8432 = vmatprep.mubr.msk.bf16.mxu0 %vm442_vm2, %v10570_v29 }
 0x497   : > { %8433 = vmatmul.mubr.msk.bf16.gmra.mrb[40].mxu0 %vm442_vm2, %v10576_v41 }
 0x498   : > { %8436 = vmatprep.mubr.msk.bf16.mxu0 %vm442_vm2, %v10578_v28 }
 0x49f   : > { %8437 = vmatmul.mubr.msk.bf16.gmra.mrb[44].mxu0 %vm442_vm2, %v10584_v42 }
 0x4a0   : > { %8448 = vmatprep.mubr.msk.bf16.mxu0 %vm442_vm2, %v10442_v24  ;;  %v9260_v24 = vld [vmem:[%s10988_s9 + $0x98] sm:$0xff]  }
 0x4a7   : > { %8449 = vmatmul.mubr.msk.bf16.vlgmr.msra.gmra.mrb[16].mxu0 %vm442_vm2, %v10447_v46 }
 0x4a8   : > { %8481 = vmatpush3.bf16.msra.mxu0 %v9257_v34  ;;  %8452 = vmatprep.mubr.msk.bf16.mxu0 %vm442_vm2, %v10457_v7  ;;  %v9261_v34 = vld [vmem:[%s10988_s9 + $0xa0] sm:$0xff]  }
 0x4a9   : > { %8482 = vmatprep.subr.bf16.mxu0 %v9258_v10 }
 0x4ac   : > { %8483 = vmatpush3.bf16.msra.mxu0 %v9258_v10  ;;  %v6154_v10 = vld [vmem:[#allocation2 + $0x108] sm:$0xff] }
 0x4ad   : > { %8484 = vmatprep.subr.bf16.mxu0 %v9259_v45 }
 0x4af   : > { %8453 = vmatmul.mubr.msk.bf16.gmra.mrb[20].mxu0 %vm442_vm2, %v10462_v35 }
 0x4b0   : > { %8456 = vmatprep.mubr.msk.bf16.mxu0 %vm442_vm2, %v10471_v19  ;;  %8485 = vmatpush3.bf16.msra.mxu0 %v9259_v45  ;;  %v6180_v45 = vpack.c.bf16 %v6155_v63, %v6154_v10 }
 0x4b1   : > { %8486 = vmatprep.subr.bf16.mxu0 %v9260_v24 }
 0x4b4   : > { %8487 = vmatpush3.bf16.msra.mxu0 %v9260_v24  ;;  %v6157_v24 = vld [vmem:[#allocation2 + $0x130] sm:$0xff] }
 0x4b5   : > { %8520 = vmatprep.subr.bf16.mxu0 %v9261_v34  ;;  %v6181_v20 = vpack.c.bf16 %v6157_v24, %v6156_v58 }
 0x4b7   : > { %8457 = vmatmul.mubr.msk.bf16.gmra.mrb[24].mxu0 %vm442_vm2, %v10473_v2 }
 0x4b8   : > { %8460 = vmatprep.mubr.msk.bf16.mxu0 %vm442_vm2, %v10479_v27 }
 0x4bf   : > { %8461 = vmatmul.mubr.msk.bf16.gmra.mrb[28].mxu0 %vm442_vm2, %v10481_v36 }
 0x4c0   : > { %8464 = vmatprep.mubr.msk.bf16.mxu0 %vm442_vm2, %v10487_v43 }
 0x4c7   : > { %8465 = vmatmul.mubr.msk.bf16.gmra.mrb[32].mxu0 %vm442_vm2, %v10489_v0 }
 0x4c8   : > { %8468 = vmatprep.mubr.msk.bf16.mxu0 %vm442_vm2, %v10495_v37 }
 0x4cf   : > { %8469 = vmatmul.mubr.msk.bf16.gmra.mrb[36].mxu0 %vm442_vm2, %v10497_v15 }
 0x4d0   : > { %8472 = vmatprep.mubr.msk.bf16.mxu0 %vm442_vm2, %v10503_v25 }
 0x4d7   : > { %8473 = vmatmul.mubr.msk.bf16.gmra.mrb[40].mxu0 %vm442_vm2, %v10505_v16 }
 0x4d8   : > { %8476 = vmatprep.mubr.msk.bf16.mxu0 %vm442_vm2, %v10511_v18 }
 0x4df   : > { %8477 = vmatmul.mubr.msk.bf16.gmra.mrb[44].mxu0 %vm442_vm2, %v10630_v3 }
 0x4e0   : > { %8488 = vmatprep.mubr.msk.bf16.mxu0 %vm442_vm2, %v10273_v57  ;;  %v9264_v57 = vld [vmem:[%s10988_s9 + $0xb8] sm:$0xff]  }
 0x4e7   : > { %8489 = vmatmul.mubr.msk.bf16.vlgmr.msra.gmra.mrb[16].mxu0 %vm442_vm2, %v10279_v22  ;;  %v9265_v22 = vld [vmem:[%s10988_s9 + $0xc0] sm:$0xff]  }
 0x4e8   : > { %8521 = vmatpush3.bf16.msra.mxu0 %v9261_v34  ;;  %8492 = vmatprep.mubr.msk.bf16.mxu0 %vm442_vm2, %v10304_v52  ;;  %v5207_v52 = vld [vmem:[#allocation2 + $0x210] sm:$0xff] }
 0x4e9   : > { %8522 = vmatprep.subr.bf16.mxu0 %v9262_v13  ;;  %v6159_v34 = vld [vmem:[#allocation2 + $0x150] sm:$0xff] }
 0x4ec   : > { %8523 = vmatpush3.bf16.msra.mxu0 %v9262_v13 }
 0x4ed   : > { %8524 = vmatprep.subr.bf16.mxu0 %v9263_v55 }
 0x4ef   : > { %8493 = vmatmul.mubr.msk.bf16.gmra.mrb[20].mxu0 %vm442_vm2, %v10310_v14  ;;  %v5206_v14 = vld [vmem:[#allocation2 + $0x208] sm:$0xff] }
 0x4f0   : > { %8496 = vmatprep.mubr.msk.bf16.mxu0 %vm442_vm2, %v10336_v48  ;;  %8525 = vmatpush3.bf16.msra.mxu0 %v9263_v55  ;;  %v10676_v48 = vpack.c.bf16 %v5207_v52, %v5206_v14  ;;  %v6161_v55 = vld [vmem:[#allocation2 + $0x170] sm:$0xff]  ;;  %v6162_v14 = vld [vmem:[#allocation2 + $0x188] sm:$0xff] }
 0x4f1   : > { %8526 = vmatprep.subr.bf16.mxu0 %v9264_v57 }
 0x4f4   : > { %8527 = vmatpush3.bf16.msra.mxu0 %v9264_v57  ;;  %v6163_v57 = vld [vmem:[#allocation2 + $0x190] sm:$0xff] }
 0x4f5   : > { %8560 = vmatprep.subr.bf16.mxu0 %v9265_v22 }
 0x4f7   : > { %8497 = vmatmul.mubr.msk.bf16.gmra.mrb[24].mxu0 %vm442_vm2, %v10340_v47  ;;  %v9266_v47 = vld [vmem:[%s10988_s9 + $0xc8] sm:$0xff]  }
 0x4f8   : > { %8500 = vmatprep.mubr.msk.bf16.mxu0 %vm442_vm2, %v10361_v39  ;;  %v9267_v39 = vld [vmem:[%s10988_s9 + $0xd0] sm:$0xff]  }
 0x4ff   : > { %8501 = vmatmul.mubr.msk.bf16.gmra.mrb[28].mxu0 %vm442_vm2, %v10364_v61  ;;  %v9268_v61 = vld [vmem:[%s10988_s9 + $0xd8] sm:$0xff]  }
 0x500   : > { %8504 = vmatprep.mubr.msk.bf16.mxu0 %vm442_vm2, %v10385_v26  ;;  %v9269_v26 = vld [vmem:[%s10988_s9 + $0xe0] sm:$0xff]  }
 0x507   : > { %8505 = vmatmul.mubr.msk.bf16.gmra.mrb[32].mxu0 %vm442_vm2, %v10388_v53  ;;  %v5528_v53 = vld [vmem:[#allocation2 + $0x209] sm:$0xff] }
 0x508   : > { %8508 = vmatprep.mubr.msk.bf16.mxu0 %vm442_vm2, %v10409_v32  ;;  %v5529_v32 = vld [vmem:[#allocation2 + $0x211] sm:$0xff] }
 0x50f   : > { %8509 = vmatmul.mubr.msk.bf16.gmra.mrb[36].mxu0 %vm442_vm2, %v10412_v50  ;;  %v10722_v50 = vpack.c.bf16 %v5529_v32, %v5528_v53  ;;  %v6166_v32 = vld [vmem:[#allocation2 + $0x1c8] sm:$0xff] }
 0x510   : > { %8512 = vmatprep.mubr.msk.bf16.mxu0 %vm442_vm2, %v10429_v31  ;;  %v9270_v31 = vld [vmem:[%s10988_s9 + $0xe8] sm:$0xff]  }
 0x517   : > { %8513 = vmatmul.mubr.msk.bf16.gmra.mrb[40].mxu0 %vm442_vm2, %v10431_v9  ;;  %v9271_v9 = vld [vmem:[%s10988_s9 + $0xf0] sm:$0xff]  }
 0x518   : > { %8516 = vmatprep.mubr.msk.bf16.mxu0 %vm442_vm2, %v10437_v6  ;;  %v9272_v6 = vld [vmem:[%s10988_s9 + $0xf8] sm:$0xff]  }
 0x51f   : > { %8517 = vmatmul.mubr.msk.bf16.gmra.mrb[44].mxu0 %vm442_vm2, %v10676_v48 }
 0x520   : > { %8528 = vmatprep.mubr.msk.bf16.mxu0 %vm442_vm2, %v10516_v62  ;;  %v9275_v62 = vld [vmem:[%s10988_s9 + $0x110] sm:$0xff]  }
 0x527   : > { %8529 = vmatmul.mubr.msk.bf16.vlgmr.msra.gmra.mrb[16].mxu0 %vm442_vm2, %v10521_v21 }
 0x528   : > { %8561 = vmatpush3.bf16.msra.mxu0 %v9265_v22  ;;  %8532 = vmatprep.mubr.msk.bf16.mxu0 %vm442_vm2, %v10530_v8  ;;  %v6160_v22 = vld [vmem:[#allocation2 + $0x168] sm:$0xff] }
 0x529   : > { %8562 = vmatprep.subr.bf16.mxu0 %v9266_v47  ;;  %v6183_v52 = vpack.c.bf16 %v6161_v55, %v6160_v22 }
 0x52c   : > { %8563 = vmatpush3.bf16.msra.mxu0 %v9266_v47  ;;  %v6184_v47 = vpack.c.bf16 %v6163_v57, %v6162_v14 }
 0x52d   : > { %8564 = vmatprep.subr.bf16.mxu0 %v9267_v39 }
 0x52f   : > { %8533 = vmatmul.mubr.msk.bf16.gmra.mrb[20].mxu0 %vm442_vm2, %v10535_v17 }
 0x530   : > { %8536 = vmatprep.mubr.msk.bf16.mxu0 %vm442_vm2, %v10544_v54  ;;  %8565 = vmatpush3.bf16.msra.mxu0 %v9267_v39  ;;  %v6165_v39 = vld [vmem:[#allocation2 + $0x1b0] sm:$0xff] }
 0x531   : > { %8566 = vmatprep.subr.bf16.mxu0 %v9268_v61 }
 0x534   : > { %8567 = vmatpush3.bf16.msra.mxu0 %v9268_v61  ;;  %v6167_v61 = vld [vmem:[#allocation2 + $0x1d0] sm:$0xff] }
 0x535   : > { %8600 = vmatprep.subr.bf16.mxu0 %v9269_v26 }
 0x537   : > { %8537 = vmatmul.mubr.msk.bf16.gmra.mrb[24].mxu0 %vm442_vm2, %v10546_v1 }
 0x538   : > { %8540 = vmatprep.mubr.msk.bf16.mxu0 %vm442_vm2, %v10552_v23 }
 0x53f   : > { %8541 = vmatmul.mubr.msk.bf16.gmra.mrb[28].mxu0 %vm442_vm2, %v10554_v30 }
 0x540   : > { %8544 = vmatprep.mubr.msk.bf16.mxu0 %vm442_vm2, %v10560_v11 }
 0x547   : > { %8545 = vmatmul.mubr.msk.bf16.gmra.mrb[32].mxu0 %vm442_vm2, %v10562_v12 }
 0x548   : > { %8548 = vmatprep.mubr.msk.bf16.mxu0 %vm442_vm2, %v10568_v5 }
 0x54f   : > { %8549 = vmatmul.mubr.msk.bf16.gmra.mrb[36].mxu0 %vm442_vm2, %v10570_v29 }
 0x550   : > { %8552 = vmatprep.mubr.msk.bf16.mxu0 %vm442_vm2, %v10576_v41 }
 0x557   : > { %8553 = vmatmul.mubr.msk.bf16.gmra.mrb[40].mxu0 %vm442_vm2, %v10578_v28 }
 0x558   : > { %8556 = vmatprep.mubr.msk.bf16.mxu0 %vm442_vm2, %v10584_v42 }
 0x55f   : > { %8557 = vmatmul.mubr.msk.bf16.gmra.mrb[44].mxu0 %vm442_vm2, %v10722_v50 }
 0x560   : > { %8568 = vmatprep.mubr.msk.bf16.mxu0 %vm442_vm2, %v10447_v46  ;;  %v9273_v46 = vld [vmem:[%s10988_s9 + $0x100] sm:$0xff]  }
 0x567   : > { %8569 = vmatmul.mubr.msk.bf16.vlgmr.msra.gmra.mrb[16].mxu0 %vm442_vm2, %v10457_v7  ;;  %v5850_v7 = vld [vmem:[#allocation2 + $0x227] sm:$0xff] }
 0x568   : > { %8601 = vmatpush3.bf16.msra.mxu0 %v9269_v26  ;;  %8572 = vmatprep.mubr.msk.bf16.mxu0 %vm442_vm2, %v10462_v35  ;;  %v5851_v35 = vld [vmem:[#allocation2 + $0x22f] sm:$0xff] }
 0x569   : > { %8602 = vmatprep.subr.bf16.mxu0 %v9270_v31  ;;  %v6164_v26 = vld [vmem:[#allocation2 + $0x1a8] sm:$0xff] }
 0x56a   : > { %v6185_v53 = vpack.c.bf16 %v6165_v39, %v6164_v26 }
 0x56c   : > { %8603 = vmatpush3.bf16.msra.mxu0 %v9270_v31  ;;  %v6186_v31 = vpack.c.bf16 %v6167_v61, %v6166_v32 }
 0x56d   : > { %8604 = vmatprep.subr.bf16.mxu0 %v9271_v9 }
 0x56f   : > { %8573 = vmatmul.mubr.msk.bf16.gmra.mrb[20].mxu0 %vm442_vm2, %v10471_v19  ;;  %v5867_v19 = vpack.c.bf16 %v5851_v35, %v5850_v7  ;;  %v6172_v7 = vld [vmem:[#allocation2 + $0x228] sm:$0xff]  ;;  %v6173_v35 = vld [vmem:[#allocation2 + $0x230] sm:$0xff] }
 0x570   : > { %8576 = vmatprep.mubr.msk.bf16.mxu0 %vm442_vm2, %v10473_v2  ;;  %8605 = vmatpush3.bf16.msra.mxu0 %v9271_v9  ;;  %v6143_v2 = vld [vmem:[#allocation2 + $0x50] sm:$0xff] }
 0x571   : > { %8606 = vmatprep.subr.bf16.mxu0 %v9272_v6  ;;  %v6169_v9 = vld [vmem:[#allocation2 + $0x1f0] sm:$0xff] }
 0x574   : > { %8607 = vmatpush3.bf16.msra.mxu0 %v9272_v6  ;;  %v6168_v6 = vld [vmem:[#allocation2 + $0x1e8] sm:$0xff] }
 0x575   : > { %8640 = vmatprep.subr.bf16.mxu0 %v9273_v46 }
 0x577   : > { %8577 = vmatmul.mubr.msk.bf16.gmra.mrb[24].mxu0 %vm442_vm2, %v10479_v27  ;;  %v6142_v27 = vld [vmem:[#allocation2 + $0x48] sm:$0xff] }
 0x578   : > { %8580 = vmatprep.mubr.msk.bf16.mxu0 %vm442_vm2, %v10481_v36  ;;  %v6174_v36 = vpack.c.bf16 %v6143_v2, %v6142_v27 }
 0x57f   : > { %8581 = vmatmul.mubr.msk.bf16.gmra.mrb[28].mxu0 %vm442_vm2, %v10487_v43  ;;  %v6145_v43 = vld [vmem:[#allocation2 + $0x70] sm:$0xff] }
 0x580   : > { %8584 = vmatprep.mubr.msk.bf16.mxu0 %vm442_vm2, %v10489_v0  ;;  %v6147_v0 = vld [vmem:[#allocation2 + $0x90] sm:$0xff] }
 0x587   : > { %8585 = vmatmul.mubr.msk.bf16.gmra.mrb[32].mxu0 %vm442_vm2, %v10495_v37  ;;  %v6144_v37 = vld [vmem:[#allocation2 + $0x68] sm:$0xff] }
 0x588   : > { %8588 = vmatprep.mubr.msk.bf16.mxu0 %vm442_vm2, %v10497_v15  ;;  %v6175_v15 = vpack.c.bf16 %v6145_v43, %v6144_v37 }
 0x58f   : > { %8589 = vmatmul.mubr.msk.bf16.gmra.mrb[36].mxu0 %vm442_vm2, %v10503_v25  ;;  %v6146_v25 = vld [vmem:[#allocation2 + $0x88] sm:$0xff] }
 0x590   : > { %8592 = vmatprep.mubr.msk.bf16.mxu0 %vm442_vm2, %v10505_v16  ;;  %v9274_v16 = vld [vmem:[%s10988_s9 + $0x108] sm:$0xff]  }
 0x597   : > { %8593 = vmatmul.mubr.msk.bf16.gmra.mrb[40].mxu0 %vm442_vm2, %v10511_v18  ;;  %v6176_v18 = vpack.c.bf16 %v6147_v0, %v6146_v25 }
 0x598   : > { %8596 = vmatprep.mubr.msk.bf16.mxu0 %vm442_vm2, %v10630_v3  ;;  %v6158_v3 = vld [vmem:[#allocation2 + $0x148] sm:$0xff] }
 0x599   : > { %v6182_v13 = vpack.c.bf16 %v6159_v34, %v6158_v3 }
 0x59f   : > { %8597 = vmatmul.mubr.msk.bf16.gmra.mrb[44].mxu0 %vm442_vm2, %v5867_v19  ;;  %v6189_v19 = vpack.c.bf16 %v6173_v35, %v6172_v7 }
 0x5a0   : > { %8608 = vmatprep.mubr.msk.bf16.mxu0 %vm442_vm2, %v6174_v36 }
 0x5a7   : > { %8609 = vmatmul.mubr.msk.bf16.vlgmr.msra.gmra.mrb[16].mxu0 %vm442_vm2, %v6175_v15 }
 0x5a8   : > { %8641 = vmatpush3.bf16.msra.mxu0 %v9273_v46  ;;  %8612 = vmatprep.mubr.msk.bf16.mxu0 %vm442_vm2, %v6176_v18  ;;  %v6187_v46 = vpack.c.bf16 %v6169_v9, %v6168_v6 }
 0x5a9   : > { %8642 = vmatprep.subr.bf16.mxu0 %v9274_v16 }
 0x5ac   : > { %8643 = vmatpush3.bf16.msra.mxu0 %v9274_v16 }
 0x5ad   : > { %8644 = vmatprep.subr.bf16.mxu0 %v9275_v62 }
 0x5af   : > { %8613 = vmatmul.mubr.msk.bf16.gmra.mrb[20].mxu0 %vm442_vm2, %v6177_v56 }
 0x5b0   : > { %8616 = vmatprep.mubr.msk.bf16.mxu0 %vm442_vm2, %v6178_v60  ;;  %8645 = vmatpush3.bf16.msra.mxu0 %v9275_v62 }
 0x5b1   : > { %8646 = vmatprep.subr.bf16.mxu0 %v9276_v49 }
 0x5b4   : > { %8647 = vmatpush3.bf16.msra.mxu0 %v9276_v49 }
 0x5b7   : > { %8617 = vmatmul.mubr.msk.bf16.gmra.mrb[24].mxu0 %vm442_vm2, %v6179_v38 }
 0x5b8   : > { %8620 = vmatprep.mubr.msk.bf16.mxu0 %vm442_vm2, %v6180_v45 }
 0x5bf   : > { %8621 = vmatmul.mubr.msk.bf16.gmra.mrb[28].mxu0 %vm442_vm2, %v6181_v20 }
 0x5c0   : > { %8624 = vmatprep.mubr.msk.bf16.mxu0 %vm442_vm2, %v6182_v13 }
 0x5c7   : > { %8625 = vmatmul.mubr.msk.bf16.gmra.mrb[32].mxu0 %vm442_vm2, %v6183_v52 }
 0x5c8   : > { %8628 = vmatprep.mubr.msk.bf16.mxu0 %vm442_vm2, %v6184_v47 }
 0x5cf   : > { %8629 = vmatmul.mubr.msk.bf16.gmra.mrb[36].mxu0 %vm442_vm2, %v6185_v53 }
 0x5d0   : > { %8632 = vmatprep.mubr.msk.bf16.mxu0 %vm442_vm2, %v6186_v31 }
 0x5d7   : > { %8633 = vmatmul.mubr.msk.bf16.gmra.mrb[40].mxu0 %vm442_vm2, %v6187_v46 }
 0x5d8   : > { %8636 = vmatprep.mubr.msk.bf16.mxu0 %vm442_vm2, %v10676_v48 }
 0x5df   : > { %8637 = vmatmul.mubr.msk.bf16.gmra.mrb[44].mxu0 %vm442_vm2, %v6189_v19 }
 0x5e0   : > { %8648 = vmatprep.mubr.msk.bf16.mxu0 %vm442_vm2, %v10521_v21  ;;  %v6494_v21 = vld [vmem:[#allocation2 + $0x229] sm:$0xff] }
 0x5e7   : > { %8649 = vmatmul.mubr.msk.bf16.vlgmr.msra.gmra.mrb[16].mxu0 %vm442_vm2, %v10530_v8  ;;  %v6495_v8 = vld [vmem:[#allocation2 + $0x231] sm:$0xff] }
 0x5e8   : > { %8652 = vmatprep.mubr.msk.bf16.mxu0 %vm442_vm2, %v10535_v17  ;;  %v6511_v17 = vpack.c.bf16 %v6495_v8, %v6494_v21 }
 0x5ef   : > { %8653 = vmatmul.mubr.msk.bf16.gmra.mrb[20].mxu0 %vm442_vm2, %v10544_v54  ;;  %v10829_v54 = vld [vmem:[%s10989_s10] ss:$0 sm:$0xff] }
 0x5f0   : > { %8656 = vmatprep.mubr.msk.bf16.mxu0 %vm442_vm2, %v10546_v1 }
 0x5f7   : > { %8657 = vmatmul.mubr.msk.bf16.gmra.mrb[24].mxu0 %vm442_vm2, %v10552_v23 }
 0x5f8   : > { %8660 = vmatprep.mubr.msk.bf16.mxu0 %vm442_vm2, %v10554_v30 }
 0x5ff   : > { %8661 = vmatmul.mubr.msk.bf16.gmra.mrb[28].mxu0 %vm442_vm2, %v10560_v11  ;;  %v10835_v11 = vld [vmem:[%s10990_s11] ss:$0 sm:$0xff] }
 0x600   : > { %8664 = vmatprep.mubr.msk.bf16.mxu0 %vm442_vm2, %v10562_v12 }
 0x607   : > { %8665 = vmatmul.mubr.msk.bf16.gmra.mrb[32].mxu0 %vm442_vm2, %v10568_v5 }
 0x608   : > { %8668 = vmatprep.mubr.msk.bf16.mxu0 %vm442_vm2, %v10570_v29 }
 0x60f   : > { %8669 = vmatmul.mubr.msk.bf16.gmra.mrb[36].mxu0 %vm442_vm2, %v10576_v41 }
 0x610   : > { %8672 = vmatprep.mubr.msk.bf16.mxu0 %vm442_vm2, %v10578_v28 }
 0x617   : > { %8673 = vmatmul.mubr.msk.bf16.gmra.mrb[40].mxu0 %vm442_vm2, %v10584_v42  ;;  %v10842_v42 = vld [vmem:[%s10991_s12] ss:$0 sm:$0xff] }
 0x618   : > { %8676 = vmatprep.mubr.msk.bf16.mxu0 %vm442_vm2, %v10722_v50 }
 0x61f   : > { %8677 = vmatmul.mubr.msk.bf16.gmra.mrb[44].mxu0 %vm442_vm2, %v6511_v17 }
 0x6ba   : > { %v8650_v1 = vpop.f32.mrb[16].mxu0 }
 0x6bb   : > { %v6795_v23 = vadd.f32 %v8650_v1, %v10829_v54  ;;  %v6627_v30 = vpop.f32.mrb[17].mxu0 }
 0x6bc   : > { %v6793_v12 = vadd.f32 %v10829_v54, %v6627_v30  ;;  %v8651_v5 = vpop.f32.mrb[18].mxu0 }
 0x6bd   : > { %v6827_v29 = vmax.f32 %v6795_v23, 0.0  ;;  %v6796_v41 = vadd.f32 %v8651_v5, %v10829_v54  ;;  %v6630_v28 = vpop.f32.mrb[19].mxu0 }
 0x6be   : > { %v6825_v48 = vmax.f32 %v6793_v12, 0.0  ;;  %v6794_v50 = vadd.f32 %v10829_v54, %v6630_v28 }
 0x6bf   : > { %v6866_v2 = vmul.f32 %v10835_v11, %v6827_v29  ;;  %v6828_v27 = vmax.f32 %v6796_v41, 0.0 }
 0x6c0   : > { %v6864_v36 = vmul.f32 %v10835_v11, %v6825_v48  ;;  %v6826_v43 = vmax.f32 %v6794_v50, 0.0 }
 0x6c1   : > { %v6905_v0 = vadd.f32 %v10842_v42, %v6866_v2  ;;  %v6867_v37 = vmul.f32 %v10835_v11, %v6828_v27 }
 0x6c2   : > { %v6903_v15 = vadd.f32 %v10842_v42, %v6864_v36  ;;  %v6865_v25 = vmul.f32 %v10835_v11, %v6826_v43  ;;  %v8654_v16 = vpop.f32.mrb[20].mxu0 }
 0x6c3   : > { %6937 = vst [vmem:[%s10851_s28 + $0x10] sm:$0xff] %v6905_v0  ;;  %v6906_v18 = vadd.f32 %v10842_v42, %v6867_v37  ;;  %v6799_v62 = vadd.f32 %v8654_v16, %v10829_v54  ;;  %v6643_v4 = vpop.f32.mrb[21].mxu0 }
 0x6c4   : > { %6935 = vst [vmem:[%s10851_s28] sm:$0xff] %v6903_v15  ;;  %v6904_v33 = vadd.f32 %v10842_v42, %v6865_v25  ;;  %v6797_v40 = vadd.f32 %v10829_v54, %v6643_v4  ;;  %v8655_v56 = vpop.f32.mrb[22].mxu0 }
 0x6c5   : > { %6938 = vst [vmem:[%s10851_s28 + $0x18] sm:$0xff] %v6906_v18  ;;  %v6831_v59 = vmax.f32 %v6799_v62, 0.0  ;;  %v6800_v49 = vadd.f32 %v8655_v56, %v10829_v54  ;;  %v6646_v60 = vpop.f32.mrb[23].mxu0 }
 0x6c6   : > { %6936 = vst [vmem:[%s10851_s28 + $0x8] sm:$0xff] %v6904_v33  ;;  %v6829_v51 = vmax.f32 %v6797_v40, 0.0  ;;  %v6798_v63 = vadd.f32 %v10829_v54, %v6646_v60 }
 0x6c7   : > { %v6870_v44 = vmul.f32 %v10835_v11, %v6831_v59  ;;  %v6832_v38 = vmax.f32 %v6800_v49, 0.0 }
 0x6c8   : > { %v6868_v10 = vmul.f32 %v10835_v11, %v6829_v51  ;;  %v6830_v45 = vmax.f32 %v6798_v63, 0.0 }
 0x6c9   : > { %v6909_v24 = vadd.f32 %v10842_v42, %v6870_v44  ;;  %v6871_v34 = vmul.f32 %v10835_v11, %v6832_v38 }
 0x6ca   : > { %v6907_v58 = vadd.f32 %v10842_v42, %v6868_v10  ;;  %v6869_v20 = vmul.f32 %v10835_v11, %v6830_v45  ;;  %v8658_v3 = vpop.f32.mrb[24].mxu0 }
 0x6cb   : > { %6941 = vst [vmem:[%s10851_s28 + $0x30] sm:$0xff] %v6909_v24  ;;  %v6910_v13 = vadd.f32 %v10842_v42, %v6871_v34  ;;  %v6803_v55 = vadd.f32 %v8658_v3, %v10829_v54  ;;  %v6659_v57 = vpop.f32.mrb[25].mxu0 }
 0x6cc   : > { %6939 = vst [vmem:[%s10851_s28 + $0x20] sm:$0xff] %v6907_v58  ;;  %v6908_v22 = vadd.f32 %v10842_v42, %v6869_v20  ;;  %v6801_v52 = vadd.f32 %v10829_v54, %v6659_v57  ;;  %v8659_v14 = vpop.f32.mrb[26].mxu0 }
 0x6cd   : > { %6942 = vst [vmem:[%s10851_s28 + $0x38] sm:$0xff] %v6910_v13  ;;  %v6835_v47 = vmax.f32 %v6803_v55, 0.0  ;;  %v6804_v39 = vadd.f32 %v8659_v14, %v10829_v54  ;;  %v6662_v61 = vpop.f32.mrb[27].mxu0 }
 0x6ce   : > { %6940 = vst [vmem:[%s10851_s28 + $0x28] sm:$0xff] %v6908_v22  ;;  %v6833_v26 = vmax.f32 %v6801_v52, 0.0  ;;  %v6802_v53 = vadd.f32 %v10829_v54, %v6662_v61 }
 0x6cf   : > { %v6874_v32 = vmul.f32 %v10835_v11, %v6835_v47  ;;  %v6836_v31 = vmax.f32 %v6804_v39, 0.0 }
 0x6d0   : > { %v6872_v9 = vmul.f32 %v10835_v11, %v6833_v26  ;;  %v6834_v6 = vmax.f32 %v6802_v53, 0.0 }
 0x6d1   : > { %v6913_v46 = vadd.f32 %v10842_v42, %v6874_v32  ;;  %v6875_v7 = vmul.f32 %v10835_v11, %v6836_v31 }
 0x6d2   : > { %v6911_v35 = vadd.f32 %v10842_v42, %v6872_v9  ;;  %v6873_v19 = vmul.f32 %v10835_v11, %v6834_v6  ;;  %v8662_v21 = vpop.f32.mrb[28].mxu0 }
 0x6d3   : > { %6945 = vst [vmem:[%s10851_s28 + $0x50] sm:$0xff] %v6913_v46  ;;  %v6914_v8 = vadd.f32 %v10842_v42, %v6875_v7  ;;  %v6807_v17 = vadd.f32 %v8662_v21, %v10829_v54  ;;  %v6675_v1 = vpop.f32.mrb[29].mxu0 }
 0x6d4   : > { %6943 = vst [vmem:[%s10851_s28 + $0x40] sm:$0xff] %v6911_v35  ;;  %v6912_v23 = vadd.f32 %v10842_v42, %v6873_v19  ;;  %v6805_v30 = vadd.f32 %v10829_v54, %v6675_v1  ;;  %v8663_v12 = vpop.f32.mrb[30].mxu0 }
 0x6d5   : > { %6946 = vst [vmem:[%s10851_s28 + $0x58] sm:$0xff] %v6914_v8  ;;  %v6839_v5 = vmax.f32 %v6807_v17, 0.0  ;;  %v6808_v29 = vadd.f32 %v8663_v12, %v10829_v54  ;;  %v6678_v41 = vpop.f32.mrb[31].mxu0 }
 0x6d6   : > { %6944 = vst [vmem:[%s10851_s28 + $0x48] sm:$0xff] %v6912_v23  ;;  %v6837_v28 = vmax.f32 %v6805_v30, 0.0  ;;  %v6806_v48 = vadd.f32 %v10829_v54, %v6678_v41 }
 0x6d7   : > { %v6878_v50 = vmul.f32 %v10835_v11, %v6839_v5  ;;  %v6840_v2 = vmax.f32 %v6808_v29, 0.0 }
 0x6d8   : > { %v6876_v27 = vmul.f32 %v10835_v11, %v6837_v28  ;;  %v6838_v36 = vmax.f32 %v6806_v48, 0.0 }
 0x6d9   : > { %v6917_v43 = vadd.f32 %v10842_v42, %v6878_v50  ;;  %v6879_v0 = vmul.f32 %v10835_v11, %v6840_v2 }
 0x6da   : > { %v6915_v37 = vadd.f32 %v10842_v42, %v6876_v27  ;;  %v6877_v15 = vmul.f32 %v10835_v11, %v6838_v36  ;;  %v8666_v25 = vpop.f32.mrb[32].mxu0 }
 0x6db   : > { %6949 = vst [vmem:[%s10851_s28 + $0x70] sm:$0xff] %v6917_v43  ;;  %v6918_v16 = vadd.f32 %v10842_v42, %v6879_v0  ;;  %v6811_v18 = vadd.f32 %v8666_v25, %v10829_v54  ;;  %v6691_v62 = vpop.f32.mrb[33].mxu0 }
 0x6dc   : > { %6947 = vst [vmem:[%s10851_s28 + $0x60] sm:$0xff] %v6915_v37  ;;  %v6916_v4 = vadd.f32 %v10842_v42, %v6877_v15  ;;  %v6809_v33 = vadd.f32 %v10829_v54, %v6691_v62  ;;  %v8667_v40 = vpop.f32.mrb[34].mxu0 }
 0x6dd   : > { %6950 = vst [vmem:[%s10851_s28 + $0x78] sm:$0xff] %v6918_v16  ;;  %v6843_v56 = vmax.f32 %v6811_v18, 0.0  ;;  %v6812_v59 = vadd.f32 %v8667_v40, %v10829_v54  ;;  %v6694_v49 = vpop.f32.mrb[35].mxu0 }
 0x6de   : > { %6948 = vst [vmem:[%s10851_s28 + $0x68] sm:$0xff] %v6916_v4  ;;  %v6841_v60 = vmax.f32 %v6809_v33, 0.0  ;;  %v6810_v51 = vadd.f32 %v10829_v54, %v6694_v49 }
 0x6df   : > { %v6882_v63 = vmul.f32 %v10835_v11, %v6843_v56  ;;  %v6844_v44 = vmax.f32 %v6812_v59, 0.0 }
 0x6e0   : > { %v6880_v38 = vmul.f32 %v10835_v11, %v6841_v60  ;;  %v6842_v10 = vmax.f32 %v6810_v51, 0.0 }
 0x6e1   : > { %v6921_v45 = vadd.f32 %v10842_v42, %v6882_v63  ;;  %v6883_v24 = vmul.f32 %v10835_v11, %v6844_v44 }
 0x6e2   : > { %v6919_v34 = vadd.f32 %v10842_v42, %v6880_v38  ;;  %v6881_v58 = vmul.f32 %v10835_v11, %v6842_v10  ;;  %v8670_v20 = vpop.f32.mrb[36].mxu0 }
 0x6e3   : > { %6953 = vst [vmem:[%s10851_s28 + $0x90] sm:$0xff] %v6921_v45  ;;  %v6922_v3 = vadd.f32 %v10842_v42, %v6883_v24  ;;  %v6815_v13 = vadd.f32 %v8670_v20, %v10829_v54  ;;  %v6707_v55 = vpop.f32.mrb[37].mxu0 }
 0x6e4   : > { %6951 = vst [vmem:[%s10851_s28 + $0x80] sm:$0xff] %v6919_v34  ;;  %v6920_v57 = vadd.f32 %v10842_v42, %v6881_v58  ;;  %v6813_v22 = vadd.f32 %v10829_v54, %v6707_v55  ;;  %v8671_v52 = vpop.f32.mrb[38].mxu0 }
 0x6e5   : > { %6954 = vst [vmem:[%s10851_s28 + $0x98] sm:$0xff] %v6922_v3  ;;  %v6847_v14 = vmax.f32 %v6815_v13, 0.0  ;;  %v6816_v47 = vadd.f32 %v8671_v52, %v10829_v54  ;;  %v6710_v39 = vpop.f32.mrb[39].mxu0 }
 0x6e6   : > { %6952 = vst [vmem:[%s10851_s28 + $0x88] sm:$0xff] %v6920_v57  ;;  %v6845_v61 = vmax.f32 %v6813_v22, 0.0  ;;  %v6814_v26 = vadd.f32 %v10829_v54, %v6710_v39 }
 0x6e7   : > { %v6886_v53 = vmul.f32 %v10835_v11, %v6847_v14  ;;  %v6848_v32 = vmax.f32 %v6816_v47, 0.0 }
 0x6e8   : > { %v6884_v31 = vmul.f32 %v10835_v11, %v6845_v61  ;;  %v6846_v9 = vmax.f32 %v6814_v26, 0.0 }
 0x6e9   : > { %v6925_v6 = vadd.f32 %v10842_v42, %v6886_v53  ;;  %v6887_v46 = vmul.f32 %v10835_v11, %v6848_v32 }
 0x6ea   : > { %v6923_v7 = vadd.f32 %v10842_v42, %v6884_v31  ;;  %v6885_v35 = vmul.f32 %v10835_v11, %v6846_v9  ;;  %v8674_v19 = vpop.f32.mrb[40].mxu0 }
 0x6eb   : > { %6957 = vst [vmem:[%s10851_s28 + $0xb0] sm:$0xff] %v6925_v6  ;;  %v6926_v21 = vadd.f32 %v10842_v42, %v6887_v46  ;;  %v6819_v8 = vadd.f32 %v8674_v19, %v10829_v54  ;;  %v6723_v17 = vpop.f32.mrb[41].mxu0 }
 0x6ec   : > { %6955 = vst [vmem:[%s10851_s28 + $0xa0] sm:$0xff] %v6923_v7  ;;  %v6924_v1 = vadd.f32 %v10842_v42, %v6885_v35  ;;  %v6817_v23 = vadd.f32 %v10829_v54, %v6723_v17  ;;  %v8675_v30 = vpop.f32.mrb[42].mxu0 }
 0x6ed   : > { %6958 = vst [vmem:[%s10851_s28 + $0xb8] sm:$0xff] %v6926_v21  ;;  %v6851_v12 = vmax.f32 %v6819_v8, 0.0  ;;  %v6820_v5 = vadd.f32 %v8675_v30, %v10829_v54  ;;  %v6726_v29 = vpop.f32.mrb[43].mxu0 }
 0x6ee   : > { %6956 = vst [vmem:[%s10851_s28 + $0xa8] sm:$0xff] %v6924_v1  ;;  %v6849_v41 = vmax.f32 %v6817_v23, 0.0  ;;  %v6818_v28 = vadd.f32 %v10829_v54, %v6726_v29 }
 0x6ef   : > { %v6890_v48 = vmul.f32 %v10835_v11, %v6851_v12  ;;  %v6852_v50 = vmax.f32 %v6820_v5, 0.0 }
 0x6f0   : > { %v6888_v2 = vmul.f32 %v10835_v11, %v6849_v41  ;;  %v6850_v27 = vmax.f32 %v6818_v28, 0.0 }
 0x6f1   : > { %v6929_v36 = vadd.f32 %v10842_v42, %v6890_v48  ;;  %v6891_v43 = vmul.f32 %v10835_v11, %v6852_v50 }
 0x6f2   : > { %v6927_v0 = vadd.f32 %v10842_v42, %v6888_v2  ;;  %v6889_v37 = vmul.f32 %v10835_v11, %v6850_v27  ;;  %v8678_v15 = vpop.f32.mrb[44].mxu0 }
 0x6f3   : > { %6961 = vst [vmem:[%s10851_s28 + $0xd0] sm:$0xff] %v6929_v36  ;;  %v6930_v25 = vadd.f32 %v10842_v42, %v6891_v43  ;;  %v6823_v16 = vadd.f32 %v8678_v15, %v10829_v54  ;;  %v6739_v18 = vpop.f32.mrb[45].mxu0 }
 0x6f4   : > { %6959 = vst [vmem:[%s10851_s28 + $0xc0] sm:$0xff] %v6927_v0  ;;  %v6928_v62 = vadd.f32 %v10842_v42, %v6889_v37  ;;  %v6821_v4 = vadd.f32 %v10829_v54, %v6739_v18  ;;  %v8679_v33 = vpop.f32.mrb[46].mxu0 }
 0x6f5   : > { %6962 = vst [vmem:[%s10851_s28 + $0xd8] sm:$0xff] %v6930_v25  ;;  %v6855_v40 = vmax.f32 %v6823_v16, 0.0  ;;  %v6824_v56 = vadd.f32 %v8679_v33, %v10829_v54  ;;  %v6742_v59 = vpop.f32.mrb[47].mxu0 }
 0x6f6   : > { %6960 = vst [vmem:[%s10851_s28 + $0xc8] sm:$0xff] %v6928_v62  ;;  %v6853_v49 = vmax.f32 %v6821_v4, 0.0  ;;  %v6822_v60 = vadd.f32 %v10829_v54, %v6742_v59 }
 0x6f7   : > { %v6894_v51 = vmul.f32 %v10835_v11, %v6855_v40  ;;  %v6856_v63 = vmax.f32 %v6824_v56, 0.0 }
 0x6f8   : > { %v6892_v44 = vmul.f32 %v10835_v11, %v6853_v49  ;;  %v6854_v38 = vmax.f32 %v6822_v60, 0.0 }
 0x6f9   : > { %v6933_v10 = vadd.f32 %v10842_v42, %v6894_v51  ;;  %v6895_v45 = vmul.f32 %v10835_v11, %v6856_v63 }
 0x6fa   : > { %v6931_v24 = vadd.f32 %v10842_v42, %v6892_v44  ;;  %v6893_v34 = vmul.f32 %v10835_v11, %v6854_v38 }
 0x6fb   : > { %6965 = vst [vmem:[%s10851_s28 + $0xf0] sm:$0xff] %v6933_v10  ;;  %v6934_v58 = vadd.f32 %v10842_v42, %v6895_v45 }
 0x6fc   : > { %6963 = vst [vmem:[%s10851_s28 + $0xe0] sm:$0xff] %v6931_v24  ;;  %v6932_v54 = vadd.f32 %v10842_v42, %v6893_v34 }
 0x6fd   : > { %6966 = vst [vmem:[%s10851_s28 + $0xf8] sm:$0xff] %v6934_v58 }
 0x6fe   : > { %6964 = vst [vmem:[%s10851_s28 + $0xe8] sm:$0xff] %v6932_v54 }
 0x6ff PF: > { %s23_s25 = sadd.s32 1, %s9283_s25  }
 0x700   : > { %p20_p4 = scmp.ge.s32.totalorder %s23_s25, 4  }
 0x702   :  { %22 = sbr.rel (!%p20_p4) target bundleno = 1 (0x1), region = 120 }

// kernel: forward.5
= control target key start
LH: loop header
LB: loop body
LE: loop exit
PB: predicated region body
PF: predicated region fallthrough
CT: control target
= control target key end

     0   :  { %18 = vsyncpa [#allocation4], 0  ;;  %s10930_s0 = inlined_call_operand.vmem [shape: f32[2,4,4,256], index: 0, kind: input, shape index: {}]   ;;  %s10931_s1 = inlined_call_operand.vmem [shape: bf16[9,256,256], index: 1, kind: input, shape index: {}]   ;;  %s10932_s2 = inlined_call_operand.vmem [shape: f32[1,256], index: 2, kind: input, shape index: {}]   ;;  %s10933_s3 = inlined_call_operand.vmem [shape: f32[1,256], index: 3, kind: input, shape index: {}]   ;;  %s10934_s4 = inlined_call_operand.vmem [shape: f32[1,256], index: 4, kind: input, shape index: {}]   ;;  %s10935_s5 = inlined_call_operand.vmem [shape: bf16[9,256,256], index: 5, kind: input, shape index: {}]   ;;  %s10936_s6 = inlined_call_operand.vmem [shape: f32[1,256], index: 6, kind: input, shape index: {}]   ;;  %s10937_s7 = inlined_call_operand.vmem [shape: f32[1,256], index: 7, kind: input, shape index: {}]   ;;  %s10938_s8 = inlined_call_operand.vmem [shape: f32[1,256], index: 8, kind: input, shape index: {}]   ;;  %s10939_s9 = inlined_call_operand.vmem [shape: bf16[256,128], index: 9, kind: input, shape index: {}]   ;;  %s10940_s10 = inlined_call_operand.vmem [shape: f32[1,128], index: 10, kind: input, shape index: {}]   ;;  %s10941_s11 = inlined_call_operand.vmem [shape: bf16[128,10], index: 11, kind: input, shape index: {}]   ;;  %s10942_s12 = inlined_call_operand.vmem [shape: f32[1,10], index: 12, kind: input, shape index: {}]   ;;  %s10943_s13 = inlined_call_operand.hbm [shape: f32[2,1,10], index: 13, kind: output, shape index: {}]  }
   0x1   :  { %20 = vsyncpa [#allocation4 + $0x1], 0  ;;  %s8675_s25 = smov 0   ;;  %s8677_s26 = smov 0  }
   0x2   :  { %s8679_s27 = smov 0   ;;  %s8681_s28 = smov 0  }
   0x3 LB: > { %10947 = sst [smem:[#allocation6_spill]] %s8596_s27  ;;  %s8696_s29 = sadd.s32 4294967295, %s8600_s28   ;;  %s8600_s28 = sphi %s8681_s28, %s10956_s28   ;;  %s8596_s27 = sphi %s8679_s27, %s10961_s27   ;;  %s8592_s26 = sphi %s8677_s26, %s10960_s26   ;;  %s8588_s25 = sphi %s8675_s25, %s10959_s25  }
   0x4   : > { %s6171_s30 = sadd.s32 4294967294, %s8600_s28   ;;  %s8700_s14 = sadd.s32 1, %s8600_s28  }
   0x5   : > { %10948 = sst [smem:[#allocation7_spill]] %s8700_s14  ;;  %s311_s15 = sadd.s32 1, %s8596_s27 }
   0x6   : > { %s308_s16 = ssub.s32 %s8600_s28, %s8700_s14  ;;  %p321_p0 = scmp.ne.s32.totalorder %s8596_s27, %s8592_s26 }
   0x7   : > { %p309_p1 = scmp.eq.s32.totalorder %s308_s16, 0  ;;  %p322_p2 = scmp.eq.s32.totalorder %s8696_s29, 1 }
   0x8   : > { %p327_p3 = scmp.ne.s32.totalorder %s8592_s26, %s8588_s25  ;;  %p328_p4 = scmp.eq.s32.totalorder %s6171_s30, 1 }
   0x9   : > { %s8711_s17 = scalar_select %p309_p1, %s8596_s27, %s311_s15  }
   0xa   : > { %p8713_p5 = por %p322_p2, %p321_p0  ;;  %p8717_p6 = por %p328_p4, %p327_p3 }
   0xb   : > { %10949 = sst [smem:[#allocation8_spill]] %s8711_s17  ;;  %p6174_p7 = scmp.ge.s32.totalorder %s8600_s28, 1 }
   0xc   : > { %p390_p8 = scmp.lt.s32.totalorder %s8600_s28, 3 }
   0xe   : > { %p391_p9 = pnand %p6174_p7, %p390_p8 }
   0xf   : > { %v7525_v0 = vld [vmem:[%s10931_s1 + $0x104] ss:$8 sps:$4 sm:$0xff] (!%p391_p9)   ;;  %v7527_v1 = vld [vmem:[%s10931_s1 + $0x100] ss:$8 sps:$4 sm:$0xff] (!%p391_p9)   ;;  %v8602_v2 = vmov (!%p391_p9), 0.0   ;;  %p433_p10 = scmp.lt.s32.totalorder (!%p391_p9), %s8696_s29, 1 }
  0x10   : > { %394 = sbr.rel (%p391_p9) target bundleno = 2036 (0x7f4), region = 72  ;;  %442 = vst [vmem:[#allocation2 + $0x18] sm:$0x1f] (!%p391_p9), %v8602_v2  ;;  %446 = vst [vmem:[#allocation2 + $0x38] sm:$0x1f] (!%p391_p9), %v8602_v2  ;;  %812 = vmatprep.subr.bf16.mxu0 (!%p391_p9), %v7525_v0  ;;  %vm528_vm0 = vcmask (!%p391_p9), 1040384  }
  0x11   : > { %450 = vst [vmem:[#allocation2 + $0x58] sm:$0x1f] (!%p391_p9), %v8602_v2  ;;  %454 = vst [vmem:[#allocation2 + $0x78] sm:$0x1f] (!%p391_p9), %v8602_v2  ;;  %v7528_v3 = vld [vmem:[%s10931_s1 + $0x114] ss:$8 sps:$4 sm:$0xff] (!%p391_p9)   ;;  %813 = vmatpush1.bf16.msra.mxu0 (!%p391_p9), %v7527_v1 }
  0x12   : > { %439 = vst [vmem:[#allocation2] sm:$0xff] (!%p391_p9), %v8602_v2  ;;  %440 = vst [vmem:[#allocation2 + $0x8] sm:$0xff] (!%p391_p9), %v8602_v2  ;;  %v7530_v4 = vld [vmem:[%s10931_s1 + $0x110] ss:$8 sps:$4 sm:$0xff] (!%p391_p9)   ;;  %814 = vmatprep.subr.bf16.mxu0 (!%p391_p9), %v7528_v3  ;;  %v7531_v5 = vld [vmem:[%s10931_s1 + $0x124] ss:$8 sps:$4 sm:$0xff] (!%p391_p9)  }
  0x13   : > { %441 = vst [vmem:[#allocation2 + $0x10] sm:$0x1f] (!%p391_p9), %v8602_v2  ;;  %443 = vst [vmem:[#allocation2 + $0x20] sm:$0xff] (!%p391_p9), %v8602_v2  ;;  %v7533_v6 = vld [vmem:[%s10931_s1 + $0x120] ss:$8 sps:$4 sm:$0xff] (!%p391_p9)   ;;  %vm529_vm1 = vcmask (!%p391_p9), 1044484  }
  0x14   : > { %444 = vst [vmem:[#allocation2 + $0x28] sm:$0xff] (!%p391_p9), %v8602_v2  ;;  %445 = vst [vmem:[#allocation2 + $0x30] sm:$0x1f] (!%p391_p9), %v8602_v2  ;;  %v7534_v7 = vld [vmem:[%s10931_s1 + $0x134] ss:$8 sps:$4 sm:$0xff] (!%p391_p9)   ;;  %vm1082_vm3 = vcmask (!%p391_p9), 1042432  }
  0x15   : > { %447 = vst [vmem:[#allocation2 + $0x40] sm:$0xff] (!%p391_p9), %v8602_v2  ;;  %448 = vst [vmem:[#allocation2 + $0x48] sm:$0xff] (!%p391_p9), %v8602_v2  ;;  %815 = vmatpush1.bf16.msra.mxu0 (!%p391_p9), %v7530_v4  ;;  %v7536_v8 = vld [vmem:[%s10931_s1 + $0x130] ss:$8 sps:$4 sm:$0xff] (!%p391_p9)   ;;  %v7537_v9 = vld [vmem:[%s10931_s1 + $0x144] ss:$8 sps:$4 sm:$0xff] (!%p391_p9)  }
  0x16   : > { %449 = vst [vmem:[#allocation2 + $0x50] sm:$0x1f] (!%p391_p9), %v8602_v2  ;;  %451 = vst [vmem:[#allocation2 + $0x60] sm:$0xff] (!%p391_p9), %v8602_v2  ;;  %816 = vmatprep.subr.bf16.mxu0 (!%p391_p9), %v7531_v5  ;;  %v7539_v10 = vld [vmem:[%s10931_s1 + $0x140] ss:$8 sps:$4 sm:$0xff] (!%p391_p9)   ;;  %vm1083_vm4 = vcmask (!%p391_p9), 1046532  }
  0x17   : > { %452 = vst [vmem:[#allocation2 + $0x68] sm:$0xff] %v8602_v2  ;;  %453 = vst [vmem:[#allocation2 + $0x70] sm:$0x1f] %v8602_v2  ;;  %s434_s16 = scalar_select %p433_p10, %s8696_s29, 1  ;;  %v7540_v11 = vld [vmem:[%s10931_s1 + $0x154] ss:$8 sps:$4 sm:$0xff]  }
  0x18   : > { %455 = vst [vmem:[#allocation2 + $0x80] sm:$0xff] %v8602_v2  ;;  %456 = vst [vmem:[#allocation2 + $0x88] sm:$0xff] %v8602_v2  ;;  %v7542_v12 = vld [vmem:[%s10931_s1 + $0x150] ss:$8 sps:$4 sm:$0xff]   ;;  %v7543_v13 = vld [vmem:[%s10931_s1 + $0x164] ss:$8 sps:$4 sm:$0xff]  }
  0x19   : > { %457 = vst [vmem:[#allocation2 + $0x90] sm:$0x1f] %v8602_v2  ;;  %458 = vst [vmem:[#allocation2 + $0x98] sm:$0x1f] %v8602_v2  ;;  %817 = vmatpush1.bf16.msra.mxu0 %v7533_v6  ;;  %s7368_s27 = sshll.u32 %s434_s16, 5  ;;  %vm8603_vm6 = vmmov 0  }
  0x1a   : > { %459 = vst [vmem:[#allocation2 + $0xa0] sm:$0xff] %v8602_v2  ;;  %460 = vst [vmem:[#allocation2 + $0xa8] sm:$0xff] %v8602_v2  ;;  %818 = vmatprep.subr.bf16.mxu0 %v7534_v7  ;;  %s8761_s15 = scalar_lea.vmem %s10930_s0, %s7368_s27  ;;  %v7545_v19 = vld [vmem:[%s10931_s1 + $0x160] ss:$8 sps:$4 sm:$0xff]   ;;  %v7546_v21 = vld [vmem:[%s10931_s1 + $0x174] ss:$8 sps:$4 sm:$0xff]  }
  0x1b   : > { %461 = vst [vmem:[#allocation2 + $0xb0] sm:$0x1f] %v8602_v2  ;;  %462 = vst [vmem:[#allocation2 + $0xb8] sm:$0x1f] %v8602_v2  ;;  %v463_v14 = vld [vmem:[%s8761_s15] sm:$0xff]  ;;  %v464_v15 = vld [vmem:[%s8761_s15 + $0x8] sm:$0xff] }
  0x1c   : > { %v465_v16 = vld [vmem:[%s8761_s15 + $0x10] sm:$0xff]  ;;  %v471_v17 = vcombine.high %v463_v14, %v463_v14  ;;  %v472_v18 = vcombine.high %v464_v15, %v464_v15  ;;  %480 = vst [vmem:[#allocation2 + $0x30] sm:$0xf] %v463_v14  ;;  %482 = vst [vmem:[#allocation2 + $0x50] sm:$0xf] %v464_v15  ;;  %s431_s16 = sand.u32 1, %s8592_s26  }
  0x1d   : > { %819 = vmatpush1.bf16.msra.mxu0 %v7536_v8  ;;  %v473_v20 = vcombine.high %v465_v16, %v465_v16  ;;  %484 = vst [vmem:[#allocation2 + $0x70] sm:$0xf] %v465_v16  ;;  %v7548_v22 = vld [vmem:[%s10931_s1 + $0x170] ss:$8 sps:$4 sm:$0xff]   ;;  %v7549_v23 = vld [vmem:[%s10931_s1 + $0x184] ss:$8 sps:$4 sm:$0xff]   ;;  %vm8828_vm2 = vmor %vm528_vm0, %vm529_vm1 }
  0x1e   : > { %820 = vmatprep.subr.bf16.mxu0 %v7537_v9  ;;  %481 = vst [vmem:[#allocation2 + $0x38] sm:$0xf] %v471_v17  ;;  %483 = vst [vmem:[#allocation2 + $0x58] sm:$0xf] %v472_v18  ;;  %v590_v24 = vld [vmem:[#allocation2 + $0x18] sm:$0xf] }
  0x1f   : > { %485 = vst [vmem:[#allocation2 + $0x78] sm:$0xf] %v473_v20  ;;  %v7551_v25 = vld [vmem:[%s10931_s1 + $0x180] ss:$8 sps:$4 sm:$0xff]   ;;  %v7552_v28 = vld [vmem:[%s10931_s1 + $0x194] ss:$8 sps:$4 sm:$0xff]   ;;  %vm8943_vm5 = vmor %vm1082_vm3, %vm1083_vm4 }
  0x20   : > { %v7554_v32 = vld [vmem:[%s10931_s1 + $0x190] ss:$8 sps:$4 sm:$0xff]   ;;  %v7555_v34 = vld [vmem:[%s10931_s1 + $0x1a4] ss:$8 sps:$4 sm:$0xff]   ;;  %v7557_v35 = vld [vmem:[%s10931_s1 + $0x1a0] ss:$8 sps:$4 sm:$0xff]  }
  0x21   : > { %821 = vmatpush1.bf16.msra.mxu0 %v7539_v10  ;;  %v7558_v36 = vld [vmem:[%s10931_s1 + $0x1b4] ss:$8 sps:$4 sm:$0xff]   ;;  %v7560_v37 = vld [vmem:[%s10931_s1 + $0x1b0] ss:$8 sps:$4 sm:$0xff]   ;;  %v7561_v38 = vld [vmem:[%s10931_s1 + $0x1c4] ss:$8 sps:$4 sm:$0xff]  }
  0x22   : > { %822 = vmatprep.subr.bf16.mxu0 %v7540_v11  ;;  %v7563_v39 = vld [vmem:[%s10931_s1 + $0x1c0] ss:$8 sps:$4 sm:$0xff]   ;;  %v7564_v40 = vld [vmem:[%s10931_s1 + $0x1d4] ss:$8 sps:$4 sm:$0xff]   ;;  %v7566_v41 = vld [vmem:[%s10931_s1 + $0x1d0] ss:$8 sps:$4 sm:$0xff]  }
  0x23   : > { %v7567_v42 = vld [vmem:[%s10931_s1 + $0x1e4] ss:$8 sps:$4 sm:$0xff]   ;;  %v7625_v44 = vld [vmem:[#allocation2 + $0x10] ss:$8 sps:$4 sm:$0x77]   ;;  %s7365_s14 = sshll.u32 %s8696_s29, 4 }
  0x24   : > { %v7624_v43 = vld [vmem:[#allocation2 + $0x4] ss:$8 sps:$4 sm:$0x88]   ;;  %v7569_v45 = vld [vmem:[%s10931_s1 + $0x1e0] ss:$8 sps:$4 sm:$0xff]   ;;  %v533_v59 = vrot.slane %v7625_v44, 7 }
  0x25   : > { %823 = vmatpush1.bf16.msra.mxu0 %v7542_v12  ;;  %v592_v26 = vld [vmem:[#allocation2 + $0x38] sm:$0xf]  ;;  %v589_v46 = vld [vmem:[#allocation2 + $0x10] sm:$0xf]  ;;  %v7570_v52 = vld [vmem:[%s10931_s1 + $0x1f4] ss:$8 sps:$4 sm:$0xff]  }
  0x26   : > { %824 = vmatprep.subr.bf16.mxu0 %v7543_v13  ;;  %v594_v27 = vld [vmem:[#allocation2 + $0x58] sm:$0xf]  ;;  %v6182_v30 = vcombine.low %v590_v24, %v592_v26  ;;  %v591_v47 = vld [vmem:[#allocation2 + $0x30] sm:$0xf]  ;;  %v6177_v58 = vrot.slane %v7624_v43, 11  ;;  %s432_s23 = scalar_lea.vmem [#allocation3], %s431_s16 }
  0x27   : > { %v596_v29 = vld [vmem:[#allocation2 + $0x78] sm:$0xf]  ;;  %v593_v48 = vld [vmem:[#allocation2 + $0x50] sm:$0xf]  ;;  %v6181_v2 = vcombine.low %v589_v46, %v591_v47  ;;  %v7578_v10 = vld [vmem:[%s10931_s1 + $0x4] ss:$8 sps:$4 sm:$0xff]  }
  0x28   : > { %v6184_v31 = vcombine.low %v594_v27, %v596_v29  ;;  %v595_v49 = vld [vmem:[#allocation2 + $0x70] sm:$0xf]  ;;  %v7626_v50 = vld [vmem:[#allocation2 + $0x24] ss:$8 sps:$4 sm:$0x88]   ;;  %v8834_v4 = vsel %vm8828_vm2, %v6177_v58, %v533_v59  ;;  %s6116_s17 = sshll.u32 %s432_s23, 4  ;;  %s10890_s17 = int_to_ptr.vmem [resolvable:$true] %s6116_s17 }
  0x29   : > { %825 = vmatpush1.bf16.msra.mxu0 %v7545_v19  ;;  %v7627_v51 = vld [vmem:[#allocation2 + $0x30] ss:$8 sps:$4 sm:$0x77]   ;;  %v7628_v53 = vld [vmem:[#allocation2 + $0x44] ss:$8 sps:$4 sm:$0x88]   ;;  %v6183_v3 = vcombine.low %v593_v48, %v595_v49 }
  0x2a   : > { %826 = vmatprep.subr.bf16.mxu0 %v7546_v21  ;;  %v618_v33 = vpack.c.bf16 %v6184_v31, %v6182_v30  ;;  %v7629_v54 = vld [vmem:[#allocation2 + $0x50] ss:$8 sps:$4 sm:$0x77]   ;;  %v7630_v55 = vld [vmem:[#allocation2 + $0x64] ss:$8 sps:$4 sm:$0x88]  }
  0x2b   : > { %v7631_v56 = vld [vmem:[#allocation2 + $0x70] ss:$8 sps:$4 sm:$0x77]   ;;  %v6178_v60 = vrot.slane %v7626_v50, 11  ;;  %v537_v61 = vrot.slane %v7627_v51, 7  ;;  %v6179_v62 = vrot.slane %v7628_v53, 11  ;;  %v617_v12 = vpack.c.bf16 %v6183_v3, %v6181_v2 }
  0x2c   : > { %844 = vmatprep.mubr.bf16.mxu0 %v618_v33  ;;  %v541_v63 = vrot.slane %v7629_v54, 7  ;;  %v6180_v0 = vrot.slane %v7630_v55, 11  ;;  %v545_v1 = vrot.slane %v7631_v56, 7  ;;  %v7572_v6 = vld [vmem:[%s10931_s1 + $0x1f0] ss:$8 sps:$4 sm:$0xff]   ;;  %vm6101_vm7 = vcmask 73728  }
  0x2d   : > { %827 = vmatpush1.bf16.msra.mxu0 %v7548_v22  ;;  %v8838_v5 = vsel %vm8828_vm2, %v6178_v60, %v537_v61  ;;  %v7576_v13 = vld [vmem:[%s10931_s1] ss:$8 sps:$4 sm:$0xff]   ;;  %v7581_v15 = vld [vmem:[%s10931_s1 + $0x14] ss:$8 sps:$4 sm:$0xff]   ;;  %v7579_v16 = vld [vmem:[%s10931_s1 + $0x10] ss:$8 sps:$4 sm:$0xff]  }
  0x2e   : > { %828 = vmatprep.subr.bf16.mxu0 %v7549_v23  ;;  %v8845_v7 = vsel %vm8828_vm2, %v6179_v62, %v541_v63  ;;  %v8849_v8 = vsel %vm8828_vm2, %v6180_v0, %v545_v1  ;;  %v548_v9 = vcombine.high %v8834_v4, %v8838_v5  ;;  %v7584_v17 = vld [vmem:[%s10931_s1 + $0x24] ss:$8 sps:$4 sm:$0xff]   ;;  %v7582_v18 = vld [vmem:[%s10931_s1 + $0x20] ss:$8 sps:$4 sm:$0xff]   ;;  %v7587_v19 = vld [vmem:[%s10931_s1 + $0x34] ss:$8 sps:$4 sm:$0xff]  }
  0x2f   : > { %v550_v11 = vcombine.high %v8845_v7, %v8849_v8  ;;  %v7585_v20 = vld [vmem:[%s10931_s1 + $0x30] ss:$8 sps:$4 sm:$0xff]   ;;  %v7590_v21 = vld [vmem:[%s10931_s1 + $0x44] ss:$8 sps:$4 sm:$0xff]   ;;  %v7588_v22 = vld [vmem:[%s10931_s1 + $0x40] ss:$8 sps:$4 sm:$0xff]  }
  0x30   : > { %v7593_v23 = vld [vmem:[%s10931_s1 + $0x54] ss:$8 sps:$4 sm:$0xff]   ;;  %v7591_v24 = vld [vmem:[%s10931_s1 + $0x50] ss:$8 sps:$4 sm:$0xff]   ;;  %v7594_v26 = vld [vmem:[%s10931_s1 + $0x60] ss:$8 sps:$4 sm:$0xff]  }
  0x31   : > { %829 = vmatpush1.bf16.msra.mxu0 %v7551_v25  ;;  %v556_v14 = vpack.c.bf16 %v550_v11, %v548_v9  ;;  %v7596_v25 = vld [vmem:[%s10931_s1 + $0x64] ss:$8 sps:$4 sm:$0xff]   ;;  %v7599_v27 = vld [vmem:[%s10931_s1 + $0x74] ss:$8 sps:$4 sm:$0xff]   ;;  %v7600_v30 = vld [vmem:[%s10931_s1 + $0x80] ss:$8 sps:$4 sm:$0xff]   ;;  %v549_v9 = vcombine.low %v8845_v7, %v8849_v8 }
  0x32   : > { %830 = vmatprep.subr.bf16.mxu0 %v7552_v28  ;;  %v7597_v28 = vld [vmem:[%s10931_s1 + $0x70] ss:$8 sps:$4 sm:$0xff]   ;;  %v7602_v29 = vld [vmem:[%s10931_s1 + $0x84] ss:$8 sps:$4 sm:$0xff]   ;;  %v7605_v31 = vld [vmem:[%s10931_s1 + $0x94] ss:$8 sps:$4 sm:$0xff]  }
  0x33   : > { %v7608_v33 = vld [vmem:[%s10931_s1 + $0xa4] ss:$8 sps:$4 sm:$0xff]   ;;  %v7686_v43 = vld [vmem:[#allocation2 + $0x50] ss:$8 sps:$4 sm:$0xee]   ;;  %s6104_s29 = scalar_lea.sflag [#allocation4], %s431_s16 }
  0x34   : > { %v7688_v44 = vld [vmem:[#allocation2 + $0x54] ss:$8 sps:$4 sm:$0x11]   ;;  %v7615_v50 = vld [vmem:[%s10931_s1 + $0xd0] ss:$8 sps:$4 sm:$0xff]   ;;  %v6283_v58 = vrot.slane %v7686_v43, 9 }
  0x35   : > { %831 = vmatpush1.bf16.msra.mxu0 %v7554_v32  ;;  %v7603_v32 = vld [vmem:[%s10931_s1 + $0x90] ss:$8 sps:$4 sm:$0xff]   ;;  %v7617_v46 = vld [vmem:[%s10931_s1 + $0xd4] ss:$8 sps:$4 sm:$0xff]   ;;  %v7620_v51 = vld [vmem:[%s10931_s1 + $0xe4] ss:$8 sps:$4 sm:$0xff]  }
  0x36   : > { %832 = vmatprep.subr.bf16.mxu0 %v7555_v34  ;;  %v7606_v34 = vld [vmem:[%s10931_s1 + $0xa0] ss:$8 sps:$4 sm:$0xff]   ;;  %v7691_v47 = vld [vmem:[#allocation2 + $0x74] ss:$8 sps:$4 sm:$0x11]   ;;  %v1095_v59 = vrot.slane %v7688_v44, 5 }
  0x37   : > { %v466_v48 = vld [vmem:[%s8761_s15 + $0x18] sm:$0xff]  ;;  %v1099_v61 = vrot.slane %v7691_v47, 5  ;;  %v7618_v62 = vld [vmem:[%s10931_s1 + $0xe0] ss:$8 sps:$4 sm:$0xff]   ;;  %v7676_v47 = vld [vmem:[%s10931_s1 + $0x2e4] ss:$8 sps:$4 sm:$0xff]   ;;  %s10888_s15 = scalar_lea.hbm %s10943_s13, %s7365_s14 }
  0x38   : > { %v474_v49 = vcombine.high %v466_v48, %v466_v48  ;;  %486 = vst [vmem:[#allocation2 + $0x90] sm:$0xf] %v466_v48  ;;  %v7623_v63 = vld [vmem:[%s10931_s1 + $0xf4] ss:$8 sps:$4 sm:$0xff]   ;;  %v8963_v2 = vsel %vm8943_vm5, %v6283_v58, %v1095_v59  ;;  %v7674_v58 = vld [vmem:[%s10931_s1 + $0x2e0] ss:$8 sps:$4 sm:$0xff]  }
  0x39   : > { %833 = vmatpush1.bf16.msra.mxu0 %v7557_v35  ;;  %v7611_v35 = vld [vmem:[%s10931_s1 + $0xb4] ss:$8 sps:$4 sm:$0xff]   ;;  %v7747_v43 = vld [vmem:[#allocation2 + $0x84] ss:$8 sps:$4 sm:$0x88]   ;;  %s8538_s20 = scalar_lea.vmem %s10890_s17, 16 }
  0x3a   : > { %834 = vmatprep.subr.bf16.mxu0 %v7558_v36  ;;  %v7609_v36 = vld [vmem:[%s10931_s1 + $0xb0] ss:$8 sps:$4 sm:$0xff]   ;;  %487 = vst [vmem:[#allocation2 + $0x98] sm:$0xf] %v474_v49  ;;  %v7637_v8 = vld [vmem:[%s10931_s1 + $0x214] ss:$8 sps:$4 sm:$0xff]   ;;  %p8539_p11 = scmp.ne.s32.totalorder %s10890_s17, %s8538_s20 }
  0x3b   : > { %v7673_v44 = vld [vmem:[%s10931_s1 + $0x2d4] ss:$8 sps:$4 sm:$0xff]   ;;  %s8604_s21 = smov [#allocation3]  }
  0x3c   : > { %v7679_v59 = vld [vmem:[%s10931_s1 + $0x2f4] ss:$8 sps:$4 sm:$0xff]   ;;  %p8540_p12 = pnand %p8539_p11, %p8713_p5  ;;  %s8542_s22 = sshll.u32 %s8604_s21, 4  ;;  %s8543_s22 = int_to_ptr.vmem [resolvable:$false] %s8542_s22 }
  0x3d   : > { %835 = vmatpush1.bf16.msra.mxu0 %v7560_v37  ;;  %v7614_v37 = vld [vmem:[%s10931_s1 + $0xc4] ss:$8 sps:$4 sm:$0xff]   ;;  %v8362_v57 = vld [vmem:[%s10935_s5 + $0x614] ss:$8 sps:$4 sm:$0xff]   ;;  %s8544_s27 = scalar_lea.vmem %s8543_s22, 32  ;;  %p8545_p0 = scmp.lt.s32.totalorder %s10890_s17, %s8543_s22 }
  0x3e   : > { %836 = vmatprep.subr.bf16.mxu0 %v7561_v38  ;;  %v7680_v38 = vld [vmem:[#allocation2 + $0x10] ss:$8 sps:$4 sm:$0xee]   ;;  %p8541_p13 = pneg %p8540_p12  ;;  %p8546_p1 = scmp.lt.s32.totalorder %s8544_s27, %s8538_s20 }
  0x40   : > { %p8547_p2 = por %p8546_p1, %p8545_p0 }
  0x41   : > { %837 = vmatpush1.bf16.msra.mxu0 %v7563_v39  ;;  %v7612_v39 = vld [vmem:[%s10931_s1 + $0xc0] ss:$8 sps:$4 sm:$0xff]  }
  0x42   : > { %838 = vmatprep.subr.bf16.mxu0 %v7564_v40  ;;  %v7682_v40 = vld [vmem:[#allocation2 + $0x14] ss:$8 sps:$4 sm:$0x11]   ;;  %p8548_p3 = pnand %p8547_p2, %p8541_p13 }
  0x43   : > { %v1087_v54 = vrot.slane %v7682_v40, 5  ;;  %v7744_v40 = vld [vmem:[#allocation2 + $0x50] ss:$8 sps:$4 sm:$0x77]  }
  0x45   : > { %839 = vmatpush1.bf16.msra.mxu0 %v7566_v41  ;;  %v7683_v41 = vld [vmem:[#allocation2 + $0x30] ss:$8 sps:$4 sm:$0xee]  }
  0x46   : > { %840 = vmatprep.subr.bf16.mxu0 %v7567_v42  ;;  %v7685_v42 = vld [vmem:[#allocation2 + $0x34] ss:$8 sps:$4 sm:$0x11]   ;;  %v6282_v55 = vrot.slane %v7683_v41, 9 }
  0x47   : > { %v1091_v56 = vrot.slane %v7685_v42, 5  ;;  %v7745_v41 = vld [vmem:[#allocation2 + $0x64] ss:$8 sps:$4 sm:$0x88]  }
  0x48   : > { %v7746_v42 = vld [vmem:[#allocation2 + $0x70] ss:$8 sps:$4 sm:$0x77]  }
  0x49   : > { %841 = vmatpush1.bf16.msra.mxu0 %v7569_v45  ;;  %v7689_v45 = vld [vmem:[#allocation2 + $0x70] ss:$8 sps:$4 sm:$0xee]   ;;  %v8959_v1 = vsel %vm8943_vm5, %v6282_v55, %v1091_v56  ;;  %v6352_v55 = vrot.slane %v7747_v43, 11 }
  0x4a   : > { %842 = vmatprep.subr.bf16.mxu0 %v7570_v52  ;;  %v6281_v52 = vrot.slane %v7680_v38, 9  ;;  %v6284_v60 = vrot.slane %v7689_v45, 9  ;;  %v7742_v38 = vld [vmem:[#allocation2 + $0x30] ss:$8 sps:$4 sm:$0x77]  }
  0x4b   : > { %v7748_v45 = vld [vmem:[#allocation2 + $0x90] ss:$8 sps:$4 sm:$0x77]   ;;  %v1393_v49 = vrot.slane %v7742_v38, 7 }
  0x4c   : > { %v8955_v0 = vsel %vm8943_vm5, %v6281_v52, %v1087_v54  ;;  %v8967_v3 = vsel %vm8943_vm5, %v6284_v60, %v1099_v61  ;;  %v6351_v52 = vrot.slane %v7745_v41, 11  ;;  %v1401_v54 = vrot.slane %v7746_v42, 7  ;;  %v1658_v38 = vld [vmem:[#allocation2 + $0x38] sm:$0xf] }
  0x4d   : > { %843 = vmatpush1.bf16.msra.mxu0 %v7572_v6  ;;  %v547_v6 = vcombine.low %v8834_v4, %v8838_v5  ;;  %v1102_v11 = vcombine.high %v8955_v0, %v8959_v1  ;;  %v7632_v5 = vld [vmem:[%s10931_s1 + $0x200] ss:$8 sps:$4 sm:$0xff]   ;;  %v1405_v56 = vrot.slane %v7748_v45, 7  ;;  %v1664_v41 = vld [vmem:[#allocation2 + $0x98] sm:$0xf] }
  0x4e   : > { %1015 = vmatprep.subr.bf16.mxu0 %v7578_v10  ;;  %v7621_v10 = vld [vmem:[%s10931_s1 + $0xf0] ss:$8 sps:$4 sm:$0xff]  }
  0x4f   : > { %v555_v4 = vpack.c.bf16 %v549_v9, %v547_v6  ;;  %v1101_v6 = vcombine.low %v8955_v0, %v8959_v1  ;;  %v1103_v9 = vcombine.low %v8963_v2, %v8967_v3  ;;  %v7692_v1 = vld [vmem:[%s10931_s1 + $0x300] ss:$8 sps:$4 sm:$0xff]  }
  0x50   : > { %845 = vmatmul.mubr.bf16.vlgmr.msra.gmra.mrb[0].mxu0 %v617_v12  ;;  %v1104_v12 = vcombine.high %v8963_v2, %v8967_v3  ;;  %v7697_v3 = vld [vmem:[%s10931_s1 + $0x314] ss:$8 sps:$4 sm:$0xff]  }
  0x51   : > { %1016 = vmatpush1.bf16.msra.mxu0 %v7576_v13  ;;  %1047 = vmatprep.mubr.bf16.mxu0 %v556_v14  ;;  %v7634_v13 = vld [vmem:[%s10931_s1 + $0x204] ss:$8 sps:$4 sm:$0xff]   ;;  %v7635_v14 = vld [vmem:[%s10931_s1 + $0x210] ss:$8 sps:$4 sm:$0xff]   ;;  %v1109_v0 = vpack.c.bf16 %v1103_v9, %v1101_v6  ;;  %v7767_v6 = vld [vmem:[%s10931_s1 + $0x460] ss:$8 sps:$4 sm:$0xff]  }
  0x52   : > { %1017 = vmatprep.subr.bf16.mxu0 %v7581_v15  ;;  %v1110_v7 = vpack.c.bf16 %v1104_v12, %v1102_v11  ;;  %v7640_v15 = vld [vmem:[%s10931_s1 + $0x224] ss:$8 sps:$4 sm:$0xff]   ;;  %v7772_v9 = vld [vmem:[%s10931_s1 + $0x474] ss:$8 sps:$4 sm:$0xff]  }
  0x53   : > { %v7694_v11 = vld [vmem:[%s10931_s1 + $0x304] ss:$8 sps:$4 sm:$0xff]  }
  0x55   : > { %1018 = vmatpush1.bf16.msra.mxu0 %v7579_v16  ;;  %v7638_v16 = vld [vmem:[%s10931_s1 + $0x220] ss:$8 sps:$4 sm:$0xff]  }
  0x56   : > { %1019 = vmatprep.subr.bf16.mxu0 %v7584_v17  ;;  %v7643_v17 = vld [vmem:[%s10931_s1 + $0x234] ss:$8 sps:$4 sm:$0xff]  }
  0x59   : > { %1020 = vmatpush1.bf16.msra.mxu0 %v7582_v18  ;;  %v7641_v18 = vld [vmem:[%s10931_s1 + $0x230] ss:$8 sps:$4 sm:$0xff]  }
  0x5a   : > { %1021 = vmatprep.subr.bf16.mxu0 %v7587_v19  ;;  %v7646_v19 = vld [vmem:[%s10931_s1 + $0x244] ss:$8 sps:$4 sm:$0xff]  }
  0x5d   : > { %1022 = vmatpush1.bf16.msra.mxu0 %v7585_v20  ;;  %v7644_v20 = vld [vmem:[%s10931_s1 + $0x240] ss:$8 sps:$4 sm:$0xff]  }
  0x5e   : > { %1023 = vmatprep.subr.bf16.mxu0 %v7590_v21  ;;  %v7649_v21 = vld [vmem:[%s10931_s1 + $0x254] ss:$8 sps:$4 sm:$0xff]  }
  0x61   : > { %1024 = vmatpush1.bf16.msra.mxu0 %v7588_v22  ;;  %v7647_v22 = vld [vmem:[%s10931_s1 + $0x250] ss:$8 sps:$4 sm:$0xff]  }
  0x62   : > { %1025 = vmatprep.subr.bf16.mxu0 %v7593_v23  ;;  %v7652_v23 = vld [vmem:[%s10931_s1 + $0x264] ss:$8 sps:$4 sm:$0xff]  }
  0x65   : > { %1026 = vmatpush1.bf16.msra.mxu0 %v7591_v24  ;;  %v7650_v24 = vld [vmem:[%s10931_s1 + $0x260] ss:$8 sps:$4 sm:$0xff]  }
  0x66   : > { %1027 = vmatprep.subr.bf16.mxu0 %v7596_v25  ;;  %v7655_v25 = vld [vmem:[%s10931_s1 + $0x274] ss:$8 sps:$4 sm:$0xff]  }
  0x69   : > { %1028 = vmatpush1.bf16.msra.mxu0 %v7594_v26  ;;  %v7653_v26 = vld [vmem:[%s10931_s1 + $0x270] ss:$8 sps:$4 sm:$0xff]  }
  0x6a   : > { %1029 = vmatprep.subr.bf16.mxu0 %v7599_v27  ;;  %v7658_v27 = vld [vmem:[%s10931_s1 + $0x284] ss:$8 sps:$4 sm:$0xff]  }
  0x6d   : > { %1030 = vmatpush1.bf16.msra.mxu0 %v7597_v28  ;;  %v7656_v28 = vld [vmem:[%s10931_s1 + $0x280] ss:$8 sps:$4 sm:$0xff]  }
  0x6e   : > { %1031 = vmatprep.subr.bf16.mxu0 %v7602_v29  ;;  %v7661_v29 = vld [vmem:[%s10931_s1 + $0x294] ss:$8 sps:$4 sm:$0xff]  }
  0x71   : > { %1032 = vmatpush1.bf16.msra.mxu0 %v7600_v30  ;;  %v7659_v30 = vld [vmem:[%s10931_s1 + $0x290] ss:$8 sps:$4 sm:$0xff]  }
  0x72   : > { %1033 = vmatprep.subr.bf16.mxu0 %v7605_v31  ;;  %v7664_v31 = vld [vmem:[%s10931_s1 + $0x2a4] ss:$8 sps:$4 sm:$0xff]  }
  0x75   : > { %1034 = vmatpush1.bf16.msra.mxu0 %v7603_v32  ;;  %v7662_v32 = vld [vmem:[%s10931_s1 + $0x2a0] ss:$8 sps:$4 sm:$0xff]  }
  0x76   : > { %1035 = vmatprep.subr.bf16.mxu0 %v7608_v33  ;;  %v7667_v33 = vld [vmem:[%s10931_s1 + $0x2b4] ss:$8 sps:$4 sm:$0xff]  }
  0x79   : > { %1036 = vmatpush1.bf16.msra.mxu0 %v7606_v34  ;;  %v7665_v34 = vld [vmem:[%s10931_s1 + $0x2b0] ss:$8 sps:$4 sm:$0xff]  }
  0x7a   : > { %1037 = vmatprep.subr.bf16.mxu0 %v7611_v35  ;;  %v7670_v35 = vld [vmem:[%s10931_s1 + $0x2c4] ss:$8 sps:$4 sm:$0xff]  }
  0x7d   : > { %1038 = vmatpush1.bf16.msra.mxu0 %v7609_v36  ;;  %v7741_v36 = vld [vmem:[#allocation2 + $0x24] ss:$8 sps:$4 sm:$0x88]  }
  0x7e   : > { %1039 = vmatprep.subr.bf16.mxu0 %v7614_v37  ;;  %v7668_v37 = vld [vmem:[%s10931_s1 + $0x2c0] ss:$8 sps:$4 sm:$0xff]   ;;  %v6349_v48 = vrot.slane %v7741_v36, 11 }
  0x7f   : > { %v7734_v36 = vld [vmem:[%s10931_s1 + $0x3e0] ss:$8 sps:$4 sm:$0xff]  }
  0x80   : > { %v9075_v60 = vsel %vm8828_vm2, %v6349_v48, %v1393_v49  ;;  %v7749_v49 = vld [vmem:[%s10931_s1 + $0x400] ss:$8 sps:$4 sm:$0xff]  }
  0x81   : > { %1040 = vmatpush1.bf16.msra.mxu0 %v7612_v39  ;;  %v7743_v39 = vld [vmem:[#allocation2 + $0x44] ss:$8 sps:$4 sm:$0x88]  }
  0x82   : > { %1041 = vmatprep.subr.bf16.mxu0 %v7617_v46  ;;  %v7671_v46 = vld [vmem:[%s10931_s1 + $0x2d0] ss:$8 sps:$4 sm:$0xff]  }
  0x85   : > { %1042 = vmatpush1.bf16.msra.mxu0 %v7615_v50  ;;  %v6350_v50 = vrot.slane %v7743_v39, 11  ;;  %v1660_v39 = vld [vmem:[#allocation2 + $0x58] sm:$0xf] }
  0x86   : > { %1043 = vmatprep.subr.bf16.mxu0 %v7620_v51  ;;  %v1397_v51 = vrot.slane %v7744_v40, 7  ;;  %v1662_v40 = vld [vmem:[#allocation2 + $0x78] sm:$0xf]  ;;  %v6418_v45 = vcombine.low %v1658_v38, %v1660_v39 }
  0x88   : > { %v9079_v61 = vsel %vm8828_vm2, %v6350_v50, %v1397_v51  ;;  %v7754_v50 = vld [vmem:[%s10931_s1 + $0x414] ss:$8 sps:$4 sm:$0xff]  }
  0x89   : > { %1044 = vmatpush1.bf16.msra.mxu0 %v7618_v62  ;;  %v9083_v62 = vsel %vm8828_vm2, %v6351_v52, %v1401_v54  ;;  %v1408_v12 = vcombine.high %v9075_v60, %v9079_v61  ;;  %v1407_v42 = vcombine.low %v9075_v60, %v9079_v61  ;;  %v7752_v52 = vld [vmem:[%s10931_s1 + $0x410] ss:$8 sps:$4 sm:$0xff]   ;;  %v7757_v54 = vld [vmem:[%s10931_s1 + $0x424] ss:$8 sps:$4 sm:$0xff]   ;;  %v7761_v60 = vld [vmem:[%s10931_s1 + $0x440] ss:$8 sps:$4 sm:$0xff]  }
  0x8a   : > { %1045 = vmatprep.subr.bf16.mxu0 %v7623_v63  ;;  %v9087_v63 = vsel %vm8828_vm2, %v6352_v55, %v1405_v56  ;;  %v7755_v55 = vld [vmem:[%s10931_s1 + $0x420] ss:$8 sps:$4 sm:$0xff]   ;;  %v7760_v56 = vld [vmem:[%s10931_s1 + $0x434] ss:$8 sps:$4 sm:$0xff]  }
  0x8b   : > { %v1409_v43 = vcombine.low %v9083_v62, %v9087_v63  ;;  %v7766_v61 = vld [vmem:[%s10931_s1 + $0x454] ss:$8 sps:$4 sm:$0xff]  }
  0x8d   : > { %1046 = vmatpush1.bf16.msra.mxu0 %v7621_v10  ;;  %v7677_v10 = vld [vmem:[%s10931_s1 + $0x2f0] ss:$8 sps:$4 sm:$0xff]   ;;  %v1415_v48 = vpack.c.bf16 %v1409_v43, %v1407_v42 }
  0x8e   : > { %1304 = vmatprep.subr.bf16.mxu0 %v7634_v13  ;;  %v1410_v13 = vcombine.high %v9083_v62, %v9087_v63  ;;  %v7764_v62 = vld [vmem:[%s10931_s1 + $0x450] ss:$8 sps:$4 sm:$0xff]   ;;  %v7769_v63 = vld [vmem:[%s10931_s1 + $0x464] ss:$8 sps:$4 sm:$0xff]  }
  0x90   : > { %1048 = vmatmul.mubr.bf16.vlgmr.msra.gmra.mrb[0].mxu0 %v555_v4  ;;  %v1416_v2 = vpack.c.bf16 %v1410_v13, %v1408_v12  ;;  %v7695_v4 = vld [vmem:[%s10931_s1 + $0x310] ss:$8 sps:$4 sm:$0xff]   ;;  %v7773_v12 = vld [vmem:[%s10931_s1 + $0x480] ss:$8 sps:$4 sm:$0xff]   ;;  %v7778_v13 = vld [vmem:[%s10931_s1 + $0x494] ss:$8 sps:$4 sm:$0xff]  }
  0x91   : > { %1305 = vmatpush1.bf16.msra.mxu0 %v7632_v5  ;;  %1336 = vmatprep.mubr.bf16.mxu0 %v1110_v7  ;;  %v7700_v5 = vld [vmem:[%s10931_s1 + $0x324] ss:$8 sps:$4 sm:$0xff]   ;;  %v7698_v7 = vld [vmem:[%s10931_s1 + $0x320] ss:$8 sps:$4 sm:$0xff]  }
  0x92   : > { %1306 = vmatprep.subr.bf16.mxu0 %v7637_v8  ;;  %v7703_v8 = vld [vmem:[%s10931_s1 + $0x334] ss:$8 sps:$4 sm:$0xff]  }
  0x95   : > { %1307 = vmatpush1.bf16.msra.mxu0 %v7635_v14  ;;  %v7701_v14 = vld [vmem:[%s10931_s1 + $0x330] ss:$8 sps:$4 sm:$0xff]  }
  0x96   : > { %1308 = vmatprep.subr.bf16.mxu0 %v7640_v15  ;;  %v7706_v15 = vld [vmem:[%s10931_s1 + $0x344] ss:$8 sps:$4 sm:$0xff]  }
  0x99   : > { %1309 = vmatpush1.bf16.msra.mxu0 %v7638_v16  ;;  %v7704_v16 = vld [vmem:[%s10931_s1 + $0x340] ss:$8 sps:$4 sm:$0xff]  }
  0x9a   : > { %1310 = vmatprep.subr.bf16.mxu0 %v7643_v17  ;;  %v7709_v17 = vld [vmem:[%s10931_s1 + $0x354] ss:$8 sps:$4 sm:$0xff]  }
  0x9d   : > { %1311 = vmatpush1.bf16.msra.mxu0 %v7641_v18  ;;  %v7707_v18 = vld [vmem:[%s10931_s1 + $0x350] ss:$8 sps:$4 sm:$0xff]  }
  0x9e   : > { %1312 = vmatprep.subr.bf16.mxu0 %v7646_v19  ;;  %v7712_v19 = vld [vmem:[%s10931_s1 + $0x364] ss:$8 sps:$4 sm:$0xff]  }
  0xa1   : > { %1313 = vmatpush1.bf16.msra.mxu0 %v7644_v20  ;;  %v7710_v20 = vld [vmem:[%s10931_s1 + $0x360] ss:$8 sps:$4 sm:$0xff]  }
  0xa2   : > { %1314 = vmatprep.subr.bf16.mxu0 %v7649_v21  ;;  %v7715_v21 = vld [vmem:[%s10931_s1 + $0x374] ss:$8 sps:$4 sm:$0xff]  }
  0xa5   : > { %1315 = vmatpush1.bf16.msra.mxu0 %v7647_v22  ;;  %v7713_v22 = vld [vmem:[%s10931_s1 + $0x370] ss:$8 sps:$4 sm:$0xff]  }
  0xa6   : > { %1316 = vmatprep.subr.bf16.mxu0 %v7652_v23  ;;  %v7718_v23 = vld [vmem:[%s10931_s1 + $0x384] ss:$8 sps:$4 sm:$0xff]  }
  0xa9   : > { %1317 = vmatpush1.bf16.msra.mxu0 %v7650_v24  ;;  %v7716_v24 = vld [vmem:[%s10931_s1 + $0x380] ss:$8 sps:$4 sm:$0xff]  }
  0xaa   : > { %1318 = vmatprep.subr.bf16.mxu0 %v7655_v25  ;;  %v7721_v25 = vld [vmem:[%s10931_s1 + $0x394] ss:$8 sps:$4 sm:$0xff]  }
  0xad   : > { %1319 = vmatpush1.bf16.msra.mxu0 %v7653_v26  ;;  %v7719_v26 = vld [vmem:[%s10931_s1 + $0x390] ss:$8 sps:$4 sm:$0xff]  }
  0xae   : > { %1320 = vmatprep.subr.bf16.mxu0 %v7658_v27  ;;  %v7724_v27 = vld [vmem:[%s10931_s1 + $0x3a4] ss:$8 sps:$4 sm:$0xff]  }
  0xb1   : > { %1321 = vmatpush1.bf16.msra.mxu0 %v7656_v28  ;;  %v7722_v28 = vld [vmem:[%s10931_s1 + $0x3a0] ss:$8 sps:$4 sm:$0xff]  }
  0xb2   : > { %1322 = vmatprep.subr.bf16.mxu0 %v7661_v29  ;;  %v7727_v29 = vld [vmem:[%s10931_s1 + $0x3b4] ss:$8 sps:$4 sm:$0xff]  }
  0xb5   : > { %1323 = vmatpush1.bf16.msra.mxu0 %v7659_v30  ;;  %v7725_v30 = vld [vmem:[%s10931_s1 + $0x3b0] ss:$8 sps:$4 sm:$0xff]  }
  0xb6   : > { %1324 = vmatprep.subr.bf16.mxu0 %v7664_v31  ;;  %v7730_v31 = vld [vmem:[%s10931_s1 + $0x3c4] ss:$8 sps:$4 sm:$0xff]  }
  0xb9   : > { %1325 = vmatpush1.bf16.msra.mxu0 %v7662_v32  ;;  %v7728_v32 = vld [vmem:[%s10931_s1 + $0x3c0] ss:$8 sps:$4 sm:$0xff]  }
  0xba   : > { %1326 = vmatprep.subr.bf16.mxu0 %v7667_v33  ;;  %v7733_v33 = vld [vmem:[%s10931_s1 + $0x3d4] ss:$8 sps:$4 sm:$0xff]  }
  0xbd   : > { %1327 = vmatpush1.bf16.msra.mxu0 %v7665_v34  ;;  %v7731_v34 = vld [vmem:[%s10931_s1 + $0x3d0] ss:$8 sps:$4 sm:$0xff]  }
  0xbe   : > { %1328 = vmatprep.subr.bf16.mxu0 %v7670_v35  ;;  %v7736_v35 = vld [vmem:[%s10931_s1 + $0x3e4] ss:$8 sps:$4 sm:$0xff]  }
  0xc1   : > { %1329 = vmatpush1.bf16.msra.mxu0 %v7668_v37  ;;  %v7739_v37 = vld [vmem:[%s10931_s1 + $0x3f4] ss:$8 sps:$4 sm:$0xff]  }
  0xc2   : > { %1330 = vmatprep.subr.bf16.mxu0 %v7673_v44  ;;  %v7737_v44 = vld [vmem:[%s10931_s1 + $0x3f0] ss:$8 sps:$4 sm:$0xff]  }
  0xc5   : > { %1331 = vmatpush1.bf16.msra.mxu0 %v7671_v46  ;;  %v6420_v46 = vcombine.low %v1662_v40, %v1664_v41 }
  0xc6   : > { %1332 = vmatprep.subr.bf16.mxu0 %v7676_v47  ;;  %v7751_v47 = vld [vmem:[%s10931_s1 + $0x404] ss:$8 sps:$4 sm:$0xff]  }
  0xc7   : > { %v1686_v51 = vpack.c.bf16 %v6420_v46, %v6418_v45 }
  0xc9   : > { %1333 = vmatpush1.bf16.msra.mxu0 %v7674_v58  ;;  %v7758_v58 = vld [vmem:[%s10931_s1 + $0x430] ss:$8 sps:$4 sm:$0xff]  }
  0xca   : > { %1334 = vmatprep.subr.bf16.mxu0 %v7679_v59  ;;  %v7763_v59 = vld [vmem:[%s10931_s1 + $0x444] ss:$8 sps:$4 sm:$0xff]  }
  0xcd   : > { %1335 = vmatpush1.bf16.msra.mxu0 %v7677_v10  ;;  %v7770_v10 = vld [vmem:[%s10931_s1 + $0x470] ss:$8 sps:$4 sm:$0xff]  }
  0xce   : > { %1610 = vmatprep.subr.bf16.mxu0 %v7694_v11  ;;  %v7775_v11 = vld [vmem:[%s10931_s1 + $0x484] ss:$8 sps:$4 sm:$0xff]  }
  0xd0   : > { %1337 = vmatmul.mubr.bf16.vlgmr.msra.gmra.mrb[0].mxu0 %v1109_v0  ;;  %v7776_v0 = vld [vmem:[%s10931_s1 + $0x490] ss:$8 sps:$4 sm:$0xff]  }
  0xd1   : > { %1611 = vmatpush1.bf16.msra.mxu0 %v7692_v1  ;;  %1642 = vmatprep.mubr.bf16.mxu0 %v1416_v2  ;;  %v7781_v1 = vld [vmem:[%s10931_s1 + $0x4a4] ss:$8 sps:$4 sm:$0xff]   ;;  %v7779_v2 = vld [vmem:[%s10931_s1 + $0x4a0] ss:$8 sps:$4 sm:$0xff]  }
  0xd2   : > { %1612 = vmatprep.subr.bf16.mxu0 %v7697_v3  ;;  %v7784_v3 = vld [vmem:[%s10931_s1 + $0x4b4] ss:$8 sps:$4 sm:$0xff]  }
  0xd5   : > { %1613 = vmatpush1.bf16.msra.mxu0 %v7695_v4  ;;  %v7782_v4 = vld [vmem:[%s10931_s1 + $0x4b0] ss:$8 sps:$4 sm:$0xff]  }
  0xd6   : > { %1614 = vmatprep.subr.bf16.mxu0 %v7700_v5  ;;  %v7787_v5 = vld [vmem:[%s10931_s1 + $0x4c4] ss:$8 sps:$4 sm:$0xff]  }
  0xd9   : > { %1615 = vmatpush1.bf16.msra.mxu0 %v7698_v7  ;;  %v7845_v7 = vld [vmem:[#allocation2 + $0x30] ss:$8 sps:$4 sm:$0xee]  }
  0xda   : > { %1616 = vmatprep.subr.bf16.mxu0 %v7703_v8  ;;  %v7785_v8 = vld [vmem:[%s10931_s1 + $0x4c0] ss:$8 sps:$4 sm:$0xff]  }
  0xdd   : > { %1617 = vmatpush1.bf16.msra.mxu0 %v7701_v14  ;;  %v7847_v14 = vld [vmem:[#allocation2 + $0x34] ss:$8 sps:$4 sm:$0x11]  }
  0xde   : > { %1618 = vmatprep.subr.bf16.mxu0 %v7706_v15  ;;  %v7848_v15 = vld [vmem:[#allocation2 + $0x50] ss:$8 sps:$4 sm:$0xee]  }
  0xe1   : > { %1619 = vmatpush1.bf16.msra.mxu0 %v7704_v16  ;;  %v7850_v16 = vld [vmem:[#allocation2 + $0x54] ss:$8 sps:$4 sm:$0x11]  }
  0xe2   : > { %1620 = vmatprep.subr.bf16.mxu0 %v7709_v17  ;;  %v7851_v17 = vld [vmem:[#allocation2 + $0x70] ss:$8 sps:$4 sm:$0xee]  }
  0xe5   : > { %1621 = vmatpush1.bf16.msra.mxu0 %v7707_v18  ;;  %v7853_v18 = vld [vmem:[#allocation2 + $0x74] ss:$8 sps:$4 sm:$0x11]  }
  0xe6   : > { %1622 = vmatprep.subr.bf16.mxu0 %v7712_v19  ;;  %v7854_v19 = vld [vmem:[#allocation2 + $0x90] ss:$8 sps:$4 sm:$0xee]  }
  0xe9   : > { %1623 = vmatpush1.bf16.msra.mxu0 %v7710_v20  ;;  %v7790_v20 = vld [vmem:[%s10931_s1 + $0x4d4] ss:$8 sps:$4 sm:$0xff]  }
  0xea   : > { %1624 = vmatprep.subr.bf16.mxu0 %v7715_v21  ;;  %v7856_v21 = vld [vmem:[#allocation2 + $0x94] ss:$8 sps:$4 sm:$0x11]  }
  0xed   : > { %1625 = vmatpush1.bf16.msra.mxu0 %v7713_v22  ;;  %v7788_v22 = vld [vmem:[%s10931_s1 + $0x4d0] ss:$8 sps:$4 sm:$0xff]  }
  0xee   : > { %1626 = vmatprep.subr.bf16.mxu0 %v7718_v23  ;;  %v7793_v23 = vld [vmem:[%s10931_s1 + $0x4e4] ss:$8 sps:$4 sm:$0xff]  }
  0xf1   : > { %1627 = vmatpush1.bf16.msra.mxu0 %v7716_v24  ;;  %v6485_v24 = vrot.slane %v7845_v7, 9  ;;  %v7833_v7 = vld [vmem:[%s10931_s1 + $0x5c0] ss:$8 sps:$4 sm:$0xff]  }
  0xf2   : > { %1628 = vmatprep.subr.bf16.mxu0 %v7721_v25  ;;  %v1953_v25 = vrot.slane %v7847_v14, 5  ;;  %v7906_v14 = vld [vmem:[#allocation2 + $0x50] ss:$8 sps:$4 sm:$0x77]  }
  0xf4   : > { %v9295_v38 = vsel %vm8943_vm5, %v6485_v24, %v1953_v25  ;;  %v2260_v24 = vrot.slane %v7906_v14, 7  ;;  %v2525_v14 = vld [vmem:[#allocation2 + $0x58] sm:$0xf] }
  0xf5   : > { %1629 = vmatpush1.bf16.msra.mxu0 %v7719_v26  ;;  %v6486_v26 = vrot.slane %v7848_v15, 9  ;;  %v7838_v15 = vld [vmem:[%s10931_s1 + $0x5d4] ss:$8 sps:$4 sm:$0xff]  }
  0xf6   : > { %1630 = vmatprep.subr.bf16.mxu0 %v7724_v27  ;;  %v1957_v27 = vrot.slane %v7850_v16, 5  ;;  %v7907_v16 = vld [vmem:[#allocation2 + $0x64] ss:$8 sps:$4 sm:$0x88]  }
  0xf7   : > { %v6554_v25 = vrot.slane %v7907_v16, 11  ;;  %v2529_v16 = vld [vmem:[#allocation2 + $0x98] sm:$0xf] }
  0xf8   : > { %v9299_v39 = vsel %vm8943_vm5, %v6486_v26, %v1957_v27  ;;  %v7841_v27 = vld [vmem:[%s10931_s1 + $0x5e4] ss:$8 sps:$4 sm:$0xff]  }
  0xf9   : > { %1631 = vmatpush1.bf16.msra.mxu0 %v7722_v28  ;;  %v6487_v28 = vrot.slane %v7851_v17, 9  ;;  %v1968_v45 = vcombine.high %v9295_v38, %v9299_v39  ;;  %v7908_v17 = vld [vmem:[#allocation2 + $0x70] ss:$8 sps:$4 sm:$0x77]  }
  0xfa   : > { %1632 = vmatprep.subr.bf16.mxu0 %v7727_v29  ;;  %v1961_v29 = vrot.slane %v7853_v18, 5  ;;  %v7909_v18 = vld [vmem:[#allocation2 + $0x84] ss:$8 sps:$4 sm:$0x88]   ;;  %v2264_v26 = vrot.slane %v7908_v17, 7 }
  0xfb   : > { %v2531_v17 = vld [vmem:[#allocation2 + $0xb8] sm:$0xf] }
  0xfc   : > { %v9303_v40 = vsel %vm8943_vm5, %v6487_v28, %v1961_v29  ;;  %v6555_v28 = vrot.slane %v7909_v18, 11 }
  0xfd   : > { %1633 = vmatpush1.bf16.msra.mxu0 %v7725_v30  ;;  %v6488_v30 = vrot.slane %v7854_v19, 9  ;;  %v7910_v19 = vld [vmem:[#allocation2 + $0x90] ss:$8 sps:$4 sm:$0x77]  }
  0xfe   : > { %1634 = vmatprep.subr.bf16.mxu0 %v7730_v31  ;;  %v1965_v31 = vrot.slane %v7856_v21, 5  ;;  %v7912_v21 = vld [vmem:[#allocation2 + $0xb0] ss:$8 sps:$4 sm:$0x77]   ;;  %v2268_v29 = vrot.slane %v7910_v19, 7 }
 0x100   : > { %v9307_v41 = vsel %vm8943_vm5, %v6488_v30, %v1965_v31  ;;  %v2272_v31 = vrot.slane %v7912_v21, 7 }
 0x101   : > { %1635 = vmatpush1.bf16.msra.mxu0 %v7728_v32  ;;  %v7791_v32 = vld [vmem:[%s10931_s1 + $0x4e0] ss:$8 sps:$4 sm:$0xff]   ;;  %v1970_v46 = vcombine.high %v9303_v40, %v9307_v41 }
 0x102   : > { %1636 = vmatprep.subr.bf16.mxu0 %v7733_v33  ;;  %v1657_v33 = vld [vmem:[#allocation2 + $0x30] sm:$0xf] }
 0x105   : > { %1637 = vmatpush1.bf16.msra.mxu0 %v7731_v34  ;;  %v1659_v34 = vld [vmem:[#allocation2 + $0x50] sm:$0xf] }
 0x106   : > { %1638 = vmatprep.subr.bf16.mxu0 %v7736_v35  ;;  %v7796_v35 = vld [vmem:[%s10931_s1 + $0x4f4] ss:$8 sps:$4 sm:$0xff]   ;;  %v6417_v42 = vcombine.low %v1657_v33, %v1659_v34 }
 0x107   : > { %v7844_v33 = vld [vmem:[%s10931_s1 + $0x5f4] ss:$8 sps:$4 sm:$0xff]  }
 0x109   : > { %1639 = vmatpush1.bf16.msra.mxu0 %v7734_v36  ;;  %v1661_v36 = vld [vmem:[#allocation2 + $0x70] sm:$0xf] }
 0x10a   : > { %1640 = vmatprep.subr.bf16.mxu0 %v7739_v37  ;;  %v1663_v37 = vld [vmem:[#allocation2 + $0x90] sm:$0xf] }
 0x10b   : > { %v6419_v43 = vcombine.low %v1661_v36, %v1663_v37  ;;  %v9419_v36 = vsel %vm8828_vm2, %v6555_v28, %v2268_v29  ;;  %v8021_v28 = vld [vmem:[%s10935_s5 + $0x104] ss:$8 sps:$4 sm:$0xff]   ;;  %v8023_v29 = vld [vmem:[%s10935_s5 + $0x100] ss:$8 sps:$4 sm:$0xff]  }
 0x10c   : > { %3485 = vmatprep.subr.bf16.mxu1 %v8021_v28  ;;  %v7955_v28 = vld [vmem:[%s10931_s1 + $0x7e0] ss:$8 sps:$4 sm:$0xff]  }
 0x10d   : > { %1641 = vmatpush1.bf16.msra.mxu0 %v7737_v44  ;;  %v7794_v44 = vld [vmem:[%s10931_s1 + $0x4f0] ss:$8 sps:$4 sm:$0xff]   ;;  %3486 = vmatpush1.bf16.msra.mxu1 %v8023_v29 }
 0x10e   : > { %1880 = vmatprep.subr.bf16.mxu0 %v7751_v47  ;;  %v7799_v47 = vld [vmem:[%s10931_s1 + $0x504] ss:$8 sps:$4 sm:$0xff]   ;;  %v2524_v29 = vld [vmem:[#allocation2 + $0x50] sm:$0xf] }
 0x110   : > { %1643 = vmatmul.mubr.bf16.vlgmr.msra.gmra.mrb[0].mxu0 %v1415_v48  ;;  %v1685_v48 = vpack.c.bf16 %v6419_v43, %v6417_v42  ;;  %v1967_v42 = vcombine.low %v9295_v38, %v9299_v39  ;;  %v1969_v43 = vcombine.low %v9303_v40, %v9307_v41  ;;  %v7857_v39 = vld [vmem:[%s10931_s1 + $0x600] ss:$8 sps:$4 sm:$0xff]   ;;  %v7862_v41 = vld [vmem:[%s10931_s1 + $0x614] ss:$8 sps:$4 sm:$0xff]  }
 0x111   : > { %1881 = vmatpush1.bf16.msra.mxu0 %v7749_v49  ;;  %1912 = vmatprep.mubr.bf16.mxu0 %v1686_v51  ;;  %v7797_v49 = vld [vmem:[%s10931_s1 + $0x500] ss:$8 sps:$4 sm:$0xff]   ;;  %v1976_v51 = vpack.c.bf16 %v1970_v46, %v1968_v45 }
 0x112   : > { %1882 = vmatprep.subr.bf16.mxu0 %v7754_v50  ;;  %v7802_v50 = vld [vmem:[%s10931_s1 + $0x514] ss:$8 sps:$4 sm:$0xff]   ;;  %v1975_v38 = vpack.c.bf16 %v1969_v43, %v1967_v42  ;;  %v7922_v43 = vld [vmem:[%s10931_s1 + $0x730] ss:$8 sps:$4 sm:$0xff]  }
 0x113   : > { %v8030_v42 = vld [vmem:[%s10935_s5 + $0x134] ss:$8 sps:$4 sm:$0xff]  }
 0x115   : > { %1883 = vmatpush1.bf16.msra.mxu0 %v7752_v52  ;;  %v7800_v52 = vld [vmem:[%s10931_s1 + $0x510] ss:$8 sps:$4 sm:$0xff]  }
 0x116   : > { %1884 = vmatprep.subr.bf16.mxu0 %v7757_v54  ;;  %v7805_v54 = vld [vmem:[%s10931_s1 + $0x524] ss:$8 sps:$4 sm:$0xff]  }
 0x119   : > { %1885 = vmatpush1.bf16.msra.mxu0 %v7755_v55  ;;  %v7803_v55 = vld [vmem:[%s10931_s1 + $0x520] ss:$8 sps:$4 sm:$0xff]  }
 0x11a   : > { %1886 = vmatprep.subr.bf16.mxu0 %v7760_v56  ;;  %v7808_v56 = vld [vmem:[%s10931_s1 + $0x534] ss:$8 sps:$4 sm:$0xff]  }
 0x11d   : > { %1887 = vmatpush1.bf16.msra.mxu0 %v7758_v58  ;;  %v7806_v58 = vld [vmem:[%s10931_s1 + $0x530] ss:$8 sps:$4 sm:$0xff]  }
 0x11e   : > { %1888 = vmatprep.subr.bf16.mxu0 %v7763_v59  ;;  %v7811_v59 = vld [vmem:[%s10931_s1 + $0x544] ss:$8 sps:$4 sm:$0xff]  }
 0x121   : > { %1889 = vmatpush1.bf16.msra.mxu0 %v7761_v60  ;;  %v7809_v60 = vld [vmem:[%s10931_s1 + $0x540] ss:$8 sps:$4 sm:$0xff]  }
 0x122   : > { %1890 = vmatprep.subr.bf16.mxu0 %v7766_v61  ;;  %v7814_v61 = vld [vmem:[%s10931_s1 + $0x554] ss:$8 sps:$4 sm:$0xff]  }
 0x125   : > { %1891 = vmatpush1.bf16.msra.mxu0 %v7764_v62  ;;  %v7812_v62 = vld [vmem:[%s10931_s1 + $0x550] ss:$8 sps:$4 sm:$0xff]  }
 0x126   : > { %1892 = vmatprep.subr.bf16.mxu0 %v7769_v63  ;;  %v7817_v63 = vld [vmem:[%s10931_s1 + $0x564] ss:$8 sps:$4 sm:$0xff]  }
 0x129   : > { %1893 = vmatpush1.bf16.msra.mxu0 %v7767_v6  ;;  %v7815_v6 = vld [vmem:[%s10931_s1 + $0x560] ss:$8 sps:$4 sm:$0xff]  }
 0x12a   : > { %1894 = vmatprep.subr.bf16.mxu0 %v7772_v9  ;;  %v7820_v9 = vld [vmem:[%s10931_s1 + $0x574] ss:$8 sps:$4 sm:$0xff]  }
 0x12d   : > { %1895 = vmatpush1.bf16.msra.mxu0 %v7770_v10  ;;  %v7818_v10 = vld [vmem:[%s10931_s1 + $0x570] ss:$8 sps:$4 sm:$0xff]  }
 0x12e   : > { %1896 = vmatprep.subr.bf16.mxu0 %v7775_v11  ;;  %v7823_v11 = vld [vmem:[%s10931_s1 + $0x584] ss:$8 sps:$4 sm:$0xff]  }
 0x131   : > { %1897 = vmatpush1.bf16.msra.mxu0 %v7773_v12  ;;  %v7821_v12 = vld [vmem:[%s10931_s1 + $0x580] ss:$8 sps:$4 sm:$0xff]  }
 0x132   : > { %1898 = vmatprep.subr.bf16.mxu0 %v7778_v13  ;;  %v7826_v13 = vld [vmem:[%s10931_s1 + $0x594] ss:$8 sps:$4 sm:$0xff]  }
 0x135   : > { %1899 = vmatpush1.bf16.msra.mxu0 %v7776_v0  ;;  %v7824_v0 = vld [vmem:[%s10931_s1 + $0x590] ss:$8 sps:$4 sm:$0xff]  }
 0x136   : > { %1900 = vmatprep.subr.bf16.mxu0 %v7781_v1  ;;  %v7829_v1 = vld [vmem:[%s10931_s1 + $0x5a4] ss:$8 sps:$4 sm:$0xff]  }
 0x139   : > { %1901 = vmatpush1.bf16.msra.mxu0 %v7779_v2  ;;  %v7827_v2 = vld [vmem:[%s10931_s1 + $0x5a0] ss:$8 sps:$4 sm:$0xff]  }
 0x13a   : > { %1902 = vmatprep.subr.bf16.mxu0 %v7784_v3  ;;  %v7832_v3 = vld [vmem:[%s10931_s1 + $0x5b4] ss:$8 sps:$4 sm:$0xff]  }
 0x13d   : > { %1903 = vmatpush1.bf16.msra.mxu0 %v7782_v4  ;;  %v7830_v4 = vld [vmem:[%s10931_s1 + $0x5b0] ss:$8 sps:$4 sm:$0xff]  }
 0x13e   : > { %1904 = vmatprep.subr.bf16.mxu0 %v7787_v5  ;;  %v7835_v5 = vld [vmem:[%s10931_s1 + $0x5c4] ss:$8 sps:$4 sm:$0xff]  }
 0x141   : > { %1905 = vmatpush1.bf16.msra.mxu0 %v7785_v8  ;;  %v7905_v8 = vld [vmem:[#allocation2 + $0x44] ss:$8 sps:$4 sm:$0x88]  }
 0x142   : > { %1906 = vmatprep.subr.bf16.mxu0 %v7790_v20  ;;  %v7911_v20 = vld [vmem:[#allocation2 + $0xa4] ss:$8 sps:$4 sm:$0x88]  }
 0x143   : > { %v6556_v30 = vrot.slane %v7911_v20, 11  ;;  %v7902_v20 = vld [vmem:[%s10931_s1 + $0x6f0] ss:$8 sps:$4 sm:$0xff]  }
 0x145   : > { %1907 = vmatpush1.bf16.msra.mxu0 %v7788_v22  ;;  %v7836_v22 = vld [vmem:[%s10931_s1 + $0x5d0] ss:$8 sps:$4 sm:$0xff]   ;;  %v9423_v37 = vsel %vm8828_vm2, %v6556_v30, %v2272_v31  ;;  %v8024_v30 = vld [vmem:[%s10935_s5 + $0x114] ss:$8 sps:$4 sm:$0xff]  }
 0x146   : > { %1908 = vmatprep.subr.bf16.mxu0 %v7793_v23  ;;  %v6553_v23 = vrot.slane %v7905_v8, 11  ;;  %v2277_v46 = vcombine.high %v9419_v36, %v9423_v37  ;;  %v7904_v8 = vld [vmem:[%s10931_s1 + $0x6f4] ss:$8 sps:$4 sm:$0xff]   ;;  %v2276_v19 = vcombine.low %v9419_v36, %v9423_v37  ;;  %v7916_v31 = vld [vmem:[%s10931_s1 + $0x710] ss:$8 sps:$4 sm:$0xff]   ;;  %3487 = vmatprep.subr.bf16.mxu1 %v8024_v30 }
 0x147   : > { %v7924_v36 = vld [vmem:[%s10931_s1 + $0x734] ss:$8 sps:$4 sm:$0xff]   ;;  %v8029_v37 = vld [vmem:[%s10935_s5 + $0x120] ss:$8 sps:$4 sm:$0xff]   ;;  %v2526_v30 = vld [vmem:[#allocation2 + $0x70] sm:$0xf] }
 0x148   : > { %v9411_v34 = vsel %vm8828_vm2, %v6553_v23, %v2260_v24  ;;  %v7915_v23 = vld [vmem:[%s10931_s1 + $0x704] ss:$8 sps:$4 sm:$0xff]  }
 0x149   : > { %1909 = vmatpush1.bf16.msra.mxu0 %v7791_v32  ;;  %v7839_v32 = vld [vmem:[%s10931_s1 + $0x5e0] ss:$8 sps:$4 sm:$0xff]  }
 0x14a   : > { %1910 = vmatprep.subr.bf16.mxu0 %v7796_v35  ;;  %v9415_v35 = vsel %vm8828_vm2, %v6554_v25, %v2264_v26  ;;  %v7913_v25 = vld [vmem:[%s10931_s1 + $0x700] ss:$8 sps:$4 sm:$0xff]  }
 0x14b   : > { %v2275_v45 = vcombine.high %v9411_v34, %v9415_v35  ;;  %v2274_v18 = vcombine.low %v9411_v34, %v9415_v35  ;;  %v8027_v34 = vld [vmem:[%s10935_s5 + $0x124] ss:$8 sps:$4 sm:$0xff]   ;;  %v7919_v35 = vld [vmem:[%s10931_s1 + $0x720] ss:$8 sps:$4 sm:$0xff]  }
 0x14d   : > { %1911 = vmatpush1.bf16.msra.mxu0 %v7794_v44  ;;  %v7842_v44 = vld [vmem:[%s10931_s1 + $0x5f0] ss:$8 sps:$4 sm:$0xff]   ;;  %v2283_v40 = vpack.c.bf16 %v2277_v46, %v2275_v45  ;;  %v2282_v24 = vpack.c.bf16 %v2276_v19, %v2274_v18  ;;  %v8033_v46 = vld [vmem:[%s10935_s5 + $0x144] ss:$8 sps:$4 sm:$0xff]  }
 0x14e   : > { %2170 = vmatprep.subr.bf16.mxu0 %v7799_v47  ;;  %v7859_v47 = vld [vmem:[%s10931_s1 + $0x604] ss:$8 sps:$4 sm:$0xff]   ;;  %v8032_v45 = vld [vmem:[%s10935_s5 + $0x130] ss:$8 sps:$4 sm:$0xff]  }
 0x14f   : > { %v7952_v18 = vld [vmem:[%s10931_s1 + $0x7d0] ss:$8 sps:$4 sm:$0xff]  }
 0x150   : > { %1913 = vmatmul.mubr.bf16.vlgmr.msra.gmra.mrb[0].mxu0 %v1685_v48  ;;  %v7860_v48 = vld [vmem:[%s10931_s1 + $0x610] ss:$8 sps:$4 sm:$0xff]  }
 0x151   : > { %2171 = vmatpush1.bf16.msra.mxu0 %v7797_v49  ;;  %2202 = vmatprep.mubr.bf16.mxu0 %v1976_v51  ;;  %v7865_v49 = vld [vmem:[%s10931_s1 + $0x624] ss:$8 sps:$4 sm:$0xff]   ;;  %v7868_v51 = vld [vmem:[%s10931_s1 + $0x634] ss:$8 sps:$4 sm:$0xff]  }
 0x152   : > { %2172 = vmatprep.subr.bf16.mxu0 %v7802_v50  ;;  %v7863_v50 = vld [vmem:[%s10931_s1 + $0x620] ss:$8 sps:$4 sm:$0xff]  }
 0x155   : > { %2173 = vmatpush1.bf16.msra.mxu0 %v7800_v52  ;;  %v7866_v52 = vld [vmem:[%s10931_s1 + $0x630] ss:$8 sps:$4 sm:$0xff]  }
 0x156   : > { %2174 = vmatprep.subr.bf16.mxu0 %v7805_v54  ;;  %v7871_v54 = vld [vmem:[%s10931_s1 + $0x644] ss:$8 sps:$4 sm:$0xff]  }
 0x159   : > { %2175 = vmatpush1.bf16.msra.mxu0 %v7803_v55  ;;  %v7869_v55 = vld [vmem:[%s10931_s1 + $0x640] ss:$8 sps:$4 sm:$0xff]  }
 0x15a   : > { %2176 = vmatprep.subr.bf16.mxu0 %v7808_v56  ;;  %v7874_v56 = vld [vmem:[%s10931_s1 + $0x654] ss:$8 sps:$4 sm:$0xff]  }
 0x15d   : > { %2177 = vmatpush1.bf16.msra.mxu0 %v7806_v58  ;;  %v7872_v58 = vld [vmem:[%s10931_s1 + $0x650] ss:$8 sps:$4 sm:$0xff]  }
 0x15e   : > { %2178 = vmatprep.subr.bf16.mxu0 %v7811_v59  ;;  %v7877_v59 = vld [vmem:[%s10931_s1 + $0x664] ss:$8 sps:$4 sm:$0xff]  }
 0x161   : > { %2179 = vmatpush1.bf16.msra.mxu0 %v7809_v60  ;;  %v7875_v60 = vld [vmem:[%s10931_s1 + $0x660] ss:$8 sps:$4 sm:$0xff]  }
 0x162   : > { %2180 = vmatprep.subr.bf16.mxu0 %v7814_v61  ;;  %v7880_v61 = vld [vmem:[%s10931_s1 + $0x674] ss:$8 sps:$4 sm:$0xff]  }
 0x165   : > { %2181 = vmatpush1.bf16.msra.mxu0 %v7812_v62  ;;  %v7878_v62 = vld [vmem:[%s10931_s1 + $0x670] ss:$8 sps:$4 sm:$0xff]  }
 0x166   : > { %2182 = vmatprep.subr.bf16.mxu0 %v7817_v63  ;;  %v7883_v63 = vld [vmem:[%s10931_s1 + $0x684] ss:$8 sps:$4 sm:$0xff]  }
 0x169   : > { %2183 = vmatpush1.bf16.msra.mxu0 %v7815_v6  ;;  %v7881_v6 = vld [vmem:[%s10931_s1 + $0x680] ss:$8 sps:$4 sm:$0xff]  }
 0x16a   : > { %2184 = vmatprep.subr.bf16.mxu0 %v7820_v9  ;;  %v7886_v9 = vld [vmem:[%s10931_s1 + $0x694] ss:$8 sps:$4 sm:$0xff]  }
 0x16d   : > { %2185 = vmatpush1.bf16.msra.mxu0 %v7818_v10  ;;  %v7884_v10 = vld [vmem:[%s10931_s1 + $0x690] ss:$8 sps:$4 sm:$0xff]  }
 0x16e   : > { %2186 = vmatprep.subr.bf16.mxu0 %v7823_v11  ;;  %v7889_v11 = vld [vmem:[%s10931_s1 + $0x6a4] ss:$8 sps:$4 sm:$0xff]  }
 0x171   : > { %2187 = vmatpush1.bf16.msra.mxu0 %v7821_v12  ;;  %v7887_v12 = vld [vmem:[%s10931_s1 + $0x6a0] ss:$8 sps:$4 sm:$0xff]  }
 0x172   : > { %2188 = vmatprep.subr.bf16.mxu0 %v7826_v13  ;;  %v7892_v13 = vld [vmem:[%s10931_s1 + $0x6b4] ss:$8 sps:$4 sm:$0xff]  }
 0x175   : > { %2189 = vmatpush1.bf16.msra.mxu0 %v7824_v0  ;;  %v7890_v0 = vld [vmem:[%s10931_s1 + $0x6b0] ss:$8 sps:$4 sm:$0xff]  }
 0x176   : > { %2190 = vmatprep.subr.bf16.mxu0 %v7829_v1  ;;  %v7895_v1 = vld [vmem:[%s10931_s1 + $0x6c4] ss:$8 sps:$4 sm:$0xff]  }
 0x179   : > { %2191 = vmatpush1.bf16.msra.mxu0 %v7827_v2  ;;  %v7893_v2 = vld [vmem:[%s10931_s1 + $0x6c0] ss:$8 sps:$4 sm:$0xff]  }
 0x17a   : > { %2192 = vmatprep.subr.bf16.mxu0 %v7832_v3  ;;  %v7898_v3 = vld [vmem:[%s10931_s1 + $0x6d4] ss:$8 sps:$4 sm:$0xff]  }
 0x17d   : > { %2193 = vmatpush1.bf16.msra.mxu0 %v7830_v4  ;;  %v7896_v4 = vld [vmem:[%s10931_s1 + $0x6d0] ss:$8 sps:$4 sm:$0xff]  }
 0x17e   : > { %2194 = vmatprep.subr.bf16.mxu0 %v7835_v5  ;;  %v7901_v5 = vld [vmem:[%s10931_s1 + $0x6e4] ss:$8 sps:$4 sm:$0xff]  }
 0x181   : > { %2195 = vmatpush1.bf16.msra.mxu0 %v7833_v7  ;;  %v7899_v7 = vld [vmem:[%s10931_s1 + $0x6e0] ss:$8 sps:$4 sm:$0xff]  }
 0x182   : > { %2196 = vmatprep.subr.bf16.mxu0 %v7838_v15  ;;  %v2527_v15 = vld [vmem:[#allocation2 + $0x78] sm:$0xf] }
 0x183   : > { %v6622_v21 = vcombine.low %v2525_v14, %v2527_v15  ;;  %v8015_v14 = vld [vmem:[#allocation2 + $0x90] ss:$8 sps:$4 sm:$0xee]   ;;  %v8017_v15 = vld [vmem:[#allocation2 + $0x94] ss:$8 sps:$4 sm:$0x11]  }
 0x185   : > { %2197 = vmatpush1.bf16.msra.mxu0 %v7836_v22  ;;  %v6624_v22 = vcombine.low %v2529_v16, %v2531_v17  ;;  %v8018_v16 = vld [vmem:[#allocation2 + $0xb0] ss:$8 sps:$4 sm:$0xee]   ;;  %v8020_v17 = vld [vmem:[#allocation2 + $0xb4] ss:$8 sps:$4 sm:$0x11]  }
 0x186   : > { %2198 = vmatprep.subr.bf16.mxu0 %v7841_v27  ;;  %v7918_v27 = vld [vmem:[%s10931_s1 + $0x714] ss:$8 sps:$4 sm:$0xff]  }
 0x187   : > { %v2553_v26 = vpack.c.bf16 %v6624_v22, %v6622_v21 }
 0x189   : > { %2199 = vmatpush1.bf16.msra.mxu0 %v7839_v32  ;;  %v7921_v32 = vld [vmem:[%s10931_s1 + $0x724] ss:$8 sps:$4 sm:$0xff]  }
 0x18a   : > { %2200 = vmatprep.subr.bf16.mxu0 %v7844_v33  ;;  %v8026_v33 = vld [vmem:[%s10935_s5 + $0x110] ss:$8 sps:$4 sm:$0xff]  }
 0x18b   : > { %3488 = vmatpush1.bf16.msra.mxu1 %v8026_v33  ;;  %v7960_v33 = vld [vmem:[%s10931_s1 + $0x7f4] ss:$8 sps:$4 sm:$0xff]  }
 0x18c   : > { %3489 = vmatprep.subr.bf16.mxu1 %v8027_v34 }
 0x18d   : > { %2201 = vmatpush1.bf16.msra.mxu0 %v7842_v44  ;;  %v7927_v44 = vld [vmem:[%s10931_s1 + $0x744] ss:$8 sps:$4 sm:$0xff]  }
 0x18e   : > { %2477 = vmatprep.subr.bf16.mxu0 %v7859_v47  ;;  %v7925_v47 = vld [vmem:[%s10931_s1 + $0x740] ss:$8 sps:$4 sm:$0xff]  }
 0x18f   : > { %3490 = vmatpush1.bf16.msra.mxu1 %v8029_v37 }
 0x190   : > { %2203 = vmatmul.mubr.bf16.vlgmr.msra.gmra.mrb[0].mxu0 %v1975_v38  ;;  %3491 = vmatprep.subr.bf16.mxu1 %v8030_v42  ;;  %v7930_v38 = vld [vmem:[%s10931_s1 + $0x754] ss:$8 sps:$4 sm:$0xff]   ;;  %v6621_v42 = vcombine.low %v2524_v29, %v2526_v30  ;;  %v8068_v29 = vld [vmem:[%s10935_s5 + $0x1f0] ss:$8 sps:$4 sm:$0xff]   ;;  %v8071_v30 = vld [vmem:[%s10935_s5 + $0x4] ss:$8 sps:$4 sm:$0xff]  }
 0x191   : > { %2478 = vmatpush1.bf16.msra.mxu0 %v7857_v39  ;;  %2509 = vmatprep.mubr.bf16.mxu0 %v2283_v40  ;;  %v8035_v39 = vld [vmem:[%s10935_s5 + $0x140] ss:$8 sps:$4 sm:$0xff]   ;;  %v8036_v40 = vld [vmem:[%s10935_s5 + $0x154] ss:$8 sps:$4 sm:$0xff]  }
 0x192   : > { %2479 = vmatprep.subr.bf16.mxu0 %v7862_v41  ;;  %v7928_v41 = vld [vmem:[%s10931_s1 + $0x750] ss:$8 sps:$4 sm:$0xff]  }
 0x193   : > { %3492 = vmatpush1.bf16.msra.mxu1 %v8032_v45 }
 0x194   : > { %3493 = vmatprep.subr.bf16.mxu1 %v8033_v46 }
 0x195   : > { %2480 = vmatpush1.bf16.msra.mxu0 %v7860_v48  ;;  %v7933_v48 = vld [vmem:[%s10931_s1 + $0x764] ss:$8 sps:$4 sm:$0xff]  }
 0x196   : > { %2481 = vmatprep.subr.bf16.mxu0 %v7865_v49  ;;  %v8038_v49 = vld [vmem:[%s10935_s5 + $0x150] ss:$8 sps:$4 sm:$0xff]  }
 0x197   : > { %3494 = vmatpush1.bf16.msra.mxu1 %v8035_v39  ;;  %v7961_v39 = vld [vmem:[%s10931_s1 + $0x800] ss:$8 sps:$4 sm:$0xff]  }
 0x198   : > { %3495 = vmatprep.subr.bf16.mxu1 %v8036_v40 }
 0x199   : > { %2482 = vmatpush1.bf16.msra.mxu0 %v7863_v50  ;;  %v8039_v50 = vld [vmem:[%s10935_s5 + $0x164] ss:$8 sps:$4 sm:$0xff]  }
 0x19a   : > { %2483 = vmatprep.subr.bf16.mxu0 %v7868_v51  ;;  %v7931_v51 = vld [vmem:[%s10931_s1 + $0x760] ss:$8 sps:$4 sm:$0xff]  }
 0x19b   : > { %3496 = vmatpush1.bf16.msra.mxu1 %v8038_v49  ;;  %v7969_v49 = vld [vmem:[%s10931_s1 + $0x824] ss:$8 sps:$4 sm:$0xff]  }
 0x19c   : > { %3497 = vmatprep.subr.bf16.mxu1 %v8039_v50  ;;  %v7967_v50 = vld [vmem:[%s10931_s1 + $0x820] ss:$8 sps:$4 sm:$0xff]  }
 0x19d   : > { %2484 = vmatpush1.bf16.msra.mxu0 %v7866_v52  ;;  %v7936_v52 = vld [vmem:[%s10931_s1 + $0x774] ss:$8 sps:$4 sm:$0xff]  }
 0x19e   : > { %2485 = vmatprep.subr.bf16.mxu0 %v7871_v54  ;;  %v8041_v54 = vld [vmem:[%s10935_s5 + $0x160] ss:$8 sps:$4 sm:$0xff]  }
 0x19f   : > { %3498 = vmatpush1.bf16.msra.mxu1 %v8041_v54  ;;  %v7975_v54 = vld [vmem:[%s10931_s1 + $0x844] ss:$8 sps:$4 sm:$0xff]  }
 0x1a1   : > { %2486 = vmatpush1.bf16.msra.mxu0 %v7869_v55  ;;  %v8042_v55 = vld [vmem:[%s10935_s5 + $0x174] ss:$8 sps:$4 sm:$0xff]  }
 0x1a2   : > { %2487 = vmatprep.subr.bf16.mxu0 %v7874_v56  ;;  %v7934_v56 = vld [vmem:[%s10931_s1 + $0x770] ss:$8 sps:$4 sm:$0xff]   ;;  %3499 = vmatprep.subr.bf16.mxu1 %v8042_v55  ;;  %v7973_v55 = vld [vmem:[%s10931_s1 + $0x840] ss:$8 sps:$4 sm:$0xff]  }
 0x1a5   : > { %2488 = vmatpush1.bf16.msra.mxu0 %v7872_v58  ;;  %v7939_v58 = vld [vmem:[%s10931_s1 + $0x784] ss:$8 sps:$4 sm:$0xff]  }
 0x1a6   : > { %2489 = vmatprep.subr.bf16.mxu0 %v7877_v59  ;;  %v8044_v59 = vld [vmem:[%s10935_s5 + $0x170] ss:$8 sps:$4 sm:$0xff]  }
 0x1a7   : > { %3500 = vmatpush1.bf16.msra.mxu1 %v8044_v59  ;;  %v7981_v59 = vld [vmem:[%s10931_s1 + $0x864] ss:$8 sps:$4 sm:$0xff]  }
 0x1a9   : > { %2490 = vmatpush1.bf16.msra.mxu0 %v7875_v60  ;;  %v8045_v60 = vld [vmem:[%s10935_s5 + $0x184] ss:$8 sps:$4 sm:$0xff]  }
 0x1aa   : > { %2491 = vmatprep.subr.bf16.mxu0 %v7880_v61  ;;  %v7937_v61 = vld [vmem:[%s10931_s1 + $0x780] ss:$8 sps:$4 sm:$0xff]   ;;  %3501 = vmatprep.subr.bf16.mxu1 %v8045_v60 }
 0x1ab   : > { %v7979_v60 = vld [vmem:[%s10931_s1 + $0x860] ss:$8 sps:$4 sm:$0xff]  }
 0x1ad   : > { %2492 = vmatpush1.bf16.msra.mxu0 %v7878_v62  ;;  %v7942_v62 = vld [vmem:[%s10931_s1 + $0x794] ss:$8 sps:$4 sm:$0xff]  }
 0x1ae   : > { %2493 = vmatprep.subr.bf16.mxu0 %v7883_v63  ;;  %v8047_v63 = vld [vmem:[%s10935_s5 + $0x180] ss:$8 sps:$4 sm:$0xff]  }
 0x1af   : > { %3502 = vmatpush1.bf16.msra.mxu1 %v8047_v63  ;;  %v7987_v63 = vld [vmem:[%s10931_s1 + $0x884] ss:$8 sps:$4 sm:$0xff]  }
 0x1b1   : > { %2494 = vmatpush1.bf16.msra.mxu0 %v7881_v6  ;;  %v8048_v6 = vld [vmem:[%s10935_s5 + $0x194] ss:$8 sps:$4 sm:$0xff]  }
 0x1b2   : > { %2495 = vmatprep.subr.bf16.mxu0 %v7886_v9  ;;  %v7940_v9 = vld [vmem:[%s10931_s1 + $0x790] ss:$8 sps:$4 sm:$0xff]   ;;  %3503 = vmatprep.subr.bf16.mxu1 %v8048_v6  ;;  %v7985_v6 = vld [vmem:[%s10931_s1 + $0x880] ss:$8 sps:$4 sm:$0xff]  }
 0x1b5   : > { %2496 = vmatpush1.bf16.msra.mxu0 %v7884_v10  ;;  %v7945_v10 = vld [vmem:[%s10931_s1 + $0x7a4] ss:$8 sps:$4 sm:$0xff]  }
 0x1b6   : > { %2497 = vmatprep.subr.bf16.mxu0 %v7889_v11  ;;  %v8050_v11 = vld [vmem:[%s10935_s5 + $0x190] ss:$8 sps:$4 sm:$0xff]  }
 0x1b7   : > { %3504 = vmatpush1.bf16.msra.mxu1 %v8050_v11  ;;  %v7993_v11 = vld [vmem:[%s10931_s1 + $0x8a4] ss:$8 sps:$4 sm:$0xff]  }
 0x1b9   : > { %2498 = vmatpush1.bf16.msra.mxu0 %v7887_v12  ;;  %v7943_v12 = vld [vmem:[%s10931_s1 + $0x7a0] ss:$8 sps:$4 sm:$0xff]  }
 0x1ba   : > { %2499 = vmatprep.subr.bf16.mxu0 %v7892_v13  ;;  %v7948_v13 = vld [vmem:[%s10931_s1 + $0x7b4] ss:$8 sps:$4 sm:$0xff]  }
 0x1bd   : > { %2500 = vmatpush1.bf16.msra.mxu0 %v7890_v0  ;;  %v7946_v0 = vld [vmem:[%s10931_s1 + $0x7b0] ss:$8 sps:$4 sm:$0xff]  }
 0x1be   : > { %2501 = vmatprep.subr.bf16.mxu0 %v7895_v1  ;;  %v7951_v1 = vld [vmem:[%s10931_s1 + $0x7c4] ss:$8 sps:$4 sm:$0xff]  }
 0x1c1   : > { %2502 = vmatpush1.bf16.msra.mxu0 %v7893_v2  ;;  %v7949_v2 = vld [vmem:[%s10931_s1 + $0x7c0] ss:$8 sps:$4 sm:$0xff]  }
 0x1c2   : > { %2503 = vmatprep.subr.bf16.mxu0 %v7898_v3  ;;  %v8009_v3 = vld [vmem:[#allocation2 + $0x50] ss:$8 sps:$4 sm:$0xee]  }
 0x1c3   : > { %v6689_v19 = vrot.slane %v8009_v3, 9  ;;  %v8002_v3 = vld [vmem:[%s10931_s1 + $0x8d4] ss:$8 sps:$4 sm:$0xff]  }
 0x1c5   : > { %2504 = vmatpush1.bf16.msra.mxu0 %v7896_v4  ;;  %v8011_v4 = vld [vmem:[#allocation2 + $0x54] ss:$8 sps:$4 sm:$0x11]  }
 0x1c6   : > { %2505 = vmatprep.subr.bf16.mxu0 %v7901_v5  ;;  %v7954_v5 = vld [vmem:[%s10931_s1 + $0x7d4] ss:$8 sps:$4 sm:$0xff]  }
 0x1c9   : > { %2506 = vmatpush1.bf16.msra.mxu0 %v7899_v7  ;;  %v8012_v7 = vld [vmem:[#allocation2 + $0x70] ss:$8 sps:$4 sm:$0xee]  }
 0x1ca   : > { %2507 = vmatprep.subr.bf16.mxu0 %v7904_v8  ;;  %v8014_v8 = vld [vmem:[#allocation2 + $0x74] ss:$8 sps:$4 sm:$0x11]   ;;  %v6690_v21 = vrot.slane %v8012_v7, 9  ;;  %v8003_v7 = vld [vmem:[%s10931_s1 + $0x8e0] ss:$8 sps:$4 sm:$0xff]  }
 0x1cb   : > { %v2824_v22 = vrot.slane %v8014_v8, 5  ;;  %v8008_v8 = vld [vmem:[%s10931_s1 + $0x8f4] ss:$8 sps:$4 sm:$0xff]  }
 0x1cd   : > { %2508 = vmatpush1.bf16.msra.mxu0 %v7902_v20  ;;  %v2820_v20 = vrot.slane %v8011_v4, 5  ;;  %v8000_v4 = vld [vmem:[%s10931_s1 + $0x8d0] ss:$8 sps:$4 sm:$0xff]  }
 0x1ce   : > { %2747 = vmatprep.subr.bf16.mxu0 %v7915_v23  ;;  %v7957_v23 = vld [vmem:[%s10931_s1 + $0x7e4] ss:$8 sps:$4 sm:$0xff]  }
 0x1cf   : > { %v9691_v34 = vsel %vm8943_vm5, %v6689_v19, %v2820_v20  ;;  %v8053_v19 = vld [vmem:[%s10935_s5 + $0x1a0] ss:$8 sps:$4 sm:$0xff]   ;;  %v8054_v20 = vld [vmem:[%s10935_s5 + $0x1b4] ss:$8 sps:$4 sm:$0xff]  }
 0x1d0   : > { %2510 = vmatmul.mubr.bf16.vlgmr.msra.gmra.mrb[0].mxu0 %v2282_v24  ;;  %v6691_v24 = vrot.slane %v8015_v14, 9 }
 0x1d1   : > { %2748 = vmatpush1.bf16.msra.mxu0 %v7913_v25  ;;  %2779 = vmatprep.mubr.bf16.mxu0 %v2553_v26  ;;  %v2828_v25 = vrot.slane %v8017_v15, 5  ;;  %v6692_v26 = vrot.slane %v8018_v16, 9  ;;  %v8006_v16 = vld [vmem:[%s10931_s1 + $0x8f0] ss:$8 sps:$4 sm:$0xff]  }
 0x1d2   : > { %2749 = vmatprep.subr.bf16.mxu0 %v7918_v27  ;;  %v2832_v27 = vrot.slane %v8020_v17, 5 }
 0x1d4   : > { %v9703_v37 = vsel %vm8943_vm5, %v6692_v26, %v2832_v27  ;;  %v8063_v26 = vld [vmem:[%s10935_s5 + $0x1e4] ss:$8 sps:$4 sm:$0xff]   ;;  %v8065_v27 = vld [vmem:[%s10935_s5 + $0x1e0] ss:$8 sps:$4 sm:$0xff]  }
 0x1d5   : > { %2750 = vmatpush1.bf16.msra.mxu0 %v7916_v31  ;;  %v2528_v31 = vld [vmem:[#allocation2 + $0x90] sm:$0xf] }
 0x1d6   : > { %2751 = vmatprep.subr.bf16.mxu0 %v7921_v32  ;;  %v2530_v32 = vld [vmem:[#allocation2 + $0xb0] sm:$0xf] }
 0x1d9   : > { %2752 = vmatpush1.bf16.msra.mxu0 %v7919_v35  ;;  %v9695_v35 = vsel %vm8943_vm5, %v6690_v21, %v2824_v22  ;;  %v8056_v21 = vld [vmem:[%s10935_s5 + $0x1b0] ss:$8 sps:$4 sm:$0xff]   ;;  %v8057_v22 = vld [vmem:[%s10935_s5 + $0x1c4] ss:$8 sps:$4 sm:$0xff]  }
 0x1da   : > { %2753 = vmatprep.subr.bf16.mxu0 %v7924_v36  ;;  %v9699_v36 = vsel %vm8943_vm5, %v6691_v24, %v2828_v25  ;;  %v2835_v45 = vcombine.high %v9691_v34, %v9695_v35  ;;  %v2834_v14 = vcombine.low %v9691_v34, %v9695_v35  ;;  %v8060_v24 = vld [vmem:[%s10935_s5 + $0x1d4] ss:$8 sps:$4 sm:$0xff]   ;;  %v8062_v25 = vld [vmem:[%s10935_s5 + $0x1d0] ss:$8 sps:$4 sm:$0xff]   ;;  %v3084_v34 = vld [vmem:[%s10932_s2] sm:$0x3] }
 0x1db   : > { %v2837_v46 = vcombine.high %v9699_v36, %v9703_v37  ;;  %v2836_v15 = vcombine.low %v9699_v36, %v9703_v37  ;;  %v3104_v37 = vld [vmem:[%s10933_s3] sm:$0x3] }
 0x1dd   : > { %2754 = vmatpush1.bf16.msra.mxu0 %v7922_v43  ;;  %v6623_v43 = vcombine.low %v2528_v31, %v2530_v32  ;;  %v2843_v40 = vpack.c.bf16 %v2837_v46, %v2835_v45  ;;  %v2842_v17 = vpack.c.bf16 %v2836_v15, %v2834_v14  ;;  %v3086_v31 = vlaneseq  ;;  %v8081_v14 = vld [vmem:[#allocation2 + $0x64] ss:$8 sps:$4 sm:$0x88]   ;;  %v3263_v15 = vld [vmem:[#allocation2 + $0x18] sm:$0xf] }
 0x1de   : > { %2755 = vmatprep.subr.bf16.mxu0 %v7927_v44  ;;  %v7958_v44 = vld [vmem:[%s10931_s1 + $0x7f0] ss:$8 sps:$4 sm:$0xff]  }
 0x1df   : > { %v3087_v32 = vshrl.u32 %v3086_v31, 7 }
 0x1e1   : > { %2756 = vmatpush1.bf16.msra.mxu0 %v7925_v47  ;;  %v7963_v47 = vld [vmem:[%s10931_s1 + $0x804] ss:$8 sps:$4 sm:$0xff]   ;;  %v9856_v35 = vsub.s32 1, %v3087_v32 }
 0x1e2   : > { %2757 = vmatprep.subr.bf16.mxu0 %v7930_v38  ;;  %v2552_v38 = vpack.c.bf16 %v6623_v43, %v6621_v42 }
 0x1e3   : > { %v3093_v42 = vrot.slane %v3084_v34, %v9856_v35 }
 0x1e5   : > { %2758 = vmatpush1.bf16.msra.mxu0 %v7928_v41  ;;  %v7966_v41 = vld [vmem:[%s10931_s1 + $0x814] ss:$8 sps:$4 sm:$0xff]  }
 0x1e6   : > { %2759 = vmatprep.subr.bf16.mxu0 %v7933_v48  ;;  %v7964_v48 = vld [vmem:[%s10931_s1 + $0x810] ss:$8 sps:$4 sm:$0xff]  }
 0x1e9   : > { %2760 = vmatpush1.bf16.msra.mxu0 %v7931_v51  ;;  %v7972_v51 = vld [vmem:[%s10931_s1 + $0x834] ss:$8 sps:$4 sm:$0xff]  }
 0x1ea   : > { %2761 = vmatprep.subr.bf16.mxu0 %v7936_v52  ;;  %v7970_v52 = vld [vmem:[%s10931_s1 + $0x830] ss:$8 sps:$4 sm:$0xff]  }
 0x1ed   : > { %2762 = vmatpush1.bf16.msra.mxu0 %v7934_v56  ;;  %v7978_v56 = vld [vmem:[%s10931_s1 + $0x854] ss:$8 sps:$4 sm:$0xff]  }
 0x1ee   : > { %2763 = vmatprep.subr.bf16.mxu0 %v7939_v58  ;;  %v7976_v58 = vld [vmem:[%s10931_s1 + $0x850] ss:$8 sps:$4 sm:$0xff]  }
 0x1f1   : > { %2764 = vmatpush1.bf16.msra.mxu0 %v7937_v61  ;;  %v7984_v61 = vld [vmem:[%s10931_s1 + $0x874] ss:$8 sps:$4 sm:$0xff]  }
 0x1f2   : > { %2765 = vmatprep.subr.bf16.mxu0 %v7942_v62  ;;  %v7982_v62 = vld [vmem:[%s10931_s1 + $0x870] ss:$8 sps:$4 sm:$0xff]  }
 0x1f5   : > { %2766 = vmatpush1.bf16.msra.mxu0 %v7940_v9  ;;  %v7990_v9 = vld [vmem:[%s10931_s1 + $0x894] ss:$8 sps:$4 sm:$0xff]  }
 0x1f6   : > { %2767 = vmatprep.subr.bf16.mxu0 %v7945_v10  ;;  %v7988_v10 = vld [vmem:[%s10931_s1 + $0x890] ss:$8 sps:$4 sm:$0xff]  }
 0x1f9   : > { %2768 = vmatpush1.bf16.msra.mxu0 %v7943_v12  ;;  %v7991_v12 = vld [vmem:[%s10931_s1 + $0x8a0] ss:$8 sps:$4 sm:$0xff]  }
 0x1fa   : > { %2769 = vmatprep.subr.bf16.mxu0 %v7948_v13  ;;  %v7996_v13 = vld [vmem:[%s10931_s1 + $0x8b4] ss:$8 sps:$4 sm:$0xff]  }
 0x1fd   : > { %2770 = vmatpush1.bf16.msra.mxu0 %v7946_v0  ;;  %v7994_v0 = vld [vmem:[%s10931_s1 + $0x8b0] ss:$8 sps:$4 sm:$0xff]  }
 0x1fe   : > { %2771 = vmatprep.subr.bf16.mxu0 %v7951_v1  ;;  %v7999_v1 = vld [vmem:[%s10931_s1 + $0x8c4] ss:$8 sps:$4 sm:$0xff]  }
 0x201   : > { %2772 = vmatpush1.bf16.msra.mxu0 %v7949_v2  ;;  %v7997_v2 = vld [vmem:[%s10931_s1 + $0x8c0] ss:$8 sps:$4 sm:$0xff]  }
 0x202   : > { %2773 = vmatprep.subr.bf16.mxu0 %v7954_v5  ;;  %v8005_v5 = vld [vmem:[%s10931_s1 + $0x8e4] ss:$8 sps:$4 sm:$0xff]  }
 0x205   : > { %2774 = vmatpush1.bf16.msra.mxu0 %v7952_v18  ;;  %v8051_v18 = vld [vmem:[%s10935_s5 + $0x1a4] ss:$8 sps:$4 sm:$0xff]  }
 0x206   : > { %2775 = vmatprep.subr.bf16.mxu0 %v7957_v23  ;;  %3505 = vmatprep.subr.bf16.mxu1 %v8051_v18  ;;  %v8059_v23 = vld [vmem:[%s10935_s5 + $0x1c0] ss:$8 sps:$4 sm:$0xff]  }
 0x207   : > { %3506 = vmatpush1.bf16.msra.mxu1 %v8053_v19 }
 0x208   : > { %3507 = vmatprep.subr.bf16.mxu1 %v8054_v20 }
 0x209   : > { %2776 = vmatpush1.bf16.msra.mxu0 %v7955_v28  ;;  %v8066_v28 = vld [vmem:[%s10935_s5 + $0x1f4] ss:$8 sps:$4 sm:$0xff]  }
 0x20a   : > { %2777 = vmatprep.subr.bf16.mxu0 %v7960_v33  ;;  %v9851_v33 = vsub.s32 0, %v3087_v32 }
 0x20b   : > { %3508 = vmatpush1.bf16.msra.mxu1 %v8056_v21 }
 0x20c   : > { %3509 = vmatprep.subr.bf16.mxu1 %v8057_v22  ;;  %v3089_v36 = vrot.slane %v3084_v34, %v9851_v33  ;;  %v3109_v46 = vrot.slane %v3104_v37, %v9851_v33 }
 0x20d   : > { %2778 = vmatpush1.bf16.msra.mxu0 %v7958_v44  ;;  %v3120_v44 = vld [vmem:[%s10934_s4] sm:$0x3] }
 0x20e   : > { %3037 = vmatprep.subr.bf16.mxu0 %v7963_v47 }
 0x20f   : > { %3510 = vmatpush1.bf16.msra.mxu1 %v8059_v23  ;;  %v6764_v23 = vrot.slane %v8081_v14, 11  ;;  %v8128_v14 = vld [vmem:[#allocation2 + $0x10] ss:$8 sps:$4 sm:$0xee]  }
 0x210   : > { %2780 = vmatmul.mubr.bf16.vlgmr.msra.gmra.mrb[0].mxu0 %v2552_v38  ;;  %3511 = vmatprep.subr.bf16.mxu1 %v8060_v24 }
 0x211   : > { %3038 = vmatpush1.bf16.msra.mxu0 %v7961_v39  ;;  %3069 = vmatprep.mubr.bf16.mxu0 %v2843_v40  ;;  %v3113_v39 = vrot.slane %v3104_v37, %v9856_v35 }
 0x212   : > { %3039 = vmatprep.subr.bf16.mxu0 %v7966_v41 }
 0x213   : > { %3512 = vmatpush1.bf16.msra.mxu1 %v8062_v25 }
 0x214   : > { %3513 = vmatprep.subr.bf16.mxu1 %v8063_v26 }
 0x215   : > { %3040 = vmatpush1.bf16.msra.mxu0 %v7964_v48  ;;  %v3125_v48 = vrot.slane %v3120_v44, %v9851_v33 }
 0x216   : > { %3041 = vmatprep.subr.bf16.mxu0 %v7969_v49 }
 0x217   : > { %3514 = vmatpush1.bf16.msra.mxu1 %v8065_v27 }
 0x218   : > { %3515 = vmatprep.subr.bf16.mxu1 %v8066_v28 }
 0x219   : > { %3042 = vmatpush1.bf16.msra.mxu0 %v7967_v50 }
 0x21a   : > { %3043 = vmatprep.subr.bf16.mxu0 %v7972_v51 }
 0x21b   : > { %3516 = vmatpush1.bf16.msra.mxu1 %v8068_v29 }
 0x21c   : > { %3688 = vmatprep.subr.bf16.mxu1 %v8071_v30  ;;  %v8069_v30 = vld [vmem:[%s10935_s5] ss:$8 sps:$4 sm:$0xff]  }
 0x21d   : > { %3044 = vmatpush1.bf16.msra.mxu0 %v7970_v52  ;;  %v3129_v52 = vrot.slane %v3120_v44, %v9856_v35 }
 0x21e   : > { %3045 = vmatprep.subr.bf16.mxu0 %v7975_v54 }
 0x221   : > { %3046 = vmatpush1.bf16.msra.mxu0 %v7973_v55 }
 0x222   : > { %3047 = vmatprep.subr.bf16.mxu0 %v7978_v56 }
 0x225   : > { %3048 = vmatpush1.bf16.msra.mxu0 %v7976_v58 }
 0x226   : > { %3049 = vmatprep.subr.bf16.mxu0 %v7981_v59 }
 0x229   : > { %3050 = vmatpush1.bf16.msra.mxu0 %v7979_v60 }
 0x22a   : > { %3051 = vmatprep.subr.bf16.mxu0 %v7984_v61 }
 0x22d   : > { %3052 = vmatpush1.bf16.msra.mxu0 %v7982_v62 }
 0x22e   : > { %3053 = vmatprep.subr.bf16.mxu0 %v7987_v63 }
 0x231   : > { %3054 = vmatpush1.bf16.msra.mxu0 %v7985_v6 }
 0x232   : > { %3055 = vmatprep.subr.bf16.mxu0 %v7990_v9 }
 0x235   : > { %3056 = vmatpush1.bf16.msra.mxu0 %v7988_v10 }
 0x236   : > { %3057 = vmatprep.subr.bf16.mxu0 %v7993_v11 }
 0x239   : > { %3058 = vmatpush1.bf16.msra.mxu0 %v7991_v12 }
 0x23a   : > { %3059 = vmatprep.subr.bf16.mxu0 %v7996_v13 }
 0x23d   : > { %3060 = vmatpush1.bf16.msra.mxu0 %v7994_v0 }
 0x23e   : > { %3061 = vmatprep.subr.bf16.mxu0 %v7999_v1 }
 0x241   : > { %3062 = vmatpush1.bf16.msra.mxu0 %v7997_v2 }
 0x242   : > { %3063 = vmatprep.subr.bf16.mxu0 %v8002_v3 }
 0x245   : > { %3064 = vmatpush1.bf16.msra.mxu0 %v8000_v4  ;;  %v8075_v4 = vld [vmem:[#allocation2 + $0x4] ss:$8 sps:$4 sm:$0x88]  }
 0x246   : > { %3065 = vmatprep.subr.bf16.mxu0 %v8005_v5  ;;  %v8076_v5 = vld [vmem:[#allocation2 + $0x10] ss:$8 sps:$4 sm:$0x77]  }
 0x247   : > { %v3206_v18 = vrot.slane %v8076_v5, 7  ;;  %v8113_v5 = vld [vmem:[%s10935_s5 + $0xc0] ss:$8 sps:$4 sm:$0xff]  }
 0x249   : > { %3066 = vmatpush1.bf16.msra.mxu0 %v8003_v7  ;;  %v8077_v7 = vld [vmem:[#allocation2 + $0x24] ss:$8 sps:$4 sm:$0x88]  }
 0x24a   : > { %3067 = vmatprep.subr.bf16.mxu0 %v8008_v8  ;;  %v8079_v8 = vld [vmem:[#allocation2 + $0x44] ss:$8 sps:$4 sm:$0x88]   ;;  %v6762_v19 = vrot.slane %v8077_v7, 11  ;;  %v8118_v7 = vld [vmem:[%s10935_s5 + $0xd4] ss:$8 sps:$4 sm:$0xff]  }
 0x24b   : > { %v6763_v22 = vrot.slane %v8079_v8, 11  ;;  %v8116_v8 = vld [vmem:[%s10935_s5 + $0xd0] ss:$8 sps:$4 sm:$0xff]  }
 0x24d   : > { %3068 = vmatpush1.bf16.msra.mxu0 %v8006_v16  ;;  %v3262_v16 = vld [vmem:[#allocation2 + $0x10] sm:$0xf] }
 0x250   : > { %3070 = vmatmul.mubr.bf16.vlgmr.msra.gmra.mrb[0].mxu0 %v2842_v17  ;;  %v6761_v17 = vrot.slane %v8075_v4, 11  ;;  %v8115_v4 = vld [vmem:[%s10935_s5 + $0xc4] ss:$8 sps:$4 sm:$0xff]  }
 0x323   : > { %v3071_v43 = vpop.f32.mrb[0].mxu0 }
 0x324   : > { %v3096_v45 = vadd.f32 %v3089_v36, %v3071_v43  ;;  %v3073_v47 = vpop.f32.mrb[1].mxu0 }
 0x325   : > { %v3097_v38 = vadd.f32 %v3093_v42, %v3073_v47  ;;  %v3075_v40 = vpop.f32.mrb[2].mxu0 }
 0x326   : > { %v3100_v41 = vmax.f32 %v3096_v45, 0.0  ;;  %v3098_v49 = vadd.f32 %v3089_v36, %v3075_v40  ;;  %v3077_v50 = vpop.f32.mrb[3].mxu0  ;;  %v8074_v36 = vld [vmem:[%s10935_s5 + $0x14] ss:$8 sps:$4 sm:$0xff]  }
 0x327   : > { %v3101_v51 = vmax.f32 %v3097_v38, 0.0  ;;  %v3099_v54 = vadd.f32 %v3093_v42, %v3077_v50 }
 0x328   : > { %v3116_v55 = vmul.f32 %v3109_v46, %v3100_v41  ;;  %v3102_v56 = vmax.f32 %v3098_v49, 0.0 }
 0x329   : > { %v3117_v58 = vmul.f32 %v3113_v39, %v3101_v51  ;;  %v3103_v59 = vmax.f32 %v3099_v54, 0.0  ;;  %v8085_v51 = vld [vmem:[%s10935_s5 + $0x24] ss:$8 sps:$4 sm:$0xff]   ;;  %v8083_v54 = vld [vmem:[%s10935_s5 + $0x20] ss:$8 sps:$4 sm:$0xff]  }
 0x32a   : > { %v3132_v60 = vadd.f32 %v3125_v48, %v3116_v55  ;;  %v3118_v61 = vmul.f32 %v3109_v46, %v3102_v56  ;;  %v9878_v46 = vsel %vm8828_vm2, %v6761_v17, %v3206_v18  ;;  %v8088_v55 = vld [vmem:[%s10935_s5 + $0x34] ss:$8 sps:$4 sm:$0xff]   ;;  %v8086_v56 = vld [vmem:[%s10935_s5 + $0x30] ss:$8 sps:$4 sm:$0xff]  }
 0x32b   : > { %v3133_v62 = vadd.f32 %v3129_v52, %v3117_v58  ;;  %v3119_v63 = vmul.f32 %v3113_v39, %v3103_v59  ;;  %v8091_v58 = vld [vmem:[%s10935_s5 + $0x44] ss:$8 sps:$4 sm:$0xff]   ;;  %v8089_v59 = vld [vmem:[%s10935_s5 + $0x40] ss:$8 sps:$4 sm:$0xff]  }
 0x32c   : > { %v3134_v6 = vadd.f32 %v3125_v48, %v3118_v61  ;;  %v8072_v48 = vld [vmem:[%s10935_s5 + $0x10] ss:$8 sps:$4 sm:$0xff]   ;;  %v8139_v18 = vld [vmem:[#allocation2 + $0x74] ss:$8 sps:$4 sm:$0x11]  }
 0x32d   : > { %v3140_v9 = vcombine.low %v3132_v60, %v3133_v62  ;;  %v3141_v10 = vcombine.high %v3132_v60, %v3133_v62  ;;  %v6757_v11 = vcombine.low %v3133_v62, %v3133_v62  ;;  %v6758_v12 = vcombine.high %v3133_v62, %v3133_v62  ;;  %v8094_v60 = vld [vmem:[%s10935_s5 + $0x54] ss:$8 sps:$4 sm:$0xff]   ;;  %v8092_v61 = vld [vmem:[%s10935_s5 + $0x50] ss:$8 sps:$4 sm:$0xff]   ;;  %v8097_v62 = vld [vmem:[%s10935_s5 + $0x64] ss:$8 sps:$4 sm:$0xff]  }
 0x32e   : > { %v3135_v13 = vadd.f32 %v3129_v52, %v3119_v63  ;;  %v8095_v63 = vld [vmem:[%s10935_s5 + $0x60] ss:$8 sps:$4 sm:$0xff]  }
 0x32f   : > { %3156 = vst [vmem:[#allocation2 + $0x30] sm:$0xf] %v3140_v9  ;;  %3157 = vst [vmem:[#allocation2 + $0x38] sm:$0xf] %v6757_v11  ;;  %v8098_v9 = vld [vmem:[%s10935_s5 + $0x70] ss:$8 sps:$4 sm:$0xff]  }
 0x330   : > { %3158 = vst [vmem:[#allocation2 + $0x50] sm:$0xf] %v3141_v10  ;;  %3159 = vst [vmem:[#allocation2 + $0x58] sm:$0xf] %v6758_v12  ;;  %v3142_v0 = vcombine.low %v3134_v6, %v3135_v13  ;;  %v3143_v1 = vcombine.high %v3134_v6, %v3135_v13  ;;  %v6759_v2 = vcombine.low %v3135_v13, %v3135_v13  ;;  %v8100_v6 = vld [vmem:[%s10935_s5 + $0x74] ss:$8 sps:$4 sm:$0xff]  }
 0x331   : > { %v6760_v3 = vcombine.high %v3135_v13, %v3135_v13  ;;  %v8103_v10 = vld [vmem:[%s10935_s5 + $0x84] ss:$8 sps:$4 sm:$0xff]   ;;  %v8101_v11 = vld [vmem:[%s10935_s5 + $0x80] ss:$8 sps:$4 sm:$0xff]   ;;  %v8106_v12 = vld [vmem:[%s10935_s5 + $0x94] ss:$8 sps:$4 sm:$0xff]  }
 0x332   : > { %3160 = vst [vmem:[#allocation2 + $0x70] sm:$0xf] %v3142_v0  ;;  %3161 = vst [vmem:[#allocation2 + $0x78] sm:$0xf] %v6759_v2  ;;  %v8104_v13 = vld [vmem:[%s10935_s5 + $0x90] ss:$8 sps:$4 sm:$0xff]  }
 0x333   : > { %3162 = vst [vmem:[#allocation2 + $0x90] sm:$0xf] %v3143_v1  ;;  %3163 = vst [vmem:[#allocation2 + $0x98] sm:$0xf] %v6760_v3  ;;  %v8109_v0 = vld [vmem:[%s10935_s5 + $0xa4] ss:$8 sps:$4 sm:$0xff]  }
 0x334   : > { %v8107_v1 = vld [vmem:[%s10935_s5 + $0xa0] ss:$8 sps:$4 sm:$0xff]   ;;  %v8112_v2 = vld [vmem:[%s10935_s5 + $0xb4] ss:$8 sps:$4 sm:$0xff]   ;;  %v8110_v3 = vld [vmem:[%s10935_s5 + $0xb0] ss:$8 sps:$4 sm:$0xff]  }
 0x336   : > { %v3265_v20 = vld [vmem:[#allocation2 + $0x38] sm:$0xf]  ;;  %v3264_v21 = vld [vmem:[#allocation2 + $0x30] sm:$0xf] }
 0x337   : > { %v3267_v24 = vld [vmem:[#allocation2 + $0x58] sm:$0xf]  ;;  %v3266_v25 = vld [vmem:[#allocation2 + $0x50] sm:$0xf]  ;;  %v6766_v28 = vcombine.low %v3263_v15, %v3265_v20  ;;  %v6765_v31 = vcombine.low %v3262_v16, %v3264_v21  ;;  %v8121_v16 = vld [vmem:[%s10935_s5 + $0xe4] ss:$8 sps:$4 sm:$0xff]  }
 0x338   : > { %v8078_v34 = vld [vmem:[#allocation2 + $0x30] ss:$8 sps:$4 sm:$0x77]   ;;  %v8130_v15 = vld [vmem:[#allocation2 + $0x14] ss:$8 sps:$4 sm:$0x11]  }
 0x339   : > { %v3269_v26 = vld [vmem:[#allocation2 + $0x78] sm:$0xf]  ;;  %v3268_v27 = vld [vmem:[#allocation2 + $0x70] sm:$0xf]  ;;  %v3210_v45 = vrot.slane %v8078_v34, 7 }
 0x33a   : > { %v6768_v29 = vcombine.low %v3267_v24, %v3269_v26  ;;  %v6767_v32 = vcombine.low %v3266_v25, %v3268_v27  ;;  %v8080_v37 = vld [vmem:[#allocation2 + $0x50] ss:$8 sps:$4 sm:$0x77]   ;;  %v8133_v20 = vld [vmem:[#allocation2 + $0x34] ss:$8 sps:$4 sm:$0x11]  }
 0x33b   : > { %v8082_v42 = vld [vmem:[#allocation2 + $0x70] ss:$8 sps:$4 sm:$0x77]   ;;  %v3214_v47 = vrot.slane %v8080_v37, 7  ;;  %v9882_v39 = vsel %vm8828_vm2, %v6762_v19, %v3210_v45  ;;  %v3769_v24 = vrot.slane %v8139_v18, 5  ;;  %v6865_v26 = vrot.slane %v8128_v14, 9 }
 0x33c   : > { %v3291_v43 = vpack.c.bf16 %v6768_v29, %v6766_v28  ;;  %v3290_v44 = vpack.c.bf16 %v6767_v32, %v6765_v31  ;;  %v3218_v38 = vrot.slane %v8082_v42, 7  ;;  %v3221_v49 = vcombine.high %v9878_v46, %v9882_v39  ;;  %v8137_v17 = vld [vmem:[#allocation2 + $0x70] ss:$8 sps:$4 sm:$0xee]   ;;  %v8119_v25 = vld [vmem:[%s10935_s5 + $0xe0] ss:$8 sps:$4 sm:$0xff]  }
 0x33d   : > { %v9886_v40 = vsel %vm8828_vm2, %v6763_v22, %v3214_v47  ;;  %v8131_v19 = vld [vmem:[#allocation2 + $0x30] ss:$8 sps:$4 sm:$0xee]   ;;  %v8136_v22 = vld [vmem:[#allocation2 + $0x54] ss:$8 sps:$4 sm:$0x11]  }
 0x33e   : > { %3517 = vmatprep.mubr.bf16.mxu1 %v3291_v43  ;;  %v9890_v41 = vsel %vm8828_vm2, %v6764_v23, %v3218_v38  ;;  %v8134_v21 = vld [vmem:[#allocation2 + $0x50] ss:$8 sps:$4 sm:$0xee]   ;;  %v6868_v23 = vrot.slane %v8137_v17, 9  ;;  %v3757_v27 = vrot.slane %v8130_v15, 5  ;;  %v6866_v29 = vrot.slane %v8131_v19, 9 }
 0x33f   : > { %3518 = vmatmul.mubr.bf16.vlgmr.msra.gmra.mrb[0].mxu1 %v3290_v44  ;;  %v3223_v50 = vcombine.high %v9886_v40, %v9890_v41  ;;  %v8124_v28 = vld [vmem:[%s10935_s5 + $0xf4] ss:$8 sps:$4 sm:$0xff]   ;;  %v6867_v31 = vrot.slane %v8134_v21, 9  ;;  %v3765_v32 = vrot.slane %v8136_v22, 5  ;;  %v3222_v37 = vcombine.low %v9886_v40, %v9890_v41  ;;  %v8127_v42 = vld [vmem:[%s10935_s5 + $0x204] ss:$8 sps:$4 sm:$0xff]  }
 0x340   : > { %3689 = vmatpush1.bf16.msra.mxu1 %v8069_v30  ;;  %v3761_v30 = vrot.slane %v8133_v20, 5  ;;  %v9982_v34 = vsel %vm8943_vm5, %v6868_v23, %v3769_v24  ;;  %v9994_v43 = vsel %vm8943_vm5, %v6865_v26, %v3757_v27  ;;  %v3220_v38 = vcombine.low %v9878_v46, %v9882_v39  ;;  %v8125_v40 = vld [vmem:[%s10935_s5 + $0x200] ss:$8 sps:$4 sm:$0xff]   ;;  %v8140_v46 = vld [vmem:[%s10935_s5 + $0x210] ss:$8 sps:$4 sm:$0xff]  }
 0x341   : > { %3690 = vmatprep.subr.bf16.mxu1 %v8074_v36  ;;  %v3229_v52 = vpack.c.bf16 %v3223_v50, %v3221_v49  ;;  %v8122_v36 = vld [vmem:[%s10935_s5 + $0xf0] ss:$8 sps:$4 sm:$0xff]   ;;  %v10002_v45 = vsel %vm8943_vm5, %v6867_v31, %v3765_v32  ;;  %v8142_v49 = vld [vmem:[%s10935_s5 + $0x214] ss:$8 sps:$4 sm:$0xff]   ;;  %v8145_v39 = vld [vmem:[%s10935_s5 + $0x224] ss:$8 sps:$4 sm:$0xff]  }
 0x342   : > { %v9998_v44 = vsel %vm8943_vm5, %v6866_v29, %v3761_v30  ;;  %v3774_v47 = vcombine.high %v10002_v45, %v9982_v34  ;;  %v8190_v14 = vld [vmem:[#allocation2 + $0x44] ss:$8 sps:$4 sm:$0x88]   ;;  %v8193_v15 = vld [vmem:[#allocation2 + $0x70] ss:$8 sps:$4 sm:$0x77]  }
 0x343   : > { %3720 = vmatprep.mubr.bf16.mxu1 %v3229_v52  ;;  %v3772_v41 = vcombine.high %v9994_v43, %v9998_v44  ;;  %v8148_v52 = vld [vmem:[%s10935_s5 + $0x234] ss:$8 sps:$4 sm:$0xff]   ;;  %v8176_v17 = vld [vmem:[%s10935_s5 + $0x2d0] ss:$8 sps:$4 sm:$0xff]   ;;  %v8181_v18 = vld [vmem:[%s10935_s5 + $0x2e4] ss:$8 sps:$4 sm:$0xff]  }
 0x344   : > { %3691 = vmatpush1.bf16.msra.mxu1 %v8072_v48  ;;  %v3228_v48 = vpack.c.bf16 %v3222_v37, %v3220_v38  ;;  %v8189_v19 = vld [vmem:[#allocation2 + $0x30] ss:$8 sps:$4 sm:$0x77]   ;;  %v4071_v22 = vrot.slane %v8193_v15, 7  ;;  %v8184_v26 = vld [vmem:[%s10935_s5 + $0x2f4] ss:$8 sps:$4 sm:$0xff]   ;;  %v3773_v37 = vcombine.low %v10002_v45, %v9982_v34 }
 0x345   : > { %3692 = vmatprep.subr.bf16.mxu1 %v8085_v51  ;;  %v3780_v50 = vpack.c.bf16 %v3774_v47, %v3772_v41  ;;  %v8143_v51 = vld [vmem:[%s10935_s5 + $0x220] ss:$8 sps:$4 sm:$0xff]   ;;  %v8191_v20 = vld [vmem:[#allocation2 + $0x50] ss:$8 sps:$4 sm:$0x77]   ;;  %v6934_v29 = vrot.slane %v8190_v14, 11  ;;  %v3771_v41 = vcombine.low %v9994_v43, %v9998_v44 }
 0x346   : > { %v4067_v30 = vrot.slane %v8191_v20, 7  ;;  %v8185_v34 = vld [vmem:[%s10935_s5 + $0x300] ss:$8 sps:$4 sm:$0xff]   ;;  %v8196_v43 = vld [vmem:[%s10935_s5 + $0x310] ss:$8 sps:$4 sm:$0xff]  }
 0x347   : > { %v8201_v44 = vld [vmem:[%s10935_s5 + $0x324] ss:$8 sps:$4 sm:$0xff]   ;;  %v4334_v14 = vld [vmem:[#allocation2 + $0x98] sm:$0xf] }
 0x348   : > { %3693 = vmatpush1.bf16.msra.mxu1 %v8083_v54  ;;  %v8146_v54 = vld [vmem:[%s10935_s5 + $0x230] ss:$8 sps:$4 sm:$0xff]   ;;  %v10122_v38 = vsel %vm8828_vm2, %v6934_v29, %v4067_v30  ;;  %v8247_v29 = vld [vmem:[%s10935_s5 + $0x420] ss:$8 sps:$4 sm:$0xff]   ;;  %v8252_v30 = vld [vmem:[%s10935_s5 + $0x434] ss:$8 sps:$4 sm:$0xff]  }
 0x349   : > { %3694 = vmatprep.subr.bf16.mxu1 %v8088_v55  ;;  %v8151_v55 = vld [vmem:[%s10935_s5 + $0x244] ss:$8 sps:$4 sm:$0xff]   ;;  %v8238_v15 = vld [vmem:[%s10935_s5 + $0x3f0] ss:$8 sps:$4 sm:$0xff]  }
 0x34c   : > { %3695 = vmatpush1.bf16.msra.mxu1 %v8086_v56  ;;  %v8149_v56 = vld [vmem:[%s10935_s5 + $0x240] ss:$8 sps:$4 sm:$0xff]  }
 0x34d   : > { %3696 = vmatprep.subr.bf16.mxu1 %v8091_v58  ;;  %v8154_v58 = vld [vmem:[%s10935_s5 + $0x254] ss:$8 sps:$4 sm:$0xff]  }
 0x350   : > { %3697 = vmatpush1.bf16.msra.mxu1 %v8089_v59  ;;  %v8152_v59 = vld [vmem:[%s10935_s5 + $0x250] ss:$8 sps:$4 sm:$0xff]  }
 0x351   : > { %3698 = vmatprep.subr.bf16.mxu1 %v8094_v60  ;;  %v8157_v60 = vld [vmem:[%s10935_s5 + $0x264] ss:$8 sps:$4 sm:$0xff]  }
 0x354   : > { %3699 = vmatpush1.bf16.msra.mxu1 %v8092_v61  ;;  %v8155_v61 = vld [vmem:[%s10935_s5 + $0x260] ss:$8 sps:$4 sm:$0xff]  }
 0x355   : > { %3700 = vmatprep.subr.bf16.mxu1 %v8097_v62  ;;  %v8160_v62 = vld [vmem:[%s10935_s5 + $0x274] ss:$8 sps:$4 sm:$0xff]  }
 0x358   : > { %3701 = vmatpush1.bf16.msra.mxu1 %v8095_v63  ;;  %v8158_v63 = vld [vmem:[%s10935_s5 + $0x270] ss:$8 sps:$4 sm:$0xff]  }
 0x359   : > { %3702 = vmatprep.subr.bf16.mxu1 %v8100_v6  ;;  %v8163_v6 = vld [vmem:[%s10935_s5 + $0x284] ss:$8 sps:$4 sm:$0xff]  }
 0x35c   : > { %3703 = vmatpush1.bf16.msra.mxu1 %v8098_v9  ;;  %v8161_v9 = vld [vmem:[%s10935_s5 + $0x280] ss:$8 sps:$4 sm:$0xff]  }
 0x35d   : > { %3704 = vmatprep.subr.bf16.mxu1 %v8103_v10  ;;  %v8166_v10 = vld [vmem:[%s10935_s5 + $0x294] ss:$8 sps:$4 sm:$0xff]  }
 0x360   : > { %3705 = vmatpush1.bf16.msra.mxu1 %v8101_v11  ;;  %v8164_v11 = vld [vmem:[%s10935_s5 + $0x290] ss:$8 sps:$4 sm:$0xff]  }
 0x361   : > { %3706 = vmatprep.subr.bf16.mxu1 %v8106_v12  ;;  %v8169_v12 = vld [vmem:[%s10935_s5 + $0x2a4] ss:$8 sps:$4 sm:$0xff]  }
 0x364   : > { %3707 = vmatpush1.bf16.msra.mxu1 %v8104_v13  ;;  %v8167_v13 = vld [vmem:[%s10935_s5 + $0x2a0] ss:$8 sps:$4 sm:$0xff]  }
 0x365   : > { %3708 = vmatprep.subr.bf16.mxu1 %v8109_v0  ;;  %v8172_v0 = vld [vmem:[%s10935_s5 + $0x2b4] ss:$8 sps:$4 sm:$0xff]  }
 0x368   : > { %3709 = vmatpush1.bf16.msra.mxu1 %v8107_v1  ;;  %v8170_v1 = vld [vmem:[%s10935_s5 + $0x2b0] ss:$8 sps:$4 sm:$0xff]  }
 0x369   : > { %3710 = vmatprep.subr.bf16.mxu1 %v8112_v2  ;;  %v8175_v2 = vld [vmem:[%s10935_s5 + $0x2c4] ss:$8 sps:$4 sm:$0xff]  }
 0x36c   : > { %3711 = vmatpush1.bf16.msra.mxu1 %v8110_v3  ;;  %v8173_v3 = vld [vmem:[%s10935_s5 + $0x2c0] ss:$8 sps:$4 sm:$0xff]  }
 0x36d   : > { %3712 = vmatprep.subr.bf16.mxu1 %v8115_v4  ;;  %v8178_v4 = vld [vmem:[%s10935_s5 + $0x2d4] ss:$8 sps:$4 sm:$0xff]  }
 0x370   : > { %3713 = vmatpush1.bf16.msra.mxu1 %v8113_v5  ;;  %v8192_v5 = vld [vmem:[#allocation2 + $0x64] ss:$8 sps:$4 sm:$0x88]  }
 0x371   : > { %3714 = vmatprep.subr.bf16.mxu1 %v8118_v7  ;;  %v8194_v7 = vld [vmem:[#allocation2 + $0x84] ss:$8 sps:$4 sm:$0x88]   ;;  %v6935_v21 = vrot.slane %v8192_v5, 11  ;;  %v8235_v5 = vld [vmem:[%s10935_s5 + $0x3e0] ss:$8 sps:$4 sm:$0xff]  }
 0x372   : > { %v6936_v23 = vrot.slane %v8194_v7, 11  ;;  %v8240_v7 = vld [vmem:[%s10935_s5 + $0x3f4] ss:$8 sps:$4 sm:$0xff]  }
 0x373   : > { %v10102_v31 = vsel %vm8828_vm2, %v6935_v21, %v4071_v22  ;;  %v8241_v22 = vld [vmem:[%s10935_s5 + $0x400] ss:$8 sps:$4 sm:$0xff]  }
 0x374   : > { %3715 = vmatpush1.bf16.msra.mxu1 %v8116_v8  ;;  %v8188_v8 = vld [vmem:[#allocation2 + $0x24] ss:$8 sps:$4 sm:$0x88]  }
 0x375   : > { %3716 = vmatprep.subr.bf16.mxu1 %v8121_v16  ;;  %v8195_v16 = vld [vmem:[#allocation2 + $0x90] ss:$8 sps:$4 sm:$0x77]   ;;  %v6933_v27 = vrot.slane %v8188_v8, 11 }
 0x376   : > { %v4075_v24 = vrot.slane %v8195_v16, 7  ;;  %v4332_v8 = vld [vmem:[#allocation2 + $0x78] sm:$0xf] }
 0x377   : > { %v7004_v20 = vcombine.low %v4332_v8, %v4334_v14 }
 0x378   : > { %3717 = vmatpush1.bf16.msra.mxu1 %v8119_v25  ;;  %v8179_v25 = vld [vmem:[%s10935_s5 + $0x2e0] ss:$8 sps:$4 sm:$0xff]   ;;  %v10106_v32 = vsel %vm8828_vm2, %v6936_v23, %v4075_v24 }
 0x379   : > { %3718 = vmatprep.subr.bf16.mxu1 %v8124_v28  ;;  %v4063_v28 = vrot.slane %v8189_v19, 7  ;;  %v4079_v16 = vcombine.low %v10102_v31, %v10106_v32  ;;  %v4330_v19 = vld [vmem:[#allocation2 + $0x58] sm:$0xf] }
 0x37b   : > { %v10118_v47 = vsel %vm8828_vm2, %v6933_v27, %v4063_v28  ;;  %v8244_v27 = vld [vmem:[%s10935_s5 + $0x410] ss:$8 sps:$4 sm:$0xff]   ;;  %v8249_v28 = vld [vmem:[%s10935_s5 + $0x424] ss:$8 sps:$4 sm:$0xff]  }
 0x37c   : > { %3719 = vmatpush1.bf16.msra.mxu1 %v8122_v36  ;;  %v8182_v36 = vld [vmem:[%s10935_s5 + $0x2f0] ss:$8 sps:$4 sm:$0xff]   ;;  %v4078_v45 = vcombine.high %v10118_v47, %v10122_v38  ;;  %v4077_v21 = vcombine.low %v10118_v47, %v10122_v38  ;;  %v8261_v47 = vld [vmem:[%s10935_s5 + $0x464] ss:$8 sps:$4 sm:$0xff]   ;;  %v8259_v38 = vld [vmem:[%s10935_s5 + $0x460] ss:$8 sps:$4 sm:$0xff]  }
 0x37d   : > { %3974 = vmatprep.subr.bf16.mxu1 %v8127_v42  ;;  %v8187_v42 = vld [vmem:[%s10935_s5 + $0x304] ss:$8 sps:$4 sm:$0xff]  }
 0x37e   : > { %v4085_v24 = vpack.c.bf16 %v4079_v16, %v4077_v21  ;;  %v4327_v16 = vld [vmem:[#allocation2 + $0x30] sm:$0xf] }
 0x37f   : > { %3721 = vmatmul.mubr.bf16.vlgmr.msra.gmra.mrb[0].mxu1 %v3228_v48  ;;  %v3779_v48 = vpack.c.bf16 %v3773_v37, %v3771_v41  ;;  %v8258_v37 = vld [vmem:[%s10935_s5 + $0x454] ss:$8 sps:$4 sm:$0xff]   ;;  %v8262_v41 = vld [vmem:[%s10935_s5 + $0x470] ss:$8 sps:$4 sm:$0xff]  }
 0x380   : > { %3975 = vmatpush1.bf16.msra.mxu1 %v8125_v40  ;;  %4006 = vmatprep.mubr.bf16.mxu1 %v3780_v50  ;;  %v4080_v40 = vcombine.high %v10102_v31, %v10106_v32  ;;  %v8250_v31 = vld [vmem:[%s10935_s5 + $0x430] ss:$8 sps:$4 sm:$0xff]   ;;  %v8255_v32 = vld [vmem:[%s10935_s5 + $0x444] ss:$8 sps:$4 sm:$0xff]  }
 0x381   : > { %3976 = vmatprep.subr.bf16.mxu1 %v8142_v49  ;;  %v8198_v49 = vld [vmem:[%s10935_s5 + $0x314] ss:$8 sps:$4 sm:$0xff]  }
 0x382   : > { %v4086_v50 = vpack.c.bf16 %v4080_v40, %v4078_v45  ;;  %v8264_v40 = vld [vmem:[%s10935_s5 + $0x474] ss:$8 sps:$4 sm:$0xff]   ;;  %v8265_v45 = vld [vmem:[%s10935_s5 + $0x480] ss:$8 sps:$4 sm:$0xff]  }
 0x384   : > { %3977 = vmatpush1.bf16.msra.mxu1 %v8140_v46  ;;  %v8199_v46 = vld [vmem:[%s10935_s5 + $0x320] ss:$8 sps:$4 sm:$0xff]  }
 0x385   : > { %3978 = vmatprep.subr.bf16.mxu1 %v8145_v39  ;;  %v8204_v39 = vld [vmem:[%s10935_s5 + $0x334] ss:$8 sps:$4 sm:$0xff]  }
 0x388   : > { %3979 = vmatpush1.bf16.msra.mxu1 %v8143_v51  ;;  %v8202_v51 = vld [vmem:[%s10935_s5 + $0x330] ss:$8 sps:$4 sm:$0xff]  }
 0x389   : > { %3980 = vmatprep.subr.bf16.mxu1 %v8148_v52  ;;  %v8207_v52 = vld [vmem:[%s10935_s5 + $0x344] ss:$8 sps:$4 sm:$0xff]  }
 0x38c   : > { %3981 = vmatpush1.bf16.msra.mxu1 %v8146_v54  ;;  %v8205_v54 = vld [vmem:[%s10935_s5 + $0x340] ss:$8 sps:$4 sm:$0xff]  }
 0x38d   : > { %3982 = vmatprep.subr.bf16.mxu1 %v8151_v55  ;;  %v8210_v55 = vld [vmem:[%s10935_s5 + $0x354] ss:$8 sps:$4 sm:$0xff]  }
 0x390   : > { %3983 = vmatpush1.bf16.msra.mxu1 %v8149_v56  ;;  %v8208_v56 = vld [vmem:[%s10935_s5 + $0x350] ss:$8 sps:$4 sm:$0xff]  }
 0x391   : > { %3984 = vmatprep.subr.bf16.mxu1 %v8154_v58  ;;  %v8213_v58 = vld [vmem:[%s10935_s5 + $0x364] ss:$8 sps:$4 sm:$0xff]  }
 0x394   : > { %3985 = vmatpush1.bf16.msra.mxu1 %v8152_v59  ;;  %v8211_v59 = vld [vmem:[%s10935_s5 + $0x360] ss:$8 sps:$4 sm:$0xff]  }
 0x395   : > { %3986 = vmatprep.subr.bf16.mxu1 %v8157_v60  ;;  %v8216_v60 = vld [vmem:[%s10935_s5 + $0x374] ss:$8 sps:$4 sm:$0xff]  }
 0x398   : > { %3987 = vmatpush1.bf16.msra.mxu1 %v8155_v61  ;;  %v8214_v61 = vld [vmem:[%s10935_s5 + $0x370] ss:$8 sps:$4 sm:$0xff]  }
 0x399   : > { %3988 = vmatprep.subr.bf16.mxu1 %v8160_v62  ;;  %v8219_v62 = vld [vmem:[%s10935_s5 + $0x384] ss:$8 sps:$4 sm:$0xff]  }
 0x39c   : > { %3989 = vmatpush1.bf16.msra.mxu1 %v8158_v63  ;;  %v8217_v63 = vld [vmem:[%s10935_s5 + $0x380] ss:$8 sps:$4 sm:$0xff]  }
 0x39d   : > { %3990 = vmatprep.subr.bf16.mxu1 %v8163_v6  ;;  %v8222_v6 = vld [vmem:[%s10935_s5 + $0x394] ss:$8 sps:$4 sm:$0xff]  }
 0x3a0   : > { %3991 = vmatpush1.bf16.msra.mxu1 %v8161_v9  ;;  %v8220_v9 = vld [vmem:[%s10935_s5 + $0x390] ss:$8 sps:$4 sm:$0xff]  }
 0x3a1   : > { %3992 = vmatprep.subr.bf16.mxu1 %v8166_v10  ;;  %v8225_v10 = vld [vmem:[%s10935_s5 + $0x3a4] ss:$8 sps:$4 sm:$0xff]  }
 0x3a4   : > { %3993 = vmatpush1.bf16.msra.mxu1 %v8164_v11  ;;  %v8223_v11 = vld [vmem:[%s10935_s5 + $0x3a0] ss:$8 sps:$4 sm:$0xff]  }
 0x3a5   : > { %3994 = vmatprep.subr.bf16.mxu1 %v8169_v12  ;;  %v8228_v12 = vld [vmem:[%s10935_s5 + $0x3b4] ss:$8 sps:$4 sm:$0xff]  }
 0x3a8   : > { %3995 = vmatpush1.bf16.msra.mxu1 %v8167_v13  ;;  %v8226_v13 = vld [vmem:[%s10935_s5 + $0x3b0] ss:$8 sps:$4 sm:$0xff]  }
 0x3a9   : > { %3996 = vmatprep.subr.bf16.mxu1 %v8172_v0  ;;  %v8231_v0 = vld [vmem:[%s10935_s5 + $0x3c4] ss:$8 sps:$4 sm:$0xff]  }
 0x3ac   : > { %3997 = vmatpush1.bf16.msra.mxu1 %v8170_v1  ;;  %v8229_v1 = vld [vmem:[%s10935_s5 + $0x3c0] ss:$8 sps:$4 sm:$0xff]  }
 0x3ad   : > { %3998 = vmatprep.subr.bf16.mxu1 %v8175_v2  ;;  %v8234_v2 = vld [vmem:[%s10935_s5 + $0x3d4] ss:$8 sps:$4 sm:$0xff]  }
 0x3b0   : > { %3999 = vmatpush1.bf16.msra.mxu1 %v8173_v3  ;;  %v8232_v3 = vld [vmem:[%s10935_s5 + $0x3d0] ss:$8 sps:$4 sm:$0xff]  }
 0x3b1   : > { %4000 = vmatprep.subr.bf16.mxu1 %v8178_v4  ;;  %v8237_v4 = vld [vmem:[%s10935_s5 + $0x3e4] ss:$8 sps:$4 sm:$0xff]  }
 0x3b4   : > { %4001 = vmatpush1.bf16.msra.mxu1 %v8176_v17  ;;  %v8243_v17 = vld [vmem:[%s10935_s5 + $0x404] ss:$8 sps:$4 sm:$0xff]  }
 0x3b5   : > { %4002 = vmatprep.subr.bf16.mxu1 %v8181_v18  ;;  %v4328_v18 = vld [vmem:[#allocation2 + $0x38] sm:$0xf] }
 0x3b6   : > { %v7002_v23 = vcombine.low %v4328_v18, %v4330_v19  ;;  %v8291_v19 = vld [vmem:[%s10935_s5 + $0x504] ss:$8 sps:$4 sm:$0xff]  }
 0x3b8   : > { %4003 = vmatpush1.bf16.msra.mxu1 %v8179_v25  ;;  %v8246_v25 = vld [vmem:[%s10935_s5 + $0x414] ss:$8 sps:$4 sm:$0xff]  }
 0x3b9   : > { %4004 = vmatprep.subr.bf16.mxu1 %v8184_v26  ;;  %v4356_v26 = vpack.c.bf16 %v7004_v20, %v7002_v23 }
 0x3bc   : > { %4005 = vmatpush1.bf16.msra.mxu1 %v8182_v36  ;;  %v8253_v36 = vld [vmem:[%s10935_s5 + $0x440] ss:$8 sps:$4 sm:$0xff]  }
 0x3bd   : > { %4280 = vmatprep.subr.bf16.mxu1 %v8187_v42  ;;  %v8256_v42 = vld [vmem:[%s10935_s5 + $0x450] ss:$8 sps:$4 sm:$0xff]  }
 0x3bf   : > { %4007 = vmatmul.mubr.bf16.vlgmr.msra.gmra.mrb[0].mxu1 %v3779_v48  ;;  %v8270_v48 = vld [vmem:[%s10935_s5 + $0x494] ss:$8 sps:$4 sm:$0xff]  }
 0x3c0   : > { %4281 = vmatpush1.bf16.msra.mxu1 %v8185_v34  ;;  %4312 = vmatprep.mubr.bf16.mxu1 %v4086_v50  ;;  %v8267_v34 = vld [vmem:[%s10935_s5 + $0x484] ss:$8 sps:$4 sm:$0xff]  }
 0x3c1   : > { %4282 = vmatprep.subr.bf16.mxu1 %v8198_v49  ;;  %v8268_v49 = vld [vmem:[%s10935_s5 + $0x490] ss:$8 sps:$4 sm:$0xff]   ;;  %v8273_v50 = vld [vmem:[%s10935_s5 + $0x4a4] ss:$8 sps:$4 sm:$0xff]  }
 0x3c4   : > { %4283 = vmatpush1.bf16.msra.mxu1 %v8196_v43  ;;  %v8271_v43 = vld [vmem:[%s10935_s5 + $0x4a0] ss:$8 sps:$4 sm:$0xff]  }
 0x3c5   : > { %4284 = vmatprep.subr.bf16.mxu1 %v8201_v44  ;;  %v8276_v44 = vld [vmem:[%s10935_s5 + $0x4b4] ss:$8 sps:$4 sm:$0xff]  }
 0x3c8   : > { %4285 = vmatpush1.bf16.msra.mxu1 %v8199_v46  ;;  %v8274_v46 = vld [vmem:[%s10935_s5 + $0x4b0] ss:$8 sps:$4 sm:$0xff]  }
 0x3c9   : > { %4286 = vmatprep.subr.bf16.mxu1 %v8204_v39  ;;  %v8279_v39 = vld [vmem:[%s10935_s5 + $0x4c4] ss:$8 sps:$4 sm:$0xff]  }
 0x3cc   : > { %4287 = vmatpush1.bf16.msra.mxu1 %v8202_v51  ;;  %v8277_v51 = vld [vmem:[%s10935_s5 + $0x4c0] ss:$8 sps:$4 sm:$0xff]  }
 0x3cd   : > { %4288 = vmatprep.subr.bf16.mxu1 %v8207_v52  ;;  %v8282_v52 = vld [vmem:[%s10935_s5 + $0x4d4] ss:$8 sps:$4 sm:$0xff]  }
 0x3d0   : > { %4289 = vmatpush1.bf16.msra.mxu1 %v8205_v54  ;;  %v8298_v54 = vld [vmem:[#allocation2 + $0x70] ss:$8 sps:$4 sm:$0xee]  }
 0x3d1   : > { %4290 = vmatprep.subr.bf16.mxu1 %v8210_v55  ;;  %v8300_v55 = vld [vmem:[#allocation2 + $0x74] ss:$8 sps:$4 sm:$0x11]  }
 0x3d4   : > { %4291 = vmatpush1.bf16.msra.mxu1 %v8208_v56  ;;  %v8292_v56 = vld [vmem:[#allocation2 + $0x30] ss:$8 sps:$4 sm:$0xee]  }
 0x3d5   : > { %4292 = vmatprep.subr.bf16.mxu1 %v8213_v58  ;;  %v8294_v58 = vld [vmem:[#allocation2 + $0x34] ss:$8 sps:$4 sm:$0x11]  }
 0x3d8   : > { %4293 = vmatpush1.bf16.msra.mxu1 %v8211_v59  ;;  %v8301_v59 = vld [vmem:[#allocation2 + $0x90] ss:$8 sps:$4 sm:$0xee]  }
 0x3d9   : > { %4294 = vmatprep.subr.bf16.mxu1 %v8216_v60  ;;  %v8303_v60 = vld [vmem:[#allocation2 + $0x94] ss:$8 sps:$4 sm:$0x11]  }
 0x3dc   : > { %4295 = vmatpush1.bf16.msra.mxu1 %v8214_v61  ;;  %v8280_v61 = vld [vmem:[%s10935_s5 + $0x4d0] ss:$8 sps:$4 sm:$0xff]  }
 0x3dd   : > { %4296 = vmatprep.subr.bf16.mxu1 %v8219_v62  ;;  %v8295_v62 = vld [vmem:[#allocation2 + $0x50] ss:$8 sps:$4 sm:$0xee]  }
 0x3e0   : > { %4297 = vmatpush1.bf16.msra.mxu1 %v8217_v63  ;;  %v8285_v63 = vld [vmem:[%s10935_s5 + $0x4e4] ss:$8 sps:$4 sm:$0xff]  }
 0x3e1   : > { %4298 = vmatprep.subr.bf16.mxu1 %v8222_v6  ;;  %v8297_v6 = vld [vmem:[#allocation2 + $0x54] ss:$8 sps:$4 sm:$0x11]  }
 0x3e4   : > { %4299 = vmatpush1.bf16.msra.mxu1 %v8220_v9  ;;  %v7071_v9 = vrot.slane %v8298_v54, 9  ;;  %v8337_v54 = vld [vmem:[%s10935_s5 + $0x5c0] ss:$8 sps:$4 sm:$0xff]  }
 0x3e5   : > { %4300 = vmatprep.subr.bf16.mxu1 %v8225_v10  ;;  %v4631_v10 = vrot.slane %v8300_v55, 5  ;;  %v8354_v55 = vld [vmem:[#allocation2 + $0x64] ss:$8 sps:$4 sm:$0x88]  }
 0x3e7   : > { %v10322_v8 = vsel %vm8943_vm5, %v7071_v9, %v4631_v10  ;;  %v8345_v9 = vld [vmem:[%s10935_s5 + $0x5e4] ss:$8 sps:$4 sm:$0xff]   ;;  %v8353_v10 = vld [vmem:[#allocation2 + $0x50] ss:$8 sps:$4 sm:$0x77]  }
 0x3e8   : > { %4301 = vmatpush1.bf16.msra.mxu1 %v8223_v11  ;;  %v7072_v11 = vrot.slane %v8301_v59, 9  ;;  %v8358_v59 = vld [vmem:[#allocation2 + $0xa4] ss:$8 sps:$4 sm:$0x88]  }
 0x3e9   : > { %4302 = vmatprep.subr.bf16.mxu1 %v8228_v12  ;;  %v4635_v12 = vrot.slane %v8303_v60, 5  ;;  %v8359_v60 = vld [vmem:[#allocation2 + $0xb0] ss:$8 sps:$4 sm:$0x77]  }
 0x3eb   : > { %v10326_v14 = vsel %vm8943_vm5, %v7072_v11, %v4635_v12  ;;  %v7138_v11 = vrot.slane %v8354_v55, 11  ;;  %v8399_v55 = vld [vmem:[%s10935_s5 + $0x6e0] ss:$8 sps:$4 sm:$0xff]  }
 0x3ec   : > { %4303 = vmatpush1.bf16.msra.mxu1 %v8226_v13  ;;  %v8283_v13 = vld [vmem:[%s10935_s5 + $0x4e0] ss:$8 sps:$4 sm:$0xff]  }
 0x3ed   : > { %4304 = vmatprep.subr.bf16.mxu1 %v8231_v0  ;;  %v8288_v0 = vld [vmem:[%s10935_s5 + $0x4f4] ss:$8 sps:$4 sm:$0xff]  }
 0x3f0   : > { %4305 = vmatpush1.bf16.msra.mxu1 %v8229_v1  ;;  %v7069_v1 = vrot.slane %v8292_v56, 9  ;;  %v8342_v56 = vld [vmem:[%s10935_s5 + $0x5d4] ss:$8 sps:$4 sm:$0xff]  }
 0x3f1   : > { %4306 = vmatprep.subr.bf16.mxu1 %v8234_v2  ;;  %v4623_v2 = vrot.slane %v8294_v58, 5  ;;  %v8356_v58 = vld [vmem:[#allocation2 + $0x84] ss:$8 sps:$4 sm:$0x88]  }
 0x3f2   : > { %v7139_v12 = vrot.slane %v8356_v58, 11  ;;  %v5196_v58 = vld [vmem:[#allocation2 + $0x78] sm:$0xf] }
 0x3f3   : > { %v10336_v20 = vsel %vm8943_vm5, %v7069_v1, %v4623_v2  ;;  %v7140_v1 = vrot.slane %v8358_v59, 11  ;;  %v4941_v2 = vrot.slane %v8359_v60, 7  ;;  %v5198_v59 = vld [vmem:[#allocation2 + $0x98] sm:$0xf] }
 0x3f4   : > { %4307 = vmatpush1.bf16.msra.mxu1 %v8232_v3  ;;  %v7070_v3 = vrot.slane %v8295_v62, 9  ;;  %v8357_v62 = vld [vmem:[#allocation2 + $0x90] ss:$8 sps:$4 sm:$0x77]  }
 0x3f5   : > { %4308 = vmatprep.subr.bf16.mxu1 %v8237_v4  ;;  %v4627_v4 = vrot.slane %v8297_v6, 5  ;;  %v8352_v6 = vld [vmem:[#allocation2 + $0x44] ss:$8 sps:$4 sm:$0x88]   ;;  %v5200_v60 = vld [vmem:[#allocation2 + $0xb8] sm:$0xf] }
 0x3f7   : > { %v10340_v21 = vsel %vm8943_vm5, %v7070_v3, %v4627_v4  ;;  %v8343_v3 = vld [vmem:[%s10935_s5 + $0x5e0] ss:$8 sps:$4 sm:$0xff]   ;;  %v8348_v4 = vld [vmem:[%s10935_s5 + $0x5f4] ss:$8 sps:$4 sm:$0xff]  }
 0x3f8   : > { %4309 = vmatpush1.bf16.msra.mxu1 %v8235_v5  ;;  %v4331_v5 = vld [vmem:[#allocation2 + $0x70] sm:$0xf] }
 0x3f9   : > { %4310 = vmatprep.subr.bf16.mxu1 %v8240_v7  ;;  %v4333_v7 = vld [vmem:[#allocation2 + $0x90] sm:$0xf] }
 0x3fa   : > { %v7003_v18 = vcombine.low %v4331_v5, %v4333_v7  ;;  %v7137_v5 = vrot.slane %v8352_v6, 11  ;;  %v4929_v7 = vrot.slane %v8353_v10, 7  ;;  %v8407_v6 = vld [vmem:[%s10935_s5 + $0x704] ss:$8 sps:$4 sm:$0xff]  }
 0x3fc   : > { %4311 = vmatpush1.bf16.msra.mxu1 %v8238_v15  ;;  %v8286_v15 = vld [vmem:[%s10935_s5 + $0x4f0] ss:$8 sps:$4 sm:$0xff]  }
 0x3fd   : > { %4550 = vmatprep.subr.bf16.mxu1 %v8243_v17  ;;  %v4329_v17 = vld [vmem:[#allocation2 + $0x50] sm:$0xf] }
 0x3fe   : > { %v7001_v23 = vcombine.low %v4327_v16, %v4329_v17  ;;  %v10446_v17 = vsel %vm8828_vm2, %v7140_v1, %v4941_v2  ;;  %v8513_v2 = vld [vmem:[%s10939_s9 + $0x40] sm:$0xff]  }
 0x3ff   : > { %4313 = vmatmul.mubr.bf16.vlgmr.msra.gmra.mrb[0].mxu1 %v4085_v24  ;;  %v8289_v24 = vld [vmem:[%s10935_s5 + $0x500] ss:$8 sps:$4 sm:$0xff]   ;;  %7369 = vmatprep.subr.bf16.mxu0 %v8513_v2  ;;  %v8470_v2 = vld [vmem:[%s10935_s5 + $0x814] ss:$8 sps:$4 sm:$0xff]  }
 0x400   : > { %4551 = vmatpush1.bf16.msra.mxu1 %v8241_v22  ;;  %4582 = vmatprep.mubr.bf16.mxu1 %v4356_v26  ;;  %v4640_v22 = vcombine.high %v10322_v8, %v10326_v14  ;;  %v4355_v26 = vpack.c.bf16 %v7003_v18, %v7001_v23  ;;  %v8346_v18 = vld [vmem:[%s10935_s5 + $0x5f0] ss:$8 sps:$4 sm:$0xff]   ;;  %v10458_v23 = vsel %vm8828_vm2, %v7137_v5, %v4929_v7  ;;  %v8411_v5 = vld [vmem:[%s10935_s5 + $0x720] ss:$8 sps:$4 sm:$0xff]   ;;  %v8416_v7 = vld [vmem:[%s10935_s5 + $0x734] ss:$8 sps:$4 sm:$0xff]  }
 0x401   : > { %4552 = vmatprep.subr.bf16.mxu1 %v8246_v25  ;;  %v4638_v25 = vcombine.high %v10336_v20, %v10340_v21 }
 0x404   : > { %4553 = vmatpush1.bf16.msra.mxu1 %v8244_v27  ;;  %v8306_v27 = vld [vmem:[%s10935_s5 + $0x514] ss:$8 sps:$4 sm:$0xff]  }
 0x405   : > { %4554 = vmatprep.subr.bf16.mxu1 %v8249_v28  ;;  %v4646_v28 = vpack.c.bf16 %v4640_v22, %v4638_v25  ;;  %v8351_v22 = vld [vmem:[%s10935_s5 + $0x604] ss:$8 sps:$4 sm:$0xff]  }
 0x408   : > { %4555 = vmatpush1.bf16.msra.mxu1 %v8247_v29  ;;  %v8304_v29 = vld [vmem:[%s10935_s5 + $0x510] ss:$8 sps:$4 sm:$0xff]  }
 0x409   : > { %4556 = vmatprep.subr.bf16.mxu1 %v8252_v30  ;;  %v8309_v30 = vld [vmem:[%s10935_s5 + $0x524] ss:$8 sps:$4 sm:$0xff]  }
 0x40c   : > { %4557 = vmatpush1.bf16.msra.mxu1 %v8250_v31  ;;  %v8307_v31 = vld [vmem:[%s10935_s5 + $0x520] ss:$8 sps:$4 sm:$0xff]  }
 0x40d   : > { %4558 = vmatprep.subr.bf16.mxu1 %v8255_v32  ;;  %v8312_v32 = vld [vmem:[%s10935_s5 + $0x534] ss:$8 sps:$4 sm:$0xff]  }
 0x410   : > { %4559 = vmatpush1.bf16.msra.mxu1 %v8253_v36  ;;  %v8310_v36 = vld [vmem:[%s10935_s5 + $0x530] ss:$8 sps:$4 sm:$0xff]  }
 0x411   : > { %4560 = vmatprep.subr.bf16.mxu1 %v8258_v37  ;;  %v8315_v37 = vld [vmem:[%s10935_s5 + $0x544] ss:$8 sps:$4 sm:$0xff]  }
 0x414   : > { %4561 = vmatpush1.bf16.msra.mxu1 %v8256_v42  ;;  %v8313_v42 = vld [vmem:[%s10935_s5 + $0x540] ss:$8 sps:$4 sm:$0xff]  }
 0x415   : > { %4562 = vmatprep.subr.bf16.mxu1 %v8261_v47  ;;  %v8318_v47 = vld [vmem:[%s10935_s5 + $0x554] ss:$8 sps:$4 sm:$0xff]  }
 0x418   : > { %4563 = vmatpush1.bf16.msra.mxu1 %v8259_v38  ;;  %v8316_v38 = vld [vmem:[%s10935_s5 + $0x550] ss:$8 sps:$4 sm:$0xff]  }
 0x419   : > { %4564 = vmatprep.subr.bf16.mxu1 %v8264_v40  ;;  %v8321_v40 = vld [vmem:[%s10935_s5 + $0x564] ss:$8 sps:$4 sm:$0xff]  }
 0x41c   : > { %4565 = vmatpush1.bf16.msra.mxu1 %v8262_v41  ;;  %v8319_v41 = vld [vmem:[%s10935_s5 + $0x560] ss:$8 sps:$4 sm:$0xff]  }
 0x41d   : > { %4566 = vmatprep.subr.bf16.mxu1 %v8267_v34  ;;  %v8324_v34 = vld [vmem:[%s10935_s5 + $0x574] ss:$8 sps:$4 sm:$0xff]  }
 0x420   : > { %4567 = vmatpush1.bf16.msra.mxu1 %v8265_v45  ;;  %v8322_v45 = vld [vmem:[%s10935_s5 + $0x570] ss:$8 sps:$4 sm:$0xff]  }
 0x421   : > { %4568 = vmatprep.subr.bf16.mxu1 %v8270_v48  ;;  %v8327_v48 = vld [vmem:[%s10935_s5 + $0x584] ss:$8 sps:$4 sm:$0xff]  }
 0x424   : > { %4569 = vmatpush1.bf16.msra.mxu1 %v8268_v49  ;;  %v8325_v49 = vld [vmem:[%s10935_s5 + $0x580] ss:$8 sps:$4 sm:$0xff]  }
 0x425   : > { %4570 = vmatprep.subr.bf16.mxu1 %v8273_v50  ;;  %v8330_v50 = vld [vmem:[%s10935_s5 + $0x594] ss:$8 sps:$4 sm:$0xff]  }
 0x428   : > { %4571 = vmatpush1.bf16.msra.mxu1 %v8271_v43  ;;  %v8328_v43 = vld [vmem:[%s10935_s5 + $0x590] ss:$8 sps:$4 sm:$0xff]  }
 0x429   : > { %4572 = vmatprep.subr.bf16.mxu1 %v8276_v44  ;;  %v8333_v44 = vld [vmem:[%s10935_s5 + $0x5a4] ss:$8 sps:$4 sm:$0xff]  }
 0x42c   : > { %4573 = vmatpush1.bf16.msra.mxu1 %v8274_v46  ;;  %v8331_v46 = vld [vmem:[%s10935_s5 + $0x5a0] ss:$8 sps:$4 sm:$0xff]  }
 0x42d   : > { %4574 = vmatprep.subr.bf16.mxu1 %v8279_v39  ;;  %v8336_v39 = vld [vmem:[%s10935_s5 + $0x5b4] ss:$8 sps:$4 sm:$0xff]  }
 0x430   : > { %4575 = vmatpush1.bf16.msra.mxu1 %v8277_v51  ;;  %v8334_v51 = vld [vmem:[%s10935_s5 + $0x5b0] ss:$8 sps:$4 sm:$0xff]  }
 0x431   : > { %4576 = vmatprep.subr.bf16.mxu1 %v8282_v52  ;;  %v8339_v52 = vld [vmem:[%s10935_s5 + $0x5c4] ss:$8 sps:$4 sm:$0xff]  }
 0x434   : > { %4577 = vmatpush1.bf16.msra.mxu1 %v8280_v61  ;;  %v8355_v61 = vld [vmem:[#allocation2 + $0x70] ss:$8 sps:$4 sm:$0x77]  }
 0x435   : > { %4578 = vmatprep.subr.bf16.mxu1 %v8285_v63  ;;  %v8340_v63 = vld [vmem:[%s10935_s5 + $0x5d0] ss:$8 sps:$4 sm:$0xff]  }
 0x438   : > { %4579 = vmatpush1.bf16.msra.mxu1 %v8283_v13  ;;  %v4933_v13 = vrot.slane %v8355_v61, 7  ;;  %v8402_v61 = vld [vmem:[%s10935_s5 + $0x6f0] ss:$8 sps:$4 sm:$0xff]  }
 0x439   : > { %4580 = vmatprep.subr.bf16.mxu1 %v8288_v0  ;;  %v4937_v0 = vrot.slane %v8357_v62, 7 }
 0x43b   : > { %v10442_v16 = vsel %vm8828_vm2, %v7139_v12, %v4937_v0  ;;  %v8405_v12 = vld [vmem:[%s10935_s5 + $0x700] ss:$8 sps:$4 sm:$0xff]   ;;  %v8410_v0 = vld [vmem:[%s10935_s5 + $0x714] ss:$8 sps:$4 sm:$0xff]  }
 0x43c   : > { %4581 = vmatpush1.bf16.msra.mxu1 %v8286_v15  ;;  %v10438_v15 = vsel %vm8828_vm2, %v7138_v11, %v4933_v13  ;;  %v4946_v25 = vcombine.high %v10442_v16, %v10446_v17  ;;  %v7208_v11 = vcombine.low %v5198_v59, %v5200_v60 }
 0x43d   : > { %4840 = vmatprep.subr.bf16.mxu1 %v8291_v19  ;;  %v4639_v19 = vcombine.low %v10322_v8, %v10326_v14  ;;  %v8349_v8 = vld [vmem:[%s10935_s5 + $0x600] ss:$8 sps:$4 sm:$0xff]   ;;  %v4943_v62 = vcombine.low %v10458_v23, %v10438_v15 }
 0x43f   : > { %4583 = vmatmul.mubr.bf16.vlgmr.msra.gmra.mrb[0].mxu1 %v4355_v26  ;;  %v4637_v26 = vcombine.low %v10336_v20, %v10340_v21  ;;  %v8365_v20 = vld [vmem:[%s10935_s5 + $0x624] ss:$8 sps:$4 sm:$0xff]   ;;  %v8363_v21 = vld [vmem:[%s10935_s5 + $0x620] ss:$8 sps:$4 sm:$0xff]  }
 0x440   : > { %4841 = vmatpush1.bf16.msra.mxu1 %v8289_v24  ;;  %4872 = vmatprep.mubr.bf16.mxu1 %v4646_v28  ;;  %v4944_v24 = vcombine.high %v10458_v23, %v10438_v15  ;;  %v8360_v28 = vld [vmem:[%s10935_s5 + $0x610] ss:$8 sps:$4 sm:$0xff]   ;;  %v8423_v23 = vld [vmem:[%s10935_s5 + $0x760] ss:$8 sps:$4 sm:$0xff]  }
 0x441   : > { %4842 = vmatprep.subr.bf16.mxu1 %v8306_v27  ;;  %v4645_v14 = vpack.c.bf16 %v4639_v19, %v4637_v26  ;;  %v8414_v15 = vld [vmem:[%s10935_s5 + $0x730] ss:$8 sps:$4 sm:$0xff]   ;;  %v8431_v26 = vld [vmem:[%s10935_s5 + $0x784] ss:$8 sps:$4 sm:$0xff]  }
 0x442   : > { %v4952_v27 = vpack.c.bf16 %v4946_v25, %v4944_v24  ;;  %v8420_v19 = vld [vmem:[%s10935_s5 + $0x750] ss:$8 sps:$4 sm:$0xff]   ;;  %v8428_v24 = vld [vmem:[%s10935_s5 + $0x774] ss:$8 sps:$4 sm:$0xff]  }
 0x443   : > { %v8426_v25 = vld [vmem:[%s10935_s5 + $0x770] ss:$8 sps:$4 sm:$0xff]  }
 0x444   : > { %4843 = vmatpush1.bf16.msra.mxu1 %v8304_v29  ;;  %v8368_v29 = vld [vmem:[%s10935_s5 + $0x634] ss:$8 sps:$4 sm:$0xff]  }
 0x445   : > { %4844 = vmatprep.subr.bf16.mxu1 %v8309_v30  ;;  %v8366_v30 = vld [vmem:[%s10935_s5 + $0x630] ss:$8 sps:$4 sm:$0xff]  }
 0x448   : > { %4845 = vmatpush1.bf16.msra.mxu1 %v8307_v31  ;;  %v8371_v31 = vld [vmem:[%s10935_s5 + $0x644] ss:$8 sps:$4 sm:$0xff]  }
 0x449   : > { %4846 = vmatprep.subr.bf16.mxu1 %v8312_v32  ;;  %v8369_v32 = vld [vmem:[%s10935_s5 + $0x640] ss:$8 sps:$4 sm:$0xff]  }
 0x44c   : > { %4847 = vmatpush1.bf16.msra.mxu1 %v8310_v36  ;;  %v8374_v36 = vld [vmem:[%s10935_s5 + $0x654] ss:$8 sps:$4 sm:$0xff]  }
 0x44d   : > { %4848 = vmatprep.subr.bf16.mxu1 %v8315_v37  ;;  %v8372_v37 = vld [vmem:[%s10935_s5 + $0x650] ss:$8 sps:$4 sm:$0xff]  }
 0x450   : > { %4849 = vmatpush1.bf16.msra.mxu1 %v8313_v42  ;;  %v8377_v42 = vld [vmem:[%s10935_s5 + $0x664] ss:$8 sps:$4 sm:$0xff]  }
 0x451   : > { %4850 = vmatprep.subr.bf16.mxu1 %v8318_v47  ;;  %v8375_v47 = vld [vmem:[%s10935_s5 + $0x660] ss:$8 sps:$4 sm:$0xff]  }
 0x454   : > { %4851 = vmatpush1.bf16.msra.mxu1 %v8316_v38  ;;  %v8380_v38 = vld [vmem:[%s10935_s5 + $0x674] ss:$8 sps:$4 sm:$0xff]  }
 0x455   : > { %4852 = vmatprep.subr.bf16.mxu1 %v8321_v40  ;;  %v8378_v40 = vld [vmem:[%s10935_s5 + $0x670] ss:$8 sps:$4 sm:$0xff]  }
 0x458   : > { %4853 = vmatpush1.bf16.msra.mxu1 %v8319_v41  ;;  %v8383_v41 = vld [vmem:[%s10935_s5 + $0x684] ss:$8 sps:$4 sm:$0xff]  }
 0x459   : > { %4854 = vmatprep.subr.bf16.mxu1 %v8324_v34  ;;  %v8381_v34 = vld [vmem:[%s10935_s5 + $0x680] ss:$8 sps:$4 sm:$0xff]  }
 0x45c   : > { %4855 = vmatpush1.bf16.msra.mxu1 %v8322_v45  ;;  %v8386_v45 = vld [vmem:[%s10935_s5 + $0x694] ss:$8 sps:$4 sm:$0xff]  }
 0x45d   : > { %4856 = vmatprep.subr.bf16.mxu1 %v8327_v48  ;;  %v8384_v48 = vld [vmem:[%s10935_s5 + $0x690] ss:$8 sps:$4 sm:$0xff]  }
 0x460   : > { %4857 = vmatpush1.bf16.msra.mxu1 %v8325_v49  ;;  %v8389_v49 = vld [vmem:[%s10935_s5 + $0x6a4] ss:$8 sps:$4 sm:$0xff]  }
 0x461   : > { %4858 = vmatprep.subr.bf16.mxu1 %v8330_v50  ;;  %v8387_v50 = vld [vmem:[%s10935_s5 + $0x6a0] ss:$8 sps:$4 sm:$0xff]  }
 0x464   : > { %4859 = vmatpush1.bf16.msra.mxu1 %v8328_v43  ;;  %v8392_v43 = vld [vmem:[%s10935_s5 + $0x6b4] ss:$8 sps:$4 sm:$0xff]  }
 0x465   : > { %4860 = vmatprep.subr.bf16.mxu1 %v8333_v44  ;;  %v8390_v44 = vld [vmem:[%s10935_s5 + $0x6b0] ss:$8 sps:$4 sm:$0xff]  }
 0x468   : > { %4861 = vmatpush1.bf16.msra.mxu1 %v8331_v46  ;;  %v8395_v46 = vld [vmem:[%s10935_s5 + $0x6c4] ss:$8 sps:$4 sm:$0xff]  }
 0x469   : > { %4862 = vmatprep.subr.bf16.mxu1 %v8336_v39  ;;  %v8393_v39 = vld [vmem:[%s10935_s5 + $0x6c0] ss:$8 sps:$4 sm:$0xff]  }
 0x46c   : > { %4863 = vmatpush1.bf16.msra.mxu1 %v8334_v51  ;;  %v8398_v51 = vld [vmem:[%s10935_s5 + $0x6d4] ss:$8 sps:$4 sm:$0xff]  }
 0x46d   : > { %4864 = vmatprep.subr.bf16.mxu1 %v8339_v52  ;;  %v8396_v52 = vld [vmem:[%s10935_s5 + $0x6d0] ss:$8 sps:$4 sm:$0xff]  }
 0x470   : > { %4865 = vmatpush1.bf16.msra.mxu1 %v8337_v54  ;;  %v8401_v54 = vld [vmem:[%s10935_s5 + $0x6e4] ss:$8 sps:$4 sm:$0xff]  }
 0x471   : > { %4866 = vmatprep.subr.bf16.mxu1 %v8342_v56  ;;  %v8404_v56 = vld [vmem:[%s10935_s5 + $0x6f4] ss:$8 sps:$4 sm:$0xff]  }
 0x474   : > { %4867 = vmatpush1.bf16.msra.mxu1 %v8340_v63  ;;  %v4945_v63 = vcombine.low %v10442_v16, %v10446_v17  ;;  %v8419_v16 = vld [vmem:[%s10935_s5 + $0x744] ss:$8 sps:$4 sm:$0xff]   ;;  %v8417_v17 = vld [vmem:[%s10935_s5 + $0x740] ss:$8 sps:$4 sm:$0xff]  }
 0x475   : > { %4868 = vmatprep.subr.bf16.mxu1 %v8345_v9  ;;  %v5194_v9 = vld [vmem:[#allocation2 + $0x58] sm:$0xf] }
 0x476   : > { %v7206_v10 = vcombine.low %v5194_v9, %v5196_v58  ;;  %v4951_v13 = vpack.c.bf16 %v4945_v63, %v4943_v62  ;;  %v5199_v58 = vld [vmem:[#allocation2 + $0xb0] sm:$0xf] }
 0x477   : > { %v8450_v62 = vld [vmem:[%s10935_s5 + $0x7f0] ss:$8 sps:$4 sm:$0xff]  }
 0x478   : > { %4869 = vmatpush1.bf16.msra.mxu1 %v8343_v3  ;;  %v5222_v1 = vpack.c.bf16 %v7208_v11, %v7206_v10  ;;  %v8408_v3 = vld [vmem:[%s10935_s5 + $0x710] ss:$8 sps:$4 sm:$0xff]   ;;  %v8455_v10 = vld [vmem:[%s10935_s5 + $0x804] ss:$8 sps:$4 sm:$0xff]  }
 0x479   : > { %4870 = vmatprep.subr.bf16.mxu1 %v8348_v4  ;;  %v8413_v4 = vld [vmem:[%s10935_s5 + $0x724] ss:$8 sps:$4 sm:$0xff]   ;;  %v5193_v63 = vld [vmem:[#allocation2 + $0x50] sm:$0xf] }
 0x47c   : > { %4871 = vmatpush1.bf16.msra.mxu1 %v8346_v18  ;;  %v8422_v18 = vld [vmem:[%s10935_s5 + $0x754] ss:$8 sps:$4 sm:$0xff]  }
 0x47d   : > { %5146 = vmatprep.subr.bf16.mxu1 %v8351_v22  ;;  %v8425_v22 = vld [vmem:[%s10935_s5 + $0x764] ss:$8 sps:$4 sm:$0xff]  }
 0x47f   : > { %4873 = vmatmul.mubr.bf16.vlgmr.msra.gmra.mrb[0].mxu1 %v4645_v14  ;;  %v8434_v14 = vld [vmem:[%s10935_s5 + $0x794] ss:$8 sps:$4 sm:$0xff]  }
 0x480   : > { %5147 = vmatpush1.bf16.msra.mxu1 %v8349_v8  ;;  %5178 = vmatprep.mubr.bf16.mxu1 %v4952_v27  ;;  %v8429_v8 = vld [vmem:[%s10935_s5 + $0x780] ss:$8 sps:$4 sm:$0xff]   ;;  %v8437_v27 = vld [vmem:[%s10935_s5 + $0x7a4] ss:$8 sps:$4 sm:$0xff]  }
 0x481   : > { %5148 = vmatprep.subr.bf16.mxu1 %v8362_v57  ;;  %v8432_v57 = vld [vmem:[%s10935_s5 + $0x790] ss:$8 sps:$4 sm:$0xff]  }
 0x484   : > { %5149 = vmatpush1.bf16.msra.mxu1 %v8360_v28  ;;  %v8435_v28 = vld [vmem:[%s10935_s5 + $0x7a0] ss:$8 sps:$4 sm:$0xff]  }
 0x485   : > { %5150 = vmatprep.subr.bf16.mxu1 %v8365_v20  ;;  %v8440_v20 = vld [vmem:[%s10935_s5 + $0x7b4] ss:$8 sps:$4 sm:$0xff]  }
 0x488   : > { %5151 = vmatpush1.bf16.msra.mxu1 %v8363_v21  ;;  %v8438_v21 = vld [vmem:[%s10935_s5 + $0x7b0] ss:$8 sps:$4 sm:$0xff]  }
 0x489   : > { %5152 = vmatprep.subr.bf16.mxu1 %v8368_v29  ;;  %v8443_v29 = vld [vmem:[%s10935_s5 + $0x7c4] ss:$8 sps:$4 sm:$0xff]  }
 0x48c   : > { %5153 = vmatpush1.bf16.msra.mxu1 %v8366_v30  ;;  %v8441_v30 = vld [vmem:[%s10935_s5 + $0x7c0] ss:$8 sps:$4 sm:$0xff]  }
 0x48d   : > { %5154 = vmatprep.subr.bf16.mxu1 %v8371_v31  ;;  %v8465_v31 = vld [vmem:[#allocation2 + $0xb0] ss:$8 sps:$4 sm:$0xee]  }
 0x490   : > { %5155 = vmatpush1.bf16.msra.mxu1 %v8369_v32  ;;  %v8446_v32 = vld [vmem:[%s10935_s5 + $0x7d4] ss:$8 sps:$4 sm:$0xff]  }
 0x491   : > { %5156 = vmatprep.subr.bf16.mxu1 %v8374_v36  ;;  %v8467_v36 = vld [vmem:[#allocation2 + $0xb4] ss:$8 sps:$4 sm:$0x11]  }
 0x494   : > { %5157 = vmatpush1.bf16.msra.mxu1 %v8372_v37  ;;  %v8459_v37 = vld [vmem:[#allocation2 + $0x70] ss:$8 sps:$4 sm:$0xee]  }
 0x495   : > { %5158 = vmatprep.subr.bf16.mxu1 %v8377_v42  ;;  %v8461_v42 = vld [vmem:[#allocation2 + $0x74] ss:$8 sps:$4 sm:$0x11]  }
 0x498   : > { %5159 = vmatpush1.bf16.msra.mxu1 %v8375_v47  ;;  %v8462_v47 = vld [vmem:[#allocation2 + $0x90] ss:$8 sps:$4 sm:$0xee]  }
 0x499   : > { %5160 = vmatprep.subr.bf16.mxu1 %v8380_v38  ;;  %v8464_v38 = vld [vmem:[#allocation2 + $0x94] ss:$8 sps:$4 sm:$0x11]  }
 0x49c   : > { %5161 = vmatpush1.bf16.msra.mxu1 %v8378_v40  ;;  %v8444_v40 = vld [vmem:[%s10935_s5 + $0x7d0] ss:$8 sps:$4 sm:$0xff]  }
 0x49d   : > { %5162 = vmatprep.subr.bf16.mxu1 %v8383_v41  ;;  %v8456_v41 = vld [vmem:[#allocation2 + $0x50] ss:$8 sps:$4 sm:$0xee]  }
 0x4a0   : > { %5163 = vmatpush1.bf16.msra.mxu1 %v8381_v34  ;;  %v8449_v34 = vld [vmem:[%s10935_s5 + $0x7e4] ss:$8 sps:$4 sm:$0xff]  }
 0x4a1   : > { %5164 = vmatprep.subr.bf16.mxu1 %v8386_v45  ;;  %v8458_v45 = vld [vmem:[#allocation2 + $0x54] ss:$8 sps:$4 sm:$0x11]  }
 0x4a4   : > { %5165 = vmatpush1.bf16.msra.mxu1 %v8384_v48  ;;  %v7276_v48 = vrot.slane %v8465_v31, 9  ;;  %v8506_v31 = vld [vmem:[%s10935_s5 + $0x8d4] ss:$8 sps:$4 sm:$0xff]  }
 0x4a5   : > { %5166 = vmatprep.subr.bf16.mxu1 %v8389_v49  ;;  %v5501_v49 = vrot.slane %v8467_v36, 5  ;;  %v8509_v36 = vld [vmem:[%s10935_s5 + $0x8e4] ss:$8 sps:$4 sm:$0xff]  }
 0x4a8   : > { %5167 = vmatpush1.bf16.msra.mxu1 %v8387_v50  ;;  %v7274_v50 = vrot.slane %v8459_v37, 9  ;;  %v8507_v37 = vld [vmem:[%s10935_s5 + $0x8e0] ss:$8 sps:$4 sm:$0xff]  }
 0x4a9   : > { %5168 = vmatprep.subr.bf16.mxu1 %v8392_v43  ;;  %v5493_v43 = vrot.slane %v8461_v42, 5  ;;  %v8512_v42 = vld [vmem:[%s10935_s5 + $0x8f4] ss:$8 sps:$4 sm:$0xff]  }
 0x4ab   : > { %v10661_v59 = vsel %vm8943_vm5, %v7274_v50, %v5493_v43  ;;  %v8517_v50 = vld [vmem:[%s10939_s9 + $0x50] sm:$0xff]  }
 0x4ac   : > { %5169 = vmatpush1.bf16.msra.mxu1 %v8390_v44  ;;  %v7275_v44 = vrot.slane %v8462_v47, 9  ;;  %v8510_v47 = vld [vmem:[%s10935_s5 + $0x8f0] ss:$8 sps:$4 sm:$0xff]  }
 0x4ad   : > { %5170 = vmatprep.subr.bf16.mxu1 %v8395_v46  ;;  %v5497_v46 = vrot.slane %v8464_v38, 5  ;;  %v8518_v43 = vld [vmem:[%s10939_s9 + $0x10] sm:$0xff]  }
 0x4af   : > { %v10665_v60 = vsel %vm8943_vm5, %v7275_v44, %v5497_v46  ;;  %v8519_v44 = vld [vmem:[%s10939_s9 + $0x58] sm:$0xff]  }
 0x4b0   : > { %5171 = vmatpush1.bf16.msra.mxu1 %v8393_v39  ;;  %v8447_v39 = vld [vmem:[%s10935_s5 + $0x7e0] ss:$8 sps:$4 sm:$0xff]   ;;  %v8520_v46 = vld [vmem:[%s10939_s9 + $0x18] sm:$0xff]  }
 0x4b1   : > { %5172 = vmatprep.subr.bf16.mxu1 %v8398_v51  ;;  %v8452_v51 = vld [vmem:[%s10935_s5 + $0x7f4] ss:$8 sps:$4 sm:$0xff]  }
 0x4b4   : > { %5173 = vmatpush1.bf16.msra.mxu1 %v8396_v52  ;;  %v7273_v52 = vrot.slane %v8456_v41, 9 }
 0x4b5   : > { %5174 = vmatprep.subr.bf16.mxu1 %v8401_v54  ;;  %v5489_v54 = vrot.slane %v8458_v45, 5  ;;  %v8514_v45 = vld [vmem:[%s10939_s9] sm:$0xff]  }
 0x4b6   : > { %7370 = vmatpush3.bf16.msra.mxu0 %v8514_v45 }
 0x4b7   : > { %v10679_v11 = vsel %vm8943_vm5, %v7273_v52, %v5489_v54  ;;  %v8523_v52 = vld [vmem:[%s10939_s9 + $0x68] sm:$0xff]   ;;  %v8529_v54 = vld [vmem:[%s10941_s11] sm:$0xff]  }
 0x4b8   : > { %5175 = vmatpush1.bf16.msra.mxu1 %v8399_v55  ;;  %v5195_v55 = vld [vmem:[#allocation2 + $0x70] sm:$0xf]  ;;  %v5503_v38 = vcombine.low %v10679_v11, %v10661_v59 }
 0x4b9   : > { %5176 = vmatprep.subr.bf16.mxu1 %v8404_v56  ;;  %v5197_v56 = vld [vmem:[#allocation2 + $0x90] sm:$0xf] }
 0x4ba   : > { %v7207_v9 = vcombine.low %v5197_v56, %v5199_v58  ;;  %v8525_v56 = vld [vmem:[%s10939_s9 + $0x70] sm:$0xff]   ;;  %v8530_v58 = vld [vmem:[%s10941_s11 + $0x8] sm:$0xff]  }
 0x4bc   : > { %5177 = vmatpush1.bf16.msra.mxu1 %v8402_v61  ;;  %v10669_v61 = vsel %vm8943_vm5, %v7276_v48, %v5501_v49  ;;  %v8515_v48 = vld [vmem:[%s10939_s9 + $0x48] sm:$0xff]  }
 0x4bd   : > { %5416 = vmatprep.subr.bf16.mxu1 %v8407_v6  ;;  %v7205_v6 = vcombine.low %v5193_v63, %v5195_v55  ;;  %v8516_v49 = vld [vmem:[%s10939_s9 + $0x8] sm:$0xff]   ;;  %7371 = vmatprep.subr.bf16.mxu0 %v8515_v48  ;;  %v8532_v63 = vld [vmem:[%s10941_s11 + $0x18] sm:$0xff]  }
 0x4be   : > { %7372 = vmatpush3.bf16.msra.mxu0 %v8516_v49  ;;  %v8524_v55 = vld [vmem:[%s10939_s9 + $0x28] sm:$0xff]  }
 0x4bf   : > { %5179 = vmatmul.mubr.bf16.vlgmr.msra.gmra.mrb[0].mxu1 %v4951_v13  ;;  %v5506_v13 = vcombine.high %v10665_v60, %v10669_v61  ;;  %7373 = vmatprep.subr.bf16.mxu0 %v8517_v50 }
 0x4c0   : > { %5417 = vmatpush1.bf16.msra.mxu1 %v8405_v12  ;;  %5448 = vmatprep.mubr.bf16.mxu1 %v5222_v1  ;;  %v5504_v12 = vcombine.high %v10679_v11, %v10661_v59  ;;  %v5221_v1 = vpack.c.bf16 %v7207_v9, %v7205_v6  ;;  %v8526_v59 = vld [vmem:[%s10939_s9 + $0x30] sm:$0xff]   ;;  %v8533_v6 = vld [vmem:[%s10941_s11 + $0x20] sm:$0xff]   ;;  %v8534_v9 = vld [vmem:[%s10941_s11 + $0x28] sm:$0xff]  }
 0x4c1   : > { %5418 = vmatprep.subr.bf16.mxu1 %v8410_v0  ;;  %v8453_v0 = vld [vmem:[%s10935_s5 + $0x800] ss:$8 sps:$4 sm:$0xff]  }
 0x4c2   : > { %v5512_v53 = vpack.c.bf16 %v5506_v13, %v5504_v12  ;;  %7374 = vmatpush3.bf16.msra.mxu0 %v8518_v43  ;;  %v5773_v12 = vld [vmem:[%s10937_s7] sm:$0x3] }
 0x4c3   : > { %7375 = vmatprep.subr.bf16.mxu0 %v8519_v44  ;;  %v8535_v44 = vld [vmem:[%s10941_s11 + $0x30] sm:$0xff]  }
 0x4c4   : > { %5419 = vmatpush1.bf16.msra.mxu1 %v8408_v3  ;;  %v8468_v3 = vld [vmem:[%s10935_s5 + $0x810] ss:$8 sps:$4 sm:$0xff]  }
 0x4c5   : > { %5420 = vmatprep.subr.bf16.mxu1 %v8413_v4  ;;  %v8473_v4 = vld [vmem:[%s10935_s5 + $0x824] ss:$8 sps:$4 sm:$0xff]  }
 0x4c6   : > { %7376 = vmatpush3.bf16.msra.mxu0 %v8520_v46  ;;  %v8536_v46 = vld [vmem:[%s10941_s11 + $0x38] sm:$0xff]  }
 0x4c8   : > { %5421 = vmatpush1.bf16.msra.mxu1 %v8411_v5  ;;  %v8471_v5 = vld [vmem:[%s10935_s5 + $0x820] ss:$8 sps:$4 sm:$0xff]  }
 0x4c9   : > { %5422 = vmatprep.subr.bf16.mxu1 %v8416_v7  ;;  %v8476_v7 = vld [vmem:[%s10935_s5 + $0x834] ss:$8 sps:$4 sm:$0xff]  }
 0x4cc   : > { %5423 = vmatpush1.bf16.msra.mxu1 %v8414_v15  ;;  %v8474_v15 = vld [vmem:[%s10935_s5 + $0x830] ss:$8 sps:$4 sm:$0xff]  }
 0x4cd   : > { %5424 = vmatprep.subr.bf16.mxu1 %v8419_v16  ;;  %v8479_v16 = vld [vmem:[%s10935_s5 + $0x844] ss:$8 sps:$4 sm:$0xff]  }
 0x4d0   : > { %5425 = vmatpush1.bf16.msra.mxu1 %v8417_v17  ;;  %v8477_v17 = vld [vmem:[%s10935_s5 + $0x840] ss:$8 sps:$4 sm:$0xff]  }
 0x4d1   : > { %5426 = vmatprep.subr.bf16.mxu1 %v8422_v18  ;;  %v8482_v18 = vld [vmem:[%s10935_s5 + $0x854] ss:$8 sps:$4 sm:$0xff]  }
 0x4d4   : > { %5427 = vmatpush1.bf16.msra.mxu1 %v8420_v19  ;;  %v8480_v19 = vld [vmem:[%s10935_s5 + $0x850] ss:$8 sps:$4 sm:$0xff]  }
 0x4d5   : > { %5428 = vmatprep.subr.bf16.mxu1 %v8425_v22  ;;  %v8485_v22 = vld [vmem:[%s10935_s5 + $0x864] ss:$8 sps:$4 sm:$0xff]  }
 0x4d8   : > { %5429 = vmatpush1.bf16.msra.mxu1 %v8423_v23  ;;  %v8483_v23 = vld [vmem:[%s10935_s5 + $0x860] ss:$8 sps:$4 sm:$0xff]  }
 0x4d9   : > { %5430 = vmatprep.subr.bf16.mxu1 %v8428_v24  ;;  %v8488_v24 = vld [vmem:[%s10935_s5 + $0x874] ss:$8 sps:$4 sm:$0xff]  }
 0x4dc   : > { %5431 = vmatpush1.bf16.msra.mxu1 %v8426_v25  ;;  %v8486_v25 = vld [vmem:[%s10935_s5 + $0x870] ss:$8 sps:$4 sm:$0xff]  }
 0x4dd   : > { %5432 = vmatprep.subr.bf16.mxu1 %v8431_v26  ;;  %v8491_v26 = vld [vmem:[%s10935_s5 + $0x884] ss:$8 sps:$4 sm:$0xff]  }
 0x4e0   : > { %5433 = vmatpush1.bf16.msra.mxu1 %v8429_v8  ;;  %v8489_v8 = vld [vmem:[%s10935_s5 + $0x880] ss:$8 sps:$4 sm:$0xff]  }
 0x4e1   : > { %5434 = vmatprep.subr.bf16.mxu1 %v8434_v14  ;;  %v8494_v14 = vld [vmem:[%s10935_s5 + $0x894] ss:$8 sps:$4 sm:$0xff]  }
 0x4e4   : > { %5435 = vmatpush1.bf16.msra.mxu1 %v8432_v57  ;;  %v8492_v57 = vld [vmem:[%s10935_s5 + $0x890] ss:$8 sps:$4 sm:$0xff]  }
 0x4e5   : > { %5436 = vmatprep.subr.bf16.mxu1 %v8437_v27  ;;  %v8497_v27 = vld [vmem:[%s10935_s5 + $0x8a4] ss:$8 sps:$4 sm:$0xff]  }
 0x4e8   : > { %5437 = vmatpush1.bf16.msra.mxu1 %v8435_v28  ;;  %v8495_v28 = vld [vmem:[%s10935_s5 + $0x8a0] ss:$8 sps:$4 sm:$0xff]  }
 0x4e9   : > { %5438 = vmatprep.subr.bf16.mxu1 %v8440_v20  ;;  %v8500_v20 = vld [vmem:[%s10935_s5 + $0x8b4] ss:$8 sps:$4 sm:$0xff]  }
 0x4ec   : > { %5439 = vmatpush1.bf16.msra.mxu1 %v8438_v21  ;;  %v8498_v21 = vld [vmem:[%s10935_s5 + $0x8b0] ss:$8 sps:$4 sm:$0xff]  }
 0x4ed   : > { %5440 = vmatprep.subr.bf16.mxu1 %v8443_v29  ;;  %v8503_v29 = vld [vmem:[%s10935_s5 + $0x8c4] ss:$8 sps:$4 sm:$0xff]  }
 0x4f0   : > { %5441 = vmatpush1.bf16.msra.mxu1 %v8441_v30  ;;  %v8501_v30 = vld [vmem:[%s10935_s5 + $0x8c0] ss:$8 sps:$4 sm:$0xff]  }
 0x4f1   : > { %5442 = vmatprep.subr.bf16.mxu1 %v8446_v32  ;;  %v8504_v32 = vld [vmem:[%s10935_s5 + $0x8d0] ss:$8 sps:$4 sm:$0xff]  }
 0x4f4   : > { %5443 = vmatpush1.bf16.msra.mxu1 %v8444_v40  ;;  %v5505_v40 = vcombine.low %v10665_v60, %v10669_v61  ;;  %v8527_v60 = vld [vmem:[%s10939_s9 + $0x78] sm:$0xff]   ;;  %v8531_v61 = vld [vmem:[%s10941_s11 + $0x10] sm:$0xff]  }
 0x4f5   : > { %5444 = vmatprep.subr.bf16.mxu1 %v8449_v34  ;;  %v10782_v34 = vld [vmem:[#allocation2] sm:$0xff] }
 0x4f6   : > { %v5511_v41 = vpack.c.bf16 %v5505_v40, %v5503_v38 }
 0x4f8   : > { %5445 = vmatpush1.bf16.msra.mxu1 %v8447_v39  ;;  %v8521_v39 = vld [vmem:[%s10939_s9 + $0x60] sm:$0xff]  }
 0x4f9   : > { %5446 = vmatprep.subr.bf16.mxu1 %v8452_v51  ;;  %v8522_v51 = vld [vmem:[%s10939_s9 + $0x20] sm:$0xff]   ;;  %7377 = vmatprep.subr.bf16.mxu0 %v8521_v39 }
 0x4fa   : > { %7378 = vmatpush3.bf16.msra.mxu0 %v8522_v51  ;;  %v5856_v51 = vld [vmem:[%s10940_s10] sm:$0x1] }
 0x4fb   : > { %7379 = vmatprep.subr.bf16.mxu0 %v8523_v52 }
 0x4fc   : > { %5447 = vmatpush1.bf16.msra.mxu1 %v8450_v62  ;;  %v8528_v62 = vld [vmem:[%s10939_s9 + $0x38] sm:$0xff]  }
 0x4fd   : > { %5706 = vmatprep.subr.bf16.mxu1 %v8455_v10  ;;  %v5753_v10 = vld [vmem:[%s10936_s6] sm:$0x3] }
 0x4fe   : > { %7380 = vmatpush3.bf16.msra.mxu0 %v8524_v55  ;;  %v5758_v11 = vrot.slane %v5753_v10, %v9851_v33  ;;  %v5762_v13 = vrot.slane %v5753_v10, %v9856_v35 }
 0x4ff   : > { %5449 = vmatmul.mubr.bf16.vlgmr.msra.gmra.mrb[0].mxu1 %v5221_v1  ;;  %7381 = vmatprep.subr.bf16.mxu0 %v8525_v56 }
 0x500   : > { %5707 = vmatpush1.bf16.msra.mxu1 %v8453_v0  ;;  %5738 = vmatprep.mubr.bf16.mxu1 %v5512_v53 }
 0x501   : > { %5708 = vmatprep.subr.bf16.mxu1 %v8470_v2  ;;  %v5778_v2 = vrot.slane %v5773_v12, %v9851_v33 }
 0x502   : > { %7382 = vmatpush3.bf16.msra.mxu0 %v8526_v59 }
 0x503   : > { %7383 = vmatprep.subr.bf16.mxu0 %v8527_v60 }
 0x504   : > { %5709 = vmatpush1.bf16.msra.mxu1 %v8468_v3  ;;  %v5789_v3 = vld [vmem:[%s10938_s8] sm:$0x3] }
 0x505   : > { %5710 = vmatprep.subr.bf16.mxu1 %v8473_v4 }
 0x506   : > { %7384 = vmatpush3.bf16.msra.mxu0 %v8528_v62 }
 0x508   : > { %5711 = vmatpush1.bf16.msra.mxu1 %v8471_v5  ;;  %v5782_v5 = vrot.slane %v5773_v12, %v9856_v35 }
 0x509   : > { %5712 = vmatprep.subr.bf16.mxu1 %v8476_v7 }
 0x50c   : > { %5713 = vmatpush1.bf16.msra.mxu1 %v8474_v15 }
 0x50d   : > { %5714 = vmatprep.subr.bf16.mxu1 %v8479_v16 }
 0x510   : > { %5715 = vmatpush1.bf16.msra.mxu1 %v8477_v17 }
 0x511   : > { %5716 = vmatprep.subr.bf16.mxu1 %v8482_v18 }
 0x514   : > { %5717 = vmatpush1.bf16.msra.mxu1 %v8480_v19 }
 0x515   : > { %5718 = vmatprep.subr.bf16.mxu1 %v8485_v22 }
 0x518   : > { %5719 = vmatpush1.bf16.msra.mxu1 %v8483_v23  ;;  %v5794_v23 = vrot.slane %v5789_v3, %v9851_v33 }
 0x519   : > { %5720 = vmatprep.subr.bf16.mxu1 %v8488_v24 }
 0x51c   : > { %5721 = vmatpush1.bf16.msra.mxu1 %v8486_v25 }
 0x51d   : > { %5722 = vmatprep.subr.bf16.mxu1 %v8491_v26  ;;  %v5798_v26 = vrot.slane %v5789_v3, %v9856_v35 }
 0x520   : > { %5723 = vmatpush1.bf16.msra.mxu1 %v8489_v8 }
 0x521   : > { %5724 = vmatprep.subr.bf16.mxu1 %v8494_v14 }
 0x524   : > { %5725 = vmatpush1.bf16.msra.mxu1 %v8492_v57 }
 0x525   : > { %5726 = vmatprep.subr.bf16.mxu1 %v8497_v27 }
 0x528   : > { %5727 = vmatpush1.bf16.msra.mxu1 %v8495_v28 }
 0x529   : > { %5728 = vmatprep.subr.bf16.mxu1 %v8500_v20 }
 0x52c   : > { %5729 = vmatpush1.bf16.msra.mxu1 %v8498_v21 }
 0x52d   : > { %5730 = vmatprep.subr.bf16.mxu1 %v8503_v29 }
 0x530   : > { %5731 = vmatpush1.bf16.msra.mxu1 %v8501_v30 }
 0x531   : > { %5732 = vmatprep.subr.bf16.mxu1 %v8506_v31 }
 0x534   : > { %5733 = vmatpush1.bf16.msra.mxu1 %v8504_v32 }
 0x535   : > { %5734 = vmatprep.subr.bf16.mxu1 %v8509_v36 }
 0x538   : > { %5735 = vmatpush1.bf16.msra.mxu1 %v8507_v37 }
 0x539   : > { %5736 = vmatprep.subr.bf16.mxu1 %v8512_v42 }
 0x53c   : > { %5737 = vmatpush1.bf16.msra.mxu1 %v8510_v47 }
 0x53d   : > { %7400 = vmatprep.subr.bf16.mxu1 %v10782_v34 }
 0x53f   : > { %5739 = vmatmul.mubr.bf16.vlgmr.msra.gmra.mrb[0].mxu1 %v5511_v41 }
 0x540   : > { %7401 = vmatpush3.bf16.msra.mxu1 %v8529_v54  ;;  %7416 = vmatprep.mubr.msk.bf16.mxu1 %vm8603_vm6, %v10782_v34 }
 0x541   : > { %7402 = vmatprep.subr.bf16.mxu1 %v10782_v34 }
 0x544   : > { %7403 = vmatpush3.bf16.msra.mxu1 %v8530_v58 }
 0x545   : > { %7404 = vmatprep.subr.bf16.mxu1 %v10782_v34 }
 0x548   : > { %7405 = vmatpush3.bf16.msra.mxu1 %v8531_v61  ;;  %v6011_v61 = vld [vmem:[%s10942_s12] sm:$0x1] }
 0x549   : > { %7406 = vmatprep.subr.bf16.mxu1 %v10782_v34 }
 0x54c   : > { %7407 = vmatpush3.bf16.msra.mxu1 %v8532_v63 }
 0x54d   : > { %7408 = vmatprep.subr.bf16.mxu1 %v10782_v34 }
 0x550   : > { %7409 = vmatpush3.bf16.msra.mxu1 %v8533_v6 }
 0x551   : > { %7410 = vmatprep.subr.bf16.mxu1 %v10782_v34 }
 0x554   : > { %7411 = vmatpush3.bf16.msra.mxu1 %v8534_v9 }
 0x555   : > { %7412 = vmatprep.subr.bf16.mxu1 %v10782_v34 }
 0x558   : > { %7413 = vmatpush3.bf16.msra.mxu1 %v8535_v44 }
 0x559   : > { %7414 = vmatprep.subr.bf16.mxu1 %v10782_v34 }
 0x55c   : > { %7415 = vmatpush3.bf16.msra.mxu1 %v8536_v46 }
 0x612   : > { %v5740_v0 = vpop.f32.mrb[0].mxu1 }
 0x613   : > { %v5765_v1 = vadd.f32 %v5758_v11, %v5740_v0  ;;  %v5742_v53 = vpop.f32.mrb[1].mxu1 }
 0x614   : > { %v5766_v4 = vadd.f32 %v5762_v13, %v5742_v53  ;;  %v5744_v7 = vpop.f32.mrb[2].mxu1 }
 0x615   : > { %v5769_v15 = vmax.f32 %v5765_v1, 0.0  ;;  %v5767_v16 = vadd.f32 %v5758_v11, %v5744_v7  ;;  %v5746_v17 = vpop.f32.mrb[3].mxu1 }
 0x616   : > { %v5770_v18 = vmax.f32 %v5766_v4, 0.0  ;;  %v5768_v19 = vadd.f32 %v5762_v13, %v5746_v17 }
 0x617   : > { %v5785_v22 = vmul.f32 %v5778_v2, %v5769_v15  ;;  %v5771_v24 = vmax.f32 %v5767_v16, 0.0 }
 0x618   : > { %v5786_v25 = vmul.f32 %v5782_v5, %v5770_v18  ;;  %v5772_v8 = vmax.f32 %v5768_v19, 0.0 }
 0x619   : > { %v5787_v14 = vmul.f32 %v5778_v2, %v5771_v24  ;;  %v5801_v27 = vadd.f32 %v5794_v23, %v5785_v22 }
 0x61a   : > { %v5788_v57 = vmul.f32 %v5782_v5, %v5772_v8  ;;  %v5802_v20 = vadd.f32 %v5798_v26, %v5786_v25 }
 0x61b   : > { %v5803_v28 = vadd.f32 %v5794_v23, %v5787_v14 }
 0x61c   : > { %v5804_v21 = vadd.f32 %v5798_v26, %v5788_v57 }
 0x61d   : > { %v5805_v29 = vadd.f32 %v5803_v28, %v5801_v27 }
 0x61e   : > { %v5812_v30 = vadd.f32 %v5804_v21, %v5802_v20 }
 0x61f   : > { %v5806_v31 = vrot.slane %v5805_v29, 4 }
 0x620   : > { %v5813_v32 = vrot.slane %v5812_v30, 4 }
 0x621   : > { %v5807_v36 = vadd.f32 %v5806_v31, %v5805_v29 }
 0x622   : > { %v5814_v37 = vadd.f32 %v5813_v32, %v5812_v30 }
 0x623   : > { %v5808_v42 = vrot.slane %v5807_v36, 2 }
 0x624   : > { %v5815_v47 = vrot.slane %v5814_v37, 2 }
 0x625   : > { %v5809_v33 = vadd.f32 %v5808_v42, %v5807_v36 }
 0x626   : > { %v5816_v38 = vadd.f32 %v5815_v47, %v5814_v37 }
 0x627   : > { %v5810_v40 = vrot.slane %v5809_v33, 1 }
 0x628   : > { %v5817_v41 = vrot.slane %v5816_v38, 1 }
 0x629   : > { %v5811_v35 = vadd.f32 %v5810_v40, %v5809_v33 }
 0x62a   : > { %v5818_v45 = vadd.f32 %v5817_v41, %v5816_v38 }
 0x62b   : > { %v5820_v48 = vmul.f32 0.0625, %v5811_v35 }
 0x62c   : > { %v5821_v49 = vmul.f32 0.0625, %v5818_v45 }
 0x62d   : > { %v5822_v43 = vpack.c.bf16 %v5820_v48, %v5820_v48 }
 0x62e   : > { %v5823_v50 = vpack.c.bf16 %v5821_v49, %v5821_v49 }
 0x630   : > { %5985 = vmatprep.mubr.bf16.mxu0 %v5823_v50 }
 0x631   : > { %5986 = vmatmul.mubr.bf16.vlgmr.msra.gmra.mrb[4].mxu0 %v5822_v43 }
 0x704   : > { %v7385_v39 = vpop.f32.mrb[4].mxu0 }
 0x705   : > { %v7386_v52 = vpop.f32.mrb[5].mxu0 }
 0x706   : > { %v7387_v54 = vadd.f32 %v7386_v52, %v7385_v39  ;;  %v7388_v55 = vpop.f32.mrb[6].mxu0 }
 0x707   : > { %v7389_v56 = vpop.f32.mrb[7].mxu0 }
 0x708   : > { %v5988_v58 = vadd.f32 %v7387_v54, %v5856_v51 }
 0x70a   : > { %v5993_v59 = vmax.f32 %v5988_v58, 0.0 }
 0x70c   : > { %v5994_v60 = vpack.c.bf16 %v5993_v59, %v5993_v59 }
 0x70e   : > { %7417 = vmatmul.mubr.bf16.vlgmr.msra.gmra.mrb[4].mxu1 %v5994_v60 }
 0x7e1   : > { %v6094_v34 = vpop.f32.mrb[4].mxu1 }
 0x7e2   : > { %v6095_v62 = vadd.f32 %v6094_v34, %v6011_v61  ;;  %v7418_v63 = vpop.f32.mrb[5].mxu1 }
 0x7e3   : > { %v6097_v6 = vpop.f32.mrb[6].mxu1 }
 0x7e4   : > { %v6100_v9 = vmax.f32 %v6095_v62, 0.0  ;;  %v7419_v10 = vpop.f32.mrb[7].mxu1 }
 0x7e6   : > { %6102 = vst.msk [vmem:[%s432_s23] sm:$0x1] %vm6101_vm7, %v6100_v9 }
 0x7e7   : > { %8551 = shalt.err (!%p8548_p3)
}
 0x7e8   : > { %s8552_s16 = scalar_lea.hbm %s10888_s15, 16  ;;  %s8556_s24 = scalar_lea.hbm %s10943_s13, 32 }
 0x7e9   : > { %p8553_p4 = scmp.ne.s32.totalorder %s10888_s15, %s8552_s16  ;;  %p8557_p9 = scmp.lt.u32.totalorder %s10888_s15, %s10943_s13 }
 0x7ea   : > { %p8558_p10 = scmp.lt.u32.totalorder %s8556_s24, %s8552_s16  ;;  %p8560_p12 = scmp.lt.u32.totalorder %s8552_s16, %s10888_s15 }
 0x7eb   : > { %p8554_p7 = pnand %p8553_p4, %p8713_p5 }
 0x7ec   : > { %p8559_p11 = por %p8558_p10, %p8557_p9 }
 0x7ed   : > { %p8555_p8 = pneg %p8554_p7 }
 0x7ee   : > { %p8561_p13 = por %p8560_p12, %p8559_p11 }
 0x7f0   : > { %p8562_p0 = pnand %p8561_p13, %p8555_p8 }
 0x7f2   : > { %8565 = shalt.err (!%p8562_p0)
}
 0x7f3   : > { %7484 = dma.vmem_to_hbm [thread:$0]  (%p8713_p5), %s10890_s17, 16, %s10888_s15, %s6104_s29  }
 0x7f4 PF: > { %p7490_p1 = scmp.ge.s32.totalorder %s8600_s28, 2  ;;  %s6128_s20 = sand.u32 1, %s8588_s25  }
 0x7f5   : > { %s6129_s22 = scalar_lea.sflag [#allocation4], %s6128_s20 }
 0x7f6   : > { %p7487_p2 = pnand %p7490_p1, %p8717_p6 }
 0x7f8   : > { %8583 = dma.done.wait (!%p7487_p2), %s6129_s22, 16  }
 0x7f9   : > { %8585 = vsyncadd (!%p7487_p2), %s6129_s22, 4294967280  ;;  %s10956_s28 = sld [smem:[#allocation7_spill]]  ;;  %s10957_s27 = sld [smem:[#allocation6_spill]] }
 0x7fa   : > { %s10958_s16 = sld [smem:[#allocation8_spill]]  ;;  %s10959_s25 = smov %s8592_s26 }
 0x7ff   : > { %p23_p3 = scmp.ge.s32.totalorder %s10956_s28, 4   ;;  %s10960_s26 = smov %s10957_s27 }
 0x800   : > { %s10961_s27 = smov %s10958_s16 }
 0x801   :  { %25 = sbr.rel (!%p23_p3) target bundleno = 3 (0x3), region = 125 }
 0x808   :  { %6133 = vsyncpa [#allocation4], 1 }
 0x809   :  { %6135 = vsyncpa [#allocation4 + $0x1], 1 }

</bundles_post_ra>
